<compile_context>
chip_gen: v7x
topology: tpu7x:2x2x1
jax: 0.10.0
libtpu: 0.0.40
codegen_flags: <defaults>
</compile_context>

<pallas_src>
import functools
import math

import jax
import jax.numpy as jnp
from jax.experimental import pallas as pl
from jax.experimental.pallas import tpu as pltpu

NEG = -1e30   # additive mask value (behaves like -inf after softmax)
EPS = 1e-5    # nn.LayerNorm default


# ----------------------------------------------------------------------------
# In-kernel helpers (operate on values, not refs)
# ----------------------------------------------------------------------------
def _layernorm(x, g, b, eps=EPS):
    mu = jnp.mean(x, axis=-1, keepdims=True)
    var = jnp.mean(jnp.square(x - mu), axis=-1, keepdims=True)
    return (x - mu) * jax.lax.rsqrt(var + eps) * g + b


def _attention_heads(q, k, v, mask, nhead):
    """q: [Mq, D], k/v: [Mk, D], mask: [Mq, Mk] additive.  Returns [Mq, D]."""
    D = q.shape[-1]
    hd = D // nhead
    scale = 1.0 / math.sqrt(hd)
    outs = []
    for h in range(nhead):            # static, small (nhead = 8)
        sl = slice(h * hd, (h + 1) * hd)
        qh, kh, vh = q[:, sl], k[:, sl], v[:, sl]
        s = jax.lax.dot_general(qh, kh, (((1,), (1,)), ((), ())),
                                preferred_element_type=jnp.float32)
        s = s * scale + mask
        s = s - jnp.max(s, axis=-1, keepdims=True)
        p = jnp.exp(s)
        p = p * pl.reciprocal(jnp.sum(p, axis=-1, keepdims=True), approx=True)
        outs.append(jnp.dot(p, vh, preferred_element_type=jnp.float32))
    return jnp.concatenate(outs, axis=-1)


def _self_attention(x, mask, wqkv, bqkv, wo, bo, nhead):
    D = x.shape[-1]
    qkv = jnp.dot(x, wqkv, preferred_element_type=jnp.float32) + bqkv
    o = _attention_heads(qkv[:, :D], qkv[:, D:2 * D], qkv[:, 2 * D:], mask, nhead)
    return jnp.dot(o, wo, preferred_element_type=jnp.float32) + bo


def _ffn(x, w1, b1, w2, b2):
    h = jnp.dot(x, w1, preferred_element_type=jnp.float32) + b1
    h = jnp.maximum(h, 0.0)
    return jnp.dot(h, w2, preferred_element_type=jnp.float32) + b2


# ----------------------------------------------------------------------------
# Fused encoder stack: one pallas_call, grid = (n_layers,)
# ----------------------------------------------------------------------------
def _encoder_stack_kernel(x_ref, mask_ref,
                          wqkv_ref, bqkv_ref, wo_ref, bo_ref,
                          ln1g_ref, ln1b_ref,
                          w1_ref, b1_ref, w2_ref, b2_ref,
                          ln2g_ref, ln2b_ref,
                          fng_ref, fnb_ref,
                          o_ref, *, nhead):
    l = pl.program_id(0)

    @pl.when(l == 0)
    def _():                                   # activation lives in o_ref (VMEM)
        o_ref[...] = x_ref[...]

    x = o_ref[...]
    mask = mask_ref[...]

    a = _self_attention(x, mask, wqkv_ref[0], bqkv_ref[0],
                        wo_ref[0], bo_ref[0], nhead)
    x = _layernorm(x + a, ln1g_ref[0], ln1b_ref[0])

    f = _ffn(x, w1_ref[0], b1_ref[0], w2_ref[0], b2_ref[0])
    x = _layernorm(x + f, ln2g_ref[0], ln2b_ref[0])

    o_ref[...] = x

    @pl.when(l == pl.num_programs(0) - 1)      # final encoder LayerNorm
    def _():
        o_ref[...] = _layernorm(x, fng_ref[...], fnb_ref[...])


def encoder_stack(x_flat, mask_flat, ep, fin_g, fin_b, *, nhead):
    n, D, _ = ep["wqkv"].shape
    dff = ep["w1"].shape[-1]
    M = x_flat.shape[0]

    const2 = lambda l: (0, 0)
    lyr3 = lambda l: (l, 0, 0)

    return pl.pallas_call(
        functools.partial(_encoder_stack_kernel, nhead=nhead),
        out_shape=jax.ShapeDtypeStruct((M, D), jnp.float32),
        grid=(n,),
        in_specs=[
            pl.BlockSpec((M, D), const2),          # x (embedded src)
            pl.BlockSpec((M, M), const2),          # additive mask (flattened)
            pl.BlockSpec((1, D, 3 * D), lyr3),     # wqkv
            pl.BlockSpec((1, 1, 3 * D), lyr3),     # bqkv
            pl.BlockSpec((1, D, D), lyr3),         # wo
            pl.BlockSpec((1, 1, D), lyr3),         # bo
            pl.BlockSpec((1, 1, D), lyr3),         # ln1_g
            pl.BlockSpec((1, 1, D), lyr3),         # ln1_b
            pl.BlockSpec((1, D, dff), lyr3),       # w1
            pl.BlockSpec((1, 1, dff), lyr3),       # b1
            pl.BlockSpec((1, dff, D), lyr3),       # w2
            pl.BlockSpec((1, 1, D), lyr3),         # b2
            pl.BlockSpec((1, 1, D), lyr3),         # ln2_g
            pl.BlockSpec((1, 1, D), lyr3),         # ln2_b
            pl.BlockSpec((1, D), const2),          # final enc norm gamma
            pl.BlockSpec((1, D), const2),          # final enc norm beta
        ],
        out_specs=pl.BlockSpec((M, D), const2),
        compiler_params=pltpu.CompilerParams(
            dimension_semantics=("arbitrary",),
            vmem_limit_bytes=32 * 1024 * 1024),
    )(x_flat, mask_flat,
      ep["wqkv"], ep["bqkv"], ep["wo"], ep["bo"],
      ep["ln1_g"], ep["ln1_b"],
      ep["w1"], ep["b1"], ep["w2"], ep["b2"],
      ep["ln2_g"], ep["ln2_b"],
      fin_g.reshape(1, D), fin_b.reshape(1, D))


# ----------------------------------------------------------------------------
# Fused decoder stack: one pallas_call, grid = (n_layers,)
# ----------------------------------------------------------------------------
def _decoder_stack_kernel(y_ref, mem_ref, tmask_ref, cmask_ref,
                          wqkv_ref, bqkv_ref, wo1_ref, bo1_ref,
                          ln1g_ref, ln1b_ref,
                          wq_ref, bq_ref, wkv_ref, bkv_ref, wo2_ref, bo2_ref,
                          ln2g_ref, ln2b_ref,
                          w1_ref, b1_ref, w2_ref, b2_ref,
                          ln3g_ref, ln3b_ref,
                          fng_ref, fnb_ref,
                          o_ref, *, nhead):
    l = pl.program_id(0)

    @pl.when(l == 0)
    def _():
        o_ref[...] = y_ref[...]

    y = o_ref[...]
    mem = mem_ref[...]
    D = y.shape[-1]

    # self-attention (causal + tgt key padding, fused QKV)
    a = _self_attention(y, tmask_ref[...], wqkv_ref[0], bqkv_ref[0],
                        wo1_ref[0], bo1_ref[0], nhead)
    y = _layernorm(y + a, ln1g_ref[0], ln1b_ref[0])

    # cross-attention on encoder memory (fused KV; no memory key padding mask)
    q = jnp.dot(y, wq_ref[0], preferred_element_type=jnp.float32) + bq_ref[0]
    kv = jnp.dot(mem, wkv_ref[0], preferred_element_type=jnp.float32) + bkv_ref[0]
    c = _attention_heads(q, kv[:, :D], kv[:, D:], cmask_ref[...], nhead)
    c = jnp.dot(c, wo2_ref[0], preferred_element_type=jnp.float32) + bo2_ref[0]
    y = _layernorm(y + c, ln2g_ref[0], ln2b_ref[0])

    # feed-forward
    f = _ffn(y, w1_ref[0], b1_ref[0], w2_ref[0], b2_ref[0])
    y = _layernorm(y + f, ln3g_ref[0], ln3b_ref[0])

    o_ref[...] = y

    @pl.when(l == pl.num_programs(0) - 1)      # final decoder LayerNorm
    def _():
        o_ref[...] = _layernorm(y, fng_ref[...], fnb_ref[...])


def decoder_stack(y_flat, mem_flat, tmask, cmask, dp, fin_g, fin_b, *, nhead):
    n, D, _ = dp["wqkv"].shape
    dff = dp["w1"].shape[-1]
    Mt = y_flat.shape[0]
    Ms = mem_flat.shape[0]

    const2 = lambda l: (0, 0)
    lyr3 = lambda l: (l, 0, 0)

    return pl.pallas_call(
        functools.partial(_decoder_stack_kernel, nhead=nhead),
        out_shape=jax.ShapeDtypeStruct((Mt, D), jnp.float32),
        grid=(n,),
        in_specs=[
            pl.BlockSpec((Mt, D), const2),         # y (embedded tgt)
            pl.BlockSpec((Ms, D), const2),         # encoder memory
            pl.BlockSpec((Mt, Mt), const2),        # self-attn mask
            pl.BlockSpec((Mt, Ms), const2),        # cross-attn mask (batch block)
            pl.BlockSpec((1, D, 3 * D), lyr3),     # wqkv (self)
            pl.BlockSpec((1, 1, 3 * D), lyr3),     # bqkv
            pl.BlockSpec((1, D, D), lyr3),         # wo1
            pl.BlockSpec((1, 1, D), lyr3),         # bo1
            pl.BlockSpec((1, 1, D), lyr3),         # ln1_g
            pl.BlockSpec((1, 1, D), lyr3),         # ln1_b
            pl.BlockSpec((1, D, D), lyr3),         # wq (cross)
            pl.BlockSpec((1, 1, D), lyr3),         # bq
            pl.BlockSpec((1, D, 2 * D), lyr3),     # wkv (cross)
            pl.BlockSpec((1, 1, 2 * D), lyr3),     # bkv
            pl.BlockSpec((1, D, D), lyr3),         # wo2
            pl.BlockSpec((1, 1, D), lyr3),         # bo2
            pl.BlockSpec((1, 1, D), lyr3),         # ln2_g
            pl.BlockSpec((1, 1, D), lyr3),         # ln2_b
            pl.BlockSpec((1, D, dff), lyr3),       # w1
            pl.BlockSpec((1, 1, dff), lyr3),       # b1
            pl.BlockSpec((1, dff, D), lyr3),       # w2
            pl.BlockSpec((1, 1, D), lyr3),         # b2
            pl.BlockSpec((1, 1, D), lyr3),         # ln3_g
            pl.BlockSpec((1, 1, D), lyr3),         # ln3_b
            pl.BlockSpec((1, D), const2),          # final dec norm gamma
            pl.BlockSpec((1, D), const2),          # final dec norm beta
        ],
        out_specs=pl.BlockSpec((Mt, D), const2),
        compiler_params=pltpu.CompilerParams(
            dimension_semantics=("arbitrary",),
            vmem_limit_bytes=32 * 1024 * 1024),
    )(y_flat, mem_flat, tmask, cmask,
      dp["wqkv"], dp["bqkv"], dp["wo1"], dp["bo1"],
      dp["ln1_g"], dp["ln1_b"],
      dp["wq"], dp["bq"], dp["wkv"], dp["bkv"], dp["wo2"], dp["bo2"],
      dp["ln2_g"], dp["ln2_b"],
      dp["w1"], dp["b1"], dp["w2"], dp["b2"],
      dp["ln3_g"], dp["ln3_b"],
      fin_g.reshape(1, D), fin_b.reshape(1, D))


# ----------------------------------------------------------------------------
# Mask construction (plain-JAX glue; batch is flattened into the sublane axis,
# so a block-diagonal additive mask prevents cross-batch attention)
# ----------------------------------------------------------------------------
def _flatten_batched_mask(per_batch_add):
    """per_batch_add: [B, Lq, Lk] additive -> [B*Lq, B*Lk] with off-diagonal
    (cross-batch) blocks set to NEG."""
    B, Lq, Lk = per_batch_add.shape
    eye = jnp.eye(B, dtype=bool)
    full = jnp.where(eye[:, None, :, None], per_batch_add[:, :, None, :], NEG)
    return full.reshape(B * Lq, B * Lk).astype(jnp.float32)


def translation_model_forward(params, src_tokens, tgt_tokens, *, nhead):
    B, S = src_tokens.shape
    T = tgt_tokens.shape[1]
    D = params["src_emb"].shape[1]

    # key-padding masks: True where token == 2  (get_key_padding_mask)
    src_kpm = src_tokens == 2
    tgt_kpm = tgt_tokens == 2

    enc_pb = jnp.broadcast_to(jnp.where(src_kpm, NEG, 0.0)[:, None, :],
                              (B, S, S)).astype(jnp.float32)
    causal = jnp.where(jnp.arange(T)[:, None] < jnp.arange(T)[None, :], NEG, 0.0)
    dec_pb = (causal[None, :, :]
              + jnp.where(tgt_kpm, NEG, 0.0)[:, None, :]).astype(jnp.float32)
    crs_pb = jnp.zeros((B, T, S), jnp.float32)   # no memory_key_padding_mask

    enc_mask = _flatten_batched_mask(enc_pb)     # [B*S, B*S]
    dec_mask = _flatten_batched_mask(dec_pb)     # [B*T, B*T]
    crs_mask = _flatten_batched_mask(crs_pb)     # [B*T, B*S]

    # embeddings + positional encoding (dropout = identity in eval mode)
    pe = params["pe"]
    src = jnp.take(params["src_emb"], src_tokens, axis=0) + pe[None, :S, :]
    tgt = jnp.take(params["tgt_emb"], tgt_tokens, axis=0) + pe[None, :T, :]

    src_f = src.reshape(B * S, D).astype(jnp.float32)
    tgt_f = tgt.reshape(B * T, D).astype(jnp.float32)

    mem = encoder_stack(src_f, enc_mask, params["enc"],
                        params["enc_norm_g"], params["enc_norm_b"], nhead=nhead)
    out = decoder_stack(tgt_f, mem, dec_mask, crs_mask, params["dec"],
                        params["dec_norm_g"], params["dec_norm_b"], nhead=nhead)

    # NOTE: predictor Linear is intentionally NOT applied (matches forward()).
    return out.reshape(B, T, D)


# ----------------------------------------------------------------------------
# Deterministic parameter initialization (stacked per-layer weights)
# ----------------------------------------------------------------------------
class _KeyGen:
    def __init__(self, key):
        self._key = key

    def __call__(self):
        self._key, k = jax.random.split(self._key)
        return k


def _dense(kg, shape, scale=0.02):
    return scale * jax.random.normal(kg(), shape, dtype=jnp.float32)


def _init_enc_stack(kg, n, d, dff):
    return {
        "wqkv": _dense(kg, (n, d, 3 * d)), "bqkv": jnp.zeros((n, 1, 3 * d), jnp.float32),
        "wo": _dense(kg, (n, d, d)),       "bo": jnp.zeros((n, 1, d), jnp.float32),
        "ln1_g": jnp.ones((n, 1, d), jnp.float32), "ln1_b": jnp.zeros((n, 1, d), jnp.float32),
        "w1": _dense(kg, (n, d, dff)),     "b1": jnp.zeros((n, 1, dff), jnp.float32),
        "w2": _dense(kg, (n, dff, d)),     "b2": jnp.zeros((n, 1, d), jnp.float32),
        "ln2_g": jnp.ones((n, 1, d), jnp.float32), "ln2_b": jnp.zeros((n, 1, d), jnp.float32),
    }


def _init_dec_stack(kg, n, d, dff):
    return {
        "wqkv": _dense(kg, (n, d, 3 * d)), "bqkv": jnp.zeros((n, 1, 3 * d), jnp.float32),
        "wo1": _dense(kg, (n, d, d)),      "bo1": jnp.zeros((n, 1, d), jnp.float32),
        "ln1_g": jnp.ones((n, 1, d), jnp.float32), "ln1_b": jnp.zeros((n, 1, d), jnp.float32),
        "wq": _dense(kg, (n, d, d)),       "bq": jnp.zeros((n, 1, d), jnp.float32),
        "wkv": _dense(kg, (n, d, 2 * d)),  "bkv": jnp.zeros((n, 1, 2 * d), jnp.float32),
        "wo2": _dense(kg, (n, d, d)),      "bo2": jnp.zeros((n, 1, d), jnp.float32),
        "ln2_g": jnp.ones((n, 1, d), jnp.float32), "ln2_b": jnp.zeros((n, 1, d), jnp.float32),
        "w1": _dense(kg, (n, d, dff)),     "b1": jnp.zeros((n, 1, dff), jnp.float32),
        "w2": _dense(kg, (n, dff, d)),     "b2": jnp.zeros((n, 1, d), jnp.float32),
        "ln3_g": jnp.ones((n, 1, d), jnp.float32), "ln3_b": jnp.zeros((n, 1, d), jnp.float32),
    }


def _positional_encoding(max_len, d_model):
    position = jnp.arange(max_len, dtype=jnp.float32)[:, None]
    div_term = jnp.exp(jnp.arange(0, d_model, 2, dtype=jnp.float32)
                       * (-math.log(10000.0) / d_model))
    pe = jnp.zeros((max_len, d_model), jnp.float32)
    pe = pe.at[:, 0::2].set(jnp.sin(position * div_term))
    pe = pe.at[:, 1::2].set(jnp.cos(position * div_term))
    return pe


def init_params(key, d_model, src_vocab_size, tgt_vocab_size,
                nhead, dff, n_enc, n_dec, max_len):
    kg = _KeyGen(key)
    src_emb = jax.random.normal(kg(), (src_vocab_size, d_model), jnp.float32)
    tgt_emb = jax.random.normal(kg(), (tgt_vocab_size, d_model), jnp.float32)
    src_emb = src_emb.at[2].set(0.0)   # padding_idx=2
    tgt_emb = tgt_emb.at[2].set(0.0)   # padding_idx=2
    return {
        "src_emb": src_emb,
        "tgt_emb": tgt_emb,
        "pe": _positional_encoding(max_len, d_model),
        "enc": _init_enc_stack(kg, n_enc, d_model, dff),
        "enc_norm_g": jnp.ones((d_model,), jnp.float32),
        "enc_norm_b": jnp.zeros((d_model,), jnp.float32),
        "dec": _init_dec_stack(kg, n_dec, d_model, dff),
        "dec_norm_g": jnp.ones((d_model,), jnp.float32),
        "dec_norm_b": jnp.zeros((d_model,), jnp.float32),
        # predictor exists in __init__ but is unused in forward():
        "pred_w": _dense(kg, (d_model, tgt_vocab_size)),
        "pred_b": jnp.zeros((tgt_vocab_size,), jnp.float32),
    }


# ----------------------------------------------------------------------------
if __name__ == "__main__":
    D_MODEL = 32
    NHEAD = 8            # nn.Transformer default
    DFF = 2048           # nn.Transformer default
    N_ENC, N_DEC = 6, 6  # nn.Transformer defaults
    SRC_VOCAB, TGT_VOCAB = 11, 13
    B, S, T = 2, 8, 8
    MAX_LEN = 64         # stand-in for config.max_length

    key = jax.random.PRNGKey(0)
    kp, ks, kt = jax.random.split(key, 3)
    params = init_params(kp, D_MODEL, SRC_VOCAB, TGT_VOCAB,
                         NHEAD, DFF, N_ENC, N_DEC, MAX_LEN)

    src = jax.random.randint(ks, (B, S), 0, SRC_VOCAB, dtype=jnp.int32)
    tgt = jax.random.randint(kt, (B, T), 0, TGT_VOCAB, dtype=jnp.int32)
    src = src.at[:, 0].set(0)          # BOS, not padding
    tgt = tgt.at[:, 0].set(0)
    src = src.at[1, -2:].set(2)        # trailing padding tokens (id == 2)
    tgt = tgt.at[1, -3:].set(2)

    fwd = jax.jit(functools.partial(translation_model_forward, nhead=NHEAD))
    out = fwd(params, src, tgt)
    out = jax.block_until_ready(out)

    assert out.shape == (B, T, D_MODEL), out.shape
    assert bool(jnp.all(jnp.isfinite(out)))
    print("KERNEL_OK")
</pallas_src>

<mosaic_0001>
module attributes {stable_mosaic.version = 11 : i64} {
  func.func @_encoder_stack_kernel(%arg0: i32, %arg1: memref<16x32xf32, #tpu.memory_space<vmem>>, %arg2: memref<16x16xf32, #tpu.memory_space<vmem>>, %arg3: memref<1x32x96xf32, #tpu.memory_space<vmem>>, %arg4: memref<1x1x96xf32, #tpu.memory_space<vmem>>, %arg5: memref<1x32x32xf32, #tpu.memory_space<vmem>>, %arg6: memref<1x1x32xf32, #tpu.memory_space<vmem>>, %arg7: memref<1x1x32xf32, #tpu.memory_space<vmem>>, %arg8: memref<1x1x32xf32, #tpu.memory_space<vmem>>, %arg9: memref<1x32x2048xf32, #tpu.memory_space<vmem>>, %arg10: memref<1x1x2048xf32, #tpu.memory_space<vmem>>, %arg11: memref<1x2048x32xf32, #tpu.memory_space<vmem>>, %arg12: memref<1x1x32xf32, #tpu.memory_space<vmem>>, %arg13: memref<1x1x32xf32, #tpu.memory_space<vmem>>, %arg14: memref<1x1x32xf32, #tpu.memory_space<vmem>>, %arg15: memref<1x32xf32, #tpu.memory_space<vmem>>, %arg16: memref<1x32xf32, #tpu.memory_space<vmem>>, %arg17: memref<16x32xf32, #tpu.memory_space<vmem>>) attributes {dimension_semantics = [#tpu.dimension_semantics<arbitrary>], iteration_bounds = array<i64: 6>, scalar_prefetch = 0 : i64, scratch_operands = 0 : i64, tpu.core_type = #tpu.core_type<tc>, window_params = [{pipeline_mode = #tpu.pipeline_mode<synchronous>, transform_indices = @transform_0, window_bounds = array<i64: 16, 32>}, {pipeline_mode = #tpu.pipeline_mode<synchronous>, transform_indices = @transform_1, window_bounds = array<i64: 16, 16>}, {transform_indices = @transform_2, window_bounds = array<i64: 1, 32, 96>}, {transform_indices = @transform_3, window_bounds = array<i64: 1, 1, 96>}, {transform_indices = @transform_4, window_bounds = array<i64: 1, 32, 32>}, {transform_indices = @transform_5, window_bounds = array<i64: 1, 1, 32>}, {transform_indices = @transform_6, window_bounds = array<i64: 1, 1, 32>}, {transform_indices = @transform_7, window_bounds = array<i64: 1, 1, 32>}, {transform_indices = @transform_8, window_bounds = array<i64: 1, 32, 2048>}, {transform_indices = @transform_9, window_bounds = array<i64: 1, 1, 2048>}, {transform_indices = @transform_10, window_bounds = array<i64: 1, 2048, 32>}, {transform_indices = @transform_11, window_bounds = array<i64: 1, 1, 32>}, {transform_indices = @transform_12, window_bounds = array<i64: 1, 1, 32>}, {transform_indices = @transform_13, window_bounds = array<i64: 1, 1, 32>}, {pipeline_mode = #tpu.pipeline_mode<synchronous>, transform_indices = @transform_14, window_bounds = array<i64: 1, 32>}, {pipeline_mode = #tpu.pipeline_mode<synchronous>, transform_indices = @transform_15, window_bounds = array<i64: 1, 32>}, {pipeline_mode = #tpu.pipeline_mode<synchronous>, transform_indices = @transform_16, window_bounds = array<i64: 16, 32>}]} {
    %c0_i32 = arith.constant 0 : i32
    %0 = arith.cmpi eq, %arg0, %c0_i32 : i32
    %1 = arith.extui %0 : i1 to i32
    %c0_i32_0 = arith.constant 0 : i32
    %2 = arith.cmpi ne, %1, %c0_i32_0 : i32
    scf.if %2 {
      %c0_97 = arith.constant 0 : index
      %c0_98 = arith.constant 0 : index
      %241 = vector.load %arg1[%c0_97, %c0_98] : memref<16x32xf32, #tpu.memory_space<vmem>>, vector<16x32xf32>
      %c0_99 = arith.constant 0 : index
      %c0_100 = arith.constant 0 : index
      %242 = vector.load %arg17[%c0_99, %c0_100] : memref<16x32xf32, #tpu.memory_space<vmem>>, vector<16x32xf32>
      tpu.vector_store %arg17[%c0_99, %c0_100], %241 {strides = array<i32>} : memref<16x32xf32, #tpu.memory_space<vmem>>, vector<16x32xf32>,
    } else {
    }
    %c0 = arith.constant 0 : index
    %c0_1 = arith.constant 0 : index
    %3 = vector.load %arg17[%c0, %c0_1] : memref<16x32xf32, #tpu.memory_space<vmem>>, vector<16x32xf32>
    %c0_2 = arith.constant 0 : index
    %c0_3 = arith.constant 0 : index
    %4 = vector.load %arg2[%c0_2, %c0_3] : memref<16x16xf32, #tpu.memory_space<vmem>>, vector<16x16xf32>
    %c0_4 = arith.constant 0 : index
    %c0_5 = arith.constant 0 : index
    %c0_6 = arith.constant 0 : index
    %5 = vector.load %arg3[%c0_4, %c0_5, %c0_6] : memref<1x32x96xf32, #tpu.memory_space<vmem>>, vector<1x32x96xf32>
    %6 = vector.shape_cast %5 : vector<1x32x96xf32> to vector<32x96xf32>
    %c0_7 = arith.constant 0 : index
    %c0_8 = arith.constant 0 : index
    %c0_9 = arith.constant 0 : index
    %7 = vector.load %arg4[%c0_7, %c0_8, %c0_9] : memref<1x1x96xf32, #tpu.memory_space<vmem>>, vector<1x1x96xf32>
    %8 = vector.shape_cast %7 : vector<1x1x96xf32> to vector<1x96xf32>
    %c0_10 = arith.constant 0 : index
    %c0_11 = arith.constant 0 : index
    %c0_12 = arith.constant 0 : index
    %9 = vector.load %arg5[%c0_10, %c0_11, %c0_12] : memref<1x32x32xf32, #tpu.memory_space<vmem>>, vector<1x32x32xf32>
    %10 = vector.shape_cast %9 : vector<1x32x32xf32> to vector<32x32xf32>
    %c0_13 = arith.constant 0 : index
    %c0_14 = arith.constant 0 : index
    %c0_15 = arith.constant 0 : index
    %11 = vector.load %arg6[%c0_13, %c0_14, %c0_15] : memref<1x1x32xf32, #tpu.memory_space<vmem>>, vector<1x1x32xf32>
    %12 = vector.shape_cast %11 : vector<1x1x32xf32> to vector<1x32xf32>
    %cst = arith.constant dense<0.000000e+00> : vector<16x96xf32>
    %13 = tpu.matmul %3, %6, %cst {dimension_numbers = #tpu.dot_dimension_numbers<[1], [0], [0], [1], [0, 0, 1, 1], [], []>} : vector<16x32xf32>, vector<32x96xf32>, vector<16x96xf32> -> vector<16x96xf32>
    %14 = vector.broadcast %8 : vector<1x96xf32> to vector<16x96xf32>
    %15 = arith.addf %13, %14 : vector<16x96xf32>
    %16 = vector.extract_strided_slice %15 {offsets = [0, 0], sizes = [16, 32], strides = [1, 1]} : vector<16x96xf32> to vector<16x32xf32>
    %17 = vector.extract_strided_slice %15 {offsets = [0, 32], sizes = [16, 32], strides = [1, 1]} : vector<16x96xf32> to vector<16x32xf32>
    %18 = vector.extract_strided_slice %15 {offsets = [0, 64], sizes = [16, 32], strides = [1, 1]} : vector<16x96xf32> to vector<16x32xf32>
    %19 = vector.extract_strided_slice %16 {offsets = [0, 0], sizes = [16, 4], strides = [1, 1]} : vector<16x32xf32> to vector<16x4xf32>
    %20 = vector.extract_strided_slice %17 {offsets = [0, 0], sizes = [16, 4], strides = [1, 1]} : vector<16x32xf32> to vector<16x4xf32>
    %21 = vector.extract_strided_slice %18 {offsets = [0, 0], sizes = [16, 4], strides = [1, 1]} : vector<16x32xf32> to vector<16x4xf32>
    %cst_16 = arith.constant dense<0.000000e+00> : vector<16x16xf32>
    %22 = tpu.matmul %19, %20, %cst_16 {dimension_numbers = #tpu.dot_dimension_numbers<[1], [1], [0], [0], [0, 0, 1, 0], [], []>} : vector<16x4xf32>, vector<16x4xf32>, vector<16x16xf32> -> vector<16x16xf32>
    %cst_17 = arith.constant 5.000000e-01 : f32
    %23 = vector.broadcast %cst_17 : f32 to vector<16x16xf32>
    %24 = arith.mulf %22, %23 : vector<16x16xf32>
    %25 = arith.addf %24, %4 : vector<16x16xf32>
    %cst_18 = arith.constant dense<0xFF800000> : vector<16xf32>
    %26 = vector.multi_reduction <maximumf>, %25, %cst_18 [1] : vector<16x16xf32> to vector<16xf32>
    %27 = vector.shape_cast %26 : vector<16xf32> to vector<16x1xf32>
    %28 = vector.broadcast %27 : vector<16x1xf32> to vector<16x16xf32>
    %29 = arith.subf %25, %28 : vector<16x16xf32>
    %30 = math.exp %29 : vector<16x16xf32>
    %cst_19 = arith.constant dense<0.000000e+00> : vector<16xf32>
    %31 = vector.multi_reduction <add>, %30, %cst_19 [1] : vector<16x16xf32> to vector<16xf32>
    %32 = vector.shape_cast %31 : vector<16xf32> to vector<16x1xf32>
    %33 = tpu.reciprocal %32 {approx = true} : vector<16x1xf32> -> vector<16x1xf32>
    %34 = vector.broadcast %33 : vector<16x1xf32> to vector<16x16xf32>
    %35 = arith.mulf %30, %34 : vector<16x16xf32>
    %cst_20 = arith.constant dense<0.000000e+00> : vector<16x4xf32>
    %36 = tpu.matmul %35, %21, %cst_20 {dimension_numbers = #tpu.dot_dimension_numbers<[1], [0], [0], [1], [0, 0, 1, 1], [], []>} : vector<16x16xf32>, vector<16x4xf32>, vector<16x4xf32> -> vector<16x4xf32>
    %37 = vector.extract_strided_slice %16 {offsets = [0, 4], sizes = [16, 4], strides = [1, 1]} : vector<16x32xf32> to vector<16x4xf32>
    %38 = vector.extract_strided_slice %17 {offsets = [0, 4], sizes = [16, 4], strides = [1, 1]} : vector<16x32xf32> to vector<16x4xf32>
    %39 = vector.extract_strided_slice %18 {offsets = [0, 4], sizes = [16, 4], strides = [1, 1]} : vector<16x32xf32> to vector<16x4xf32>
    %cst_21 = arith.constant dense<0.000000e+00> : vector<16x16xf32>
    %40 = tpu.matmul %37, %38, %cst_21 {dimension_numbers = #tpu.dot_dimension_numbers<[1], [1], [0], [0], [0, 0, 1, 0], [], []>} : vector<16x4xf32>, vector<16x4xf32>, vector<16x16xf32> -> vector<16x16xf32>
    %cst_22 = arith.constant 5.000000e-01 : f32
    %41 = vector.broadcast %cst_22 : f32 to vector<16x16xf32>
    %42 = arith.mulf %40, %41 : vector<16x16xf32>
    %43 = arith.addf %42, %4 : vector<16x16xf32>
    %cst_23 = arith.constant dense<0xFF800000> : vector<16xf32>
    %44 = vector.multi_reduction <maximumf>, %43, %cst_23 [1] : vector<16x16xf32> to vector<16xf32>
    %45 = vector.shape_cast %44 : vector<16xf32> to vector<16x1xf32>
    %46 = vector.broadcast %45 : vector<16x1xf32> to vector<16x16xf32>
    %47 = arith.subf %43, %46 : vector<16x16xf32>
    %48 = math.exp %47 : vector<16x16xf32>
    %cst_24 = arith.constant dense<0.000000e+00> : vector<16xf32>
    %49 = vector.multi_reduction <add>, %48, %cst_24 [1] : vector<16x16xf32> to vector<16xf32>
    %50 = vector.shape_cast %49 : vector<16xf32> to vector<16x1xf32>
    %51 = tpu.reciprocal %50 {approx = true} : vector<16x1xf32> -> vector<16x1xf32>
    %52 = vector.broadcast %51 : vector<16x1xf32> to vector<16x16xf32>
    %53 = arith.mulf %48, %52 : vector<16x16xf32>
    %cst_25 = arith.constant dense<0.000000e+00> : vector<16x4xf32>
    %54 = tpu.matmul %53, %39, %cst_25 {dimension_numbers = #tpu.dot_dimension_numbers<[1], [0], [0], [1], [0, 0, 1, 1], [], []>} : vector<16x16xf32>, vector<16x4xf32>, vector<16x4xf32> -> vector<16x4xf32>
    %55 = vector.extract_strided_slice %16 {offsets = [0, 8], sizes = [16, 4], strides = [1, 1]} : vector<16x32xf32> to vector<16x4xf32>
    %56 = vector.extract_strided_slice %17 {offsets = [0, 8], sizes = [16, 4], strides = [1, 1]} : vector<16x32xf32> to vector<16x4xf32>
    %57 = vector.extract_strided_slice %18 {offsets = [0, 8], sizes = [16, 4], strides = [1, 1]} : vector<16x32xf32> to vector<16x4xf32>
    %cst_26 = arith.constant dense<0.000000e+00> : vector<16x16xf32>
    %58 = tpu.matmul %55, %56, %cst_26 {dimension_numbers = #tpu.dot_dimension_numbers<[1], [1], [0], [0], [0, 0, 1, 0], [], []>} : vector<16x4xf32>, vector<16x4xf32>, vector<16x16xf32> -> vector<16x16xf32>
    %cst_27 = arith.constant 5.000000e-01 : f32
    %59 = vector.broadcast %cst_27 : f32 to vector<16x16xf32>
    %60 = arith.mulf %58, %59 : vector<16x16xf32>
    %61 = arith.addf %60, %4 : vector<16x16xf32>
    %cst_28 = arith.constant dense<0xFF800000> : vector<16xf32>
    %62 = vector.multi_reduction <maximumf>, %61, %cst_28 [1] : vector<16x16xf32> to vector<16xf32>
    %63 = vector.shape_cast %62 : vector<16xf32> to vector<16x1xf32>
    %64 = vector.broadcast %63 : vector<16x1xf32> to vector<16x16xf32>
    %65 = arith.subf %61, %64 : vector<16x16xf32>
    %66 = math.exp %65 : vector<16x16xf32>
    %cst_29 = arith.constant dense<0.000000e+00> : vector<16xf32>
    %67 = vector.multi_reduction <add>, %66, %cst_29 [1] : vector<16x16xf32> to vector<16xf32>
    %68 = vector.shape_cast %67 : vector<16xf32> to vector<16x1xf32>
    %69 = tpu.reciprocal %68 {approx = true} : vector<16x1xf32> -> vector<16x1xf32>
    %70 = vector.broadcast %69 : vector<16x1xf32> to vector<16x16xf32>
    %71 = arith.mulf %66, %70 : vector<16x16xf32>
    %cst_30 = arith.constant dense<0.000000e+00> : vector<16x4xf32>
    %72 = tpu.matmul %71, %57, %cst_30 {dimension_numbers = #tpu.dot_dimension_numbers<[1], [0], [0], [1], [0, 0, 1, 1], [], []>} : vector<16x16xf32>, vector<16x4xf32>, vector<16x4xf32> -> vector<16x4xf32>
    %73 = vector.extract_strided_slice %16 {offsets = [0, 12], sizes = [16, 4], strides = [1, 1]} : vector<16x32xf32> to vector<16x4xf32>
    %74 = vector.extract_strided_slice %17 {offsets = [0, 12], sizes = [16, 4], strides = [1, 1]} : vector<16x32xf32> to vector<16x4xf32>
    %75 = vector.extract_strided_slice %18 {offsets = [0, 12], sizes = [16, 4], strides = [1, 1]} : vector<16x32xf32> to vector<16x4xf32>
    %cst_31 = arith.constant dense<0.000000e+00> : vector<16x16xf32>
    %76 = tpu.matmul %73, %74, %cst_31 {dimension_numbers = #tpu.dot_dimension_numbers<[1], [1], [0], [0], [0, 0, 1, 0], [], []>} : vector<16x4xf32>, vector<16x4xf32>, vector<16x16xf32> -> vector<16x16xf32>
    %cst_32 = arith.constant 5.000000e-01 : f32
    %77 = vector.broadcast %cst_32 : f32 to vector<16x16xf32>
    %78 = arith.mulf %76, %77 : vector<16x16xf32>
    %79 = arith.addf %78, %4 : vector<16x16xf32>
    %cst_33 = arith.constant dense<0xFF800000> : vector<16xf32>
    %80 = vector.multi_reduction <maximumf>, %79, %cst_33 [1] : vector<16x16xf32> to vector<16xf32>
    %81 = vector.shape_cast %80 : vector<16xf32> to vector<16x1xf32>
    %82 = vector.broadcast %81 : vector<16x1xf32> to vector<16x16xf32>
    %83 = arith.subf %79, %82 : vector<16x16xf32>
    %84 = math.exp %83 : vector<16x16xf32>
    %cst_34 = arith.constant dense<0.000000e+00> : vector<16xf32>
    %85 = vector.multi_reduction <add>, %84, %cst_34 [1] : vector<16x16xf32> to vector<16xf32>
    %86 = vector.shape_cast %85 : vector<16xf32> to vector<16x1xf32>
    %87 = tpu.reciprocal %86 {approx = true} : vector<16x1xf32> -> vector<16x1xf32>
    %88 = vector.broadcast %87 : vector<16x1xf32> to vector<16x16xf32>
    %89 = arith.mulf %84, %88 : vector<16x16xf32>
    %cst_35 = arith.constant dense<0.000000e+00> : vector<16x4xf32>
    %90 = tpu.matmul %89, %75, %cst_35 {dimension_numbers = #tpu.dot_dimension_numbers<[1], [0], [0], [1], [0, 0, 1, 1], [], []>} : vector<16x16xf32>, vector<16x4xf32>, vector<16x4xf32> -> vector<16x4xf32>
    %91 = vector.extract_strided_slice %16 {offsets = [0, 16], sizes = [16, 4], strides = [1, 1]} : vector<16x32xf32> to vector<16x4xf32>
    %92 = vector.extract_strided_slice %17 {offsets = [0, 16], sizes = [16, 4], strides = [1, 1]} : vector<16x32xf32> to vector<16x4xf32>
    %93 = vector.extract_strided_slice %18 {offsets = [0, 16], sizes = [16, 4], strides = [1, 1]} : vector<16x32xf32> to vector<16x4xf32>
    %cst_36 = arith.constant dense<0.000000e+00> : vector<16x16xf32>
    %94 = tpu.matmul %91, %92, %cst_36 {dimension_numbers = #tpu.dot_dimension_numbers<[1], [1], [0], [0], [0, 0, 1, 0], [], []>} : vector<16x4xf32>, vector<16x4xf32>, vector<16x16xf32> -> vector<16x16xf32>
    %cst_37 = arith.constant 5.000000e-01 : f32
    %95 = vector.broadcast %cst_37 : f32 to vector<16x16xf32>
    %96 = arith.mulf %94, %95 : vector<16x16xf32>
    %97 = arith.addf %96, %4 : vector<16x16xf32>
    %cst_38 = arith.constant dense<0xFF800000> : vector<16xf32>
    %98 = vector.multi_reduction <maximumf>, %97, %cst_38 [1] : vector<16x16xf32> to vector<16xf32>
    %99 = vector.shape_cast %98 : vector<16xf32> to vector<16x1xf32>
    %100 = vector.broadcast %99 : vector<16x1xf32> to vector<16x16xf32>
    %101 = arith.subf %97, %100 : vector<16x16xf32>
    %102 = math.exp %101 : vector<16x16xf32>
    %cst_39 = arith.constant dense<0.000000e+00> : vector<16xf32>
    %103 = vector.multi_reduction <add>, %102, %cst_39 [1] : vector<16x16xf32> to vector<16xf32>
    %104 = vector.shape_cast %103 : vector<16xf32> to vector<16x1xf32>
    %105 = tpu.reciprocal %104 {approx = true} : vector<16x1xf32> -> vector<16x1xf32>
    %106 = vector.broadcast %105 : vector<16x1xf32> to vector<16x16xf32>
    %107 = arith.mulf %102, %106 : vector<16x16xf32>
    %cst_40 = arith.constant dense<0.000000e+00> : vector<16x4xf32>
    %108 = tpu.matmul %107, %93, %cst_40 {dimension_numbers = #tpu.dot_dimension_numbers<[1], [0], [0], [1], [0, 0, 1, 1], [], []>} : vector<16x16xf32>, vector<16x4xf32>, vector<16x4xf32> -> vector<16x4xf32>
    %109 = vector.extract_strided_slice %16 {offsets = [0, 20], sizes = [16, 4], strides = [1, 1]} : vector<16x32xf32> to vector<16x4xf32>
    %110 = vector.extract_strided_slice %17 {offsets = [0, 20], sizes = [16, 4], strides = [1, 1]} : vector<16x32xf32> to vector<16x4xf32>
    %111 = vector.extract_strided_slice %18 {offsets = [0, 20], sizes = [16, 4], strides = [1, 1]} : vector<16x32xf32> to vector<16x4xf32>
    %cst_41 = arith.constant dense<0.000000e+00> : vector<16x16xf32>
    %112 = tpu.matmul %109, %110, %cst_41 {dimension_numbers = #tpu.dot_dimension_numbers<[1], [1], [0], [0], [0, 0, 1, 0], [], []>} : vector<16x4xf32>, vector<16x4xf32>, vector<16x16xf32> -> vector<16x16xf32>
    %cst_42 = arith.constant 5.000000e-01 : f32
    %113 = vector.broadcast %cst_42 : f32 to vector<16x16xf32>
    %114 = arith.mulf %112, %113 : vector<16x16xf32>
    %115 = arith.addf %114, %4 : vector<16x16xf32>
    %cst_43 = arith.constant dense<0xFF800000> : vector<16xf32>
    %116 = vector.multi_reduction <maximumf>, %115, %cst_43 [1] : vector<16x16xf32> to vector<16xf32>
    %117 = vector.shape_cast %116 : vector<16xf32> to vector<16x1xf32>
    %118 = vector.broadcast %117 : vector<16x1xf32> to vector<16x16xf32>
    %119 = arith.subf %115, %118 : vector<16x16xf32>
    %120 = math.exp %119 : vector<16x16xf32>
    %cst_44 = arith.constant dense<0.000000e+00> : vector<16xf32>
    %121 = vector.multi_reduction <add>, %120, %cst_44 [1] : vector<16x16xf32> to vector<16xf32>
    %122 = vector.shape_cast %121 : vector<16xf32> to vector<16x1xf32>
    %123 = tpu.reciprocal %122 {approx = true} : vector<16x1xf32> -> vector<16x1xf32>
    %124 = vector.broadcast %123 : vector<16x1xf32> to vector<16x16xf32>
    %125 = arith.mulf %120, %124 : vector<16x16xf32>
    %cst_45 = arith.constant dense<0.000000e+00> : vector<16x4xf32>
    %126 = tpu.matmul %125, %111, %cst_45 {dimension_numbers = #tpu.dot_dimension_numbers<[1], [0], [0], [1], [0, 0, 1, 1], [], []>} : vector<16x16xf32>, vector<16x4xf32>, vector<16x4xf32> -> vector<16x4xf32>
    %127 = vector.extract_strided_slice %16 {offsets = [0, 24], sizes = [16, 4], strides = [1, 1]} : vector<16x32xf32> to vector<16x4xf32>
    %128 = vector.extract_strided_slice %17 {offsets = [0, 24], sizes = [16, 4], strides = [1, 1]} : vector<16x32xf32> to vector<16x4xf32>
    %129 = vector.extract_strided_slice %18 {offsets = [0, 24], sizes = [16, 4], strides = [1, 1]} : vector<16x32xf32> to vector<16x4xf32>
    %cst_46 = arith.constant dense<0.000000e+00> : vector<16x16xf32>
    %130 = tpu.matmul %127, %128, %cst_46 {dimension_numbers = #tpu.dot_dimension_numbers<[1], [1], [0], [0], [0, 0, 1, 0], [], []>} : vector<16x4xf32>, vector<16x4xf32>, vector<16x16xf32> -> vector<16x16xf32>
    %cst_47 = arith.constant 5.000000e-01 : f32
    %131 = vector.broadcast %cst_47 : f32 to vector<16x16xf32>
    %132 = arith.mulf %130, %131 : vector<16x16xf32>
    %133 = arith.addf %132, %4 : vector<16x16xf32>
    %cst_48 = arith.constant dense<0xFF800000> : vector<16xf32>
    %134 = vector.multi_reduction <maximumf>, %133, %cst_48 [1] : vector<16x16xf32> to vector<16xf32>
    %135 = vector.shape_cast %134 : vector<16xf32> to vector<16x1xf32>
    %136 = vector.broadcast %135 : vector<16x1xf32> to vector<16x16xf32>
    %137 = arith.subf %133, %136 : vector<16x16xf32>
    %138 = math.exp %137 : vector<16x16xf32>
    %cst_49 = arith.constant dense<0.000000e+00> : vector<16xf32>
    %139 = vector.multi_reduction <add>, %138, %cst_49 [1] : vector<16x16xf32> to vector<16xf32>
    %140 = vector.shape_cast %139 : vector<16xf32> to vector<16x1xf32>
    %141 = tpu.reciprocal %140 {approx = true} : vector<16x1xf32> -> vector<16x1xf32>
    %142 = vector.broadcast %141 : vector<16x1xf32> to vector<16x16xf32>
    %143 = arith.mulf %138, %142 : vector<16x16xf32>
    %cst_50 = arith.constant dense<0.000000e+00> : vector<16x4xf32>
    %144 = tpu.matmul %143, %129, %cst_50 {dimension_numbers = #tpu.dot_dimension_numbers<[1], [0], [0], [1], [0, 0, 1, 1], [], []>} : vector<16x16xf32>, vector<16x4xf32>, vector<16x4xf32> -> vector<16x4xf32>
    %145 = vector.extract_strided_slice %16 {offsets = [0, 28], sizes = [16, 4], strides = [1, 1]} : vector<16x32xf32> to vector<16x4xf32>
    %146 = vector.extract_strided_slice %17 {offsets = [0, 28], sizes = [16, 4], strides = [1, 1]} : vector<16x32xf32> to vector<16x4xf32>
    %147 = vector.extract_strided_slice %18 {offsets = [0, 28], sizes = [16, 4], strides = [1, 1]} : vector<16x32xf32> to vector<16x4xf32>
    %cst_51 = arith.constant dense<0.000000e+00> : vector<16x16xf32>
    %148 = tpu.matmul %145, %146, %cst_51 {dimension_numbers = #tpu.dot_dimension_numbers<[1], [1], [0], [0], [0, 0, 1, 0], [], []>} : vector<16x4xf32>, vector<16x4xf32>, vector<16x16xf32> -> vector<16x16xf32>
    %cst_52 = arith.constant 5.000000e-01 : f32
    %149 = vector.broadcast %cst_52 : f32 to vector<16x16xf32>
    %150 = arith.mulf %148, %149 : vector<16x16xf32>
    %151 = arith.addf %150, %4 : vector<16x16xf32>
    %cst_53 = arith.constant dense<0xFF800000> : vector<16xf32>
    %152 = vector.multi_reduction <maximumf>, %151, %cst_53 [1] : vector<16x16xf32> to vector<16xf32>
    %153 = vector.shape_cast %152 : vector<16xf32> to vector<16x1xf32>
    %154 = vector.broadcast %153 : vector<16x1xf32> to vector<16x16xf32>
    %155 = arith.subf %151, %154 : vector<16x16xf32>
    %156 = math.exp %155 : vector<16x16xf32>
    %cst_54 = arith.constant dense<0.000000e+00> : vector<16xf32>
    %157 = vector.multi_reduction <add>, %156, %cst_54 [1] : vector<16x16xf32> to vector<16xf32>
    %158 = vector.shape_cast %157 : vector<16xf32> to vector<16x1xf32>
    %159 = tpu.reciprocal %158 {approx = true} : vector<16x1xf32> -> vector<16x1xf32>
    %160 = vector.broadcast %159 : vector<16x1xf32> to vector<16x16xf32>
    %161 = arith.mulf %156, %160 : vector<16x16xf32>
    %cst_55 = arith.constant dense<0.000000e+00> : vector<16x4xf32>
    %162 = tpu.matmul %161, %147, %cst_55 {dimension_numbers = #tpu.dot_dimension_numbers<[1], [0], [0], [1], [0, 0, 1, 1], [], []>} : vector<16x16xf32>, vector<16x4xf32>, vector<16x4xf32> -> vector<16x4xf32>
    %163 = tpu.concatenate %36, %54, %72, %90, %108, %126, %144, %162 in 1 : vector<16x4xf32>, vector<16x4xf32>, vector<16x4xf32>, vector<16x4xf32>, vector<16x4xf32>, vector<16x4xf32>, vector<16x4xf32>, vector<16x4xf32> -> vector<16x32xf32>
    %cst_56 = arith.constant dense<0.000000e+00> : vector<16x32xf32>
    %164 = tpu.matmul %163, %10, %cst_56 {dimension_numbers = #tpu.dot_dimension_numbers<[1], [0], [0], [1], [0, 0, 1, 1], [], []>} : vector<16x32xf32>, vector<32x32xf32>, vector<16x32xf32> -> vector<16x32xf32>
    %165 = vector.broadcast %12 : vector<1x32xf32> to vector<16x32xf32>
    %166 = arith.addf %164, %165 : vector<16x32xf32>
    %167 = arith.addf %3, %166 : vector<16x32xf32>
    %c0_57 = arith.constant 0 : index
    %c0_58 = arith.constant 0 : index
    %c0_59 = arith.constant 0 : index
    %168 = vector.load %arg7[%c0_57, %c0_58, %c0_59] : memref<1x1x32xf32, #tpu.memory_space<vmem>>, vector<1x1x32xf32>
    %169 = vector.shape_cast %168 : vector<1x1x32xf32> to vector<1x32xf32>
    %c0_60 = arith.constant 0 : index
    %c0_61 = arith.constant 0 : index
    %c0_62 = arith.constant 0 : index
    %170 = vector.load %arg8[%c0_60, %c0_61, %c0_62] : memref<1x1x32xf32, #tpu.memory_space<vmem>>, vector<1x1x32xf32>
    %171 = vector.shape_cast %170 : vector<1x1x32xf32> to vector<1x32xf32>
    %cst_63 = arith.constant dense<0.000000e+00> : vector<16xf32>
    %172 = vector.multi_reduction <add>, %167, %cst_63 [1] : vector<16x32xf32> to vector<16xf32>
    %173 = vector.shape_cast %172 : vector<16xf32> to vector<16x1xf32>
    %cst_64 = arith.constant 3.200000e+01 : f32
    %174 = vector.broadcast %cst_64 : f32 to vector<16x1xf32>
    %175 = arith.divf %173, %174 : vector<16x1xf32>
    %176 = vector.broadcast %175 : vector<16x1xf32> to vector<16x32xf32>
    %177 = arith.subf %167, %176 : vector<16x32xf32>
    %178 = arith.mulf %177, %177 : vector<16x32xf32>
    %cst_65 = arith.constant dense<0.000000e+00> : vector<16xf32>
    %179 = vector.multi_reduction <add>, %178, %cst_65 [1] : vector<16x32xf32> to vector<16xf32>
    %180 = vector.shape_cast %179 : vector<16xf32> to vector<16x1xf32>
    %cst_66 = arith.constant 3.200000e+01 : f32
    %181 = vector.broadcast %cst_66 : f32 to vector<16x1xf32>
    %182 = arith.divf %180, %181 : vector<16x1xf32>
    %183 = vector.broadcast %175 : vector<16x1xf32> to vector<16x32xf32>
    %184 = arith.subf %167, %183 : vector<16x32xf32>
    %cst_67 = arith.constant 9.99999974E-6 : f32
    %185 = vector.broadcast %cst_67 : f32 to vector<16x1xf32>
    %186 = arith.addf %182, %185 : vector<16x1xf32>
    %187 = math.rsqrt %186 : vector<16x1xf32>
    %188 = vector.broadcast %187 : vector<16x1xf32> to vector<16x32xf32>
    %189 = arith.mulf %184, %188 : vector<16x32xf32>
    %190 = vector.broadcast %169 : vector<1x32xf32> to vector<16x32xf32>
    %191 = arith.mulf %189, %190 : vector<16x32xf32>
    %192 = vector.broadcast %171 : vector<1x32xf32> to vector<16x32xf32>
    %193 = arith.addf %191, %192 : vector<16x32xf32>
    %c0_68 = arith.constant 0 : index
    %c0_69 = arith.constant 0 : index
    %c0_70 = arith.constant 0 : index
    %194 = vector.load %arg9[%c0_68, %c0_69, %c0_70] : memref<1x32x2048xf32, #tpu.memory_space<vmem>>, vector<1x32x2048xf32>
    %195 = vector.shape_cast %194 : vector<1x32x2048xf32> to vector<32x2048xf32>
    %c0_71 = arith.constant 0 : index
    %c0_72 = arith.constant 0 : index
    %c0_73 = arith.constant 0 : index
    %196 = vector.load %arg10[%c0_71, %c0_72, %c0_73] : memref<1x1x2048xf32, #tpu.memory_space<vmem>>, vector<1x1x2048xf32>
    %197 = vector.shape_cast %196 : vector<1x1x2048xf32> to vector<1x2048xf32>
    %c0_74 = arith.constant 0 : index
    %c0_75 = arith.constant 0 : index
    %c0_76 = arith.constant 0 : index
    %198 = vector.load %arg11[%c0_74, %c0_75, %c0_76] : memref<1x2048x32xf32, #tpu.memory_space<vmem>>, vector<1x2048x32xf32>
    %199 = vector.shape_cast %198 : vector<1x2048x32xf32> to vector<2048x32xf32>
    %c0_77 = arith.constant 0 : index
    %c0_78 = arith.constant 0 : index
    %c0_79 = arith.constant 0 : index
    %200 = vector.load %arg12[%c0_77, %c0_78, %c0_79] : memref<1x1x32xf32, #tpu.memory_space<vmem>>, vector<1x1x32xf32>
    %201 = vector.shape_cast %200 : vector<1x1x32xf32> to vector<1x32xf32>
    %cst_80 = arith.constant dense<0.000000e+00> : vector<16x2048xf32>
    %202 = tpu.matmul %193, %195, %cst_80 {dimension_numbers = #tpu.dot_dimension_numbers<[1], [0], [0], [1], [0, 0, 1, 1], [], []>} : vector<16x32xf32>, vector<32x2048xf32>, vector<16x2048xf32> -> vector<16x2048xf32>
    %203 = vector.broadcast %197 : vector<1x2048xf32> to vector<16x2048xf32>
    %204 = arith.addf %202, %203 : vector<16x2048xf32>
    %cst_81 = arith.constant 0.000000e+00 : f32
    %205 = vector.broadcast %cst_81 : f32 to vector<16x2048xf32>
    %206 = arith.maximumf %204, %205 : vector<16x2048xf32>
    %cst_82 = arith.constant dense<0.000000e+00> : vector<16x32xf32>
    %207 = tpu.matmul %206, %199, %cst_82 {dimension_numbers = #tpu.dot_dimension_numbers<[1], [0], [0], [1], [0, 0, 1, 1], [], []>} : vector<16x2048xf32>, vector<2048x32xf32>, vector<16x32xf32> -> vector<16x32xf32>
    %208 = vector.broadcast %201 : vector<1x32xf32> to vector<16x32xf32>
    %209 = arith.addf %207, %208 : vector<16x32xf32>
    %210 = arith.addf %193, %209 : vector<16x32xf32>
    %c0_83 = arith.constant 0 : index
    %c0_84 = arith.constant 0 : index
    %c0_85 = arith.constant 0 : index
    %211 = vector.load %arg13[%c0_83, %c0_84, %c0_85] : memref<1x1x32xf32, #tpu.memory_space<vmem>>, vector<1x1x32xf32>
    %212 = vector.shape_cast %211 : vector<1x1x32xf32> to vector<1x32xf32>
    %c0_86 = arith.constant 0 : index
    %c0_87 = arith.constant 0 : index
    %c0_88 = arith.constant 0 : index
    %213 = vector.load %arg14[%c0_86, %c0_87, %c0_88] : memref<1x1x32xf32, #tpu.memory_space<vmem>>, vector<1x1x32xf32>
    %214 = vector.shape_cast %213 : vector<1x1x32xf32> to vector<1x32xf32>
    %cst_89 = arith.constant dense<0.000000e+00> : vector<16xf32>
    %215 = vector.multi_reduction <add>, %210, %cst_89 [1] : vector<16x32xf32> to vector<16xf32>
    %216 = vector.shape_cast %215 : vector<16xf32> to vector<16x1xf32>
    %cst_90 = arith.constant 3.200000e+01 : f32
    %217 = vector.broadcast %cst_90 : f32 to vector<16x1xf32>
    %218 = arith.divf %216, %217 : vector<16x1xf32>
    %219 = vector.broadcast %218 : vector<16x1xf32> to vector<16x32xf32>
    %220 = arith.subf %210, %219 : vector<16x32xf32>
    %221 = arith.mulf %220, %220 : vector<16x32xf32>
    %cst_91 = arith.constant dense<0.000000e+00> : vector<16xf32>
    %222 = vector.multi_reduction <add>, %221, %cst_91 [1] : vector<16x32xf32> to vector<16xf32>
    %223 = vector.shape_cast %222 : vector<16xf32> to vector<16x1xf32>
    %cst_92 = arith.constant 3.200000e+01 : f32
    %224 = vector.broadcast %cst_92 : f32 to vector<16x1xf32>
    %225 = arith.divf %223, %224 : vector<16x1xf32>
    %226 = vector.broadcast %218 : vector<16x1xf32> to vector<16x32xf32>
    %227 = arith.subf %210, %226 : vector<16x32xf32>
    %cst_93 = arith.constant 9.99999974E-6 : f32
    %228 = vector.broadcast %cst_93 : f32 to vector<16x1xf32>
    %229 = arith.addf %225, %228 : vector<16x1xf32>
    %230 = math.rsqrt %229 : vector<16x1xf32>
    %231 = vector.broadcast %230 : vector<16x1xf32> to vector<16x32xf32>
    %232 = arith.mulf %227, %231 : vector<16x32xf32>
    %233 = vector.broadcast %212 : vector<1x32xf32> to vector<16x32xf32>
    %234 = arith.mulf %232, %233 : vector<16x32xf32>
    %235 = vector.broadcast %214 : vector<1x32xf32> to vector<16x32xf32>
    %236 = arith.addf %234, %235 : vector<16x32xf32>
    %c0_94 = arith.constant 0 : index
    %c0_95 = arith.constant 0 : index
    %237 = vector.load %arg17[%c0_94, %c0_95] : memref<16x32xf32, #tpu.memory_space<vmem>>, vector<16x32xf32>
    tpu.vector_store %arg17[%c0_94, %c0_95], %236 {strides = array<i32>} : memref<16x32xf32, #tpu.memory_space<vmem>>, vector<16x32xf32>,
    %c5_i32 = arith.constant 5 : i32
    %238 = arith.cmpi eq, %arg0, %c5_i32 : i32
    %239 = arith.extui %238 : i1 to i32
    %c0_i32_96 = arith.constant 0 : i32
    %240 = arith.cmpi ne, %239, %c0_i32_96 : i32
    scf.if %240 {
      %c0_97 = arith.constant 0 : index
      %c0_98 = arith.constant 0 : index
      %241 = vector.load %arg15[%c0_97, %c0_98] : memref<1x32xf32, #tpu.memory_space<vmem>>, vector<1x32xf32>
      %c0_99 = arith.constant 0 : index
      %c0_100 = arith.constant 0 : index
      %242 = vector.load %arg16[%c0_99, %c0_100] : memref<1x32xf32, #tpu.memory_space<vmem>>, vector<1x32xf32>
      %cst_101 = arith.constant dense<0.000000e+00> : vector<16xf32>
      %243 = vector.multi_reduction <add>, %236, %cst_101 [1] : vector<16x32xf32> to vector<16xf32>
      %244 = vector.shape_cast %243 : vector<16xf32> to vector<16x1xf32>
      %cst_102 = arith.constant 3.200000e+01 : f32
      %245 = vector.broadcast %cst_102 : f32 to vector<16x1xf32>
      %246 = arith.divf %244, %245 : vector<16x1xf32>
      %247 = vector.broadcast %246 : vector<16x1xf32> to vector<16x32xf32>
      %248 = arith.subf %236, %247 : vector<16x32xf32>
      %249 = arith.mulf %248, %248 : vector<16x32xf32>
      %cst_103 = arith.constant dense<0.000000e+00> : vector<16xf32>
      %250 = vector.multi_reduction <add>, %249, %cst_103 [1] : vector<16x32xf32> to vector<16xf32>
      %251 = vector.shape_cast %250 : vector<16xf32> to vector<16x1xf32>
      %cst_104 = arith.constant 3.200000e+01 : f32
      %252 = vector.broadcast %cst_104 : f32 to vector<16x1xf32>
      %253 = arith.divf %251, %252 : vector<16x1xf32>
      %254 = vector.broadcast %246 : vector<16x1xf32> to vector<16x32xf32>
      %255 = arith.subf %236, %254 : vector<16x32xf32>
      %cst_105 = arith.constant 9.99999974E-6 : f32
      %256 = vector.broadcast %cst_105 : f32 to vector<16x1xf32>
      %257 = arith.addf %253, %256 : vector<16x1xf32>
      %258 = math.rsqrt %257 : vector<16x1xf32>
      %259 = vector.broadcast %258 : vector<16x1xf32> to vector<16x32xf32>
      %260 = arith.mulf %255, %259 : vector<16x32xf32>
      %261 = vector.broadcast %241 : vector<1x32xf32> to vector<16x32xf32>
      %262 = arith.mulf %260, %261 : vector<16x32xf32>
      %263 = vector.broadcast %242 : vector<1x32xf32> to vector<16x32xf32>
      %264 = arith.addf %262, %263 : vector<16x32xf32>
      %c0_106 = arith.constant 0 : index
      %c0_107 = arith.constant 0 : index
      %265 = vector.load %arg17[%c0_106, %c0_107] : memref<16x32xf32, #tpu.memory_space<vmem>>, vector<16x32xf32>
      tpu.vector_store %arg17[%c0_106, %c0_107], %264 {strides = array<i32>} : memref<16x32xf32, #tpu.memory_space<vmem>>, vector<16x32xf32>,
    } else {
    }
    return
  }
  func.func @transform_0(%arg0: i32) -> (i32, i32) {
    %c0_i32 = arith.constant 0 : i32
    %c0_i32_0 = arith.constant 0 : i32
    %c0_i32_1 = arith.constant 0 : i32
    return %c0_i32, %c0_i32_0 : i32, i32
  }
  func.func @transform_1(%arg0: i32) -> (i32, i32) {
    %c0_i32 = arith.constant 0 : i32
    %c0_i32_0 = arith.constant 0 : i32
    %c0_i32_1 = arith.constant 0 : i32
    return %c0_i32, %c0_i32_0 : i32, i32
  }
  func.func @transform_2(%arg0: i32) -> (i32, i32, i32) {
    %c0_i32 = arith.constant 0 : i32
    %c0_i32_0 = arith.constant 0 : i32
    %c0_i32_1 = arith.constant 0 : i32
    return %arg0, %c0_i32, %c0_i32_0 : i32, i32, i32
  }
  func.func @transform_3(%arg0: i32) -> (i32, i32, i32) {
    %c0_i32 = arith.constant 0 : i32
    %c0_i32_0 = arith.constant 0 : i32
    %c0_i32_1 = arith.constant 0 : i32
    return %arg0, %c0_i32, %c0_i32_0 : i32, i32, i32
  }
  func.func @transform_4(%arg0: i32) -> (i32, i32, i32) {
    %c0_i32 = arith.constant 0 : i32
    %c0_i32_0 = arith.constant 0 : i32
    %c0_i32_1 = arith.constant 0 : i32
    return %arg0, %c0_i32, %c0_i32_0 : i32, i32, i32
  }
  func.func @transform_5(%arg0: i32) -> (i32, i32, i32) {
    %c0_i32 = arith.constant 0 : i32
    %c0_i32_0 = arith.constant 0 : i32
    %c0_i32_1 = arith.constant 0 : i32
    return %arg0, %c0_i32, %c0_i32_0 : i32, i32, i32
  }
  func.func @transform_6(%arg0: i32) -> (i32, i32, i32) {
    %c0_i32 = arith.constant 0 : i32
    %c0_i32_0 = arith.constant 0 : i32
    %c0_i32_1 = arith.constant 0 : i32
    return %arg0, %c0_i32, %c0_i32_0 : i32, i32, i32
  }
  func.func @transform_7(%arg0: i32) -> (i32, i32, i32) {
    %c0_i32 = arith.constant 0 : i32
    %c0_i32_0 = arith.constant 0 : i32
    %c0_i32_1 = arith.constant 0 : i32
    return %arg0, %c0_i32, %c0_i32_0 : i32, i32, i32
  }
  func.func @transform_8(%arg0: i32) -> (i32, i32, i32) {
    %c0_i32 = arith.constant 0 : i32
    %c0_i32_0 = arith.constant 0 : i32
    %c0_i32_1 = arith.constant 0 : i32
    return %arg0, %c0_i32, %c0_i32_0 : i32, i32, i32
  }
  func.func @transform_9(%arg0: i32) -> (i32, i32, i32) {
    %c0_i32 = arith.constant 0 : i32
    %c0_i32_0 = arith.constant 0 : i32
    %c0_i32_1 = arith.constant 0 : i32
    return %arg0, %c0_i32, %c0_i32_0 : i32, i32, i32
  }
  func.func @transform_10(%arg0: i32) -> (i32, i32, i32) {
    %c0_i32 = arith.constant 0 : i32
    %c0_i32_0 = arith.constant 0 : i32
    %c0_i32_1 = arith.constant 0 : i32
    return %arg0, %c0_i32, %c0_i32_0 : i32, i32, i32
  }
  func.func @transform_11(%arg0: i32) -> (i32, i32, i32) {
    %c0_i32 = arith.constant 0 : i32
    %c0_i32_0 = arith.constant 0 : i32
    %c0_i32_1 = arith.constant 0 : i32
    return %arg0, %c0_i32, %c0_i32_0 : i32, i32, i32
  }
  func.func @transform_12(%arg0: i32) -> (i32, i32, i32) {
    %c0_i32 = arith.constant 0 : i32
    %c0_i32_0 = arith.constant 0 : i32
    %c0_i32_1 = arith.constant 0 : i32
    return %arg0, %c0_i32, %c0_i32_0 : i32, i32, i32
  }
  func.func @transform_13(%arg0: i32) -> (i32, i32, i32) {
    %c0_i32 = arith.constant 0 : i32
    %c0_i32_0 = arith.constant 0 : i32
    %c0_i32_1 = arith.constant 0 : i32
    return %arg0, %c0_i32, %c0_i32_0 : i32, i32, i32
  }
  func.func @transform_14(%arg0: i32) -> (i32, i32) {
    %c0_i32 = arith.constant 0 : i32
    %c0_i32_0 = arith.constant 0 : i32
    %c0_i32_1 = arith.constant 0 : i32
    return %c0_i32, %c0_i32_0 : i32, i32
  }
  func.func @transform_15(%arg0: i32) -> (i32, i32) {
    %c0_i32 = arith.constant 0 : i32
    %c0_i32_0 = arith.constant 0 : i32
    %c0_i32_1 = arith.constant 0 : i32
    return %c0_i32, %c0_i32_0 : i32, i32
  }
  func.func @transform_16(%arg0: i32) -> (i32, i32) {
    %c0_i32 = arith.constant 0 : i32
    %c0_i32_0 = arith.constant 0 : i32
    %c0_i32_1 = arith.constant 0 : i32
    return %c0_i32, %c0_i32_0 : i32, i32
  }
}

module attributes {stable_mosaic.version = 11 : i64} {
  func.func @_decoder_stack_kernel(%arg0: i32, %arg1: memref<16x32xf32, #tpu.memory_space<vmem>>, %arg2: memref<16x32xf32, #tpu.memory_space<vmem>>, %arg3: memref<16x16xf32, #tpu.memory_space<vmem>>, %arg4: memref<16x16xf32, #tpu.memory_space<vmem>>, %arg5: memref<1x32x96xf32, #tpu.memory_space<vmem>>, %arg6: memref<1x1x96xf32, #tpu.memory_space<vmem>>, %arg7: memref<1x32x32xf32, #tpu.memory_space<vmem>>, %arg8: memref<1x1x32xf32, #tpu.memory_space<vmem>>, %arg9: memref<1x1x32xf32, #tpu.memory_space<vmem>>, %arg10: memref<1x1x32xf32, #tpu.memory_space<vmem>>, %arg11: memref<1x32x32xf32, #tpu.memory_space<vmem>>, %arg12: memref<1x1x32xf32, #tpu.memory_space<vmem>>, %arg13: memref<1x32x64xf32, #tpu.memory_space<vmem>>, %arg14: memref<1x1x64xf32, #tpu.memory_space<vmem>>, %arg15: memref<1x32x32xf32, #tpu.memory_space<vmem>>, %arg16: memref<1x1x32xf32, #tpu.memory_space<vmem>>, %arg17: memref<1x1x32xf32, #tpu.memory_space<vmem>>, %arg18: memref<1x1x32xf32, #tpu.memory_space<vmem>>, %arg19: memref<1x32x2048xf32, #tpu.memory_space<vmem>>, %arg20: memref<1x1x2048xf32, #tpu.memory_space<vmem>>, %arg21: memref<1x2048x32xf32, #tpu.memory_space<vmem>>, %arg22: memref<1x1x32xf32, #tpu.memory_space<vmem>>, %arg23: memref<1x1x32xf32, #tpu.memory_space<vmem>>, %arg24: memref<1x1x32xf32, #tpu.memory_space<vmem>>, %arg25: memref<1x32xf32, #tpu.memory_space<vmem>>, %arg26: memref<1x32xf32, #tpu.memory_space<vmem>>, %arg27: memref<16x32xf32, #tpu.memory_space<vmem>>) attributes {dimension_semantics = [#tpu.dimension_semantics<arbitrary>], iteration_bounds = array<i64: 6>, scalar_prefetch = 0 : i64, scratch_operands = 0 : i64, tpu.core_type = #tpu.core_type<tc>, window_params = [{pipeline_mode = #tpu.pipeline_mode<synchronous>, transform_indices = @transform_0, window_bounds = array<i64: 16, 32>}, {pipeline_mode = #tpu.pipeline_mode<synchronous>, transform_indices = @transform_1, window_bounds = array<i64: 16, 32>}, {pipeline_mode = #tpu.pipeline_mode<synchronous>, transform_indices = @transform_2, window_bounds = array<i64: 16, 16>}, {pipeline_mode = #tpu.pipeline_mode<synchronous>, transform_indices = @transform_3, window_bounds = array<i64: 16, 16>}, {transform_indices = @transform_4, window_bounds = array<i64: 1, 32, 96>}, {transform_indices = @transform_5, window_bounds = array<i64: 1, 1, 96>}, {transform_indices = @transform_6, window_bounds = array<i64: 1, 32, 32>}, {transform_indices = @transform_7, window_bounds = array<i64: 1, 1, 32>}, {transform_indices = @transform_8, window_bounds = array<i64: 1, 1, 32>}, {transform_indices = @transform_9, window_bounds = array<i64: 1, 1, 32>}, {transform_indices = @transform_10, window_bounds = array<i64: 1, 32, 32>}, {transform_indices = @transform_11, window_bounds = array<i64: 1, 1, 32>}, {transform_indices = @transform_12, window_bounds = array<i64: 1, 32, 64>}, {transform_indices = @transform_13, window_bounds = array<i64: 1, 1, 64>}, {transform_indices = @transform_14, window_bounds = array<i64: 1, 32, 32>}, {transform_indices = @transform_15, window_bounds = array<i64: 1, 1, 32>}, {transform_indices = @transform_16, window_bounds = array<i64: 1, 1, 32>}, {transform_indices = @transform_17, window_bounds = array<i64: 1, 1, 32>}, {transform_indices = @transform_18, window_bounds = array<i64: 1, 32, 2048>}, {transform_indices = @transform_19, window_bounds = array<i64: 1, 1, 2048>}, {transform_indices = @transform_20, window_bounds = array<i64: 1, 2048, 32>}, {transform_indices = @transform_21, window_bounds = array<i64: 1, 1, 32>}, {transform_indices = @transform_22, window_bounds = array<i64: 1, 1, 32>}, {transform_indices = @transform_23, window_bounds = array<i64: 1, 1, 32>}, {pipeline_mode = #tpu.pipeline_mode<synchronous>, transform_indices = @transform_24, window_bounds = array<i64: 1, 32>}, {pipeline_mode = #tpu.pipeline_mode<synchronous>, transform_indices = @transform_25, window_bounds = array<i64: 1, 32>}, {pipeline_mode = #tpu.pipeline_mode<synchronous>, transform_indices = @transform_26, window_bounds = array<i64: 16, 32>}]} {
    %c0_i32 = arith.constant 0 : i32
    %0 = arith.cmpi eq, %arg0, %c0_i32 : i32
    %1 = arith.extui %0 : i1 to i32
    %c0_i32_0 = arith.constant 0 : i32
    %2 = arith.cmpi ne, %1, %c0_i32_0 : i32
    scf.if %2 {
      %c0_173 = arith.constant 0 : index
      %c0_174 = arith.constant 0 : index
      %438 = vector.load %arg1[%c0_173, %c0_174] : memref<16x32xf32, #tpu.memory_space<vmem>>, vector<16x32xf32>
      %c0_175 = arith.constant 0 : index
      %c0_176 = arith.constant 0 : index
      %439 = vector.load %arg27[%c0_175, %c0_176] : memref<16x32xf32, #tpu.memory_space<vmem>>, vector<16x32xf32>
      tpu.vector_store %arg27[%c0_175, %c0_176], %438 {strides = array<i32>} : memref<16x32xf32, #tpu.memory_space<vmem>>, vector<16x32xf32>,
    } else {
    }
    %c0 = arith.constant 0 : index
    %c0_1 = arith.constant 0 : index
    %3 = vector.load %arg27[%c0, %c0_1] : memref<16x32xf32, #tpu.memory_space<vmem>>, vector<16x32xf32>
    %c0_2 = arith.constant 0 : index
    %c0_3 = arith.constant 0 : index
    %4 = vector.load %arg2[%c0_2, %c0_3] : memref<16x32xf32, #tpu.memory_space<vmem>>, vector<16x32xf32>
    %c0_4 = arith.constant 0 : index
    %c0_5 = arith.constant 0 : index
    %5 = vector.load %arg3[%c0_4, %c0_5] : memref<16x16xf32, #tpu.memory_space<vmem>>, vector<16x16xf32>
    %c0_6 = arith.constant 0 : index
    %c0_7 = arith.constant 0 : index
    %c0_8 = arith.constant 0 : index
    %6 = vector.load %arg5[%c0_6, %c0_7, %c0_8] : memref<1x32x96xf32, #tpu.memory_space<vmem>>, vector<1x32x96xf32>
    %7 = vector.shape_cast %6 : vector<1x32x96xf32> to vector<32x96xf32>
    %c0_9 = arith.constant 0 : index
    %c0_10 = arith.constant 0 : index
    %c0_11 = arith.constant 0 : index
    %8 = vector.load %arg6[%c0_9, %c0_10, %c0_11] : memref<1x1x96xf32, #tpu.memory_space<vmem>>, vector<1x1x96xf32>
    %9 = vector.shape_cast %8 : vector<1x1x96xf32> to vector<1x96xf32>
    %c0_12 = arith.constant 0 : index
    %c0_13 = arith.constant 0 : index
    %c0_14 = arith.constant 0 : index
    %10 = vector.load %arg7[%c0_12, %c0_13, %c0_14] : memref<1x32x32xf32, #tpu.memory_space<vmem>>, vector<1x32x32xf32>
    %11 = vector.shape_cast %10 : vector<1x32x32xf32> to vector<32x32xf32>
    %c0_15 = arith.constant 0 : index
    %c0_16 = arith.constant 0 : index
    %c0_17 = arith.constant 0 : index
    %12 = vector.load %arg8[%c0_15, %c0_16, %c0_17] : memref<1x1x32xf32, #tpu.memory_space<vmem>>, vector<1x1x32xf32>
    %13 = vector.shape_cast %12 : vector<1x1x32xf32> to vector<1x32xf32>
    %cst = arith.constant dense<0.000000e+00> : vector<16x96xf32>
    %14 = tpu.matmul %3, %7, %cst {dimension_numbers = #tpu.dot_dimension_numbers<[1], [0], [0], [1], [0, 0, 1, 1], [], []>} : vector<16x32xf32>, vector<32x96xf32>, vector<16x96xf32> -> vector<16x96xf32>
    %15 = vector.broadcast %9 : vector<1x96xf32> to vector<16x96xf32>
    %16 = arith.addf %14, %15 : vector<16x96xf32>
    %17 = vector.extract_strided_slice %16 {offsets = [0, 0], sizes = [16, 32], strides = [1, 1]} : vector<16x96xf32> to vector<16x32xf32>
    %18 = vector.extract_strided_slice %16 {offsets = [0, 32], sizes = [16, 32], strides = [1, 1]} : vector<16x96xf32> to vector<16x32xf32>
    %19 = vector.extract_strided_slice %16 {offsets = [0, 64], sizes = [16, 32], strides = [1, 1]} : vector<16x96xf32> to vector<16x32xf32>
    %20 = vector.extract_strided_slice %17 {offsets = [0, 0], sizes = [16, 4], strides = [1, 1]} : vector<16x32xf32> to vector<16x4xf32>
    %21 = vector.extract_strided_slice %18 {offsets = [0, 0], sizes = [16, 4], strides = [1, 1]} : vector<16x32xf32> to vector<16x4xf32>
    %22 = vector.extract_strided_slice %19 {offsets = [0, 0], sizes = [16, 4], strides = [1, 1]} : vector<16x32xf32> to vector<16x4xf32>
    %cst_18 = arith.constant dense<0.000000e+00> : vector<16x16xf32>
    %23 = tpu.matmul %20, %21, %cst_18 {dimension_numbers = #tpu.dot_dimension_numbers<[1], [1], [0], [0], [0, 0, 1, 0], [], []>} : vector<16x4xf32>, vector<16x4xf32>, vector<16x16xf32> -> vector<16x16xf32>
    %cst_19 = arith.constant 5.000000e-01 : f32
    %24 = vector.broadcast %cst_19 : f32 to vector<16x16xf32>
    %25 = arith.mulf %23, %24 : vector<16x16xf32>
    %26 = arith.addf %25, %5 : vector<16x16xf32>
    %cst_20 = arith.constant dense<0xFF800000> : vector<16xf32>
    %27 = vector.multi_reduction <maximumf>, %26, %cst_20 [1] : vector<16x16xf32> to vector<16xf32>
    %28 = vector.shape_cast %27 : vector<16xf32> to vector<16x1xf32>
    %29 = vector.broadcast %28 : vector<16x1xf32> to vector<16x16xf32>
    %30 = arith.subf %26, %29 : vector<16x16xf32>
    %31 = math.exp %30 : vector<16x16xf32>
    %cst_21 = arith.constant dense<0.000000e+00> : vector<16xf32>
    %32 = vector.multi_reduction <add>, %31, %cst_21 [1] : vector<16x16xf32> to vector<16xf32>
    %33 = vector.shape_cast %32 : vector<16xf32> to vector<16x1xf32>
    %34 = tpu.reciprocal %33 {approx = true} : vector<16x1xf32> -> vector<16x1xf32>
    %35 = vector.broadcast %34 : vector<16x1xf32> to vector<16x16xf32>
    %36 = arith.mulf %31, %35 : vector<16x16xf32>
    %cst_22 = arith.constant dense<0.000000e+00> : vector<16x4xf32>
    %37 = tpu.matmul %36, %22, %cst_22 {dimension_numbers = #tpu.dot_dimension_numbers<[1], [0], [0], [1], [0, 0, 1, 1], [], []>} : vector<16x16xf32>, vector<16x4xf32>, vector<16x4xf32> -> vector<16x4xf32>
    %38 = vector.extract_strided_slice %17 {offsets = [0, 4], sizes = [16, 4], strides = [1, 1]} : vector<16x32xf32> to vector<16x4xf32>
    %39 = vector.extract_strided_slice %18 {offsets = [0, 4], sizes = [16, 4], strides = [1, 1]} : vector<16x32xf32> to vector<16x4xf32>
    %40 = vector.extract_strided_slice %19 {offsets = [0, 4], sizes = [16, 4], strides = [1, 1]} : vector<16x32xf32> to vector<16x4xf32>
    %cst_23 = arith.constant dense<0.000000e+00> : vector<16x16xf32>
    %41 = tpu.matmul %38, %39, %cst_23 {dimension_numbers = #tpu.dot_dimension_numbers<[1], [1], [0], [0], [0, 0, 1, 0], [], []>} : vector<16x4xf32>, vector<16x4xf32>, vector<16x16xf32> -> vector<16x16xf32>
    %cst_24 = arith.constant 5.000000e-01 : f32
    %42 = vector.broadcast %cst_24 : f32 to vector<16x16xf32>
    %43 = arith.mulf %41, %42 : vector<16x16xf32>
    %44 = arith.addf %43, %5 : vector<16x16xf32>
    %cst_25 = arith.constant dense<0xFF800000> : vector<16xf32>
    %45 = vector.multi_reduction <maximumf>, %44, %cst_25 [1] : vector<16x16xf32> to vector<16xf32>
    %46 = vector.shape_cast %45 : vector<16xf32> to vector<16x1xf32>
    %47 = vector.broadcast %46 : vector<16x1xf32> to vector<16x16xf32>
    %48 = arith.subf %44, %47 : vector<16x16xf32>
    %49 = math.exp %48 : vector<16x16xf32>
    %cst_26 = arith.constant dense<0.000000e+00> : vector<16xf32>
    %50 = vector.multi_reduction <add>, %49, %cst_26 [1] : vector<16x16xf32> to vector<16xf32>
    %51 = vector.shape_cast %50 : vector<16xf32> to vector<16x1xf32>
    %52 = tpu.reciprocal %51 {approx = true} : vector<16x1xf32> -> vector<16x1xf32>
    %53 = vector.broadcast %52 : vector<16x1xf32> to vector<16x16xf32>
    %54 = arith.mulf %49, %53 : vector<16x16xf32>
    %cst_27 = arith.constant dense<0.000000e+00> : vector<16x4xf32>
    %55 = tpu.matmul %54, %40, %cst_27 {dimension_numbers = #tpu.dot_dimension_numbers<[1], [0], [0], [1], [0, 0, 1, 1], [], []>} : vector<16x16xf32>, vector<16x4xf32>, vector<16x4xf32> -> vector<16x4xf32>
    %56 = vector.extract_strided_slice %17 {offsets = [0, 8], sizes = [16, 4], strides = [1, 1]} : vector<16x32xf32> to vector<16x4xf32>
    %57 = vector.extract_strided_slice %18 {offsets = [0, 8], sizes = [16, 4], strides = [1, 1]} : vector<16x32xf32> to vector<16x4xf32>
    %58 = vector.extract_strided_slice %19 {offsets = [0, 8], sizes = [16, 4], strides = [1, 1]} : vector<16x32xf32> to vector<16x4xf32>
    %cst_28 = arith.constant dense<0.000000e+00> : vector<16x16xf32>
    %59 = tpu.matmul %56, %57, %cst_28 {dimension_numbers = #tpu.dot_dimension_numbers<[1], [1], [0], [0], [0, 0, 1, 0], [], []>} : vector<16x4xf32>, vector<16x4xf32>, vector<16x16xf32> -> vector<16x16xf32>
    %cst_29 = arith.constant 5.000000e-01 : f32
    %60 = vector.broadcast %cst_29 : f32 to vector<16x16xf32>
    %61 = arith.mulf %59, %60 : vector<16x16xf32>
    %62 = arith.addf %61, %5 : vector<16x16xf32>
    %cst_30 = arith.constant dense<0xFF800000> : vector<16xf32>
    %63 = vector.multi_reduction <maximumf>, %62, %cst_30 [1] : vector<16x16xf32> to vector<16xf32>
    %64 = vector.shape_cast %63 : vector<16xf32> to vector<16x1xf32>
    %65 = vector.broadcast %64 : vector<16x1xf32> to vector<16x16xf32>
    %66 = arith.subf %62, %65 : vector<16x16xf32>
    %67 = math.exp %66 : vector<16x16xf32>
    %cst_31 = arith.constant dense<0.000000e+00> : vector<16xf32>
    %68 = vector.multi_reduction <add>, %67, %cst_31 [1] : vector<16x16xf32> to vector<16xf32>
    %69 = vector.shape_cast %68 : vector<16xf32> to vector<16x1xf32>
    %70 = tpu.reciprocal %69 {approx = true} : vector<16x1xf32> -> vector<16x1xf32>
    %71 = vector.broadcast %70 : vector<16x1xf32> to vector<16x16xf32>
    %72 = arith.mulf %67, %71 : vector<16x16xf32>
    %cst_32 = arith.constant dense<0.000000e+00> : vector<16x4xf32>
    %73 = tpu.matmul %72, %58, %cst_32 {dimension_numbers = #tpu.dot_dimension_numbers<[1], [0], [0], [1], [0, 0, 1, 1], [], []>} : vector<16x16xf32>, vector<16x4xf32>, vector<16x4xf32> -> vector<16x4xf32>
    %74 = vector.extract_strided_slice %17 {offsets = [0, 12], sizes = [16, 4], strides = [1, 1]} : vector<16x32xf32> to vector<16x4xf32>
    %75 = vector.extract_strided_slice %18 {offsets = [0, 12], sizes = [16, 4], strides = [1, 1]} : vector<16x32xf32> to vector<16x4xf32>
    %76 = vector.extract_strided_slice %19 {offsets = [0, 12], sizes = [16, 4], strides = [1, 1]} : vector<16x32xf32> to vector<16x4xf32>
    %cst_33 = arith.constant dense<0.000000e+00> : vector<16x16xf32>
    %77 = tpu.matmul %74, %75, %cst_33 {dimension_numbers = #tpu.dot_dimension_numbers<[1], [1], [0], [0], [0, 0, 1, 0], [], []>} : vector<16x4xf32>, vector<16x4xf32>, vector<16x16xf32> -> vector<16x16xf32>
    %cst_34 = arith.constant 5.000000e-01 : f32
    %78 = vector.broadcast %cst_34 : f32 to vector<16x16xf32>
    %79 = arith.mulf %77, %78 : vector<16x16xf32>
    %80 = arith.addf %79, %5 : vector<16x16xf32>
    %cst_35 = arith.constant dense<0xFF800000> : vector<16xf32>
    %81 = vector.multi_reduction <maximumf>, %80, %cst_35 [1] : vector<16x16xf32> to vector<16xf32>
    %82 = vector.shape_cast %81 : vector<16xf32> to vector<16x1xf32>
    %83 = vector.broadcast %82 : vector<16x1xf32> to vector<16x16xf32>
    %84 = arith.subf %80, %83 : vector<16x16xf32>
    %85 = math.exp %84 : vector<16x16xf32>
    %cst_36 = arith.constant dense<0.000000e+00> : vector<16xf32>
    %86 = vector.multi_reduction <add>, %85, %cst_36 [1] : vector<16x16xf32> to vector<16xf32>
    %87 = vector.shape_cast %86 : vector<16xf32> to vector<16x1xf32>
    %88 = tpu.reciprocal %87 {approx = true} : vector<16x1xf32> -> vector<16x1xf32>
    %89 = vector.broadcast %88 : vector<16x1xf32> to vector<16x16xf32>
    %90 = arith.mulf %85, %89 : vector<16x16xf32>
    %cst_37 = arith.constant dense<0.000000e+00> : vector<16x4xf32>
    %91 = tpu.matmul %90, %76, %cst_37 {dimension_numbers = #tpu.dot_dimension_numbers<[1], [0], [0], [1], [0, 0, 1, 1], [], []>} : vector<16x16xf32>, vector<16x4xf32>, vector<16x4xf32> -> vector<16x4xf32>
    %92 = vector.extract_strided_slice %17 {offsets = [0, 16], sizes = [16, 4], strides = [1, 1]} : vector<16x32xf32> to vector<16x4xf32>
    %93 = vector.extract_strided_slice %18 {offsets = [0, 16], sizes = [16, 4], strides = [1, 1]} : vector<16x32xf32> to vector<16x4xf32>
    %94 = vector.extract_strided_slice %19 {offsets = [0, 16], sizes = [16, 4], strides = [1, 1]} : vector<16x32xf32> to vector<16x4xf32>
    %cst_38 = arith.constant dense<0.000000e+00> : vector<16x16xf32>
    %95 = tpu.matmul %92, %93, %cst_38 {dimension_numbers = #tpu.dot_dimension_numbers<[1], [1], [0], [0], [0, 0, 1, 0], [], []>} : vector<16x4xf32>, vector<16x4xf32>, vector<16x16xf32> -> vector<16x16xf32>
    %cst_39 = arith.constant 5.000000e-01 : f32
    %96 = vector.broadcast %cst_39 : f32 to vector<16x16xf32>
    %97 = arith.mulf %95, %96 : vector<16x16xf32>
    %98 = arith.addf %97, %5 : vector<16x16xf32>
    %cst_40 = arith.constant dense<0xFF800000> : vector<16xf32>
    %99 = vector.multi_reduction <maximumf>, %98, %cst_40 [1] : vector<16x16xf32> to vector<16xf32>
    %100 = vector.shape_cast %99 : vector<16xf32> to vector<16x1xf32>
    %101 = vector.broadcast %100 : vector<16x1xf32> to vector<16x16xf32>
    %102 = arith.subf %98, %101 : vector<16x16xf32>
    %103 = math.exp %102 : vector<16x16xf32>
    %cst_41 = arith.constant dense<0.000000e+00> : vector<16xf32>
    %104 = vector.multi_reduction <add>, %103, %cst_41 [1] : vector<16x16xf32> to vector<16xf32>
    %105 = vector.shape_cast %104 : vector<16xf32> to vector<16x1xf32>
    %106 = tpu.reciprocal %105 {approx = true} : vector<16x1xf32> -> vector<16x1xf32>
    %107 = vector.broadcast %106 : vector<16x1xf32> to vector<16x16xf32>
    %108 = arith.mulf %103, %107 : vector<16x16xf32>
    %cst_42 = arith.constant dense<0.000000e+00> : vector<16x4xf32>
    %109 = tpu.matmul %108, %94, %cst_42 {dimension_numbers = #tpu.dot_dimension_numbers<[1], [0], [0], [1], [0, 0, 1, 1], [], []>} : vector<16x16xf32>, vector<16x4xf32>, vector<16x4xf32> -> vector<16x4xf32>
    %110 = vector.extract_strided_slice %17 {offsets = [0, 20], sizes = [16, 4], strides = [1, 1]} : vector<16x32xf32> to vector<16x4xf32>
    %111 = vector.extract_strided_slice %18 {offsets = [0, 20], sizes = [16, 4], strides = [1, 1]} : vector<16x32xf32> to vector<16x4xf32>
    %112 = vector.extract_strided_slice %19 {offsets = [0, 20], sizes = [16, 4], strides = [1, 1]} : vector<16x32xf32> to vector<16x4xf32>
    %cst_43 = arith.constant dense<0.000000e+00> : vector<16x16xf32>
    %113 = tpu.matmul %110, %111, %cst_43 {dimension_numbers = #tpu.dot_dimension_numbers<[1], [1], [0], [0], [0, 0, 1, 0], [], []>} : vector<16x4xf32>, vector<16x4xf32>, vector<16x16xf32> -> vector<16x16xf32>
    %cst_44 = arith.constant 5.000000e-01 : f32
    %114 = vector.broadcast %cst_44 : f32 to vector<16x16xf32>
    %115 = arith.mulf %113, %114 : vector<16x16xf32>
    %116 = arith.addf %115, %5 : vector<16x16xf32>
    %cst_45 = arith.constant dense<0xFF800000> : vector<16xf32>
    %117 = vector.multi_reduction <maximumf>, %116, %cst_45 [1] : vector<16x16xf32> to vector<16xf32>
    %118 = vector.shape_cast %117 : vector<16xf32> to vector<16x1xf32>
    %119 = vector.broadcast %118 : vector<16x1xf32> to vector<16x16xf32>
    %120 = arith.subf %116, %119 : vector<16x16xf32>
    %121 = math.exp %120 : vector<16x16xf32>
    %cst_46 = arith.constant dense<0.000000e+00> : vector<16xf32>
    %122 = vector.multi_reduction <add>, %121, %cst_46 [1] : vector<16x16xf32> to vector<16xf32>
    %123 = vector.shape_cast %122 : vector<16xf32> to vector<16x1xf32>
    %124 = tpu.reciprocal %123 {approx = true} : vector<16x1xf32> -> vector<16x1xf32>
    %125 = vector.broadcast %124 : vector<16x1xf32> to vector<16x16xf32>
    %126 = arith.mulf %121, %125 : vector<16x16xf32>
    %cst_47 = arith.constant dense<0.000000e+00> : vector<16x4xf32>
    %127 = tpu.matmul %126, %112, %cst_47 {dimension_numbers = #tpu.dot_dimension_numbers<[1], [0], [0], [1], [0, 0, 1, 1], [], []>} : vector<16x16xf32>, vector<16x4xf32>, vector<16x4xf32> -> vector<16x4xf32>
    %128 = vector.extract_strided_slice %17 {offsets = [0, 24], sizes = [16, 4], strides = [1, 1]} : vector<16x32xf32> to vector<16x4xf32>
    %129 = vector.extract_strided_slice %18 {offsets = [0, 24], sizes = [16, 4], strides = [1, 1]} : vector<16x32xf32> to vector<16x4xf32>
    %130 = vector.extract_strided_slice %19 {offsets = [0, 24], sizes = [16, 4], strides = [1, 1]} : vector<16x32xf32> to vector<16x4xf32>
    %cst_48 = arith.constant dense<0.000000e+00> : vector<16x16xf32>
    %131 = tpu.matmul %128, %129, %cst_48 {dimension_numbers = #tpu.dot_dimension_numbers<[1], [1], [0], [0], [0, 0, 1, 0], [], []>} : vector<16x4xf32>, vector<16x4xf32>, vector<16x16xf32> -> vector<16x16xf32>
    %cst_49 = arith.constant 5.000000e-01 : f32
    %132 = vector.broadcast %cst_49 : f32 to vector<16x16xf32>
    %133 = arith.mulf %131, %132 : vector<16x16xf32>
    %134 = arith.addf %133, %5 : vector<16x16xf32>
    %cst_50 = arith.constant dense<0xFF800000> : vector<16xf32>
    %135 = vector.multi_reduction <maximumf>, %134, %cst_50 [1] : vector<16x16xf32> to vector<16xf32>
    %136 = vector.shape_cast %135 : vector<16xf32> to vector<16x1xf32>
    %137 = vector.broadcast %136 : vector<16x1xf32> to vector<16x16xf32>
    %138 = arith.subf %134, %137 : vector<16x16xf32>
    %139 = math.exp %138 : vector<16x16xf32>
    %cst_51 = arith.constant dense<0.000000e+00> : vector<16xf32>
    %140 = vector.multi_reduction <add>, %139, %cst_51 [1] : vector<16x16xf32> to vector<16xf32>
    %141 = vector.shape_cast %140 : vector<16xf32> to vector<16x1xf32>
    %142 = tpu.reciprocal %141 {approx = true} : vector<16x1xf32> -> vector<16x1xf32>
    %143 = vector.broadcast %142 : vector<16x1xf32> to vector<16x16xf32>
    %144 = arith.mulf %139, %143 : vector<16x16xf32>
    %cst_52 = arith.constant dense<0.000000e+00> : vector<16x4xf32>
    %145 = tpu.matmul %144, %130, %cst_52 {dimension_numbers = #tpu.dot_dimension_numbers<[1], [0], [0], [1], [0, 0, 1, 1], [], []>} : vector<16x16xf32>, vector<16x4xf32>, vector<16x4xf32> -> vector<16x4xf32>
    %146 = vector.extract_strided_slice %17 {offsets = [0, 28], sizes = [16, 4], strides = [1, 1]} : vector<16x32xf32> to vector<16x4xf32>
    %147 = vector.extract_strided_slice %18 {offsets = [0, 28], sizes = [16, 4], strides = [1, 1]} : vector<16x32xf32> to vector<16x4xf32>
    %148 = vector.extract_strided_slice %19 {offsets = [0, 28], sizes = [16, 4], strides = [1, 1]} : vector<16x32xf32> to vector<16x4xf32>
    %cst_53 = arith.constant dense<0.000000e+00> : vector<16x16xf32>
    %149 = tpu.matmul %146, %147, %cst_53 {dimension_numbers = #tpu.dot_dimension_numbers<[1], [1], [0], [0], [0, 0, 1, 0], [], []>} : vector<16x4xf32>, vector<16x4xf32>, vector<16x16xf32> -> vector<16x16xf32>
    %cst_54 = arith.constant 5.000000e-01 : f32
    %150 = vector.broadcast %cst_54 : f32 to vector<16x16xf32>
    %151 = arith.mulf %149, %150 : vector<16x16xf32>
    %152 = arith.addf %151, %5 : vector<16x16xf32>
    %cst_55 = arith.constant dense<0xFF800000> : vector<16xf32>
    %153 = vector.multi_reduction <maximumf>, %152, %cst_55 [1] : vector<16x16xf32> to vector<16xf32>
    %154 = vector.shape_cast %153 : vector<16xf32> to vector<16x1xf32>
    %155 = vector.broadcast %154 : vector<16x1xf32> to vector<16x16xf32>
    %156 = arith.subf %152, %155 : vector<16x16xf32>
    %157 = math.exp %156 : vector<16x16xf32>
    %cst_56 = arith.constant dense<0.000000e+00> : vector<16xf32>
    %158 = vector.multi_reduction <add>, %157, %cst_56 [1] : vector<16x16xf32> to vector<16xf32>
    %159 = vector.shape_cast %158 : vector<16xf32> to vector<16x1xf32>
    %160 = tpu.reciprocal %159 {approx = true} : vector<16x1xf32> -> vector<16x1xf32>
    %161 = vector.broadcast %160 : vector<16x1xf32> to vector<16x16xf32>
    %162 = arith.mulf %157, %161 : vector<16x16xf32>
    %cst_57 = arith.constant dense<0.000000e+00> : vector<16x4xf32>
    %163 = tpu.matmul %162, %148, %cst_57 {dimension_numbers = #tpu.dot_dimension_numbers<[1], [0], [0], [1], [0, 0, 1, 1], [], []>} : vector<16x16xf32>, vector<16x4xf32>, vector<16x4xf32> -> vector<16x4xf32>
    %164 = tpu.concatenate %37, %55, %73, %91, %109, %127, %145, %163 in 1 : vector<16x4xf32>, vector<16x4xf32>, vector<16x4xf32>, vector<16x4xf32>, vector<16x4xf32>, vector<16x4xf32>, vector<16x4xf32>, vector<16x4xf32> -> vector<16x32xf32>
    %cst_58 = arith.constant dense<0.000000e+00> : vector<16x32xf32>
    %165 = tpu.matmul %164, %11, %cst_58 {dimension_numbers = #tpu.dot_dimension_numbers<[1], [0], [0], [1], [0, 0, 1, 1], [], []>} : vector<16x32xf32>, vector<32x32xf32>, vector<16x32xf32> -> vector<16x32xf32>
    %166 = vector.broadcast %13 : vector<1x32xf32> to vector<16x32xf32>
    %167 = arith.addf %165, %166 : vector<16x32xf32>
    %168 = arith.addf %3, %167 : vector<16x32xf32>
    %c0_59 = arith.constant 0 : index
    %c0_60 = arith.constant 0 : index
    %c0_61 = arith.constant 0 : index
    %169 = vector.load %arg9[%c0_59, %c0_60, %c0_61] : memref<1x1x32xf32, #tpu.memory_space<vmem>>, vector<1x1x32xf32>
    %170 = vector.shape_cast %169 : vector<1x1x32xf32> to vector<1x32xf32>
    %c0_62 = arith.constant 0 : index
    %c0_63 = arith.constant 0 : index
    %c0_64 = arith.constant 0 : index
    %171 = vector.load %arg10[%c0_62, %c0_63, %c0_64] : memref<1x1x32xf32, #tpu.memory_space<vmem>>, vector<1x1x32xf32>
    %172 = vector.shape_cast %171 : vector<1x1x32xf32> to vector<1x32xf32>
    %cst_65 = arith.constant dense<0.000000e+00> : vector<16xf32>
    %173 = vector.multi_reduction <add>, %168, %cst_65 [1] : vector<16x32xf32> to vector<16xf32>
    %174 = vector.shape_cast %173 : vector<16xf32> to vector<16x1xf32>
    %cst_66 = arith.constant 3.200000e+01 : f32
    %175 = vector.broadcast %cst_66 : f32 to vector<16x1xf32>
    %176 = arith.divf %174, %175 : vector<16x1xf32>
    %177 = vector.broadcast %176 : vector<16x1xf32> to vector<16x32xf32>
    %178 = arith.subf %168, %177 : vector<16x32xf32>
    %179 = arith.mulf %178, %178 : vector<16x32xf32>
    %cst_67 = arith.constant dense<0.000000e+00> : vector<16xf32>
    %180 = vector.multi_reduction <add>, %179, %cst_67 [1] : vector<16x32xf32> to vector<16xf32>
    %181 = vector.shape_cast %180 : vector<16xf32> to vector<16x1xf32>
    %cst_68 = arith.constant 3.200000e+01 : f32
    %182 = vector.broadcast %cst_68 : f32 to vector<16x1xf32>
    %183 = arith.divf %181, %182 : vector<16x1xf32>
    %184 = vector.broadcast %176 : vector<16x1xf32> to vector<16x32xf32>
    %185 = arith.subf %168, %184 : vector<16x32xf32>
    %cst_69 = arith.constant 9.99999974E-6 : f32
    %186 = vector.broadcast %cst_69 : f32 to vector<16x1xf32>
    %187 = arith.addf %183, %186 : vector<16x1xf32>
    %188 = math.rsqrt %187 : vector<16x1xf32>
    %189 = vector.broadcast %188 : vector<16x1xf32> to vector<16x32xf32>
    %190 = arith.mulf %185, %189 : vector<16x32xf32>
    %191 = vector.broadcast %170 : vector<1x32xf32> to vector<16x32xf32>
    %192 = arith.mulf %190, %191 : vector<16x32xf32>
    %193 = vector.broadcast %172 : vector<1x32xf32> to vector<16x32xf32>
    %194 = arith.addf %192, %193 : vector<16x32xf32>
    %c0_70 = arith.constant 0 : index
    %c0_71 = arith.constant 0 : index
    %c0_72 = arith.constant 0 : index
    %195 = vector.load %arg11[%c0_70, %c0_71, %c0_72] : memref<1x32x32xf32, #tpu.memory_space<vmem>>, vector<1x32x32xf32>
    %196 = vector.shape_cast %195 : vector<1x32x32xf32> to vector<32x32xf32>
    %cst_73 = arith.constant dense<0.000000e+00> : vector<16x32xf32>
    %197 = tpu.matmul %194, %196, %cst_73 {dimension_numbers = #tpu.dot_dimension_numbers<[1], [0], [0], [1], [0, 0, 1, 1], [], []>} : vector<16x32xf32>, vector<32x32xf32>, vector<16x32xf32> -> vector<16x32xf32>
    %c0_74 = arith.constant 0 : index
    %c0_75 = arith.constant 0 : index
    %c0_76 = arith.constant 0 : index
    %198 = vector.load %arg12[%c0_74, %c0_75, %c0_76] : memref<1x1x32xf32, #tpu.memory_space<vmem>>, vector<1x1x32xf32>
    %199 = vector.shape_cast %198 : vector<1x1x32xf32> to vector<1x32xf32>
    %200 = vector.broadcast %199 : vector<1x32xf32> to vector<16x32xf32>
    %201 = arith.addf %197, %200 : vector<16x32xf32>
    %c0_77 = arith.constant 0 : index
    %c0_78 = arith.constant 0 : index
    %c0_79 = arith.constant 0 : index
    %202 = vector.load %arg13[%c0_77, %c0_78, %c0_79] : memref<1x32x64xf32, #tpu.memory_space<vmem>>, vector<1x32x64xf32>
    %203 = vector.shape_cast %202 : vector<1x32x64xf32> to vector<32x64xf32>
    %cst_80 = arith.constant dense<0.000000e+00> : vector<16x64xf32>
    %204 = tpu.matmul %4, %203, %cst_80 {dimension_numbers = #tpu.dot_dimension_numbers<[1], [0], [0], [1], [0, 0, 1, 1], [], []>} : vector<16x32xf32>, vector<32x64xf32>, vector<16x64xf32> -> vector<16x64xf32>
    %c0_81 = arith.constant 0 : index
    %c0_82 = arith.constant 0 : index
    %c0_83 = arith.constant 0 : index
    %205 = vector.load %arg14[%c0_81, %c0_82, %c0_83] : memref<1x1x64xf32, #tpu.memory_space<vmem>>, vector<1x1x64xf32>
    %206 = vector.shape_cast %205 : vector<1x1x64xf32> to vector<1x64xf32>
    %207 = vector.broadcast %206 : vector<1x64xf32> to vector<16x64xf32>
    %208 = arith.addf %204, %207 : vector<16x64xf32>
    %209 = vector.extract_strided_slice %208 {offsets = [0, 0], sizes = [16, 32], strides = [1, 1]} : vector<16x64xf32> to vector<16x32xf32>
    %210 = vector.extract_strided_slice %208 {offsets = [0, 32], sizes = [16, 32], strides = [1, 1]} : vector<16x64xf32> to vector<16x32xf32>
    %c0_84 = arith.constant 0 : index
    %c0_85 = arith.constant 0 : index
    %211 = vector.load %arg4[%c0_84, %c0_85] : memref<16x16xf32, #tpu.memory_space<vmem>>, vector<16x16xf32>
    %212 = vector.extract_strided_slice %201 {offsets = [0, 0], sizes = [16, 4], strides = [1, 1]} : vector<16x32xf32> to vector<16x4xf32>
    %213 = vector.extract_strided_slice %209 {offsets = [0, 0], sizes = [16, 4], strides = [1, 1]} : vector<16x32xf32> to vector<16x4xf32>
    %214 = vector.extract_strided_slice %210 {offsets = [0, 0], sizes = [16, 4], strides = [1, 1]} : vector<16x32xf32> to vector<16x4xf32>
    %cst_86 = arith.constant dense<0.000000e+00> : vector<16x16xf32>
    %215 = tpu.matmul %212, %213, %cst_86 {dimension_numbers = #tpu.dot_dimension_numbers<[1], [1], [0], [0], [0, 0, 1, 0], [], []>} : vector<16x4xf32>, vector<16x4xf32>, vector<16x16xf32> -> vector<16x16xf32>
    %cst_87 = arith.constant 5.000000e-01 : f32
    %216 = vector.broadcast %cst_87 : f32 to vector<16x16xf32>
    %217 = arith.mulf %215, %216 : vector<16x16xf32>
    %218 = arith.addf %217, %211 : vector<16x16xf32>
    %cst_88 = arith.constant dense<0xFF800000> : vector<16xf32>
    %219 = vector.multi_reduction <maximumf>, %218, %cst_88 [1] : vector<16x16xf32> to vector<16xf32>
    %220 = vector.shape_cast %219 : vector<16xf32> to vector<16x1xf32>
    %221 = vector.broadcast %220 : vector<16x1xf32> to vector<16x16xf32>
    %222 = arith.subf %218, %221 : vector<16x16xf32>
    %223 = math.exp %222 : vector<16x16xf32>
    %cst_89 = arith.constant dense<0.000000e+00> : vector<16xf32>
    %224 = vector.multi_reduction <add>, %223, %cst_89 [1] : vector<16x16xf32> to vector<16xf32>
    %225 = vector.shape_cast %224 : vector<16xf32> to vector<16x1xf32>
    %226 = tpu.reciprocal %225 {approx = true} : vector<16x1xf32> -> vector<16x1xf32>
    %227 = vector.broadcast %226 : vector<16x1xf32> to vector<16x16xf32>
    %228 = arith.mulf %223, %227 : vector<16x16xf32>
    %cst_90 = arith.constant dense<0.000000e+00> : vector<16x4xf32>
    %229 = tpu.matmul %228, %214, %cst_90 {dimension_numbers = #tpu.dot_dimension_numbers<[1], [0], [0], [1], [0, 0, 1, 1], [], []>} : vector<16x16xf32>, vector<16x4xf32>, vector<16x4xf32> -> vector<16x4xf32>
    %230 = vector.extract_strided_slice %201 {offsets = [0, 4], sizes = [16, 4], strides = [1, 1]} : vector<16x32xf32> to vector<16x4xf32>
    %231 = vector.extract_strided_slice %209 {offsets = [0, 4], sizes = [16, 4], strides = [1, 1]} : vector<16x32xf32> to vector<16x4xf32>
    %232 = vector.extract_strided_slice %210 {offsets = [0, 4], sizes = [16, 4], strides = [1, 1]} : vector<16x32xf32> to vector<16x4xf32>
    %cst_91 = arith.constant dense<0.000000e+00> : vector<16x16xf32>
    %233 = tpu.matmul %230, %231, %cst_91 {dimension_numbers = #tpu.dot_dimension_numbers<[1], [1], [0], [0], [0, 0, 1, 0], [], []>} : vector<16x4xf32>, vector<16x4xf32>, vector<16x16xf32> -> vector<16x16xf32>
    %cst_92 = arith.constant 5.000000e-01 : f32
    %234 = vector.broadcast %cst_92 : f32 to vector<16x16xf32>
    %235 = arith.mulf %233, %234 : vector<16x16xf32>
    %236 = arith.addf %235, %211 : vector<16x16xf32>
    %cst_93 = arith.constant dense<0xFF800000> : vector<16xf32>
    %237 = vector.multi_reduction <maximumf>, %236, %cst_93 [1] : vector<16x16xf32> to vector<16xf32>
    %238 = vector.shape_cast %237 : vector<16xf32> to vector<16x1xf32>
    %239 = vector.broadcast %238 : vector<16x1xf32> to vector<16x16xf32>
    %240 = arith.subf %236, %239 : vector<16x16xf32>
    %241 = math.exp %240 : vector<16x16xf32>
    %cst_94 = arith.constant dense<0.000000e+00> : vector<16xf32>
    %242 = vector.multi_reduction <add>, %241, %cst_94 [1] : vector<16x16xf32> to vector<16xf32>
    %243 = vector.shape_cast %242 : vector<16xf32> to vector<16x1xf32>
    %244 = tpu.reciprocal %243 {approx = true} : vector<16x1xf32> -> vector<16x1xf32>
    %245 = vector.broadcast %244 : vector<16x1xf32> to vector<16x16xf32>
    %246 = arith.mulf %241, %245 : vector<16x16xf32>
    %cst_95 = arith.constant dense<0.000000e+00> : vector<16x4xf32>
    %247 = tpu.matmul %246, %232, %cst_95 {dimension_numbers = #tpu.dot_dimension_numbers<[1], [0], [0], [1], [0, 0, 1, 1], [], []>} : vector<16x16xf32>, vector<16x4xf32>, vector<16x4xf32> -> vector<16x4xf32>
    %248 = vector.extract_strided_slice %201 {offsets = [0, 8], sizes = [16, 4], strides = [1, 1]} : vector<16x32xf32> to vector<16x4xf32>
    %249 = vector.extract_strided_slice %209 {offsets = [0, 8], sizes = [16, 4], strides = [1, 1]} : vector<16x32xf32> to vector<16x4xf32>
    %250 = vector.extract_strided_slice %210 {offsets = [0, 8], sizes = [16, 4], strides = [1, 1]} : vector<16x32xf32> to vector<16x4xf32>
    %cst_96 = arith.constant dense<0.000000e+00> : vector<16x16xf32>
    %251 = tpu.matmul %248, %249, %cst_96 {dimension_numbers = #tpu.dot_dimension_numbers<[1], [1], [0], [0], [0, 0, 1, 0], [], []>} : vector<16x4xf32>, vector<16x4xf32>, vector<16x16xf32> -> vector<16x16xf32>
    %cst_97 = arith.constant 5.000000e-01 : f32
    %252 = vector.broadcast %cst_97 : f32 to vector<16x16xf32>
    %253 = arith.mulf %251, %252 : vector<16x16xf32>
    %254 = arith.addf %253, %211 : vector<16x16xf32>
    %cst_98 = arith.constant dense<0xFF800000> : vector<16xf32>
    %255 = vector.multi_reduction <maximumf>, %254, %cst_98 [1] : vector<16x16xf32> to vector<16xf32>
    %256 = vector.shape_cast %255 : vector<16xf32> to vector<16x1xf32>
    %257 = vector.broadcast %256 : vector<16x1xf32> to vector<16x16xf32>
    %258 = arith.subf %254, %257 : vector<16x16xf32>
    %259 = math.exp %258 : vector<16x16xf32>
    %cst_99 = arith.constant dense<0.000000e+00> : vector<16xf32>
    %260 = vector.multi_reduction <add>, %259, %cst_99 [1] : vector<16x16xf32> to vector<16xf32>
    %261 = vector.shape_cast %260 : vector<16xf32> to vector<16x1xf32>
    %262 = tpu.reciprocal %261 {approx = true} : vector<16x1xf32> -> vector<16x1xf32>
    %263 = vector.broadcast %262 : vector<16x1xf32> to vector<16x16xf32>
    %264 = arith.mulf %259, %263 : vector<16x16xf32>
    %cst_100 = arith.constant dense<0.000000e+00> : vector<16x4xf32>
    %265 = tpu.matmul %264, %250, %cst_100 {dimension_numbers = #tpu.dot_dimension_numbers<[1], [0], [0], [1], [0, 0, 1, 1], [], []>} : vector<16x16xf32>, vector<16x4xf32>, vector<16x4xf32> -> vector<16x4xf32>
    %266 = vector.extract_strided_slice %201 {offsets = [0, 12], sizes = [16, 4], strides = [1, 1]} : vector<16x32xf32> to vector<16x4xf32>
    %267 = vector.extract_strided_slice %209 {offsets = [0, 12], sizes = [16, 4], strides = [1, 1]} : vector<16x32xf32> to vector<16x4xf32>
    %268 = vector.extract_strided_slice %210 {offsets = [0, 12], sizes = [16, 4], strides = [1, 1]} : vector<16x32xf32> to vector<16x4xf32>
    %cst_101 = arith.constant dense<0.000000e+00> : vector<16x16xf32>
    %269 = tpu.matmul %266, %267, %cst_101 {dimension_numbers = #tpu.dot_dimension_numbers<[1], [1], [0], [0], [0, 0, 1, 0], [], []>} : vector<16x4xf32>, vector<16x4xf32>, vector<16x16xf32> -> vector<16x16xf32>
    %cst_102 = arith.constant 5.000000e-01 : f32
    %270 = vector.broadcast %cst_102 : f32 to vector<16x16xf32>
    %271 = arith.mulf %269, %270 : vector<16x16xf32>
    %272 = arith.addf %271, %211 : vector<16x16xf32>
    %cst_103 = arith.constant dense<0xFF800000> : vector<16xf32>
    %273 = vector.multi_reduction <maximumf>, %272, %cst_103 [1] : vector<16x16xf32> to vector<16xf32>
    %274 = vector.shape_cast %273 : vector<16xf32> to vector<16x1xf32>
    %275 = vector.broadcast %274 : vector<16x1xf32> to vector<16x16xf32>
    %276 = arith.subf %272, %275 : vector<16x16xf32>
    %277 = math.exp %276 : vector<16x16xf32>
    %cst_104 = arith.constant dense<0.000000e+00> : vector<16xf32>
    %278 = vector.multi_reduction <add>, %277, %cst_104 [1] : vector<16x16xf32> to vector<16xf32>
    %279 = vector.shape_cast %278 : vector<16xf32> to vector<16x1xf32>
    %280 = tpu.reciprocal %279 {approx = true} : vector<16x1xf32> -> vector<16x1xf32>
    %281 = vector.broadcast %280 : vector<16x1xf32> to vector<16x16xf32>
    %282 = arith.mulf %277, %281 : vector<16x16xf32>
    %cst_105 = arith.constant dense<0.000000e+00> : vector<16x4xf32>
    %283 = tpu.matmul %282, %268, %cst_105 {dimension_numbers = #tpu.dot_dimension_numbers<[1], [0], [0], [1], [0, 0, 1, 1], [], []>} : vector<16x16xf32>, vector<16x4xf32>, vector<16x4xf32> -> vector<16x4xf32>
    %284 = vector.extract_strided_slice %201 {offsets = [0, 16], sizes = [16, 4], strides = [1, 1]} : vector<16x32xf32> to vector<16x4xf32>
    %285 = vector.extract_strided_slice %209 {offsets = [0, 16], sizes = [16, 4], strides = [1, 1]} : vector<16x32xf32> to vector<16x4xf32>
    %286 = vector.extract_strided_slice %210 {offsets = [0, 16], sizes = [16, 4], strides = [1, 1]} : vector<16x32xf32> to vector<16x4xf32>
    %cst_106 = arith.constant dense<0.000000e+00> : vector<16x16xf32>
    %287 = tpu.matmul %284, %285, %cst_106 {dimension_numbers = #tpu.dot_dimension_numbers<[1], [1], [0], [0], [0, 0, 1, 0], [], []>} : vector<16x4xf32>, vector<16x4xf32>, vector<16x16xf32> -> vector<16x16xf32>
    %cst_107 = arith.constant 5.000000e-01 : f32
    %288 = vector.broadcast %cst_107 : f32 to vector<16x16xf32>
    %289 = arith.mulf %287, %288 : vector<16x16xf32>
    %290 = arith.addf %289, %211 : vector<16x16xf32>
    %cst_108 = arith.constant dense<0xFF800000> : vector<16xf32>
    %291 = vector.multi_reduction <maximumf>, %290, %cst_108 [1] : vector<16x16xf32> to vector<16xf32>
    %292 = vector.shape_cast %291 : vector<16xf32> to vector<16x1xf32>
    %293 = vector.broadcast %292 : vector<16x1xf32> to vector<16x16xf32>
    %294 = arith.subf %290, %293 : vector<16x16xf32>
    %295 = math.exp %294 : vector<16x16xf32>
    %cst_109 = arith.constant dense<0.000000e+00> : vector<16xf32>
    %296 = vector.multi_reduction <add>, %295, %cst_109 [1] : vector<16x16xf32> to vector<16xf32>
    %297 = vector.shape_cast %296 : vector<16xf32> to vector<16x1xf32>
    %298 = tpu.reciprocal %297 {approx = true} : vector<16x1xf32> -> vector<16x1xf32>
    %299 = vector.broadcast %298 : vector<16x1xf32> to vector<16x16xf32>
    %300 = arith.mulf %295, %299 : vector<16x16xf32>
    %cst_110 = arith.constant dense<0.000000e+00> : vector<16x4xf32>
    %301 = tpu.matmul %300, %286, %cst_110 {dimension_numbers = #tpu.dot_dimension_numbers<[1], [0], [0], [1], [0, 0, 1, 1], [], []>} : vector<16x16xf32>, vector<16x4xf32>, vector<16x4xf32> -> vector<16x4xf32>
    %302 = vector.extract_strided_slice %201 {offsets = [0, 20], sizes = [16, 4], strides = [1, 1]} : vector<16x32xf32> to vector<16x4xf32>
    %303 = vector.extract_strided_slice %209 {offsets = [0, 20], sizes = [16, 4], strides = [1, 1]} : vector<16x32xf32> to vector<16x4xf32>
    %304 = vector.extract_strided_slice %210 {offsets = [0, 20], sizes = [16, 4], strides = [1, 1]} : vector<16x32xf32> to vector<16x4xf32>
    %cst_111 = arith.constant dense<0.000000e+00> : vector<16x16xf32>
    %305 = tpu.matmul %302, %303, %cst_111 {dimension_numbers = #tpu.dot_dimension_numbers<[1], [1], [0], [0], [0, 0, 1, 0], [], []>} : vector<16x4xf32>, vector<16x4xf32>, vector<16x16xf32> -> vector<16x16xf32>
    %cst_112 = arith.constant 5.000000e-01 : f32
    %306 = vector.broadcast %cst_112 : f32 to vector<16x16xf32>
    %307 = arith.mulf %305, %306 : vector<16x16xf32>
    %308 = arith.addf %307, %211 : vector<16x16xf32>
    %cst_113 = arith.constant dense<0xFF800000> : vector<16xf32>
    %309 = vector.multi_reduction <maximumf>, %308, %cst_113 [1] : vector<16x16xf32> to vector<16xf32>
    %310 = vector.shape_cast %309 : vector<16xf32> to vector<16x1xf32>
    %311 = vector.broadcast %310 : vector<16x1xf32> to vector<16x16xf32>
    %312 = arith.subf %308, %311 : vector<16x16xf32>
    %313 = math.exp %312 : vector<16x16xf32>
    %cst_114 = arith.constant dense<0.000000e+00> : vector<16xf32>
    %314 = vector.multi_reduction <add>, %313, %cst_114 [1] : vector<16x16xf32> to vector<16xf32>
    %315 = vector.shape_cast %314 : vector<16xf32> to vector<16x1xf32>
    %316 = tpu.reciprocal %315 {approx = true} : vector<16x1xf32> -> vector<16x1xf32>
    %317 = vector.broadcast %316 : vector<16x1xf32> to vector<16x16xf32>
    %318 = arith.mulf %313, %317 : vector<16x16xf32>
    %cst_115 = arith.constant dense<0.000000e+00> : vector<16x4xf32>
    %319 = tpu.matmul %318, %304, %cst_115 {dimension_numbers = #tpu.dot_dimension_numbers<[1], [0], [0], [1], [0, 0, 1, 1], [], []>} : vector<16x16xf32>, vector<16x4xf32>, vector<16x4xf32> -> vector<16x4xf32>
    %320 = vector.extract_strided_slice %201 {offsets = [0, 24], sizes = [16, 4], strides = [1, 1]} : vector<16x32xf32> to vector<16x4xf32>
    %321 = vector.extract_strided_slice %209 {offsets = [0, 24], sizes = [16, 4], strides = [1, 1]} : vector<16x32xf32> to vector<16x4xf32>
    %322 = vector.extract_strided_slice %210 {offsets = [0, 24], sizes = [16, 4], strides = [1, 1]} : vector<16x32xf32> to vector<16x4xf32>
    %cst_116 = arith.constant dense<0.000000e+00> : vector<16x16xf32>
    %323 = tpu.matmul %320, %321, %cst_116 {dimension_numbers = #tpu.dot_dimension_numbers<[1], [1], [0], [0], [0, 0, 1, 0], [], []>} : vector<16x4xf32>, vector<16x4xf32>, vector<16x16xf32> -> vector<16x16xf32>
    %cst_117 = arith.constant 5.000000e-01 : f32
    %324 = vector.broadcast %cst_117 : f32 to vector<16x16xf32>
    %325 = arith.mulf %323, %324 : vector<16x16xf32>
    %326 = arith.addf %325, %211 : vector<16x16xf32>
    %cst_118 = arith.constant dense<0xFF800000> : vector<16xf32>
    %327 = vector.multi_reduction <maximumf>, %326, %cst_118 [1] : vector<16x16xf32> to vector<16xf32>
    %328 = vector.shape_cast %327 : vector<16xf32> to vector<16x1xf32>
    %329 = vector.broadcast %328 : vector<16x1xf32> to vector<16x16xf32>
    %330 = arith.subf %326, %329 : vector<16x16xf32>
    %331 = math.exp %330 : vector<16x16xf32>
    %cst_119 = arith.constant dense<0.000000e+00> : vector<16xf32>
    %332 = vector.multi_reduction <add>, %331, %cst_119 [1] : vector<16x16xf32> to vector<16xf32>
    %333 = vector.shape_cast %332 : vector<16xf32> to vector<16x1xf32>
    %334 = tpu.reciprocal %333 {approx = true} : vector<16x1xf32> -> vector<16x1xf32>
    %335 = vector.broadcast %334 : vector<16x1xf32> to vector<16x16xf32>
    %336 = arith.mulf %331, %335 : vector<16x16xf32>
    %cst_120 = arith.constant dense<0.000000e+00> : vector<16x4xf32>
    %337 = tpu.matmul %336, %322, %cst_120 {dimension_numbers = #tpu.dot_dimension_numbers<[1], [0], [0], [1], [0, 0, 1, 1], [], []>} : vector<16x16xf32>, vector<16x4xf32>, vector<16x4xf32> -> vector<16x4xf32>
    %338 = vector.extract_strided_slice %201 {offsets = [0, 28], sizes = [16, 4], strides = [1, 1]} : vector<16x32xf32> to vector<16x4xf32>
    %339 = vector.extract_strided_slice %209 {offsets = [0, 28], sizes = [16, 4], strides = [1, 1]} : vector<16x32xf32> to vector<16x4xf32>
    %340 = vector.extract_strided_slice %210 {offsets = [0, 28], sizes = [16, 4], strides = [1, 1]} : vector<16x32xf32> to vector<16x4xf32>
    %cst_121 = arith.constant dense<0.000000e+00> : vector<16x16xf32>
    %341 = tpu.matmul %338, %339, %cst_121 {dimension_numbers = #tpu.dot_dimension_numbers<[1], [1], [0], [0], [0, 0, 1, 0], [], []>} : vector<16x4xf32>, vector<16x4xf32>, vector<16x16xf32> -> vector<16x16xf32>
    %cst_122 = arith.constant 5.000000e-01 : f32
    %342 = vector.broadcast %cst_122 : f32 to vector<16x16xf32>
    %343 = arith.mulf %341, %342 : vector<16x16xf32>
    %344 = arith.addf %343, %211 : vector<16x16xf32>
    %cst_123 = arith.constant dense<0xFF800000> : vector<16xf32>
    %345 = vector.multi_reduction <maximumf>, %344, %cst_123 [1] : vector<16x16xf32> to vector<16xf32>
    %346 = vector.shape_cast %345 : vector<16xf32> to vector<16x1xf32>
    %347 = vector.broadcast %346 : vector<16x1xf32> to vector<16x16xf32>
    %348 = arith.subf %344, %347 : vector<16x16xf32>
    %349 = math.exp %348 : vector<16x16xf32>
    %cst_124 = arith.constant dense<0.000000e+00> : vector<16xf32>
    %350 = vector.multi_reduction <add>, %349, %cst_124 [1] : vector<16x16xf32> to vector<16xf32>
    %351 = vector.shape_cast %350 : vector<16xf32> to vector<16x1xf32>
    %352 = tpu.reciprocal %351 {approx = true} : vector<16x1xf32> -> vector<16x1xf32>
    %353 = vector.broadcast %352 : vector<16x1xf32> to vector<16x16xf32>
    %354 = arith.mulf %349, %353 : vector<16x16xf32>
    %cst_125 = arith.constant dense<0.000000e+00> : vector<16x4xf32>
    %355 = tpu.matmul %354, %340, %cst_125 {dimension_numbers = #tpu.dot_dimension_numbers<[1], [0], [0], [1], [0, 0, 1, 1], [], []>} : vector<16x16xf32>, vector<16x4xf32>, vector<16x4xf32> -> vector<16x4xf32>
    %356 = tpu.concatenate %229, %247, %265, %283, %301, %319, %337, %355 in 1 : vector<16x4xf32>, vector<16x4xf32>, vector<16x4xf32>, vector<16x4xf32>, vector<16x4xf32>, vector<16x4xf32>, vector<16x4xf32>, vector<16x4xf32> -> vector<16x32xf32>
    %c0_126 = arith.constant 0 : index
    %c0_127 = arith.constant 0 : index
    %c0_128 = arith.constant 0 : index
    %357 = vector.load %arg15[%c0_126, %c0_127, %c0_128] : memref<1x32x32xf32, #tpu.memory_space<vmem>>, vector<1x32x32xf32>
    %358 = vector.shape_cast %357 : vector<1x32x32xf32> to vector<32x32xf32>
    %cst_129 = arith.constant dense<0.000000e+00> : vector<16x32xf32>
    %359 = tpu.matmul %356, %358, %cst_129 {dimension_numbers = #tpu.dot_dimension_numbers<[1], [0], [0], [1], [0, 0, 1, 1], [], []>} : vector<16x32xf32>, vector<32x32xf32>, vector<16x32xf32> -> vector<16x32xf32>
    %c0_130 = arith.constant 0 : index
    %c0_131 = arith.constant 0 : index
    %c0_132 = arith.constant 0 : index
    %360 = vector.load %arg16[%c0_130, %c0_131, %c0_132] : memref<1x1x32xf32, #tpu.memory_space<vmem>>, vector<1x1x32xf32>
    %361 = vector.shape_cast %360 : vector<1x1x32xf32> to vector<1x32xf32>
    %362 = vector.broadcast %361 : vector<1x32xf32> to vector<16x32xf32>
    %363 = arith.addf %359, %362 : vector<16x32xf32>
    %364 = arith.addf %194, %363 : vector<16x32xf32>
    %c0_133 = arith.constant 0 : index
    %c0_134 = arith.constant 0 : index
    %c0_135 = arith.constant 0 : index
    %365 = vector.load %arg17[%c0_133, %c0_134, %c0_135] : memref<1x1x32xf32, #tpu.memory_space<vmem>>, vector<1x1x32xf32>
    %366 = vector.shape_cast %365 : vector<1x1x32xf32> to vector<1x32xf32>
    %c0_136 = arith.constant 0 : index
    %c0_137 = arith.constant 0 : index
    %c0_138 = arith.constant 0 : index
    %367 = vector.load %arg18[%c0_136, %c0_137, %c0_138] : memref<1x1x32xf32, #tpu.memory_space<vmem>>, vector<1x1x32xf32>
    %368 = vector.shape_cast %367 : vector<1x1x32xf32> to vector<1x32xf32>
    %cst_139 = arith.constant dense<0.000000e+00> : vector<16xf32>
    %369 = vector.multi_reduction <add>, %364, %cst_139 [1] : vector<16x32xf32> to vector<16xf32>
    %370 = vector.shape_cast %369 : vector<16xf32> to vector<16x1xf32>
    %cst_140 = arith.constant 3.200000e+01 : f32
    %371 = vector.broadcast %cst_140 : f32 to vector<16x1xf32>
    %372 = arith.divf %370, %371 : vector<16x1xf32>
    %373 = vector.broadcast %372 : vector<16x1xf32> to vector<16x32xf32>
    %374 = arith.subf %364, %373 : vector<16x32xf32>
    %375 = arith.mulf %374, %374 : vector<16x32xf32>
    %cst_141 = arith.constant dense<0.000000e+00> : vector<16xf32>
    %376 = vector.multi_reduction <add>, %375, %cst_141 [1] : vector<16x32xf32> to vector<16xf32>
    %377 = vector.shape_cast %376 : vector<16xf32> to vector<16x1xf32>
    %cst_142 = arith.constant 3.200000e+01 : f32
    %378 = vector.broadcast %cst_142 : f32 to vector<16x1xf32>
    %379 = arith.divf %377, %378 : vector<16x1xf32>
    %380 = vector.broadcast %372 : vector<16x1xf32> to vector<16x32xf32>
    %381 = arith.subf %364, %380 : vector<16x32xf32>
    %cst_143 = arith.constant 9.99999974E-6 : f32
    %382 = vector.broadcast %cst_143 : f32 to vector<16x1xf32>
    %383 = arith.addf %379, %382 : vector<16x1xf32>
    %384 = math.rsqrt %383 : vector<16x1xf32>
    %385 = vector.broadcast %384 : vector<16x1xf32> to vector<16x32xf32>
    %386 = arith.mulf %381, %385 : vector<16x32xf32>
    %387 = vector.broadcast %366 : vector<1x32xf32> to vector<16x32xf32>
    %388 = arith.mulf %386, %387 : vector<16x32xf32>
    %389 = vector.broadcast %368 : vector<1x32xf32> to vector<16x32xf32>
    %390 = arith.addf %388, %389 : vector<16x32xf32>
    %c0_144 = arith.constant 0 : index
    %c0_145 = arith.constant 0 : index
    %c0_146 = arith.constant 0 : index
    %391 = vector.load %arg19[%c0_144, %c0_145, %c0_146] : memref<1x32x2048xf32, #tpu.memory_space<vmem>>, vector<1x32x2048xf32>
    %392 = vector.shape_cast %391 : vector<1x32x2048xf32> to vector<32x2048xf32>
    %c0_147 = arith.constant 0 : index
    %c0_148 = arith.constant 0 : index
    %c0_149 = arith.constant 0 : index
    %393 = vector.load %arg20[%c0_147, %c0_148, %c0_149] : memref<1x1x2048xf32, #tpu.memory_space<vmem>>, vector<1x1x2048xf32>
    %394 = vector.shape_cast %393 : vector<1x1x2048xf32> to vector<1x2048xf32>
    %c0_150 = arith.constant 0 : index
    %c0_151 = arith.constant 0 : index
    %c0_152 = arith.constant 0 : index
    %395 = vector.load %arg21[%c0_150, %c0_151, %c0_152] : memref<1x2048x32xf32, #tpu.memory_space<vmem>>, vector<1x2048x32xf32>
    %396 = vector.shape_cast %395 : vector<1x2048x32xf32> to vector<2048x32xf32>
    %c0_153 = arith.constant 0 : index
    %c0_154 = arith.constant 0 : index
    %c0_155 = arith.constant 0 : index
    %397 = vector.load %arg22[%c0_153, %c0_154, %c0_155] : memref<1x1x32xf32, #tpu.memory_space<vmem>>, vector<1x1x32xf32>
    %398 = vector.shape_cast %397 : vector<1x1x32xf32> to vector<1x32xf32>
    %cst_156 = arith.constant dense<0.000000e+00> : vector<16x2048xf32>
    %399 = tpu.matmul %390, %392, %cst_156 {dimension_numbers = #tpu.dot_dimension_numbers<[1], [0], [0], [1], [0, 0, 1, 1], [], []>} : vector<16x32xf32>, vector<32x2048xf32>, vector<16x2048xf32> -> vector<16x2048xf32>
    %400 = vector.broadcast %394 : vector<1x2048xf32> to vector<16x2048xf32>
    %401 = arith.addf %399, %400 : vector<16x2048xf32>
    %cst_157 = arith.constant 0.000000e+00 : f32
    %402 = vector.broadcast %cst_157 : f32 to vector<16x2048xf32>
    %403 = arith.maximumf %401, %402 : vector<16x2048xf32>
    %cst_158 = arith.constant dense<0.000000e+00> : vector<16x32xf32>
    %404 = tpu.matmul %403, %396, %cst_158 {dimension_numbers = #tpu.dot_dimension_numbers<[1], [0], [0], [1], [0, 0, 1, 1], [], []>} : vector<16x2048xf32>, vector<2048x32xf32>, vector<16x32xf32> -> vector<16x32xf32>
    %405 = vector.broadcast %398 : vector<1x32xf32> to vector<16x32xf32>
    %406 = arith.addf %404, %405 : vector<16x32xf32>
    %407 = arith.addf %390, %406 : vector<16x32xf32>
    %c0_159 = arith.constant 0 : index
    %c0_160 = arith.constant 0 : index
    %c0_161 = arith.constant 0 : index
    %408 = vector.load %arg23[%c0_159, %c0_160, %c0_161] : memref<1x1x32xf32, #tpu.memory_space<vmem>>, vector<1x1x32xf32>
    %409 = vector.shape_cast %408 : vector<1x1x32xf32> to vector<1x32xf32>
    %c0_162 = arith.constant 0 : index
    %c0_163 = arith.constant 0 : index
    %c0_164 = arith.constant 0 : index
    %410 = vector.load %arg24[%c0_162, %c0_163, %c0_164] : memref<1x1x32xf32, #tpu.memory_space<vmem>>, vector<1x1x32xf32>
    %411 = vector.shape_cast %410 : vector<1x1x32xf32> to vector<1x32xf32>
    %cst_165 = arith.constant dense<0.000000e+00> : vector<16xf32>
    %412 = vector.multi_reduction <add>, %407, %cst_165 [1] : vector<16x32xf32> to vector<16xf32>
    %413 = vector.shape_cast %412 : vector<16xf32> to vector<16x1xf32>
    %cst_166 = arith.constant 3.200000e+01 : f32
    %414 = vector.broadcast %cst_166 : f32 to vector<16x1xf32>
    %415 = arith.divf %413, %414 : vector<16x1xf32>
    %416 = vector.broadcast %415 : vector<16x1xf32> to vector<16x32xf32>
    %417 = arith.subf %407, %416 : vector<16x32xf32>
    %418 = arith.mulf %417, %417 : vector<16x32xf32>
    %cst_167 = arith.constant dense<0.000000e+00> : vector<16xf32>
    %419 = vector.multi_reduction <add>, %418, %cst_167 [1] : vector<16x32xf32> to vector<16xf32>
    %420 = vector.shape_cast %419 : vector<16xf32> to vector<16x1xf32>
    %cst_168 = arith.constant 3.200000e+01 : f32
    %421 = vector.broadcast %cst_168 : f32 to vector<16x1xf32>
    %422 = arith.divf %420, %421 : vector<16x1xf32>
    %423 = vector.broadcast %415 : vector<16x1xf32> to vector<16x32xf32>
    %424 = arith.subf %407, %423 : vector<16x32xf32>
    %cst_169 = arith.constant 9.99999974E-6 : f32
    %425 = vector.broadcast %cst_169 : f32 to vector<16x1xf32>
    %426 = arith.addf %422, %425 : vector<16x1xf32>
    %427 = math.rsqrt %426 : vector<16x1xf32>
    %428 = vector.broadcast %427 : vector<16x1xf32> to vector<16x32xf32>
    %429 = arith.mulf %424, %428 : vector<16x32xf32>
    %430 = vector.broadcast %409 : vector<1x32xf32> to vector<16x32xf32>
    %431 = arith.mulf %429, %430 : vector<16x32xf32>
    %432 = vector.broadcast %411 : vector<1x32xf32> to vector<16x32xf32>
    %433 = arith.addf %431, %432 : vector<16x32xf32>
    %c0_170 = arith.constant 0 : index
    %c0_171 = arith.constant 0 : index
    %434 = vector.load %arg27[%c0_170, %c0_171] : memref<16x32xf32, #tpu.memory_space<vmem>>, vector<16x32xf32>
    tpu.vector_store %arg27[%c0_170, %c0_171], %433 {strides = array<i32>} : memref<16x32xf32, #tpu.memory_space<vmem>>, vector<16x32xf32>,
    %c5_i32 = arith.constant 5 : i32
    %435 = arith.cmpi eq, %arg0, %c5_i32 : i32
    %436 = arith.extui %435 : i1 to i32
    %c0_i32_172 = arith.constant 0 : i32
    %437 = arith.cmpi ne, %436, %c0_i32_172 : i32
    scf.if %437 {
      %c0_173 = arith.constant 0 : index
      %c0_174 = arith.constant 0 : index
      %438 = vector.load %arg25[%c0_173, %c0_174] : memref<1x32xf32, #tpu.memory_space<vmem>>, vector<1x32xf32>
      %c0_175 = arith.constant 0 : index
      %c0_176 = arith.constant 0 : index
      %439 = vector.load %arg26[%c0_175, %c0_176] : memref<1x32xf32, #tpu.memory_space<vmem>>, vector<1x32xf32>
      %cst_177 = arith.constant dense<0.000000e+00> : vector<16xf32>
      %440 = vector.multi_reduction <add>, %433, %cst_177 [1] : vector<16x32xf32> to vector<16xf32>
      %441 = vector.shape_cast %440 : vector<16xf32> to vector<16x1xf32>
      %cst_178 = arith.constant 3.200000e+01 : f32
      %442 = vector.broadcast %cst_178 : f32 to vector<16x1xf32>
      %443 = arith.divf %441, %442 : vector<16x1xf32>
      %444 = vector.broadcast %443 : vector<16x1xf32> to vector<16x32xf32>
      %445 = arith.subf %433, %444 : vector<16x32xf32>
      %446 = arith.mulf %445, %445 : vector<16x32xf32>
      %cst_179 = arith.constant dense<0.000000e+00> : vector<16xf32>
      %447 = vector.multi_reduction <add>, %446, %cst_179 [1] : vector<16x32xf32> to vector<16xf32>
      %448 = vector.shape_cast %447 : vector<16xf32> to vector<16x1xf32>
      %cst_180 = arith.constant 3.200000e+01 : f32
      %449 = vector.broadcast %cst_180 : f32 to vector<16x1xf32>
      %450 = arith.divf %448, %449 : vector<16x1xf32>
      %451 = vector.broadcast %443 : vector<16x1xf32> to vector<16x32xf32>
      %452 = arith.subf %433, %451 : vector<16x32xf32>
      %cst_181 = arith.constant 9.99999974E-6 : f32
      %453 = vector.broadcast %cst_181 : f32 to vector<16x1xf32>
      %454 = arith.addf %450, %453 : vector<16x1xf32>
      %455 = math.rsqrt %454 : vector<16x1xf32>
      %456 = vector.broadcast %455 : vector<16x1xf32> to vector<16x32xf32>
      %457 = arith.mulf %452, %456 : vector<16x32xf32>
      %458 = vector.broadcast %438 : vector<1x32xf32> to vector<16x32xf32>
      %459 = arith.mulf %457, %458 : vector<16x32xf32>
      %460 = vector.broadcast %439 : vector<1x32xf32> to vector<16x32xf32>
      %461 = arith.addf %459, %460 : vector<16x32xf32>
      %c0_182 = arith.constant 0 : index
      %c0_183 = arith.constant 0 : index
      %462 = vector.load %arg27[%c0_182, %c0_183] : memref<16x32xf32, #tpu.memory_space<vmem>>, vector<16x32xf32>
      tpu.vector_store %arg27[%c0_182, %c0_183], %461 {strides = array<i32>} : memref<16x32xf32, #tpu.memory_space<vmem>>, vector<16x32xf32>,
    } else {
    }
    return
  }
  func.func @transform_0(%arg0: i32) -> (i32, i32) {
    %c0_i32 = arith.constant 0 : i32
    %c0_i32_0 = arith.constant 0 : i32
    %c0_i32_1 = arith.constant 0 : i32
    return %c0_i32, %c0_i32_0 : i32, i32
  }
  func.func @transform_1(%arg0: i32) -> (i32, i32) {
    %c0_i32 = arith.constant 0 : i32
    %c0_i32_0 = arith.constant 0 : i32
    %c0_i32_1 = arith.constant 0 : i32
    return %c0_i32, %c0_i32_0 : i32, i32
  }
  func.func @transform_2(%arg0: i32) -> (i32, i32) {
    %c0_i32 = arith.constant 0 : i32
    %c0_i32_0 = arith.constant 0 : i32
    %c0_i32_1 = arith.constant 0 : i32
    return %c0_i32, %c0_i32_0 : i32, i32
  }
  func.func @transform_3(%arg0: i32) -> (i32, i32) {
    %c0_i32 = arith.constant 0 : i32
    %c0_i32_0 = arith.constant 0 : i32
    %c0_i32_1 = arith.constant 0 : i32
    return %c0_i32, %c0_i32_0 : i32, i32
  }
  func.func @transform_4(%arg0: i32) -> (i32, i32, i32) {
    %c0_i32 = arith.constant 0 : i32
    %c0_i32_0 = arith.constant 0 : i32
    %c0_i32_1 = arith.constant 0 : i32
    return %arg0, %c0_i32, %c0_i32_0 : i32, i32, i32
  }
  func.func @transform_5(%arg0: i32) -> (i32, i32, i32) {
    %c0_i32 = arith.constant 0 : i32
    %c0_i32_0 = arith.constant 0 : i32
    %c0_i32_1 = arith.constant 0 : i32
    return %arg0, %c0_i32, %c0_i32_0 : i32, i32, i32
  }
  func.func @transform_6(%arg0: i32) -> (i32, i32, i32) {
    %c0_i32 = arith.constant 0 : i32
    %c0_i32_0 = arith.constant 0 : i32
    %c0_i32_1 = arith.constant 0 : i32
    return %arg0, %c0_i32, %c0_i32_0 : i32, i32, i32
  }
  func.func @transform_7(%arg0: i32) -> (i32, i32, i32) {
    %c0_i32 = arith.constant 0 : i32
    %c0_i32_0 = arith.constant 0 : i32
    %c0_i32_1 = arith.constant 0 : i32
    return %arg0, %c0_i32, %c0_i32_0 : i32, i32, i32
  }
  func.func @transform_8(%arg0: i32) -> (i32, i32, i32) {
    %c0_i32 = arith.constant 0 : i32
    %c0_i32_0 = arith.constant 0 : i32
    %c0_i32_1 = arith.constant 0 : i32
    return %arg0, %c0_i32, %c0_i32_0 : i32, i32, i32
  }
  func.func @transform_9(%arg0: i32) -> (i32, i32, i32) {
    %c0_i32 = arith.constant 0 : i32
    %c0_i32_0 = arith.constant 0 : i32
    %c0_i32_1 = arith.constant 0 : i32
    return %arg0, %c0_i32, %c0_i32_0 : i32, i32, i32
  }
  func.func @transform_10(%arg0: i32) -> (i32, i32, i32) {
    %c0_i32 = arith.constant 0 : i32
    %c0_i32_0 = arith.constant 0 : i32
    %c0_i32_1 = arith.constant 0 : i32
    return %arg0, %c0_i32, %c0_i32_0 : i32, i32, i32
  }
  func.func @transform_11(%arg0: i32) -> (i32, i32, i32) {
    %c0_i32 = arith.constant 0 : i32
    %c0_i32_0 = arith.constant 0 : i32
    %c0_i32_1 = arith.constant 0 : i32
    return %arg0, %c0_i32, %c0_i32_0 : i32, i32, i32
  }
  func.func @transform_12(%arg0: i32) -> (i32, i32, i32) {
    %c0_i32 = arith.constant 0 : i32
    %c0_i32_0 = arith.constant 0 : i32
    %c0_i32_1 = arith.constant 0 : i32
    return %arg0, %c0_i32, %c0_i32_0 : i32, i32, i32
  }
  func.func @transform_13(%arg0: i32) -> (i32, i32, i32) {
    %c0_i32 = arith.constant 0 : i32
    %c0_i32_0 = arith.constant 0 : i32
    %c0_i32_1 = arith.constant 0 : i32
    return %arg0, %c0_i32, %c0_i32_0 : i32, i32, i32
  }
  func.func @transform_14(%arg0: i32) -> (i32, i32, i32) {
    %c0_i32 = arith.constant 0 : i32
    %c0_i32_0 = arith.constant 0 : i32
    %c0_i32_1 = arith.constant 0 : i32
    return %arg0, %c0_i32, %c0_i32_0 : i32, i32, i32
  }
  func.func @transform_15(%arg0: i32) -> (i32, i32, i32) {
    %c0_i32 = arith.constant 0 : i32
    %c0_i32_0 = arith.constant 0 : i32
    %c0_i32_1 = arith.constant 0 : i32
    return %arg0, %c0_i32, %c0_i32_0 : i32, i32, i32
  }
  func.func @transform_16(%arg0: i32) -> (i32, i32, i32) {
    %c0_i32 = arith.constant 0 : i32
    %c0_i32_0 = arith.constant 0 : i32
    %c0_i32_1 = arith.constant 0 : i32
    return %arg0, %c0_i32, %c0_i32_0 : i32, i32, i32
  }
  func.func @transform_17(%arg0: i32) -> (i32, i32, i32) {
    %c0_i32 = arith.constant 0 : i32
    %c0_i32_0 = arith.constant 0 : i32
    %c0_i32_1 = arith.constant 0 : i32
    return %arg0, %c0_i32, %c0_i32_0 : i32, i32, i32
  }
  func.func @transform_18(%arg0: i32) -> (i32, i32, i32) {
    %c0_i32 = arith.constant 0 : i32
    %c0_i32_0 = arith.constant 0 : i32
    %c0_i32_1 = arith.constant 0 : i32
    return %arg0, %c0_i32, %c0_i32_0 : i32, i32, i32
  }
  func.func @transform_19(%arg0: i32) -> (i32, i32, i32) {
    %c0_i32 = arith.constant 0 : i32
    %c0_i32_0 = arith.constant 0 : i32
    %c0_i32_1 = arith.constant 0 : i32
    return %arg0, %c0_i32, %c0_i32_0 : i32, i32, i32
  }
  func.func @transform_20(%arg0: i32) -> (i32, i32, i32) {
    %c0_i32 = arith.constant 0 : i32
    %c0_i32_0 = arith.constant 0 : i32
    %c0_i32_1 = arith.constant 0 : i32
    return %arg0, %c0_i32, %c0_i32_0 : i32, i32, i32
  }
  func.func @transform_21(%arg0: i32) -> (i32, i32, i32) {
    %c0_i32 = arith.constant 0 : i32
    %c0_i32_0 = arith.constant 0 : i32
    %c0_i32_1 = arith.constant 0 : i32
    return %arg0, %c0_i32, %c0_i32_0 : i32, i32, i32
  }
  func.func @transform_22(%arg0: i32) -> (i32, i32, i32) {
    %c0_i32 = arith.constant 0 : i32
    %c0_i32_0 = arith.constant 0 : i32
    %c0_i32_1 = arith.constant 0 : i32
    return %arg0, %c0_i32, %c0_i32_0 : i32, i32, i32
  }
  func.func @transform_23(%arg0: i32) -> (i32, i32, i32) {
    %c0_i32 = arith.constant 0 : i32
    %c0_i32_0 = arith.constant 0 : i32
    %c0_i32_1 = arith.constant 0 : i32
    return %arg0, %c0_i32, %c0_i32_0 : i32, i32, i32
  }
  func.func @transform_24(%arg0: i32) -> (i32, i32) {
    %c0_i32 = arith.constant 0 : i32
    %c0_i32_0 = arith.constant 0 : i32
    %c0_i32_1 = arith.constant 0 : i32
    return %c0_i32, %c0_i32_0 : i32, i32
  }
  func.func @transform_25(%arg0: i32) -> (i32, i32) {
    %c0_i32 = arith.constant 0 : i32
    %c0_i32_0 = arith.constant 0 : i32
    %c0_i32_1 = arith.constant 0 : i32
    return %c0_i32, %c0_i32_0 : i32, i32
  }
  func.func @transform_26(%arg0: i32) -> (i32, i32) {
    %c0_i32 = arith.constant 0 : i32
    %c0_i32_0 = arith.constant 0 : i32
    %c0_i32_1 = arith.constant 0 : i32
    return %c0_i32, %c0_i32_0 : i32, i32
  }
}

</mosaic_0001>

<bundles_post_ra>
// kernel: translation_model_forward.2
= control target key start
LH: loop header
LB: loop body
LE: loop exit
PB: predicated region body
PF: predicated region fallthrough
CT: control target
= control target key end

     0   :  { %s5885_s21 = smov 0   ;;  %s6785_s0 = inlined_call_operand.vmem [shape: f32[16,32], index: 0, kind: input, shape index: {}]   ;;  %s6786_s1 = inlined_call_operand.vmem [shape: f32[16,16], index: 1, kind: input, shape index: {}]   ;;  %s6787_s2 = inlined_call_operand.vmem [shape: f32[6,32,96], index: 2, kind: input, shape index: {}]   ;;  %s6788_s3 = inlined_call_operand.vmem [shape: f32[6,1,96], index: 3, kind: input, shape index: {}]   ;;  %s6789_s4 = inlined_call_operand.vmem [shape: f32[6,32,32], index: 4, kind: input, shape index: {}]   ;;  %s6790_s5 = inlined_call_operand.vmem [shape: f32[6,1,32], index: 5, kind: input, shape index: {}]   ;;  %s6791_s6 = inlined_call_operand.vmem [shape: f32[6,1,32], index: 6, kind: input, shape index: {}]   ;;  %s6792_s7 = inlined_call_operand.vmem [shape: f32[6,1,32], index: 7, kind: input, shape index: {}]   ;;  %s6793_s8 = inlined_call_operand.vmem [shape: f32[6,32,2048], index: 8, kind: input, shape index: {}]   ;;  %s6794_s9 = inlined_call_operand.vmem [shape: f32[6,1,2048], index: 9, kind: input, shape index: {}]   ;;  %s6795_s10 = inlined_call_operand.vmem [shape: f32[6,2048,32], index: 10, kind: input, shape index: {}]   ;;  %s6796_s11 = inlined_call_operand.vmem [shape: f32[6,1,32], index: 11, kind: input, shape index: {}]   ;;  %s6797_s12 = inlined_call_operand.vmem [shape: f32[6,1,32], index: 12, kind: input, shape index: {}]   ;;  %s6798_s13 = inlined_call_operand.vmem [shape: f32[6,1,32], index: 13, kind: input, shape index: {}]   ;;  %s6799_s14 = inlined_call_operand.vmem [shape: f32[1,32], index: 14, kind: input, shape index: {}]   ;;  %s6800_s15 = inlined_call_operand.vmem [shape: f32[1,32], index: 15, kind: input, shape index: {}]   ;;  %s6801_s16 = inlined_call_operand.vmem [shape: f32[16,32], index: 16, kind: output, shape index: {}]  }
   0x1   :  { %6808 = sst [smem:[#allocation3_spill]] %s6785_s0 }
   0x2   :  { %6809 = sst [smem:[#allocation4_spill]] %s6786_s1 }
   0x3   :  { %6810 = sst [smem:[#allocation5_spill]] %s6787_s2 }
   0x4   :  { %6811 = sst [smem:[#allocation6_spill]] %s6789_s4 }
   0x5   :  { %6812 = sst [smem:[#allocation7_spill]] %s6793_s8 }
   0x6   :  { %6813 = sst [smem:[#allocation8_spill]] %s6799_s14 }
   0x7   :  { %6814 = sst [smem:[#allocation9_spill]] %s6800_s15 }
   0x8   :  { %6815 = sst [smem:[#allocation10_spill]] %s6801_s16 }
   0x9 LB: > { %6816 = sst [smem:[#allocation2_spill]] %s5767_s21  ;;  %s5891_s22 = sadd.s32 4294967295, %s5767_s21   ;;  %s5767_s21 = sphi %s5885_s21, %s26_s21  }
   0xa   : > { %p4539_p0 = scmp.ge.s32.totalorder %s5767_s21, 1  ;;  %p552_p1 = scmp.lt.s32.totalorder %s5767_s21, 7 }
   0xc   : > { %p553_p2 = pnand %p4539_p0, %p552_p1 }
   0xd   : > { %p637_p3 = scmp.lt.s32.totalorder (!%p553_p2), %s5891_s22, 5  ;;  %s6817_s2 = sld [smem:[#allocation5_spill]] (!%p553_p2) }
   0xe   : > { %556 = sbr.rel (%p553_p2) target bundleno = 6752 (0x1a60), region = 84  ;;  %s6818_s4 = sld [smem:[#allocation6_spill]] (!%p553_p2) }
   0xf   : > { %s6819_s8 = sld [smem:[#allocation7_spill]] (!%p553_p2)  ;;  %p4549_p4 = scmp.ne.s32.totalorder (!%p553_p2), %s5891_s22, 0 }
  0x15   : > { %s5897_s23 = scalar_select %p637_p3, %s5891_s22, 5 }
  0x16   : > { %685 = sbr.rel (%p4549_p4) target bundleno = 36 (0x24), region = 88  ;;  %s6820_s21 = sld [smem:[#allocation3_spill]] (!%p4549_p4)  ;;  %vm688_vm0 = vcmask (!%p4549_p4), 261120  }
  0x17   : > { %s4630_s24 = sshll.u32 %s5897_s23, 5  ;;  %s4632_s27 = sshll.u32 %s5897_s23, 9 }
  0x18   : > { %s641_s30 = scalar_lea.vmem %s6817_s2, %s4630_s24  ;;  %s5910_s18 = scalar_lea.vmem %s6818_s4, %s4630_s24 }
  0x19   : > { %s5928_s2 = scalar_lea.vmem %s6819_s8, %s4632_s27  ;;  %s4546_s24 = sshll.u32 %s5897_s23, 4 }
  0x1a   : > { %s5934_s19 = scalar_lea.vmem %s6794_s9, %s4546_s24  ;;  %s4633_s20 = sshll.u32 %s5897_s23, 11 }
  0x1b   : > { %s5940_s15 = scalar_lea.vmem %s6795_s10, %s4633_s20  ;;  %s675_s26 = scalar_lea.vmem %s6796_s11, %s5897_s23 }
  0x1c   : > { %s681_s0 = scalar_lea.vmem %s6798_s13, %s5897_s23  ;;  %s6821_s14 = smov (!%p4549_p4), %s6820_s21  ;;  %v686_v0 = vld [vmem:[%s6820_s21] sm:$0xff] (!%p4549_p4) }
  0x1d   : > { %v687_v1 = vld [vmem:[%s6821_s14 + $0x8] sm:$0xff]  ;;  %s6822_s1 = sld [smem:[#allocation10_spill]] }
  0x23   : > { %689 = vst.msk [vmem:[%s6822_s1] sm:$0xff] %vm688_vm0, %v686_v0  ;;  %690 = vst.msk [vmem:[%s6822_s1 + $0x8] sm:$0xff] %vm688_vm0, %v687_v1 }
  0x24 PF: > { %v695_v2 = vld [vmem:[%s641_s30] sm:$0xff]  ;;  %v696_v3 = vld [vmem:[%s641_s30 + $0x8] sm:$0xff]  ;;  %v697_v4 = vld [vmem:[%s641_s30 + $0x10] sm:$0xff]  ;;  %vm711_vm1 = vcmask 261120   ;;  %s6823_s8 = sld [smem:[#allocation10_spill]]  ;;  %vm799_vm2 = vcmask 31744  }
  0x25   : > { %v5148_v5 = vpack.c.bf16 %v696_v3, %v695_v2  ;;  %v698_v6 = vld [vmem:[%s641_s30 + $0x18] sm:$0xff]  ;;  %s6824_s30 = scalar_lea.vmem %s6788_s3, %s5897_s23  ;;  %s5769_s20 = smov 96   ;;  %vm5993_vm3 = vmpackc.low %vm799_vm2, %vm799_vm2  ;;  %vm887_vm4 = vcmask 130048   ;;  %vm2483_vm5 = vcmask 64512   ;;  %vm2486_vm6 = vcmask 97280  }
  0x26   : > { %v5152_v8 = vpack.c.bf16 %v698_v6, %v697_v4  ;;  %v4550_v10 = vld [vmem:[%s6824_s30] ss:$0 sm:$0xff]  ;;  %s6827_s1 = sld [smem:[#allocation4_spill]]  ;;  %s5770_s29 = smov 64   ;;  %vm2491_vm7 = vcmask 162816   ;;  %vm2494_vm8 = vcmask 195584  }
  0x27   : > { %5149 = vmatprep.subr.bf16.mxu0 %v5148_v5  ;;  %s5771_s27 = smov 92   ;;  %s5772_s24 = smov 124   ;;  %vm2497_vm9 = vcmask 228352  }
  0x28   : > { %5151 = vmatpush3.bf16.msra.mxu0 %v5148_v5  ;;  %s5773_s17 = smov 60   ;;  %s5774_s21 = smov 88  }
  0x29   : > { %5153 = vmatprep.subr.bf16.mxu0 %v5152_v8  ;;  %s5775_s30 = smov 120   ;;  %s5777_s16 = smov 116  }
  0x2a   : > { %v691_v7 = vld [vmem:[%s6823_s8] sm:$0xff]  ;;  %v692_v9 = vld [vmem:[%s6823_s8 + $0x8] sm:$0xff]  ;;  %s5778_s25 = smov 56   ;;  %s5779_s28 = smov 80  }
  0x2b   : > { %5022 = vmatprep.mubr.msk.f32.mxu0 %vm711_vm1, %v691_v7  ;;  %s5780_s4 = smov 112   ;;  %p4625_p5 = scmp.ne.s32.totalorder %s5891_s22, 5 }
  0x2c   : > { %5155 = vmatpush3.bf16.msra.mxu0 %v5152_v8  ;;  %v6006_v22 = vld [vmem:[%s6827_s1 + $0x8] sm:$0xff]  ;;  %v6011_v25 = vld [vmem:[%s6827_s1] sm:$0xff] }
  0x2f   : > { %5023 = vmatmul.mubr.msk.f32.vlgmr.msra.gmra.mrb[0].mxu0 %vm711_vm1, %v692_v9 }
 0x102   : > { %v5024_v11 = vpop.f32.mrb[0].mxu0 }
 0x103   : > { %v5980_v12 = vadd.f32 %v5024_v11, %v4550_v10  ;;  %v784_v13 = vpop.f32.mrb[1].mxu0 }
 0x104   : > { %v5982_v14 = vadd.f32 %v4550_v10, %v784_v13 }
 0x106   : > { %5029 = vmatprep.mubr.msk.f32.mxu1 %vm799_vm2, %v5982_v14  ;;  %v5988_v15 = vpack.i.bf16 %v5980_v12, %v5982_v14 }
 0x108   : > { %5604 = vrot.lane.b32.xlu0 %v5988_v15, %s5769_s20  ;;  %s5776_s20 = smov 84  }
 0x17a   : > { %v5605_v16 = vpop.permute.xlu0 %5604 }
 0x17b   : > { %v5607_v17 = vunpack.i.h.bf16 %v5605_v16  ;;  %v5606_v18 = vunpack.i.l.bf16 %v5605_v16 }
 0x17d   : > { %v5156_v20 = vpack.c.bf16 %v5607_v17, %v5606_v18 }
 0x17f   : > { %5158 = vmatprep.subr.msk.bf16.mxu1 %vm5993_vm3, %v5156_v20 }
 0x180   : > { %5161 = vmatpush3.bf16.xpose.msk.msra.mxu1 %vm5993_vm3, %v5156_v20 }
 0x187   : > { %5030 = vmatmul.mubr.msk.f32.vlgmr.msra.gmra.mrb[0].mxu1 %vm799_vm2, %v5980_v12 }
 0x25a   : > { %v5031_v21 = vpop.f32.mrb[0].mxu1 }
 0x25b   : > { %v884_v23 = vmul.f32 0.5, %v5031_v21  ;;  %v874_v24 = vpop.f32.mrb[1].mxu1 }
 0x25c   : > { %v883_v26 = vmul.f32 0.5, %v874_v24 }
 0x25d   : > { %v886_v27 = vadd.f32 %v884_v23, %v6006_v22 }
 0x25e   : > { %v885_v28 = vadd.f32 %v883_v26, %v6011_v25 }
 0x25f   : > { %v891_v29 = vsel %vm887_vm4, %v886_v27, -inf }
 0x260   : > { %892 = vmax.xlane.f32.xlu1 %v891_v29  ;;  %v888_v30 = vsel %vm887_vm4, %v885_v28, -inf }
 0x261   : > { %889 = vmax.xlane.f32.xlu0 %v888_v30 }
 0x271   : > { %5609 = vrot.lane.b32.xlu1 %v5988_v15, %s5770_s29  ;;  %s5781_s29 = smov 52  }
 0x275   : > { %5614 = vrot.lane.b32.xlu1 %v5988_v15, %s5771_s27  ;;  %s5782_s27 = smov 76  }
 0x277   : > { %999 = vrot.lane.b32.xlu0 %v5980_v12, %s5772_s24 }
 0x2ed   : > { %v893_v31 = vpop.xlane.xlu1 %892 }
 0x2ee   : > { %v895_v32 = vsub.f32 %v886_v27, %v893_v31  ;;  %v890_v33 = vpop.xlane.xlu0 %889 }
 0x2ef   : > { %v894_v34 = vsub.f32 %v885_v28, %v890_v33 }
 0x2f0   : > { %v898_v35 = vmul.f32 1.442695, %v895_v32 }
 0x2f1   : > { %v896_v36 = vmul.f32 1.442695, %v894_v34  ;;  %v5610_v37 = vpop.permute.xlu1 %5609 }
 0x2f2   : > { %5683 = vpow2.f32 %v898_v35  ;;  %v5612_v38 = vunpack.i.h.bf16 %v5610_v37  ;;  %v5611_v39 = vunpack.i.l.bf16 %v5610_v37  ;;  %v1000_v56 = vpop.permute.xlu0 %999 }
 0x2f3   : > { %5685 = vpow2.f32 %v896_v36 }
 0x2f4   : > { %v5162_v40 = vpack.c.bf16 %v5612_v38, %v5611_v39 }
 0x2f5   : > { %v5615_v41 = vpop.permute.xlu1 %5614 }
 0x2f6   : > { %v5617_v42 = vunpack.i.h.bf16 %v5615_v41  ;;  %v5616_v43 = vunpack.i.l.bf16 %v5615_v41  ;;  %5163 = vmatprep.subr.bf16.mxu1 %v5162_v40 }
 0x2f7   : > { %5165 = vmatpush3.bf16.msra.mxu1 %v5162_v40 }
 0x2f8   : > { %v5166_v44 = vpack.c.bf16 %v5617_v42, %v5616_v43 }
 0x2fa   : > { %5168 = vmatprep.subr.msk.bf16.mxu1 %vm5993_vm3, %v5166_v44 }
 0x2fc   : > { %v5684_v45 = vpop.eup %5683 }
 0x2fd   : > { %v903_v46 = vsel %vm887_vm4, %v5684_v45, 0.0  ;;  %v5686_v47 = vpop.eup %5685 }
 0x2fe   : > { %904 = vadd.xlane.f32.xlu1 %v903_v46  ;;  %v900_v48 = vsel %vm887_vm4, %v5686_v47, 0.0 }
 0x302   : > { %901 = vadd.xlane.f32.xlu1 %v900_v48 }
 0x313   : > { %997 = vrot.lane.b32.xlu1 %v5982_v14, %s5772_s24  ;;  %s5783_s24 = smov 108  }
 0x38b   : > { %v905_v49 = vpop.xlane.xlu1 %904 }
 0x38c   : > { %5687 = vrcp.f32 %v905_v49 }
 0x38f   : > { %v902_v50 = vpop.xlane.xlu1 %901 }
 0x390   : > { %5689 = vrcp.f32 %v902_v50 }
 0x393   : > { %v998_v55 = vpop.permute.xlu1 %997 }
 0x396   : > { %v5688_v51 = vpop.eup %5687 }
 0x397   : > { %v909_v54 = vmul.f32 %v5688_v51, %v5684_v45 }
 0x39a   : > { %v5690_v52 = vpop.eup %5689 }
 0x39b   : > { %v908_v53 = vmul.f32 %v5690_v52, %v5686_v47 }
 0x39d   : > { %5036 = vmatprep.mubr.msk.f32.mxu1 %vm887_vm4, %v908_v53 }
 0x39e   : > { %5037 = vmatmul.mubr.msk.f32.vlgmr.msra.gmra.mrb[2].mxu1 %vm887_vm4, %v909_v54 }
 0x39f   : > { %5171 = vmatpush3.bf16.xpose.msk.msra.mxu1 %vm5993_vm3, %v5166_v44  ;;  %5043 = vmatprep.mubr.msk.f32.mxu1 %vm799_vm2, %v998_v55 }
 0x3a6   : > { %5044 = vmatmul.mubr.msk.f32.vlgmr.msra.gmra.mrb[4].mxu1 %vm799_vm2, %v1000_v56 }
 0x471   : > { %v6031_v57 = vpop.f32.mrb[2].mxu1 }
 0x472   : > { %v6033_v58 = vpop.f32.mrb[3].mxu1 }
 0x479   : > { %v5045_v59 = vpop.f32.mrb[4].mxu1 }
 0x47a   : > { %v1089_v60 = vmul.f32 0.5, %v5045_v59  ;;  %v1079_v61 = vpop.f32.mrb[5].mxu1 }
 0x47b   : > { %v1088_v62 = vmul.f32 0.5, %v1079_v61 }
 0x47c   : > { %v1091_v63 = vadd.f32 %v1089_v60, %v6006_v22 }
 0x47d   : > { %v1090_v0 = vadd.f32 %v1088_v62, %v6011_v25 }
 0x47e   : > { %v1095_v1 = vsel %vm887_vm4, %v1091_v63, -inf }
 0x47f   : > { %1096 = vmax.xlane.f32.xlu0 %v1095_v1  ;;  %v1092_v2 = vsel %vm887_vm4, %v1090_v0, -inf }
 0x480   : > { %1093 = vmax.xlane.f32.xlu1 %v1092_v2 }
 0x491   : > { %5619 = vrot.lane.b32.xlu1 %v5988_v15, %s5773_s17  ;;  %s5784_s17 = smov 48  }
 0x495   : > { %5624 = vrot.lane.b32.xlu0 %v5988_v15, %s5774_s21  ;;  %1201 = vrot.lane.b32.xlu1 %v5982_v14, %s5775_s30  ;;  %s5785_s21 = smov 72  }
 0x50c   : > { %v1097_v3 = vpop.xlane.xlu0 %1096 }
 0x50d   : > { %v1099_v4 = vsub.f32 %v1091_v63, %v1097_v3  ;;  %v1094_v5 = vpop.xlane.xlu1 %1093 }
 0x50e   : > { %v1098_v6 = vsub.f32 %v1090_v0, %v1094_v5 }
 0x50f   : > { %v1102_v7 = vmul.f32 1.442695, %v1099_v4 }
 0x510   : > { %v1100_v8 = vmul.f32 1.442695, %v1098_v6  ;;  %v5625_v9 = vpop.permute.xlu0 %5624 }
 0x511   : > { %5691 = vpow2.f32 %v1102_v7  ;;  %v5620_v10 = vpop.permute.xlu1 %5619  ;;  %v5627_v11 = vunpack.i.h.bf16 %v5625_v9  ;;  %v5626_v13 = vunpack.i.l.bf16 %v5625_v9 }
 0x512   : > { %v5622_v16 = vunpack.i.h.bf16 %v5620_v10  ;;  %v5621_v17 = vunpack.i.l.bf16 %v5620_v10  ;;  %5693 = vpow2.f32 %v1100_v8 }
 0x513   : > { %v5176_v20 = vpack.c.bf16 %v5627_v11, %v5626_v13 }
 0x514   : > { %v5172_v18 = vpack.c.bf16 %v5622_v16, %v5621_v17 }
 0x515   : > { %v1202_v27 = vpop.permute.xlu1 %1201 }
 0x516   : > { %5173 = vmatprep.subr.bf16.mxu0 %v5172_v18 }
 0x517   : > { %5175 = vmatpush3.bf16.msra.mxu0 %v5172_v18 }
 0x518   : > { %5178 = vmatprep.subr.msk.bf16.mxu0 %vm5993_vm3, %v5176_v20 }
 0x51b   : > { %v5692_v21 = vpop.eup %5691 }
 0x51c   : > { %v1107_v23 = vsel %vm887_vm4, %v5692_v21, 0.0  ;;  %v5694_v24 = vpop.eup %5693 }
 0x51d   : > { %1108 = vadd.xlane.f32.xlu1 %v1107_v23  ;;  %v1104_v26 = vsel %vm887_vm4, %v5694_v24, 0.0 }
 0x521   : > { %1105 = vadd.xlane.f32.xlu1 %v1104_v26 }
 0x532   : > { %1203 = vrot.lane.b32.xlu1 %v5980_v12, %s5775_s30  ;;  %s5786_s30 = smov 104  }
 0x5aa   : > { %v1109_v28 = vpop.xlane.xlu1 %1108 }
 0x5ab   : > { %5695 = vrcp.f32 %v1109_v28 }
 0x5ae   : > { %v1106_v29 = vpop.xlane.xlu1 %1105 }
 0x5af   : > { %5697 = vrcp.f32 %v1106_v29 }
 0x5b2   : > { %v1204_v34 = vpop.permute.xlu1 %1203 }
 0x5b5   : > { %v5696_v30 = vpop.eup %5695 }
 0x5b6   : > { %v1113_v33 = vmul.f32 %v5696_v30, %v5692_v21 }
 0x5b9   : > { %v5698_v31 = vpop.eup %5697 }
 0x5ba   : > { %v1112_v32 = vmul.f32 %v5698_v31, %v5694_v24 }
 0x5bc   : > { %5050 = vmatprep.mubr.msk.f32.mxu0 %vm887_vm4, %v1112_v32 }
 0x5bd   : > { %5051 = vmatmul.mubr.msk.f32.vlgmr.msra.gmra.mrb[2].mxu0 %vm887_vm4, %v1113_v33 }
 0x5be   : > { %5181 = vmatpush3.bf16.xpose.msk.msra.mxu0 %vm5993_vm3, %v5176_v20  ;;  %5057 = vmatprep.mubr.msk.f32.mxu0 %vm799_vm2, %v1202_v27 }
 0x5c5   : > { %5058 = vmatmul.mubr.msk.f32.vlgmr.msra.gmra.mrb[4].mxu0 %vm799_vm2, %v1204_v34 }
 0x690   : > { %v6053_v35 = vpop.f32.mrb[2].mxu0 }
 0x691   : > { %v6055_v36 = vpop.f32.mrb[3].mxu0 }
 0x698   : > { %v5059_v37 = vpop.f32.mrb[4].mxu0 }
 0x699   : > { %v1293_v38 = vmul.f32 0.5, %v5059_v37  ;;  %v1283_v39 = vpop.f32.mrb[5].mxu0 }
 0x69a   : > { %v1292_v40 = vmul.f32 0.5, %v1283_v39 }
 0x69b   : > { %v1295_v41 = vadd.f32 %v1293_v38, %v6006_v22 }
 0x69c   : > { %v1294_v42 = vadd.f32 %v1292_v40, %v6011_v25 }
 0x69d   : > { %v1299_v43 = vsel %vm887_vm4, %v1295_v41, -inf }
 0x69e   : > { %1300 = vmax.xlane.f32.xlu0 %v1299_v43  ;;  %v1296_v44 = vsel %vm887_vm4, %v1294_v42, -inf }
 0x69f   : > { %1297 = vmax.xlane.f32.xlu1 %v1296_v44 }
 0x72b   : > { %v1301_v45 = vpop.xlane.xlu0 %1300 }
 0x72c   : > { %v1303_v46 = vsub.f32 %v1295_v41, %v1301_v45  ;;  %v1298_v47 = vpop.xlane.xlu1 %1297 }
 0x72d   : > { %v1302_v48 = vsub.f32 %v1294_v42, %v1298_v47 }
 0x72e   : > { %v1306_v49 = vmul.f32 1.442695, %v1303_v46 }
 0x72f   : > { %v1304_v50 = vmul.f32 1.442695, %v1302_v48 }
 0x730   : > { %5699 = vpow2.f32 %v1306_v49 }
 0x731   : > { %5701 = vpow2.f32 %v1304_v50 }
 0x73a   : > { %v5700_v51 = vpop.eup %5699 }
 0x73b   : > { %v5702_v52 = vpop.eup %5701  ;;  %v1311_v53 = vsel %vm887_vm4, %v5700_v51, 0.0 }
 0x73c   : > { %1312 = vadd.xlane.f32.xlu1 %v1311_v53  ;;  %v1308_v54 = vsel %vm887_vm4, %v5702_v52, 0.0 }
 0x73d   : > { %1309 = vadd.xlane.f32.xlu0 %v1308_v54 }
 0x74d   : > { %5634 = vrot.lane.b32.xlu1 %v5988_v15, %s5776_s20  ;;  %s5787_s20 = smov 44  }
 0x751   : > { %1405 = vrot.lane.b32.xlu1 %v5982_v14, %s5777_s16 }
 0x753   : > { %5629 = vrot.lane.b32.xlu0 %v5988_v15, %s5778_s25  ;;  %s5789_s25 = smov 100  }
 0x757   : > { %1407 = vrot.lane.b32.xlu0 %v5980_v12, %s5777_s16  ;;  %s5788_s16 = smov 68  }
 0x7c9   : > { %v1313_v55 = vpop.xlane.xlu1 %1312 }
 0x7ca   : > { %5703 = vrcp.f32 %v1313_v55  ;;  %v1310_v56 = vpop.xlane.xlu0 %1309 }
 0x7cb   : > { %5705 = vrcp.f32 %v1310_v56 }
 0x7cd   : > { %v5635_v59 = vpop.permute.xlu1 %5634 }
 0x7ce   : > { %v5630_v60 = vpop.permute.xlu0 %5629  ;;  %v5637_v61 = vunpack.i.h.bf16 %v5635_v59  ;;  %v5636_v62 = vunpack.i.l.bf16 %v5635_v59 }
 0x7cf   : > { %v5632_v63 = vunpack.i.h.bf16 %v5630_v60  ;;  %v5631_v0 = vunpack.i.l.bf16 %v5630_v60 }
 0x7d0   : > { %v5186_v2 = vpack.c.bf16 %v5637_v61, %v5636_v62 }
 0x7d1   : > { %v5182_v1 = vpack.c.bf16 %v5632_v63, %v5631_v0  ;;  %v1406_v7 = vpop.permute.xlu1 %1405 }
 0x7d2   : > { %v1408_v8 = vpop.permute.xlu0 %1407 }
 0x7d3   : > { %5183 = vmatprep.subr.bf16.mxu1 %v5182_v1 }
 0x7d4   : > { %v5704_v3 = vpop.eup %5703  ;;  %5185 = vmatpush3.bf16.msra.mxu1 %v5182_v1 }
 0x7d5   : > { %v5706_v4 = vpop.eup %5705  ;;  %5188 = vmatprep.subr.msk.bf16.mxu1 %vm5993_vm3, %v5186_v2  ;;  %v1317_v6 = vmul.f32 %v5704_v3, %v5700_v51 }
 0x7d6   : > { %v1316_v5 = vmul.f32 %v5706_v4, %v5702_v52 }
 0x7d8   : > { %5064 = vmatprep.mubr.msk.f32.mxu1 %vm887_vm4, %v1316_v5 }
 0x7d9   : > { %5065 = vmatmul.mubr.msk.f32.vlgmr.msra.gmra.mrb[6].mxu1 %vm887_vm4, %v1317_v6 }
 0x7da   : > { %5071 = vmatprep.mubr.msk.f32.mxu1 %vm799_vm2, %v1406_v7 }
 0x7dd   : > { %5191 = vmatpush3.bf16.xpose.msk.msra.mxu1 %vm5993_vm3, %v5186_v2 }
 0x7e4   : > { %5072 = vmatmul.mubr.msk.f32.vlgmr.msra.gmra.mrb[8].mxu1 %vm799_vm2, %v1408_v8 }
 0x8ac   : > { %v6075_v9 = vpop.f32.mrb[6].mxu1 }
 0x8ad   : > { %v6077_v10 = vpop.f32.mrb[7].mxu1 }
 0x8b7   : > { %v5073_v11 = vpop.f32.mrb[8].mxu1 }
 0x8b8   : > { %v1497_v13 = vmul.f32 0.5, %v5073_v11  ;;  %v1487_v16 = vpop.f32.mrb[9].mxu1 }
 0x8b9   : > { %v1496_v17 = vmul.f32 0.5, %v1487_v16 }
 0x8ba   : > { %v1499_v18 = vadd.f32 %v1497_v13, %v6006_v22 }
 0x8bb   : > { %v1498_v20 = vadd.f32 %v1496_v17, %v6011_v25 }
 0x8bc   : > { %v1503_v21 = vsel %vm887_vm4, %v1499_v18, -inf }
 0x8bd   : > { %1504 = vmax.xlane.f32.xlu0 %v1503_v21  ;;  %v1500_v23 = vsel %vm887_vm4, %v1498_v20, -inf }
 0x8be   : > { %1501 = vmax.xlane.f32.xlu1 %v1500_v23 }
 0x94a   : > { %v1505_v24 = vpop.xlane.xlu0 %1504 }
 0x94b   : > { %v1507_v26 = vsub.f32 %v1499_v18, %v1505_v24  ;;  %v1502_v27 = vpop.xlane.xlu1 %1501 }
 0x94c   : > { %v1506_v28 = vsub.f32 %v1498_v20, %v1502_v27 }
 0x94d   : > { %v1510_v29 = vmul.f32 1.442695, %v1507_v26 }
 0x94e   : > { %v1508_v30 = vmul.f32 1.442695, %v1506_v28 }
 0x94f   : > { %5707 = vpow2.f32 %v1510_v29 }
 0x950   : > { %5709 = vpow2.f32 %v1508_v30 }
 0x959   : > { %v5708_v31 = vpop.eup %5707 }
 0x95a   : > { %v5710_v32 = vpop.eup %5709  ;;  %v1515_v33 = vsel %vm887_vm4, %v5708_v31, 0.0 }
 0x95b   : > { %1516 = vadd.xlane.f32.xlu1 %v1515_v33  ;;  %v1512_v34 = vsel %vm887_vm4, %v5710_v32, 0.0 }
 0x95c   : > { %1513 = vadd.xlane.f32.xlu0 %v1512_v34 }
 0x96c   : > { %5644 = vrot.lane.b32.xlu1 %v5988_v15, %s5779_s28  ;;  %s5790_s28 = smov 40  }
 0x970   : > { %1609 = vrot.lane.b32.xlu1 %v5982_v14, %s5780_s4 }
 0x972   : > { %5639 = vrot.lane.b32.xlu0 %v5988_v15, %s5781_s29  ;;  %s5792_s29 = smov 36  }
 0x976   : > { %1611 = vrot.lane.b32.xlu0 %v5980_v12, %s5780_s4  ;;  %s5791_s4 = smov 4  }
 0x9e8   : > { %v1517_v37 = vpop.xlane.xlu1 %1516 }
 0x9e9   : > { %5711 = vrcp.f32 %v1517_v37  ;;  %v1514_v38 = vpop.xlane.xlu0 %1513 }
 0x9ea   : > { %5713 = vrcp.f32 %v1514_v38 }
 0x9ec   : > { %v5645_v39 = vpop.permute.xlu1 %5644 }
 0x9ed   : > { %v5640_v40 = vpop.permute.xlu0 %5639  ;;  %v5647_v41 = vunpack.i.h.bf16 %v5645_v39  ;;  %v5646_v42 = vunpack.i.l.bf16 %v5645_v39 }
 0x9ee   : > { %v5642_v43 = vunpack.i.h.bf16 %v5640_v40  ;;  %v5641_v44 = vunpack.i.l.bf16 %v5640_v40 }
 0x9ef   : > { %v5196_v46 = vpack.c.bf16 %v5647_v41, %v5646_v42 }
 0x9f0   : > { %v5192_v45 = vpack.c.bf16 %v5642_v43, %v5641_v44  ;;  %v1610_v51 = vpop.permute.xlu1 %1609 }
 0x9f1   : > { %v1612_v52 = vpop.permute.xlu0 %1611 }
 0x9f2   : > { %5193 = vmatprep.subr.bf16.mxu0 %v5192_v45 }
 0x9f3   : > { %v5712_v47 = vpop.eup %5711  ;;  %5195 = vmatpush3.bf16.msra.mxu0 %v5192_v45 }
 0x9f4   : > { %v5714_v48 = vpop.eup %5713  ;;  %5198 = vmatprep.subr.msk.bf16.mxu0 %vm5993_vm3, %v5196_v46  ;;  %v1521_v50 = vmul.f32 %v5712_v47, %v5708_v31 }
 0x9f5   : > { %v1520_v49 = vmul.f32 %v5714_v48, %v5710_v32 }
 0x9f7   : > { %5078 = vmatprep.mubr.msk.f32.mxu0 %vm887_vm4, %v1520_v49 }
 0x9f8   : > { %5079 = vmatmul.mubr.msk.f32.vlgmr.msra.gmra.mrb[6].mxu0 %vm887_vm4, %v1521_v50 }
 0x9f9   : > { %5085 = vmatprep.mubr.msk.f32.mxu0 %vm799_vm2, %v1610_v51 }
 0x9fc   : > { %5201 = vmatpush3.bf16.xpose.msk.msra.mxu0 %vm5993_vm3, %v5196_v46 }
 0xa03   : > { %5086 = vmatmul.mubr.msk.f32.vlgmr.msra.gmra.mrb[8].mxu0 %vm799_vm2, %v1612_v52 }
 0xacb   : > { %v6097_v53 = vpop.f32.mrb[6].mxu0 }
 0xacc   : > { %v6099_v54 = vpop.f32.mrb[7].mxu0 }
 0xad6   : > { %v5087_v55 = vpop.f32.mrb[8].mxu0 }
 0xad7   : > { %v1701_v56 = vmul.f32 0.5, %v5087_v55  ;;  %v1691_v59 = vpop.f32.mrb[9].mxu0 }
 0xad8   : > { %v1700_v60 = vmul.f32 0.5, %v1691_v59 }
 0xad9   : > { %v1703_v61 = vadd.f32 %v1701_v56, %v6006_v22 }
 0xada   : > { %v1702_v62 = vadd.f32 %v1700_v60, %v6011_v25 }
 0xadb   : > { %v1707_v63 = vsel %vm887_vm4, %v1703_v61, -inf }
 0xadc   : > { %1708 = vmax.xlane.f32.xlu0 %v1707_v63  ;;  %v1704_v0 = vsel %vm887_vm4, %v1702_v62, -inf }
 0xadd   : > { %1705 = vmax.xlane.f32.xlu1 %v1704_v0 }
 0xb69   : > { %v1709_v1 = vpop.xlane.xlu0 %1708 }
 0xb6a   : > { %v1711_v2 = vsub.f32 %v1703_v61, %v1709_v1  ;;  %v1706_v3 = vpop.xlane.xlu1 %1705 }
 0xb6b   : > { %v1710_v4 = vsub.f32 %v1702_v62, %v1706_v3 }
 0xb6c   : > { %v1714_v5 = vmul.f32 1.442695, %v1711_v2 }
 0xb6d   : > { %v1712_v6 = vmul.f32 1.442695, %v1710_v4 }
 0xb6e   : > { %5715 = vpow2.f32 %v1714_v5 }
 0xb6f   : > { %5717 = vpow2.f32 %v1712_v6 }
 0xb78   : > { %v5716_v7 = vpop.eup %5715 }
 0xb79   : > { %v5718_v8 = vpop.eup %5717  ;;  %v1719_v11 = vsel %vm887_vm4, %v5716_v7, 0.0 }
 0xb7a   : > { %1720 = vadd.xlane.f32.xlu1 %v1719_v11  ;;  %v1716_v13 = vsel %vm887_vm4, %v5718_v8, 0.0 }
 0xb7b   : > { %1717 = vadd.xlane.f32.xlu0 %v1716_v13 }
 0xb8b   : > { %5654 = vrot.lane.b32.xlu1 %v5988_v15, %s5782_s27  ;;  %s5793_s27 = smov 8  }
 0xb8f   : > { %1813 = vrot.lane.b32.xlu1 %v5982_v14, %s5783_s24 }
 0xb91   : > { %5649 = vrot.lane.b32.xlu0 %v5988_v15, %s5784_s17  ;;  %s5795_s17 = smov 16  }
 0xb95   : > { %1815 = vrot.lane.b32.xlu0 %v5980_v12, %s5783_s24  ;;  %s5794_s24 = smov 12  }
 0xc07   : > { %v1721_v16 = vpop.xlane.xlu1 %1720 }
 0xc08   : > { %5719 = vrcp.f32 %v1721_v16  ;;  %v1718_v17 = vpop.xlane.xlu0 %1717 }
 0xc09   : > { %5721 = vrcp.f32 %v1718_v17 }
 0xc0b   : > { %v5655_v18 = vpop.permute.xlu1 %5654 }
 0xc0c   : > { %v5650_v20 = vpop.permute.xlu0 %5649  ;;  %v5657_v21 = vunpack.i.h.bf16 %v5655_v18  ;;  %v5656_v23 = vunpack.i.l.bf16 %v5655_v18 }
 0xc0d   : > { %v5652_v24 = vunpack.i.h.bf16 %v5650_v20  ;;  %v5651_v26 = vunpack.i.l.bf16 %v5650_v20 }
 0xc0e   : > { %v5206_v28 = vpack.c.bf16 %v5657_v21, %v5656_v23 }
 0xc0f   : > { %v5202_v27 = vpack.c.bf16 %v5652_v24, %v5651_v26  ;;  %v1814_v33 = vpop.permute.xlu1 %1813 }
 0xc10   : > { %v1816_v34 = vpop.permute.xlu0 %1815 }
 0xc11   : > { %5203 = vmatprep.subr.bf16.mxu1 %v5202_v27 }
 0xc12   : > { %v5720_v29 = vpop.eup %5719  ;;  %5205 = vmatpush3.bf16.msra.mxu1 %v5202_v27 }
 0xc13   : > { %v5722_v30 = vpop.eup %5721  ;;  %5208 = vmatprep.subr.msk.bf16.mxu1 %vm5993_vm3, %v5206_v28  ;;  %v1725_v32 = vmul.f32 %v5720_v29, %v5716_v7 }
 0xc14   : > { %v1724_v31 = vmul.f32 %v5722_v30, %v5718_v8 }
 0xc16   : > { %5092 = vmatprep.mubr.msk.f32.mxu1 %vm887_vm4, %v1724_v31 }
 0xc17   : > { %5093 = vmatmul.mubr.msk.f32.vlgmr.msra.gmra.mrb[10].mxu1 %vm887_vm4, %v1725_v32 }
 0xc18   : > { %5099 = vmatprep.mubr.msk.f32.mxu1 %vm799_vm2, %v1814_v33 }
 0xc1b   : > { %5211 = vmatpush3.bf16.xpose.msk.msra.mxu1 %vm5993_vm3, %v5206_v28 }
 0xc22   : > { %5100 = vmatmul.mubr.msk.f32.vlgmr.msra.gmra.mrb[12].mxu1 %vm799_vm2, %v1816_v34 }
 0xcea   : > { %v6119_v37 = vpop.f32.mrb[10].mxu1 }
 0xceb   : > { %v6121_v38 = vpop.f32.mrb[11].mxu1 }
 0xcf5   : > { %v5101_v39 = vpop.f32.mrb[12].mxu1 }
 0xcf6   : > { %v1905_v40 = vmul.f32 0.5, %v5101_v39  ;;  %v1895_v41 = vpop.f32.mrb[13].mxu1 }
 0xcf7   : > { %v1904_v42 = vmul.f32 0.5, %v1895_v41 }
 0xcf8   : > { %v1907_v43 = vadd.f32 %v1905_v40, %v6006_v22 }
 0xcf9   : > { %v1906_v44 = vadd.f32 %v1904_v42, %v6011_v25 }
 0xcfa   : > { %v1911_v45 = vsel %vm887_vm4, %v1907_v43, -inf }
 0xcfb   : > { %1912 = vmax.xlane.f32.xlu0 %v1911_v45  ;;  %v1908_v46 = vsel %vm887_vm4, %v1906_v44, -inf }
 0xcfc   : > { %1909 = vmax.xlane.f32.xlu1 %v1908_v46 }
 0xd88   : > { %v1913_v47 = vpop.xlane.xlu0 %1912 }
 0xd89   : > { %v1915_v48 = vsub.f32 %v1907_v43, %v1913_v47  ;;  %v1910_v49 = vpop.xlane.xlu1 %1909 }
 0xd8a   : > { %v1914_v50 = vsub.f32 %v1906_v44, %v1910_v49 }
 0xd8b   : > { %v1918_v51 = vmul.f32 1.442695, %v1915_v48 }
 0xd8c   : > { %v1916_v52 = vmul.f32 1.442695, %v1914_v50 }
 0xd8d   : > { %5723 = vpow2.f32 %v1918_v51 }
 0xd8e   : > { %5725 = vpow2.f32 %v1916_v52 }
 0xd97   : > { %v5724_v55 = vpop.eup %5723 }
 0xd98   : > { %v5726_v56 = vpop.eup %5725  ;;  %v1923_v59 = vsel %vm887_vm4, %v5724_v55, 0.0 }
 0xd99   : > { %1924 = vadd.xlane.f32.xlu1 %v1923_v59  ;;  %v1920_v60 = vsel %vm887_vm4, %v5726_v56, 0.0 }
 0xd9a   : > { %1921 = vadd.xlane.f32.xlu0 %v1920_v60 }
 0xdaa   : > { %5664 = vrot.lane.b32.xlu1 %v5988_v15, %s5785_s21  ;;  %s5796_s21 = smov 20  }
 0xdae   : > { %2017 = vrot.lane.b32.xlu1 %v5982_v14, %s5786_s30 }
 0xdb0   : > { %5659 = vrot.lane.b32.xlu0 %v5988_v15, %s5787_s20  ;;  %s5798_s20 = smov 28  }
 0xdb4   : > { %2019 = vrot.lane.b32.xlu0 %v5980_v12, %s5786_s30  ;;  %s5797_s30 = smov 24  }
 0xe26   : > { %v1925_v61 = vpop.xlane.xlu1 %1924 }
 0xe27   : > { %5727 = vrcp.f32 %v1925_v61  ;;  %v1922_v62 = vpop.xlane.xlu0 %1921 }
 0xe28   : > { %5729 = vrcp.f32 %v1922_v62 }
 0xe2a   : > { %v5665_v63 = vpop.permute.xlu1 %5664 }
 0xe2b   : > { %v5660_v0 = vpop.permute.xlu0 %5659  ;;  %v5667_v1 = vunpack.i.h.bf16 %v5665_v63  ;;  %v5666_v2 = vunpack.i.l.bf16 %v5665_v63 }
 0xe2c   : > { %v5662_v3 = vunpack.i.h.bf16 %v5660_v0  ;;  %v5661_v4 = vunpack.i.l.bf16 %v5660_v0 }
 0xe2d   : > { %v5216_v6 = vpack.c.bf16 %v5667_v1, %v5666_v2 }
 0xe2e   : > { %v5212_v5 = vpack.c.bf16 %v5662_v3, %v5661_v4  ;;  %v2018_v16 = vpop.permute.xlu1 %2017 }
 0xe2f   : > { %v2020_v17 = vpop.permute.xlu0 %2019 }
 0xe30   : > { %5213 = vmatprep.subr.bf16.mxu0 %v5212_v5 }
 0xe31   : > { %v5728_v7 = vpop.eup %5727  ;;  %5215 = vmatpush3.bf16.msra.mxu0 %v5212_v5 }
 0xe32   : > { %v5730_v8 = vpop.eup %5729  ;;  %5218 = vmatprep.subr.msk.bf16.mxu0 %vm5993_vm3, %v5216_v6  ;;  %v1929_v13 = vmul.f32 %v5728_v7, %v5724_v55 }
 0xe33   : > { %v1928_v11 = vmul.f32 %v5730_v8, %v5726_v56 }
 0xe35   : > { %5106 = vmatprep.mubr.msk.f32.mxu0 %vm887_vm4, %v1928_v11 }
 0xe36   : > { %5107 = vmatmul.mubr.msk.f32.vlgmr.msra.gmra.mrb[10].mxu0 %vm887_vm4, %v1929_v13 }
 0xe37   : > { %5113 = vmatprep.mubr.msk.f32.mxu0 %vm799_vm2, %v2018_v16 }
 0xe3a   : > { %5221 = vmatpush3.bf16.xpose.msk.msra.mxu0 %vm5993_vm3, %v5216_v6 }
 0xe41   : > { %5114 = vmatmul.mubr.msk.f32.vlgmr.msra.gmra.mrb[12].mxu0 %vm799_vm2, %v2020_v17 }
 0xf09   : > { %v6141_v18 = vpop.f32.mrb[10].mxu0 }
 0xf0a   : > { %v6143_v20 = vpop.f32.mrb[11].mxu0 }
 0xf14   : > { %v5115_v21 = vpop.f32.mrb[12].mxu0 }
 0xf15   : > { %v2109_v23 = vmul.f32 0.5, %v5115_v21  ;;  %v2099_v24 = vpop.f32.mrb[13].mxu0 }
 0xf16   : > { %v2108_v26 = vmul.f32 0.5, %v2099_v24 }
 0xf17   : > { %v2111_v27 = vadd.f32 %v2109_v23, %v6006_v22 }
 0xf18   : > { %v2110_v28 = vadd.f32 %v2108_v26, %v6011_v25  ;;  %v701_v26 = vld [vmem:[%s5910_s18 + $0x8] sm:$0xff] }
 0xf19   : > { %v2115_v29 = vsel %vm887_vm4, %v2111_v27, -inf }
 0xf1a   : > { %2116 = vmax.xlane.f32.xlu0 %v2115_v29  ;;  %v2112_v30 = vsel %vm887_vm4, %v2110_v28, -inf  ;;  %v703_v29 = vld [vmem:[%s5910_s18 + $0x18] sm:$0xff] }
 0xf1b   : > { %2113 = vmax.xlane.f32.xlu1 %v2112_v30 }
 0xfa7   : > { %v2117_v31 = vpop.xlane.xlu0 %2116 }
 0xfa8   : > { %v2119_v32 = vsub.f32 %v2111_v27, %v2117_v31  ;;  %v2114_v33 = vpop.xlane.xlu1 %2113  ;;  %v702_v27 = vld [vmem:[%s5910_s18 + $0x10] sm:$0xff] }
 0xfa9   : > { %v2118_v34 = vsub.f32 %v2110_v28, %v2114_v33  ;;  %v5240_v30 = vpack.c.bf16 %v703_v29, %v702_v27  ;;  %v2636_v27 = vld [vmem:[%s5928_s2 + $0x10] sm:$0xff] }
 0xfaa   : > { %v2122_v39 = vmul.f32 1.442695, %v2119_v32 }
 0xfab   : > { %v2120_v40 = vmul.f32 1.442695, %v2118_v34 }
 0xfac   : > { %5731 = vpow2.f32 %v2122_v39 }
 0xfad   : > { %5733 = vpow2.f32 %v2120_v40 }
 0xfb6   : > { %v5732_v41 = vpop.eup %5731 }
 0xfb7   : > { %v5734_v42 = vpop.eup %5733  ;;  %v2127_v43 = vsel %vm887_vm4, %v5732_v41, 0.0 }
 0xfb8   : > { %2128 = vadd.xlane.f32.xlu1 %v2127_v43  ;;  %v2124_v44 = vsel %vm887_vm4, %v5734_v42, 0.0 }
 0xfb9   : > { %2125 = vadd.xlane.f32.xlu0 %v2124_v44 }
 0xfc9   : > { %5674 = vrot.lane.b32.xlu1 %v5988_v15, %s5788_s16  ;;  %s6831_s16 = scalar_lea.vmem %s6797_s12, %s5897_s23 }
 0xfcd   : > { %2221 = vrot.lane.b32.xlu1 %v5982_v14, %s5789_s25 }
 0xfcf   : > { %5669 = vrot.lane.b32.xlu0 %v5988_v15, %s5790_s28 }
 0xfd3   : > { %2223 = vrot.lane.b32.xlu0 %v5980_v12, %s5789_s25  ;;  %s6828_s25 = scalar_lea.vmem %s6790_s5, %s5897_s23 }
0x1045   : > { %v2129_v45 = vpop.xlane.xlu1 %2128 }
0x1046   : > { %5735 = vrcp.f32 %v2129_v45  ;;  %v2126_v46 = vpop.xlane.xlu0 %2125 }
0x1047   : > { %5737 = vrcp.f32 %v2126_v46 }
0x1049   : > { %v5675_v47 = vpop.permute.xlu1 %5674 }
0x104a   : > { %v5670_v48 = vpop.permute.xlu0 %5669  ;;  %v5677_v49 = vunpack.i.h.bf16 %v5675_v47  ;;  %v5676_v50 = vunpack.i.l.bf16 %v5675_v47 }
0x104b   : > { %v5672_v51 = vunpack.i.h.bf16 %v5670_v48  ;;  %v5671_v52 = vunpack.i.l.bf16 %v5670_v48 }
0x104c   : > { %v5226_v56 = vpack.c.bf16 %v5677_v49, %v5676_v50 }
0x104d   : > { %v5222_v55 = vpack.c.bf16 %v5672_v51, %v5671_v52  ;;  %v2222_v61 = vpop.permute.xlu1 %2221 }
0x104e   : > { %v2224_v62 = vpop.permute.xlu0 %2223 }
0x104f   : > { %5223 = vmatprep.subr.bf16.mxu1 %v5222_v55 }
0x1050   : > { %v5736_v59 = vpop.eup %5735  ;;  %5225 = vmatpush3.bf16.msra.mxu1 %v5222_v55 }
0x1051   : > { %v5738_v14 = vpop.eup %5737  ;;  %5228 = vmatprep.subr.msk.bf16.mxu1 %vm5993_vm3, %v5226_v56  ;;  %v2133_v60 = vmul.f32 %v5736_v59, %v5732_v41 }
0x1052   : > { %v2132_v12 = vmul.f32 %v5738_v14, %v5734_v42 }
0x1054   : > { %5120 = vmatprep.mubr.msk.f32.mxu1 %vm887_vm4, %v2132_v12 }
0x1055   : > { %5121 = vmatmul.mubr.msk.f32.vlgmr.msra.gmra.mrb[14].mxu1 %vm887_vm4, %v2133_v60 }
0x1056   : > { %5127 = vmatprep.mubr.msk.f32.mxu1 %vm799_vm2, %v2222_v61 }
0x1059   : > { %5231 = vmatpush3.bf16.xpose.msk.msra.mxu1 %vm5993_vm3, %v5226_v56 }
0x1060   : > { %5128 = vmatmul.mubr.msk.f32.vlgmr.msra.gmra.mrb[16].mxu1 %vm799_vm2, %v2224_v62 }
0x1128   : > { %v5122_v63 = vpop.f32.mrb[14].mxu1 }
0x1129   : > { %v2212_v0 = vpop.f32.mrb[15].mxu1 }
0x1133   : > { %v5129_v1 = vpop.f32.mrb[16].mxu1 }
0x1134   : > { %v2313_v2 = vmul.f32 0.5, %v5129_v1  ;;  %v2303_v3 = vpop.f32.mrb[17].mxu1  ;;  %v4601_v1 = vld [vmem:[%s6828_s25] ss:$0 sm:$0xff] }
0x1135   : > { %v2312_v4 = vmul.f32 0.5, %v2303_v3 }
0x1136   : > { %v2315_v5 = vadd.f32 %v2313_v2, %v6006_v22 }
0x1137   : > { %v2314_v6 = vadd.f32 %v2312_v4, %v6011_v25 }
0x1138   : > { %v2319_v7 = vsel %vm887_vm4, %v2315_v5, -inf }
0x1139   : > { %2320 = vmax.xlane.f32.xlu0 %v2319_v7  ;;  %v2316_v8 = vsel %vm887_vm4, %v2314_v6, -inf }
0x113a   : > { %2317 = vmax.xlane.f32.xlu1 %v2316_v8  ;;  %v5756_v8 = vld [vmem:[%s6823_s8] sm:$0xff] }
0x11c6   : > { %v2321_v19 = vpop.xlane.xlu0 %2320 }
0x11c7   : > { %v2323_v11 = vsub.f32 %v2315_v5, %v2321_v19  ;;  %v2318_v13 = vpop.xlane.xlu1 %2317 }
0x11c8   : > { %v2322_v16 = vsub.f32 %v2314_v6, %v2318_v13  ;;  %v5755_v6 = vld [vmem:[%s6823_s8 + $0x8] sm:$0xff] }
0x11c9   : > { %v2326_v17 = vmul.f32 1.442695, %v2323_v11 }
0x11ca   : > { %v2324_v21 = vmul.f32 1.442695, %v2322_v16 }
0x11cb   : > { %5739 = vpow2.f32 %v2326_v17 }
0x11cc   : > { %5741 = vpow2.f32 %v2324_v21 }
0x11d5   : > { %v5740_v23 = vpop.eup %5739 }
0x11d6   : > { %v5742_v24 = vpop.eup %5741  ;;  %v2331_v22 = vsel %vm887_vm4, %v5740_v23, 0.0 }
0x11d7   : > { %2332 = vadd.xlane.f32.xlu1 %v2331_v22  ;;  %v2328_v25 = vsel %vm887_vm4, %v5742_v24, 0.0 }
0x11d8   : > { %2329 = vadd.xlane.f32.xlu0 %v2328_v25 }
0x11e8   : > { %2427 = vrot.lane.b32.xlu1 %v6055_v36, %s5791_s4 }
0x11ec   : > { %2429 = vrot.lane.b32.xlu1 %v6053_v35, %s5791_s4 }
0x11ee   : > { %5679 = vrot.lane.b32.xlu0 %v5988_v15, %s5792_s29 }
0x11f0   : > { %2437 = vrot.lane.b32.xlu1 %v6075_v9, %s5793_s27 }
0x11f2   : > { %2435 = vrot.lane.b32.xlu0 %v6077_v10, %s5793_s27 }
0x11f4   : > { %2445 = vrot.lane.b32.xlu1 %v6097_v53, %s5794_s24 }
0x11f6   : > { %2443 = vrot.lane.b32.xlu0 %v6099_v54, %s5794_s24 }
0x11f8   : > { %2453 = vrot.lane.b32.xlu1 %v6119_v37, %s5795_s17 }
0x11fa   : > { %2451 = vrot.lane.b32.xlu0 %v6121_v38, %s5795_s17 }
0x11fc   : > { %2461 = vrot.lane.b32.xlu1 %v6141_v18, %s5796_s21 }
0x11fe   : > { %2459 = vrot.lane.b32.xlu0 %v6143_v20, %s5796_s21  ;;  %v700_v20 = vld [vmem:[%s5910_s18] sm:$0xff]  ;;  %s6829_s21 = scalar_lea.vmem %s6791_s6, %s5897_s23  ;;  %s6830_s18 = scalar_lea.vmem %s6792_s7, %s5897_s23 }
0x11ff   : > { %v5236_v28 = vpack.c.bf16 %v701_v26, %v700_v20 }
0x1200   : > { %2469 = vrot.lane.b32.xlu1 %v5122_v63, %s5797_s30 }
0x1202   : > { %2467 = vrot.lane.b32.xlu0 %v2212_v0, %s5797_s30 }
0x1264   : > { %v2333_v15 = vpop.xlane.xlu1 %2332 }
0x1265   : > { %5743 = vrcp.f32 %v2333_v15  ;;  %v2330_v35 = vpop.xlane.xlu0 %2329 }
0x1266   : > { %5745 = vrcp.f32 %v2330_v35 }
0x1268   : > { %v2428_v33 = vpop.permute.xlu1 %2427 }
0x1269   : > { %v5680_v36 = vpop.permute.xlu0 %5679  ;;  %v2481_v47 = vsel %vm799_vm2, %v6033_v58, %v2428_v33 }
0x126a   : > { %v5682_v9 = vunpack.i.h.bf16 %v5680_v36  ;;  %v5681_v10 = vunpack.i.l.bf16 %v5680_v36 }
0x126c   : > { %v5232_v53 = vpack.c.bf16 %v5682_v9, %v5681_v10  ;;  %v2430_v34 = vpop.permute.xlu1 %2429  ;;  %v2635_v9 = vld [vmem:[%s5928_s2 + $0x8] sm:$0xff] }
0x126d   : > { %v2436_v40 = vpop.permute.xlu0 %2435  ;;  %v2482_v49 = vsel %vm799_vm2, %v6031_v57, %v2430_v34  ;;  %v2651_v10 = vld [vmem:[%s5928_s2 + $0x88] sm:$0xff]  ;;  %v2685_v34 = vld [vmem:[%s5928_s2 + $0x198] sm:$0xff] }
0x126e   : > { %5233 = vmatprep.subr.bf16.mxu0 %v5232_v53  ;;  %v2484_v50 = vsel %vm2483_vm5, %v2481_v47, %v2436_v40  ;;  %v2682_v40 = vld [vmem:[%s5928_s2 + $0x180] sm:$0xff]  ;;  %v2655_v47 = vld [vmem:[%s5928_s2 + $0xa8] sm:$0xff] }
0x126f   : > { %v5744_v54 = vpop.eup %5743  ;;  %5235 = vmatpush3.bf16.msra.mxu0 %v5232_v53  ;;  %v2637_v53 = vld [vmem:[%s5928_s2 + $0x18] sm:$0xff] }
0x1270   : > { %v5746_v37 = vpop.eup %5745  ;;  %v2337_v18 = vmul.f32 %v5744_v54, %v5740_v23  ;;  %5237 = vmatprep.subr.bf16.mxu0 %v5236_v28  ;;  %v2438_v39 = vpop.permute.xlu1 %2437  ;;  %v5244_v54 = vpack.c.bf16 %v2651_v10, %v2635_v9  ;;  %v2659_v9 = vld [vmem:[%s5928_s2 + $0xc8] sm:$0xff]  ;;  %v2645_v10 = vld [vmem:[%s5928_s2 + $0x58] sm:$0xff] }
0x1271   : > { %v2336_v38 = vmul.f32 %v5746_v37, %v5742_v24  ;;  %v2444_v42 = vpop.permute.xlu0 %2443  ;;  %v2485_v52 = vsel %vm2483_vm5, %v2482_v49, %v2438_v39  ;;  %v2653_v37 = vld [vmem:[%s5928_s2 + $0x98] sm:$0xff]  ;;  %v2666_v39 = vld [vmem:[%s5928_s2 + $0x100] sm:$0xff] }
0x1272   : > { %v2487_v55 = vsel %vm2486_vm6, %v2484_v50, %v2444_v42  ;;  %v5252_v20 = vpack.c.bf16 %v2653_v37, %v2637_v53  ;;  %5245 = vmatprep.subr.bf16.mxu1 %v5244_v54  ;;  %v5250_v42 = vpack.c.bf16 %v2682_v40, %v2666_v39  ;;  %v2657_v50 = vld [vmem:[%s5928_s2 + $0xb8] sm:$0xff]  ;;  %v2642_v37 = vld [vmem:[%s5928_s2 + $0x40] sm:$0xff] }
0x1273   : > { %5134 = vmatprep.mubr.msk.f32.mxu0 %vm887_vm4, %v2336_v38  ;;  %v2634_v38 = vld [vmem:[%s5928_s2] sm:$0xff] }
0x1274   : > { %5135 = vmatmul.mubr.msk.f32.vlgmr.msra.gmra.mrb[14].mxu0 %vm887_vm4, %v2337_v18  ;;  %v2446_v41 = vpop.permute.xlu1 %2445  ;;  %v2650_v18 = vld [vmem:[%s5928_s2 + $0x80] sm:$0xff] }
0x1275   : > { %5239 = vmatpush3.bf16.msra.mxu0 %v5236_v28  ;;  %v2452_v44 = vpop.permute.xlu0 %2451  ;;  %v2488_v56 = vsel %vm2486_vm6, %v2485_v52, %v2446_v41  ;;  %v5246_v26 = vpack.c.bf16 %v2650_v18, %v2634_v38  ;;  %v2652_v28 = vld [vmem:[%s5928_s2 + $0x90] sm:$0xff]  ;;  %v2658_v18 = vld [vmem:[%s5928_s2 + $0xc0] sm:$0xff] }
0x1276   : > { %5241 = vmatprep.subr.bf16.mxu0 %v5240_v30  ;;  %v2489_v59 = vsel %vm887_vm4, %v2487_v55, %v2452_v44  ;;  %v5254_v29 = vpack.c.bf16 %v2652_v28, %v2636_v27  ;;  %v2684_v44 = vld [vmem:[%s5928_s2 + $0x190] sm:$0xff]  ;;  %v2674_v39 = vld [vmem:[%s5928_s2 + $0x140] sm:$0xff] }
0x1277   : > { %5247 = vmatpush1.bf16.msra.mxu1 %v5246_v26  ;;  %v2660_v26 = vld [vmem:[%s5928_s2 + $0xd0] sm:$0xff]  ;;  %v2690_v40 = vld [vmem:[%s5928_s2 + $0x1c0] sm:$0xff] }
0x1278   : > { %v2454_v43 = vpop.permute.xlu1 %2453 }
0x1279   : > { %5243 = vmatpush3.bf16.msra.mxu0 %v5240_v30  ;;  %v2460_v46 = vpop.permute.xlu0 %2459  ;;  %v2490_v14 = vsel %vm887_vm4, %v2488_v56, %v2454_v43  ;;  %v2667_v30 = vld [vmem:[%s5928_s2 + $0x108] sm:$0xff]  ;;  %v2668_v43 = vld [vmem:[%s5928_s2 + $0x110] sm:$0xff] }
0x127a   : > { %v2492_v12 = vsel %vm2491_vm7, %v2489_v59, %v2460_v46  ;;  %5253 = vmatprep.subr.bf16.mxu0 %v5252_v20  ;;  %v2639_v46 = vld [vmem:[%s5928_s2 + $0x28] sm:$0xff]  ;;  %v2644_v20 = vld [vmem:[%s5928_s2 + $0x50] sm:$0xff] }
0x127b   : > { %v5260_v49 = vpack.c.bf16 %v2655_v47, %v2639_v46  ;;  %v2663_v46 = vld [vmem:[%s5928_s2 + $0xe8] sm:$0xff]  ;;  %v2649_v47 = vld [vmem:[%s5928_s2 + $0x78] sm:$0xff] }
0x127c   : > { %v2462_v45 = vpop.permute.xlu1 %2461 }
0x127d   : > { %v2468_v51 = vpop.permute.xlu0 %2467  ;;  %v2493_v58 = vsel %vm2491_vm7, %v2490_v14, %v2462_v45  ;;  %v5258_v45 = vpack.c.bf16 %v2684_v44, %v2668_v43 }
0x127e   : > { %v2495_v61 = vsel %vm2494_vm8, %v2492_v12, %v2468_v51  ;;  %v5799_v51 = vmov 0.0  }
0x127f   : > { %3109 = vmatprep.mubr.f32.mxu1 %v5799_v51 }
0x1280   : > { %v2470_v48 = vpop.permute.xlu1 %2469 }
0x1281   : > { %v2496_v63 = vsel %vm2494_vm8, %v2493_v58, %v2470_v48  ;;  %v2641_v48 = vld [vmem:[%s5928_s2 + $0x38] sm:$0xff] }
0x1282   : > { %v5268_v52 = vpack.c.bf16 %v2657_v50, %v2641_v48  ;;  %v2665_v48 = vld [vmem:[%s5928_s2 + $0xf8] sm:$0xff] }
0x1347   : > { %v5136_v31 = vpop.f32.mrb[14].mxu0 }
0x1348   : > { %2477 = vrot.lane.b32.xlu1 %v5136_v31, %s5798_s20  ;;  %v2416_v32 = vpop.f32.mrb[15].mxu0  ;;  %v2683_v31 = vld [vmem:[%s5928_s2 + $0x188] sm:$0xff] }
0x1349   : > { %2475 = vrot.lane.b32.xlu0 %v2416_v32, %s5798_s20  ;;  %v2669_v32 = vld [vmem:[%s5928_s2 + $0x118] sm:$0xff]  ;;  %v5248_v33 = vpack.c.bf16 %v2683_v31, %v2667_v30  ;;  %v2691_v30 = vld [vmem:[%s5928_s2 + $0x1c8] sm:$0xff] }
0x134a   : > { %v5256_v41 = vpack.c.bf16 %v2685_v34, %v2669_v32  ;;  %v2677_v31 = vld [vmem:[%s5928_s2 + $0x158] sm:$0xff]  ;;  %v5286_v34 = vpack.c.bf16 %v2660_v26, %v2644_v20  ;;  %v2734_v26 = vld [vmem:[%s5940_s15 + $0x110] sm:$0xff] }
0x134b   : > { %5249 = vmatprep.subr.bf16.mxu1 %v5248_v33  ;;  %v2693_v32 = vld [vmem:[%s5928_s2 + $0x1d8] sm:$0xff]  ;;  %v5278_v33 = vpack.c.bf16 %v2658_v18, %v2642_v37 }
0x134c   : > { %5251 = vmatpush1.bf16.msra.mxu1 %v5250_v42  ;;  %v2692_v42 = vld [vmem:[%s5928_s2 + $0x1d0] sm:$0xff]  ;;  %v5288_v44 = vpack.c.bf16 %v2693_v32, %v2677_v31  ;;  %v2703_v37 = vld [vmem:[%s5940_s15 + $0x18] sm:$0xff]  ;;  %v2753_v31 = vld [vmem:[%s5940_s15 + $0x1a8] sm:$0xff] }
0x134d   : > { %5261 = vmatprep.subr.bf16.mxu1 %v5260_v49  ;;  %v5282_v49 = vpack.c.bf16 %v2690_v40, %v2674_v39  ;;  %v2705_v39 = vld [vmem:[%s5940_s15 + $0x28] sm:$0xff] }
0x13ba   : > { %v2478_v60 = vpop.permute.xlu1 %2477 }
0x13bb   : > { %v2476_v62 = vpop.permute.xlu0 %2475  ;;  %v2499_v0 = vsel %vm2497_vm9, %v2496_v63, %v2478_v60 }
0x13bc   : > { %v2498_v57 = vsel %vm2497_vm9, %v2495_v61, %v2476_v62  ;;  %v4604_v61 = vld [vmem:[%s6829_s21] ss:$0 sm:$0xff]  ;;  %s6833_s21 = sld [smem:[#allocation9_spill]] (!%p4625_p5) }
0x13bd   : > { %5145 = vmatprep.mubr.msk.f32.mxu0 %vm711_vm1, %v2498_v57  ;;  %v2638_v62 = vld [vmem:[%s5928_s2 + $0x20] sm:$0xff] }
0x13be   : > { %5146 = vmatmul.mubr.msk.f32.vlgmr.msra.gmra.mrb[16].mxu0 %vm711_vm1, %v2499_v0  ;;  %v2654_v57 = vld [vmem:[%s5928_s2 + $0xa0] sm:$0xff]  ;;  %v2640_v0 = vld [vmem:[%s5928_s2 + $0x30] sm:$0xff] }
0x13bf   : > { %5255 = vmatpush1.bf16.msra.mxu0 %v5254_v29  ;;  %3186 = vmatprep.mubr.f32.mxu0 %v5799_v51  ;;  %v2675_v29 = vld [vmem:[%s5928_s2 + $0x148] sm:$0xff] }
0x13c0   : > { %5257 = vmatprep.subr.bf16.mxu0 %v5256_v41  ;;  %v2676_v41 = vld [vmem:[%s5928_s2 + $0x150] sm:$0xff]  ;;  %v5280_v43 = vpack.c.bf16 %v2691_v30, %v2675_v29  ;;  %v2721_v29 = vld [vmem:[%s5940_s15 + $0xa8] sm:$0xff]  ;;  %v2752_v30 = vld [vmem:[%s5940_s15 + $0x1a0] sm:$0xff] }
0x13c1   : > { %v5290_v50 = vpack.c.bf16 %v2692_v42, %v2676_v41  ;;  %v5348_v41 = vpack.c.bf16 %v2753_v31, %v2752_v30  ;;  %v2736_v42 = vld [vmem:[%s5940_s15 + $0x120] sm:$0xff]  ;;  %v2762_v30 = vld [vmem:[%s5940_s15 + $0x1f0] sm:$0xff] }
0x13c3   : > { %5259 = vmatpush1.bf16.msra.mxu0 %v5258_v45  ;;  %v2647_v45 = vld [vmem:[%s5928_s2 + $0x68] sm:$0xff] }
0x13c4   : > { %5269 = vmatprep.subr.bf16.mxu0 %v5268_v52  ;;  %v2646_v52 = vld [vmem:[%s5928_s2 + $0x60] sm:$0xff] }
0x1491   : > { %v5147_v2 = vpop.f32.mrb[16].mxu0 }
0x1492   : > { %v2584_v3 = vadd.f32 %v5147_v2, %v4601_v1  ;;  %v2578_v4 = vpop.f32.mrb[17].mxu0  ;;  %v4605_v2 = vld [vmem:[%s6830_s18] ss:$0 sm:$0xff]  ;;  %s6834_s18 = sld [smem:[#allocation10_spill]] (!%p4625_p5) }
0x1493   : > { %v2579_v5 = vadd.f32 %v4601_v1, %v2578_v4  ;;  %v2656_v1 = vld [vmem:[%s5928_s2 + $0xb0] sm:$0xff] }
0x1494   : > { %v2588_v7 = vadd.f32 %v5755_v6, %v2584_v3  ;;  %v2671_v3 = vld [vmem:[%s5928_s2 + $0x128] sm:$0xff]  ;;  %v2673_v6 = vld [vmem:[%s5928_s2 + $0x138] sm:$0xff] }
0x1495   : > { %v2587_v19 = vadd.f32 %v5756_v8, %v2579_v5  ;;  %v2687_v5 = vld [vmem:[%s5928_s2 + $0x1a8] sm:$0xff] }
0x1496   : > { %v2594_v11 = vsel %vm711_vm1, %v2588_v7, 0.0 }
0x1497   : > { %2595 = vadd.xlane.f32.xlu1 %v2594_v11  ;;  %v2591_v13 = vsel %vm711_vm1, %v2587_v19, 0.0  ;;  %v5270_v11 = vpack.c.bf16 %v2656_v1, %v2640_v0  ;;  %v2678_v0 = vld [vmem:[%s5928_s2 + $0x160] sm:$0xff] }
0x1498   : > { %2592 = vadd.xlane.f32.xlu0 %v2591_v13  ;;  %v2670_v13 = vld [vmem:[%s5928_s2 + $0x120] sm:$0xff] }
0x1499   : > { %v2694_v1 = vld [vmem:[%s5928_s2 + $0x1e0] sm:$0xff] }
0x1524   : > { %v2596_v16 = vpop.xlane.xlu1 %2595 }
0x1525   : > { %v2599_v17 = vmul.f32 0.03125, %v2596_v16  ;;  %v2593_v21 = vpop.xlane.xlu0 %2592 }
0x1526   : > { %v2598_v23 = vmul.f32 0.03125, %v2593_v21  ;;  %v2686_v21 = vld [vmem:[%s5928_s2 + $0x1a0] sm:$0xff] }
0x1527   : > { %v6207_v24 = vsub.f32 %v2588_v7, %v2599_v17  ;;  %v2689_v7 = vld [vmem:[%s5928_s2 + $0x1b8] sm:$0xff]  ;;  %v5266_v53 = vpack.c.bf16 %v2686_v21, %v2670_v13  ;;  %v2701_v21 = vld [vmem:[%s5940_s15 + $0x8] sm:$0xff] }
0x1528   : > { %v2600_v22 = vsub.f32 %v2587_v19, %v2598_v23  ;;  %v5262_v19 = vpack.c.bf16 %v2654_v57, %v2638_v62  ;;  %v2672_v23 = vld [vmem:[%s5928_s2 + $0x130] sm:$0xff]  ;;  %v2697_v62 = vld [vmem:[%s5928_s2 + $0x1f8] sm:$0xff] }
0x1529   : > { %v2603_v35 = vmul.f32 %v6207_v24, %v6207_v24 }
0x152a   : > { %v2602_v25 = vmul.f32 %v2600_v22, %v2600_v22 }
0x152b   : > { %v2607_v36 = vsel %vm711_vm1, %v2603_v35, 0.0  ;;  %v2643_v35 = vld [vmem:[%s5928_s2 + $0x48] sm:$0xff] }
0x152c   : > { %v2604_v15 = vsel %vm711_vm1, %v2602_v25, 0.0  ;;  %v5264_v25 = vpack.c.bf16 %v2687_v5, %v2671_v3  ;;  %v5276_v27 = vpack.c.bf16 %v2659_v9, %v2643_v35  ;;  %v2696_v3 = vld [vmem:[%s5928_s2 + $0x1f0] sm:$0xff] }
0x152d   : > { %2605 = vadd.xlane.f32.xlu0 %v2604_v15  ;;  %v5272_v15 = vpack.c.bf16 %v2689_v7, %v2673_v6  ;;  %v2716_v6 = vld [vmem:[%s5940_s15 + $0x80] sm:$0xff]  ;;  %v2717_v7 = vld [vmem:[%s5940_s15 + $0x88] sm:$0xff]  ;;  %v2718_v35 = vld [vmem:[%s5940_s15 + $0x90] sm:$0xff] }
0x152e   : > { %v2750_v9 = vld [vmem:[%s5940_s15 + $0x190] sm:$0xff] }
0x1531   : > { %2608 = vadd.xlane.f32.xlu0 %v2607_v36 }
0x15ba   : > { %v2606_v55 = vpop.xlane.xlu0 %2605 }
0x15bb   : > { %v2610_v56 = vmul.f32 0.03125, %v2606_v55  ;;  %v2662_v55 = vld [vmem:[%s5928_s2 + $0xe0] sm:$0xff] }
0x15bd   : > { %v2612_v59 = vadd.f32 1e-05, %v2610_v56  ;;  %v2648_v56 = vld [vmem:[%s5928_s2 + $0x70] sm:$0xff] }
0x15be   : > { %v2609_v14 = vpop.xlane.xlu0 %2608 }
0x15bf   : > { %5747 = vrsqrt.f32 %v2612_v59  ;;  %v2611_v12 = vmul.f32 0.03125, %v2609_v14  ;;  %v2664_v59 = vld [vmem:[%s5928_s2 + $0xf0] sm:$0xff]  ;;  %v5292_v14 = vpack.c.bf16 %v2663_v46, %v2647_v45  ;;  %v2755_v46 = vld [vmem:[%s5940_s15 + $0x1b8] sm:$0xff] }
0x15c0   : > { %v5302_v57 = vpack.c.bf16 %v2664_v59, %v2648_v56  ;;  %v2754_v45 = vld [vmem:[%s5940_s15 + $0x1b0] sm:$0xff]  ;;  %v2739_v59 = vld [vmem:[%s5940_s15 + $0x138] sm:$0xff] }
0x15c1   : > { %v2613_v60 = vadd.f32 1e-05, %v2611_v12  ;;  %v5300_v12 = vpack.c.bf16 %v2665_v48, %v2649_v47  ;;  %v2738_v56 = vld [vmem:[%s5940_s15 + $0x130] sm:$0xff] }
0x15c3   : > { %5749 = vrsqrt.f32 %v2613_v60  ;;  %v2679_v60 = vld [vmem:[%s5928_s2 + $0x168] sm:$0xff] }
0x15c9   : > { %v5748_v58 = vpop.eup %5747 }
0x15ca   : > { %v2616_v63 = vmul.f32 %v5748_v58, %v2600_v22  ;;  %v2688_v22 = vld [vmem:[%s5928_s2 + $0x1b0] sm:$0xff]  ;;  %v2695_v58 = vld [vmem:[%s5928_s2 + $0x1e8] sm:$0xff] }
0x15cb   : > { %v5274_v54 = vpack.c.bf16 %v2688_v22, %v2672_v23  ;;  %v5308_v23 = vpack.c.bf16 %v2717_v7, %v2716_v6  ;;  %v2758_v6 = vld [vmem:[%s5940_s15 + $0x1d0] sm:$0xff]  ;;  %v2759_v7 = vld [vmem:[%s5940_s15 + $0x1d8] sm:$0xff] }
0x15cc   : > { %v2624_v4 = vmul.f32 %v4604_v61, %v2616_v63  ;;  %v5294_v63 = vpack.c.bf16 %v2662_v55, %v2646_v52  ;;  %v5352_v55 = vpack.c.bf16 %v2755_v46, %v2754_v45  ;;  %v2812_v45 = vld [vmem:[%s5940_s15 + $0x380] sm:$0xff] }
0x15cd   : > { %v5750_v8 = vpop.eup %5749 }
0x15ce   : > { %v6254_v16 = vadd.f32 %v4605_v2, %v2624_v4  ;;  %v2617_v17 = vmul.f32 %v5750_v8, %v6207_v24  ;;  %v2661_v24 = vld [vmem:[%s5928_s2 + $0xd8] sm:$0xff]  ;;  %v5296_v4 = vpack.c.bf16 %v2695_v58, %v2679_v60  ;;  %v2748_v8 = vld [vmem:[%s5940_s15 + $0x180] sm:$0xff]  ;;  %v2757_v58 = vld [vmem:[%s5940_s15 + $0x1c8] sm:$0xff] }
0x15cf   : > { %v5284_v28 = vpack.c.bf16 %v2661_v24, %v2645_v10  ;;  %v2751_v10 = vld [vmem:[%s5940_s15 + $0x198] sm:$0xff]  ;;  %v2756_v60 = vld [vmem:[%s5940_s15 + $0x1c0] sm:$0xff] }
0x15d0   : > { %v2625_v36 = vmul.f32 %v4604_v61, %v2617_v17  ;;  %4606 = vmatmul.mubr.msk.f32.vlgmr.msra.gmra.mrb[18].mxu1 %vm711_vm1, %v6254_v16  ;;  %4608 = vmatmul.mubr.msk.f32.vlgmr.msra.gmra.mrb[18].mxu0 %vm711_vm1, %v6254_v16  ;;  %v2681_v61 = vld [vmem:[%s5928_s2 + $0x178] sm:$0xff]  ;;  %v2700_v17 = vld [vmem:[%s5940_s15] sm:$0xff]  ;;  %v5344_v20 = vpack.c.bf16 %v2751_v10, %v2750_v9 }
0x15d1   : > { %5263 = vmatpush1.bf16.msra.mxu1 %v5262_v19  ;;  %5271 = vmatpush1.bf16.msra.mxu0 %v5270_v11  ;;  %v5304_v5 = vpack.c.bf16 %v2697_v62, %v2681_v61  ;;  %v2749_v19 = vld [vmem:[%s5940_s15 + $0x188] sm:$0xff]  ;;  %v5298_v11 = vpack.c.bf16 %v2694_v1, %v2678_v0  ;;  %v5310_v24 = vpack.c.bf16 %v2701_v21, %v2700_v17 }
0x15d2   : > { %v6269_v38 = vadd.f32 %v4605_v2, %v2625_v36  ;;  %3115 = vmatprep.mubr.f32.mxu1 %v5799_v51  ;;  %3192 = vmatprep.mubr.f32.mxu0 %v5799_v51  ;;  %v2680_v2 = vld [vmem:[%s5928_s2 + $0x170] sm:$0xff]  ;;  %v5340_v22 = vpack.c.bf16 %v2749_v19, %v2748_v8  ;;  %v2719_v36 = vld [vmem:[%s5940_s15 + $0x98] sm:$0xff]  ;;  %v5354_v62 = vpack.c.bf16 %v2739_v59, %v2738_v56  ;;  %v6413_v56 = vld [vmem:[%s5934_s19] sm:$0xff] }
0x15d3   : > { %5265 = vmatprep.subr.bf16.mxu1 %v5264_v25  ;;  %5273 = vmatprep.subr.bf16.mxu0 %v5272_v15  ;;  %v5306_v13 = vpack.c.bf16 %v2696_v3, %v2680_v2  ;;  %v2732_v25 = vld [vmem:[%s5940_s15 + $0x100] sm:$0xff]  ;;  %v2733_v15 = vld [vmem:[%s5940_s15 + $0x108] sm:$0xff]  ;;  %v5312_v18 = vpack.c.bf16 %v2719_v36, %v2718_v35  ;;  %v5356_v1 = vpack.c.bf16 %v2757_v58, %v2756_v60 }
0x15d4   : > { %4607 = vmatmul.mubr.msk.f32.gmra.mrb[20].mxu1 %vm711_vm1, %v6269_v38  ;;  %4609 = vmatmul.mubr.msk.f32.gmra.mrb[20].mxu0 %vm711_vm1, %v6269_v38  ;;  %v2740_v2 = vld [vmem:[%s5940_s15 + $0x140] sm:$0xff]  ;;  %v2741_v3 = vld [vmem:[%s5940_s15 + $0x148] sm:$0xff]  ;;  %v5360_v21 = vpack.c.bf16 %v2759_v7, %v2758_v6 }
0x15d5   : > { %5267 = vmatpush1.bf16.msra.mxu1 %v5266_v53  ;;  %5275 = vmatpush1.bf16.msra.mxu0 %v5274_v54  ;;  %v5342_v53 = vpack.c.bf16 %v2733_v15, %v2732_v25  ;;  %v2702_v54 = vld [vmem:[%s5940_s15 + $0x10] sm:$0xff]  ;;  %v5358_v19 = vpack.c.bf16 %v2741_v3, %v2740_v2  ;;  %v2728_v25 = vld [vmem:[%s5940_s15 + $0xe0] sm:$0xff]  ;;  %v2729_v15 = vld [vmem:[%s5940_s15 + $0xe8] sm:$0xff] }
0x15d6   : > { %3263 = vmatprep.mubr.f32.mxu1 %v5799_v51  ;;  %3340 = vmatprep.mubr.f32.mxu0 %v5799_v51  ;;  %v5314_v32 = vpack.c.bf16 %v2703_v37, %v2702_v54  ;;  %v2760_v35 = vld [vmem:[%s5940_s15 + $0x1e0] sm:$0xff]  ;;  %v2761_v36 = vld [vmem:[%s5940_s15 + $0x1e8] sm:$0xff] }
0x15d7   : > { %5277 = vmatprep.subr.bf16.mxu1 %v5276_v27  ;;  %5285 = vmatprep.subr.bf16.mxu0 %v5284_v28  ;;  %v2735_v27 = vld [vmem:[%s5940_s15 + $0x118] sm:$0xff]  ;;  %v2720_v28 = vld [vmem:[%s5940_s15 + $0xa0] sm:$0xff]  ;;  %v5364_v54 = vpack.c.bf16 %v2761_v36, %v2760_v35  ;;  %v2713_v37 = vld [vmem:[%s5940_s15 + $0x68] sm:$0xff] }
0x15d8   : > { %4610 = vmatmul.mubr.msk.f32.vlgmr.msra.gmra.mrb[22].mxu1 %vm711_vm1, %v6254_v16  ;;  %4612 = vmatmul.mubr.msk.f32.vlgmr.msra.gmra.mrb[22].mxu0 %vm711_vm1, %v6254_v16  ;;  %v5316_v40 = vpack.c.bf16 %v2721_v29, %v2720_v28  ;;  %v2730_v28 = vld [vmem:[%s5940_s15 + $0xf0] sm:$0xff]  ;;  %v2731_v29 = vld [vmem:[%s5940_s15 + $0xf8] sm:$0xff]  ;;  %v2796_v2 = vld [vmem:[%s5940_s15 + $0x300] sm:$0xff] }
0x15d9   : > { %5279 = vmatpush1.bf16.msra.mxu1 %v5278_v33  ;;  %5287 = vmatpush1.bf16.msra.mxu0 %v5286_v34  ;;  %v5346_v33 = vpack.c.bf16 %v2735_v27, %v2734_v26  ;;  %v2704_v34 = vld [vmem:[%s5940_s15 + $0x20] sm:$0xff]  ;;  %v5336_v31 = vpack.c.bf16 %v2731_v29, %v2730_v28  ;;  %v2797_v3 = vld [vmem:[%s5940_s15 + $0x308] sm:$0xff]  ;;  %v2766_v35 = vld [vmem:[%s5940_s15 + $0x210] sm:$0xff] }
0x15da   : > { %3269 = vmatprep.mubr.f32.mxu1 %v5799_v51  ;;  %3346 = vmatprep.mubr.f32.mxu0 %v5799_v51  ;;  %v5318_v47 = vpack.c.bf16 %v2705_v39, %v2704_v34  ;;  %v2715_v34 = vld [vmem:[%s5940_s15 + $0x78] sm:$0xff] }
0x15db   : > { %5281 = vmatprep.subr.bf16.mxu1 %v5280_v43  ;;  %5289 = vmatprep.subr.bf16.mxu0 %v5288_v44  ;;  %v2737_v43 = vld [vmem:[%s5940_s15 + $0x128] sm:$0xff]  ;;  %v2722_v44 = vld [vmem:[%s5940_s15 + $0xb0] sm:$0xff] }
0x15dc   : > { %4611 = vmatmul.mubr.msk.f32.gmra.mrb[24].mxu1 %vm711_vm1, %v6269_v38  ;;  %4613 = vmatmul.mubr.msk.f32.gmra.mrb[24].mxu0 %vm711_vm1, %v6269_v38  ;;  %v5350_v48 = vpack.c.bf16 %v2737_v43, %v2736_v42  ;;  %v2747_v42 = vld [vmem:[%s5940_s15 + $0x178] sm:$0xff] }
0x15dd   : > { %5283 = vmatpush1.bf16.msra.mxu1 %v5282_v49  ;;  %5291 = vmatpush1.bf16.msra.mxu0 %v5290_v50  ;;  %v2706_v49 = vld [vmem:[%s5940_s15 + $0x30] sm:$0xff]  ;;  %v2707_v50 = vld [vmem:[%s5940_s15 + $0x38] sm:$0xff] }
0x15de   : > { %3417 = vmatprep.mubr.f32.mxu1 %v5799_v51  ;;  %3494 = vmatprep.mubr.f32.mxu0 %v5799_v51  ;;  %v5322_v61 = vpack.c.bf16 %v2707_v50, %v2706_v49  ;;  %v2959_v49 = vlaneseq }
0x15df   : > { %5293 = vmatprep.subr.bf16.mxu1 %v5292_v14  ;;  %5301 = vmatprep.subr.bf16.mxu0 %v5300_v12  ;;  %v2724_v14 = vld [vmem:[%s5940_s15 + $0xc0] sm:$0xff]  ;;  %v2725_v12 = vld [vmem:[%s5940_s15 + $0xc8] sm:$0xff] }
0x15e0   : > { %4614 = vmatmul.mubr.msk.f32.vlgmr.msra.gmra.mrb[26].mxu1 %vm711_vm1, %v6254_v16  ;;  %4616 = vmatmul.mubr.msk.f32.vlgmr.msra.gmra.mrb[26].mxu0 %vm711_vm1, %v6254_v16  ;;  %v5324_v0 = vpack.c.bf16 %v2725_v12, %v2724_v14  ;;  %v6408_v50 = vshrl.u32 %v2959_v49, 7 }
0x15e1   : > { %5295 = vmatpush1.bf16.msra.mxu1 %v5294_v63  ;;  %5303 = vmatpush1.bf16.msra.mxu0 %v5302_v57  ;;  %v2708_v63 = vld [vmem:[%s5940_s15 + $0x40] sm:$0xff]  ;;  %v2709_v57 = vld [vmem:[%s5940_s15 + $0x48] sm:$0xff] }
0x15e2   : > { %3423 = vmatprep.mubr.f32.mxu1 %v5799_v51  ;;  %3500 = vmatprep.mubr.f32.mxu0 %v5799_v51  ;;  %v5326_v8 = vpack.c.bf16 %v2709_v57, %v2708_v63  ;;  %v2965_v59 = vsub.s32 1, %v6408_v50  ;;  %v2973_v14 = vsub.s32 3, %v6408_v50  ;;  %v2765_v63 = vld [vmem:[%s5940_s15 + $0x208] sm:$0xff]  ;;  %v2981_v57 = vsub.s32 5, %v6408_v50 }
0x15e3   : > { %5297 = vmatprep.subr.bf16.mxu1 %v5296_v4  ;;  %5305 = vmatprep.subr.bf16.mxu0 %v5304_v5  ;;  %v2726_v4 = vld [vmem:[%s5940_s15 + $0xd0] sm:$0xff]  ;;  %v2727_v5 = vld [vmem:[%s5940_s15 + $0xd8] sm:$0xff] }
0x15e4   : > { %4615 = vmatmul.mubr.msk.f32.gmra.mrb[28].mxu1 %vm711_vm1, %v6269_v38  ;;  %4617 = vmatmul.mubr.msk.f32.gmra.mrb[28].mxu0 %vm711_vm1, %v6269_v38  ;;  %v5328_v17 = vpack.c.bf16 %v2727_v5, %v2726_v4  ;;  %v2966_v58 = vrot.slane %v6413_v56, %v2965_v59  ;;  %v2782_v4 = vld [vmem:[%s5940_s15 + $0x290] sm:$0xff] }
0x15e5   : > { %5299 = vmatpush1.bf16.msra.mxu1 %v5298_v11  ;;  %5307 = vmatpush1.bf16.msra.mxu0 %v5306_v13  ;;  %v2710_v11 = vld [vmem:[%s5940_s15 + $0x50] sm:$0xff]  ;;  %v2711_v13 = vld [vmem:[%s5940_s15 + $0x58] sm:$0xff] }
0x15e6   : > { %3571 = vmatprep.mubr.f32.mxu1 %v5799_v51  ;;  %3648 = vmatprep.mubr.f32.mxu0 %v5799_v51  ;;  %v5330_v9 = vpack.c.bf16 %v2711_v13, %v2710_v11  ;;  %v2814_v11 = vld [vmem:[%s5940_s15 + $0x390] sm:$0xff]  ;;  %v2815_v13 = vld [vmem:[%s5940_s15 + $0x398] sm:$0xff] }
0x15e7   : > { %5309 = vmatprep.subr.bf16.mxu1 %v5308_v23  ;;  %5341 = vmatprep.subr.bf16.mxu0 %v5340_v22  ;;  %v2742_v23 = vld [vmem:[%s5940_s15 + $0x150] sm:$0xff]  ;;  %v2743_v22 = vld [vmem:[%s5940_s15 + $0x158] sm:$0xff] }
0x15e8   : > { %4618 = vmatmul.mubr.msk.f32.vlgmr.msra.gmra.mrb[30].mxu1 %vm711_vm1, %v6254_v16  ;;  %4620 = vmatmul.mubr.msk.f32.vlgmr.msra.gmra.mrb[30].mxu0 %vm711_vm1, %v6254_v16  ;;  %v5362_v10 = vpack.c.bf16 %v2743_v22, %v2742_v23  ;;  %v2989_v23 = vsub.s32 7, %v6408_v50 }
0x15e9   : > { %3577 = vmatprep.mubr.f32.mxu1 %v5799_v51  ;;  %3654 = vmatprep.mubr.f32.mxu0 %v5799_v51  ;;  %v2723_v51 = vld [vmem:[%s5940_s15 + $0xb8] sm:$0xff] }
0x15ea   : > { %5311 = vmatpush3.bf16.msra.mxu1 %v5310_v24  ;;  %5343 = vmatpush3.bf16.msra.mxu0 %v5342_v53  ;;  %v5320_v52 = vpack.c.bf16 %v2723_v51, %v2722_v44  ;;  %v2712_v24 = vld [vmem:[%s5940_s15 + $0x60] sm:$0xff]  ;;  %v5332_v53 = vpack.c.bf16 %v2729_v15, %v2728_v25  ;;  %v2781_v51 = vld [vmem:[%s5940_s15 + $0x288] sm:$0xff]  ;;  %v5406_v25 = vpack.c.bf16 %v2797_v3, %v2796_v2  ;;  %v2786_v3 = vld [vmem:[%s5940_s15 + $0x2b0] sm:$0xff] }
0x15eb   : > { %5313 = vmatprep.subr.bf16.mxu1 %v5312_v18  ;;  %5345 = vmatprep.subr.bf16.mxu0 %v5344_v20  ;;  %v2744_v18 = vld [vmem:[%s5940_s15 + $0x160] sm:$0xff]  ;;  %v2745_v20 = vld [vmem:[%s5940_s15 + $0x168] sm:$0xff]  ;;  %v5334_v26 = vpack.c.bf16 %v2713_v37, %v2712_v24  ;;  %v6442_v15 = vrot.slane %v6413_v56, %v2981_v57  ;;  %v2767_v37 = vld [vmem:[%s5940_s15 + $0x218] sm:$0xff] }
0x15ec   : > { %4619 = vmatmul.mubr.msk.f32.gmra.mrb[32].mxu1 %vm711_vm1, %v6269_v38  ;;  %4621 = vmatmul.mubr.msk.f32.gmra.mrb[32].mxu0 %vm711_vm1, %v6269_v38  ;;  %v5366_v27 = vpack.c.bf16 %v2745_v20, %v2744_v18  ;;  %v2780_v44 = vld [vmem:[%s5940_s15 + $0x280] sm:$0xff]  ;;  %v2798_v18 = vld [vmem:[%s5940_s15 + $0x310] sm:$0xff]  ;;  %v6466_v2 = vld [vmem:[%s5934_s19 + $0x8] sm:$0xff] }
0x15ed   : > { %v5372_v46 = vpack.c.bf16 %v2781_v51, %v2780_v44  ;;  %v2769_v44 = vld [vmem:[%s5940_s15 + $0x228] sm:$0xff] }
0x15ee   : > { %5315 = vmatpush3.bf16.msra.mxu1 %v5314_v32  ;;  %5347 = vmatpush3.bf16.msra.mxu0 %v5346_v33  ;;  %v2763_v32 = vld [vmem:[%s5940_s15 + $0x1f8] sm:$0xff]  ;;  %v2714_v33 = vld [vmem:[%s5940_s15 + $0x70] sm:$0xff] }
0x15ef   : > { %5317 = vmatprep.subr.bf16.mxu1 %v5316_v40  ;;  %5349 = vmatprep.subr.bf16.mxu0 %v5348_v41  ;;  %v5368_v39 = vpack.c.bf16 %v2763_v32, %v2762_v30  ;;  %v5338_v40 = vpack.c.bf16 %v2715_v34, %v2714_v33  ;;  %v2746_v41 = vld [vmem:[%s5940_s15 + $0x170] sm:$0xff]  ;;  %v2784_v32 = vld [vmem:[%s5940_s15 + $0x2a0] sm:$0xff] }
0x15f0   : > { %v5370_v43 = vpack.c.bf16 %v2747_v42, %v2746_v41  ;;  %v2816_v41 = vld [vmem:[%s5940_s15 + $0x3a0] sm:$0xff]  ;;  %v2817_v42 = vld [vmem:[%s5940_s15 + $0x3a8] sm:$0xff] }
0x15f2   : > { %5319 = vmatpush3.bf16.msra.mxu1 %v5318_v47  ;;  %5351 = vmatpush3.bf16.msra.mxu0 %v5350_v48  ;;  %v2813_v47 = vld [vmem:[%s5940_s15 + $0x388] sm:$0xff] }
0x15f3   : > { %5321 = vmatprep.subr.bf16.mxu1 %v5320_v52  ;;  %5353 = vmatprep.subr.bf16.mxu0 %v5352_v55  ;;  %v5404_v48 = vpack.c.bf16 %v2813_v47, %v2812_v45  ;;  %v2961_v52 = vsub.s32 0, %v6408_v50  ;;  %v2969_v55 = vsub.s32 2, %v6408_v50 }
0x15f5   : > { %v2962_v12 = vrot.slane %v6413_v56, %v2961_v52  ;;  %v2970_v60 = vrot.slane %v6413_v56, %v2969_v55 }
0x15f6   : > { %5323 = vmatpush3.bf16.msra.mxu1 %v5322_v61  ;;  %5355 = vmatpush3.bf16.msra.mxu0 %v5354_v62  ;;  %v2974_v61 = vrot.slane %v6413_v56, %v2973_v14  ;;  %v2764_v62 = vld [vmem:[%s5940_s15 + $0x200] sm:$0xff] }
0x15f7   : > { %5325 = vmatprep.subr.bf16.mxu1 %v5324_v0  ;;  %5357 = vmatprep.subr.bf16.mxu0 %v5356_v1  ;;  %v5374_v22 = vpack.c.bf16 %v2765_v63, %v2764_v62 }
0x15fa   : > { %5327 = vmatpush3.bf16.msra.mxu1 %v5326_v8  ;;  %5359 = vmatpush3.bf16.msra.mxu0 %v5358_v19  ;;  %v2783_v19 = vld [vmem:[%s5940_s15 + $0x298] sm:$0xff] }
0x15fb   : > { %5329 = vmatprep.subr.bf16.mxu1 %v5328_v17  ;;  %5361 = vmatprep.subr.bf16.mxu0 %v5360_v21 }
0x15fe   : > { %5331 = vmatpush3.bf16.msra.mxu1 %v5330_v9  ;;  %5363 = vmatpush3.bf16.msra.mxu0 %v5362_v10 }
0x15ff   : > { %5333 = vmatprep.subr.bf16.mxu1 %v5332_v53  ;;  %5365 = vmatprep.subr.bf16.mxu0 %v5364_v54  ;;  %v5376_v53 = vpack.c.bf16 %v2783_v19, %v2782_v4  ;;  %v5408_v54 = vpack.c.bf16 %v2815_v13, %v2814_v11 }
0x1602   : > { %5335 = vmatpush3.bf16.msra.mxu1 %v5334_v26  ;;  %5367 = vmatpush3.bf16.msra.mxu0 %v5366_v27 }
0x1603   : > { %5337 = vmatprep.subr.bf16.mxu1 %v5336_v31  ;;  %5369 = vmatprep.subr.bf16.mxu0 %v5368_v39  ;;  %v2799_v31 = vld [vmem:[%s5940_s15 + $0x318] sm:$0xff]  ;;  %v6452_v39 = vrot.slane %v6413_v56, %v2989_v23 }
0x1604   : > { %v5410_v49 = vpack.c.bf16 %v2799_v31, %v2798_v18  ;;  %v2788_v18 = vld [vmem:[%s5940_s15 + $0x2c0] sm:$0xff] }
0x1605   : > { %v2772_v31 = vld [vmem:[%s5940_s15 + $0x240] sm:$0xff] }
0x1606   : > { %5339 = vmatpush3.bf16.msra.mxu1 %v5338_v40  ;;  %5371 = vmatpush3.bf16.msra.mxu0 %v5370_v43  ;;  %v2785_v40 = vld [vmem:[%s5940_s15 + $0x2a8] sm:$0xff]  ;;  %v2768_v43 = vld [vmem:[%s5940_s15 + $0x220] sm:$0xff] }
0x1607   : > { %5373 = vmatprep.subr.bf16.mxu1 %v5372_v46  ;;  %5405 = vmatprep.subr.bf16.mxu0 %v5404_v48  ;;  %v5378_v48 = vpack.c.bf16 %v2767_v37, %v2766_v35  ;;  %v2771_v35 = vld [vmem:[%s5940_s15 + $0x238] sm:$0xff] }
0x1608   : > { %v2803_v37 = vld [vmem:[%s5940_s15 + $0x338] sm:$0xff] }
0x16a3   : > { %v3111_v0 = vpop.f32.mrb[18].mxu1  ;;  %v3188_v1 = vpop.f32.mrb[18].mxu0 }
0x16a4   : > { %v3112_v5 = vadd.f32 %v3111_v0, %v2962_v12  ;;  %v3189_v6 = vadd.f32 %v3188_v1, %v2970_v60  ;;  %v3113_v7 = vpop.f32.mrb[19].mxu1  ;;  %v3190_v8 = vpop.f32.mrb[19].mxu0  ;;  %v5380_v0 = vpack.c.bf16 %v2785_v40, %v2784_v32  ;;  %v5412_v1 = vpack.c.bf16 %v2817_v42, %v2816_v41  ;;  %v2773_v32 = vld [vmem:[%s5940_s15 + $0x248] sm:$0xff] }
0x16a5   : > { %v3114_v17 = vadd.f32 %v3113_v7, %v2966_v58  ;;  %v3191_v21 = vadd.f32 %v3190_v8, %v2974_v61  ;;  %v2818_v7 = vld [vmem:[%s5940_s15 + $0x3b0] sm:$0xff]  ;;  %v2819_v8 = vld [vmem:[%s5940_s15 + $0x3b8] sm:$0xff] }
0x16a6   : > { %v3661_v20 = vmax.f32 %v3112_v5, 0.0  ;;  %v3663_v26 = vmax.f32 %v3189_v6, 0.0  ;;  %v2787_v6 = vld [vmem:[%s5940_s15 + $0x2b8] sm:$0xff] }
0x16a7   : > { %v3662_v36 = vmax.f32 %v3114_v17, 0.0  ;;  %v3664_v9 = vmax.f32 %v3191_v21, 0.0  ;;  %v3117_v10 = vpop.f32.mrb[20].mxu1  ;;  %v3194_v24 = vpop.f32.mrb[20].mxu0  ;;  %v5382_v21 = vpack.c.bf16 %v2769_v44, %v2768_v43  ;;  %v2804_v43 = vld [vmem:[%s5940_s15 + $0x340] sm:$0xff]  ;;  %v2805_v44 = vld [vmem:[%s5940_s15 + $0x348] sm:$0xff] }
0x16a8   : > { %v3118_v27 = vadd.f32 %v3117_v10, %v2962_v12  ;;  %v3195_v28 = vadd.f32 %v3194_v24, %v2970_v60  ;;  %v3119_v29 = vpop.f32.mrb[21].mxu1  ;;  %v3196_v30 = vpop.f32.mrb[21].mxu0  ;;  %v2800_v12 = vld [vmem:[%s5940_s15 + $0x320] sm:$0xff]  ;;  %v2801_v60 = vld [vmem:[%s5940_s15 + $0x328] sm:$0xff]  ;;  %v3002_v10 = vrot.slane %v6466_v2, %v2969_v55  ;;  %v5384_v24 = vpack.c.bf16 %v2787_v6, %v2786_v3  ;;  %v2774_v3 = vld [vmem:[%s5940_s15 + $0x250] sm:$0xff] }
0x16a9   : > { %v3120_v33 = vadd.f32 %v3119_v29, %v2966_v58  ;;  %v3197_v34 = vadd.f32 %v3196_v30, %v2974_v61  ;;  %3763 = vmatprep.mubr.f32.mxu1 %v3662_v36  ;;  %3838 = vmatprep.mubr.f32.mxu0 %v3664_v9 }
0x16aa   : > { %3764 = vmatmul.mubr.f32.vlgmr.msra.gmra.mrb[34].mxu1 %v3661_v20  ;;  %3839 = vmatmul.mubr.f32.vlgmr.msra.gmra.mrb[34].mxu0 %v3663_v26  ;;  %v3677_v58 = vmax.f32 %v3118_v27, 0.0  ;;  %v3679_v61 = vmax.f32 %v3195_v28, 0.0  ;;  %v2789_v20 = vld [vmem:[%s5940_s15 + $0x2c8] sm:$0xff]  ;;  %v2820_v26 = vld [vmem:[%s5940_s15 + $0x3c0] sm:$0xff] }
0x16ab   : > { %v3678_v51 = vmax.f32 %v3120_v33, 0.0  ;;  %v3680_v45 = vmax.f32 %v3197_v34, 0.0  ;;  %5375 = vmatpush3.bf16.msra.mxu1 %v5374_v22  ;;  %5407 = vmatpush3.bf16.msra.mxu0 %v5406_v25  ;;  %v6459_v46 = vpop.f32.mrb[22].mxu1  ;;  %v6461_v47 = vpop.f32.mrb[22].mxu0  ;;  %v5414_v22 = vpack.c.bf16 %v2801_v60, %v2800_v12  ;;  %v2770_v25 = vld [vmem:[%s5940_s15 + $0x230] sm:$0xff]  ;;  %v2821_v27 = vld [vmem:[%s5940_s15 + $0x3c8] sm:$0xff]  ;;  %v5388_v41 = vpack.c.bf16 %v2789_v20, %v2788_v18 }
0x16ac   : > { %v3267_v62 = vpop.f32.mrb[23].mxu1  ;;  %v3344_v63 = vpop.f32.mrb[23].mxu0  ;;  %5377 = vmatprep.subr.bf16.mxu1 %v5376_v53  ;;  %5409 = vmatprep.subr.bf16.mxu0 %v5408_v54  ;;  %v5416_v53 = vpack.c.bf16 %v2819_v8, %v2818_v7  ;;  %v2802_v54 = vld [vmem:[%s5940_s15 + $0x330] sm:$0xff]  ;;  %v5386_v29 = vpack.c.bf16 %v2771_v35, %v2770_v25  ;;  %v5420_v42 = vpack.c.bf16 %v2821_v27, %v2820_v26  ;;  %v2823_v60 = vld [vmem:[%s5940_s15 + $0x3d8] sm:$0xff]  ;;  %v2793_v25 = vld [vmem:[%s5940_s15 + $0x2e8] sm:$0xff] }
0x16ad   : > { %v3268_v4 = vadd.f32 %v3267_v62, %v6442_v15  ;;  %v3345_v5 = vadd.f32 %v3344_v63, %v6452_v39  ;;  %3768 = vmatprep.mubr.f32.mxu1 %v3678_v51  ;;  %3843 = vmatprep.mubr.f32.mxu0 %v3680_v45  ;;  %v5418_v30 = vpack.c.bf16 %v2803_v37, %v2802_v54  ;;  %v2790_v51 = vld [vmem:[%s5940_s15 + $0x2d0] sm:$0xff]  ;;  %v2977_v45 = vsub.s32 4, %v6408_v50  ;;  %v2776_v27 = vld [vmem:[%s5940_s15 + $0x260] sm:$0xff] }
0x16ae   : > { %3769 = vmatmul.mubr.f32.gmra.mrb[36].mxu1 %v3677_v58  ;;  %3844 = vmatmul.mubr.f32.gmra.mrb[36].mxu0 %v3679_v61  ;;  %v2822_v12 = vld [vmem:[%s5940_s15 + $0x3d0] sm:$0xff]  ;;  %v5390_v58 = vpack.c.bf16 %v2773_v32, %v2772_v31  ;;  %v5422_v63 = vpack.c.bf16 %v2805_v44, %v2804_v43  ;;  %v3014_v35 = vrot.slane %v6466_v2, %v2981_v57  ;;  %v2777_v57 = vld [vmem:[%s5940_s15 + $0x268] sm:$0xff]  ;;  %v2795_v43 = vld [vmem:[%s5940_s15 + $0x2f8] sm:$0xff] }
0x16af   : > { %v3666_v19 = vmax.f32 %v3268_v4, 0.0  ;;  %v3668_v11 = vmax.f32 %v3345_v5, 0.0  ;;  %5379 = vmatpush3.bf16.msra.mxu1 %v5378_v48  ;;  %5411 = vmatpush3.bf16.msra.mxu0 %v5410_v49  ;;  %v6474_v13 = vpop.f32.mrb[24].mxu1  ;;  %v6476_v17 = vpop.f32.mrb[24].mxu0  ;;  %v2985_v48 = vsub.s32 6, %v6408_v50  ;;  %v2791_v49 = vld [vmem:[%s5940_s15 + $0x2d8] sm:$0xff] }
0x16b0   : > { %v6480_v36 = vpop.f32.mrb[25].mxu1  ;;  %v6482_v9 = vpop.f32.mrb[25].mxu0  ;;  %5381 = vmatprep.subr.bf16.mxu1 %v5380_v0  ;;  %5413 = vmatprep.subr.bf16.mxu0 %v5412_v1  ;;  %v3010_v0 = vrot.slane %v6466_v2, %v2977_v45  ;;  %v2775_v4 = vld [vmem:[%s5940_s15 + $0x258] sm:$0xff]  ;;  %v2806_v5 = vld [vmem:[%s5940_s15 + $0x350] sm:$0xff] }
0x16b1   : > { %3913 = vmatprep.mubr.f32.mxu1 %v3666_v19  ;;  %3988 = vmatprep.mubr.f32.mxu0 %v3668_v11  ;;  %v3018_v1 = vrot.slane %v6466_v2, %v2985_v48  ;;  %v5392_v19 = vpack.c.bf16 %v2791_v49, %v2790_v51  ;;  %v5424_v11 = vpack.c.bf16 %v2823_v60, %v2822_v12  ;;  %v2826_v49 = vld [vmem:[%s5940_s15 + $0x3f0] sm:$0xff]  ;;  %v2827_v12 = vld [vmem:[%s5940_s15 + $0x3f8] sm:$0xff] }
0x16b2   : > { %v5394_v18 = vpack.c.bf16 %v2775_v4, %v2774_v3  ;;  %v2978_v60 = vrot.slane %v6413_v56, %v2977_v45  ;;  %v5398_v3 = vpack.c.bf16 %v2777_v57, %v2776_v27  ;;  %v2829_v27 = vld [vmem:[%s5940_s15 + $0x408] sm:$0xff] }
0x16b3   : > { %5383 = vmatpush3.bf16.msra.mxu1 %v5382_v21  ;;  %5415 = vmatpush3.bf16.msra.mxu0 %v5414_v22  ;;  %v6493_v28 = vpop.f32.mrb[26].mxu1  ;;  %v3496_v55 = vpop.f32.mrb[26].mxu0  ;;  %v2807_v21 = vld [vmem:[%s5940_s15 + $0x358] sm:$0xff]  ;;  %v2792_v22 = vld [vmem:[%s5940_s15 + $0x2e0] sm:$0xff] }
0x16b4   : > { %v6497_v33 = vadd.f32 %v3496_v55, %v3002_v10  ;;  %v6499_v34 = vpop.f32.mrb[27].mxu1  ;;  %v6501_v40 = vpop.f32.mrb[27].mxu0  ;;  %5385 = vmatprep.subr.bf16.mxu1 %v5384_v24  ;;  %5417 = vmatprep.subr.bf16.mxu0 %v5416_v53  ;;  %v2824_v24 = vld [vmem:[%s5940_s15 + $0x3e0] sm:$0xff]  ;;  %v2825_v53 = vld [vmem:[%s5940_s15 + $0x3e8] sm:$0xff]  ;;  %v5426_v20 = vpack.c.bf16 %v2807_v21, %v2806_v5  ;;  %v5396_v26 = vpack.c.bf16 %v2793_v25, %v2792_v22  ;;  %v2810_v21 = vld [vmem:[%s5940_s15 + $0x370] sm:$0xff] }
0x16b5   : > { %v2808_v55 = vld [vmem:[%s5940_s15 + $0x360] sm:$0xff]  ;;  %v5428_v32 = vpack.c.bf16 %v2825_v53, %v2824_v24  ;;  %v5432_v25 = vpack.c.bf16 %v2827_v12, %v2826_v49  ;;  %v2811_v24 = vld [vmem:[%s5940_s15 + $0x378] sm:$0xff]  ;;  %v3274_v12 = vadd.f32 %v6480_v36, %v6442_v15 }
0x16b6   : > { %v2844_v53 = vld [vmem:[%s5940_s15 + $0x480] sm:$0xff]  ;;  %v5434_v57 = vpack.c.bf16 %v2811_v24, %v2810_v21  ;;  %v2879_v49 = vld [vmem:[%s5940_s15 + $0x598] sm:$0xff] }
0x16b7   : > { %5387 = vmatpush3.bf16.msra.mxu1 %v5386_v29  ;;  %5419 = vmatpush3.bf16.msra.mxu0 %v5418_v30  ;;  %v6511_v61 = vpop.f32.mrb[28].mxu1  ;;  %v3502_v62 = vpop.f32.mrb[28].mxu0 }
0x16b8   : > { %v6518_v6 = vadd.f32 %v3502_v62, %v3002_v10  ;;  %v6520_v7 = vpop.f32.mrb[29].mxu1  ;;  %v6522_v8 = vpop.f32.mrb[29].mxu0  ;;  %5389 = vmatprep.subr.bf16.mxu1 %v5388_v41  ;;  %5421 = vmatprep.subr.bf16.mxu0 %v5420_v42  ;;  %v3022_v10 = vrot.slane %v6466_v2, %v2989_v23  ;;  %v2809_v41 = vld [vmem:[%s5940_s15 + $0x368] sm:$0xff]  ;;  %v2794_v42 = vld [vmem:[%s5940_s15 + $0x2f0] sm:$0xff] }
0x16b9   : > { %v5430_v4 = vpack.c.bf16 %v2809_v41, %v2808_v55  ;;  %v5400_v5 = vpack.c.bf16 %v2795_v43, %v2794_v42  ;;  %v2847_v42 = vld [vmem:[%s5940_s15 + $0x498] sm:$0xff]  ;;  %v2878_v43 = vld [vmem:[%s5940_s15 + $0x590] sm:$0xff] }
0x16bb   : > { %5391 = vmatpush3.bf16.msra.mxu1 %v5390_v58  ;;  %5423 = vmatpush3.bf16.msra.mxu0 %v5422_v63  ;;  %v3573_v54 = vpop.f32.mrb[30].mxu1  ;;  %v3650_v37 = vpop.f32.mrb[30].mxu0  ;;  %v2986_v58 = vrot.slane %v6413_v56, %v2985_v48 }
0x16bc   : > { %v6538_v29 = vadd.f32 %v3573_v54, %v3010_v0  ;;  %v6540_v23 = vadd.f32 %v3650_v37, %v3018_v1  ;;  %v3575_v30 = vpop.f32.mrb[31].mxu1  ;;  %v3652_v31 = vpop.f32.mrb[31].mxu0  ;;  %5393 = vmatprep.subr.bf16.mxu1 %v5392_v19  ;;  %5425 = vmatprep.subr.bf16.mxu0 %v5424_v11  ;;  %v2778_v19 = vld [vmem:[%s5940_s15 + $0x270] sm:$0xff]  ;;  %v2779_v11 = vld [vmem:[%s5940_s15 + $0x278] sm:$0xff]  ;;  %v2845_v54 = vld [vmem:[%s5940_s15 + $0x488] sm:$0xff] }
0x16bd   : > { %v6545_v44 = vadd.f32 %v3575_v30, %v3014_v35  ;;  %v6547_v51 = vadd.f32 %v3652_v31, %v3022_v10  ;;  %v5436_v55 = vpack.c.bf16 %v2845_v54, %v2844_v53  ;;  %v2860_v30 = vld [vmem:[%s5940_s15 + $0x500] sm:$0xff]  ;;  %v2861_v31 = vld [vmem:[%s5940_s15 + $0x508] sm:$0xff] }
0x16be   : > { %v5470_v15 = vpack.c.bf16 %v2861_v31, %v2860_v30  ;;  %v2832_v54 = vld [vmem:[%s5940_s15 + $0x420] sm:$0xff]  ;;  %v2850_v30 = vld [vmem:[%s5940_s15 + $0x4b0] sm:$0xff]  ;;  %v2851_v31 = vld [vmem:[%s5940_s15 + $0x4b8] sm:$0xff] }
0x16bf   : > { %5395 = vmatpush3.bf16.msra.mxu1 %v5394_v18  ;;  %5427 = vmatpush3.bf16.msra.mxu0 %v5426_v20  ;;  %v3579_v62 = vpop.f32.mrb[32].mxu1  ;;  %v3656_v63 = vpop.f32.mrb[32].mxu0  ;;  %v2876_v20 = vld [vmem:[%s5940_s15 + $0x580] sm:$0xff] }
0x16c0   : > { %v6556_v45 = vadd.f32 %v3579_v62, %v3010_v0  ;;  %v6558_v56 = vadd.f32 %v3656_v63, %v3018_v1  ;;  %v3581_v48 = vpop.f32.mrb[33].mxu1  ;;  %v3658_v22 = vpop.f32.mrb[33].mxu0  ;;  %5397 = vmatprep.subr.bf16.mxu1 %v5396_v26  ;;  %5429 = vmatprep.subr.bf16.mxu0 %v5428_v32  ;;  %v2877_v0 = vld [vmem:[%s5940_s15 + $0x588] sm:$0xff]  ;;  %v2828_v1 = vld [vmem:[%s5940_s15 + $0x400] sm:$0xff]  ;;  %v5402_v26 = vpack.c.bf16 %v2779_v11, %v2778_v19  ;;  %v2846_v32 = vld [vmem:[%s5940_s15 + $0x490] sm:$0xff]  ;;  %v3682_v19 = vmax.f32 %v3274_v12, 0.0 }
0x16c1   : > { %v6563_v37 = vadd.f32 %v3581_v48, %v3014_v35  ;;  %v6565_v18 = vadd.f32 %v3658_v22, %v3022_v10  ;;  %v3266_v35 = vadd.f32 %v6459_v46, %v2978_v60  ;;  %v3343_v10 = vadd.f32 %v6461_v47, %v2986_v58  ;;  %v2862_v22 = vld [vmem:[%s5940_s15 + $0x510] sm:$0xff] }
0x16c2   : > { %v5468_v41 = vpack.c.bf16 %v2877_v0, %v2876_v20  ;;  %v3351_v62 = vadd.f32 %v6482_v9, %v6452_v39  ;;  %v6586_v46 = vrot.slane %v6466_v2, %v2965_v59  ;;  %v6591_v47 = vrot.slane %v6466_v2, %v2973_v14  ;;  %v2830_v14 = vld [vmem:[%s5940_s15 + $0x410] sm:$0xff]  ;;  %v2833_v20 = vld [vmem:[%s5940_s15 + $0x428] sm:$0xff] }
0x16c3   : > { %5399 = vmatpush3.bf16.msra.mxu1 %v5398_v3  ;;  %5431 = vmatpush3.bf16.msra.mxu0 %v5430_v4  ;;  %v5438_v63 = vpack.c.bf16 %v2829_v27, %v2828_v1  ;;  %v5440_v36 = vpack.c.bf16 %v2847_v42, %v2846_v32  ;;  %v5472_v39 = vpack.c.bf16 %v2879_v49, %v2878_v43  ;;  %v3665_v9 = vmax.f32 %v3266_v35, 0.0  ;;  %v2882_v32 = vld [vmem:[%s5940_s15 + $0x5b0] sm:$0xff]  ;;  %v2883_v35 = vld [vmem:[%s5940_s15 + $0x5b8] sm:$0xff] }
0x16c4   : > { %5401 = vmatprep.subr.bf16.mxu1 %v5400_v5  ;;  %5433 = vmatprep.subr.bf16.mxu0 %v5432_v25  ;;  %v3667_v3 = vmax.f32 %v3343_v10, 0.0  ;;  %v3272_v59 = vadd.f32 %v6474_v13, %v2978_v60  ;;  %v3349_v4 = vadd.f32 %v6476_v17, %v2986_v58  ;;  %v2831_v5 = vld [vmem:[%s5940_s15 + $0x418] sm:$0xff]  ;;  %v3684_v11 = vmax.f32 %v3351_v62, 0.0  ;;  %v2848_v13 = vld [vmem:[%s5940_s15 + $0x4a0] sm:$0xff]  ;;  %v2849_v17 = vld [vmem:[%s5940_s15 + $0x4a8] sm:$0xff] }
0x16c5   : > { %v3422_v21 = vadd.f32 %v6499_v34, %v6586_v46  ;;  %v3499_v48 = vadd.f32 %v6501_v40, %v6591_v47  ;;  %v2863_v25 = vld [vmem:[%s5940_s15 + $0x518] sm:$0xff]  ;;  %v2880_v60 = vld [vmem:[%s5940_s15 + $0x5a0] sm:$0xff]  ;;  %v2881_v58 = vld [vmem:[%s5940_s15 + $0x5a8] sm:$0xff]  ;;  %v5442_v40 = vpack.c.bf16 %v2831_v5, %v2830_v14  ;;  %v5444_v27 = vpack.c.bf16 %v2849_v17, %v2848_v13 }
0x16c6   : > { %v3681_v24 = vmax.f32 %v3272_v59, 0.0  ;;  %v3683_v34 = vmax.f32 %v3349_v4, 0.0  ;;  %v5474_v53 = vpack.c.bf16 %v2863_v25, %v2862_v22  ;;  %v5446_v10 = vpack.c.bf16 %v2833_v20, %v2832_v54  ;;  %v2834_v42 = vld [vmem:[%s5940_s15 + $0x430] sm:$0xff]  ;;  %v2835_v43 = vld [vmem:[%s5940_s15 + $0x438] sm:$0xff]  ;;  %v2836_v4 = vld [vmem:[%s5940_s15 + $0x440] sm:$0xff] }
0x16c7   : > { %5403 = vmatpush3.bf16.msra.mxu1 %v5402_v26  ;;  %5435 = vmatpush3.bf16.msra.mxu0 %v5434_v57  ;;  %v3670_v0 = vmax.f32 %v3422_v21, 0.0  ;;  %v3672_v1 = vmax.f32 %v3499_v48, 0.0  ;;  %v5476_v26 = vpack.c.bf16 %v2881_v58, %v2880_v60  ;;  %v2864_v57 = vld [vmem:[%s5940_s15 + $0x520] sm:$0xff]  ;;  %v5448_v49 = vpack.c.bf16 %v2851_v31, %v2850_v30  ;;  %v2866_v62 = vld [vmem:[%s5940_s15 + $0x530] sm:$0xff]  ;;  %v2837_v14 = vld [vmem:[%s5940_s15 + $0x448] sm:$0xff] }
0x16c8   : > { %5437 = vmatprep.subr.bf16.mxu1 %v5436_v55  ;;  %5469 = vmatprep.subr.bf16.mxu0 %v5468_v41  ;;  %v2865_v55 = vld [vmem:[%s5940_s15 + $0x528] sm:$0xff]  ;;  %v5480_v12 = vpack.c.bf16 %v2883_v35, %v2882_v32  ;;  %v2854_v48 = vld [vmem:[%s5940_s15 + $0x4d0] sm:$0xff]  ;;  %v2855_v22 = vld [vmem:[%s5940_s15 + $0x4d8] sm:$0xff]  ;;  %v5454_v17 = vpack.c.bf16 %v2837_v14, %v2836_v4 }
0x16c9   : > { %v5478_v41 = vpack.c.bf16 %v2865_v55, %v2864_v57  ;;  %v2869_v21 = vld [vmem:[%s5940_s15 + $0x548] sm:$0xff]  ;;  %v2886_v25 = vld [vmem:[%s5940_s15 + $0x5d0] sm:$0xff]  ;;  %v2887_v13 = vld [vmem:[%s5940_s15 + $0x5d8] sm:$0xff] }
0x16ca   : > { %3914 = vmatmul.mubr.f32.vlgmr.msra.gmra.mrb[38].mxu1 %v3665_v9  ;;  %3989 = vmatmul.mubr.f32.vlgmr.msra.gmra.mrb[38].mxu0 %v3667_v3  ;;  %v2885_v9 = vld [vmem:[%s5940_s15 + $0x5c8] sm:$0xff]  ;;  %v5450_v3 = vpack.c.bf16 %v2835_v43, %v2834_v42  ;;  %v2838_v58 = vld [vmem:[%s5940_s15 + $0x450] sm:$0xff]  ;;  %v2871_v54 = vld [vmem:[%s5940_s15 + $0x558] sm:$0xff] }
0x16cb   : > { %3918 = vmatprep.mubr.f32.mxu1 %v3682_v19  ;;  %3993 = vmatprep.mubr.f32.mxu0 %v3684_v11  ;;  %v2868_v11 = vld [vmem:[%s5940_s15 + $0x540] sm:$0xff]  ;;  %v2841_v30 = vld [vmem:[%s5940_s15 + $0x468] sm:$0xff]  ;;  %v2859_v42 = vld [vmem:[%s5940_s15 + $0x4f8] sm:$0xff] }
0x16cc   : > { %5439 = vmatpush3.bf16.msra.mxu1 %v5438_v63  ;;  %5471 = vmatpush3.bf16.msra.mxu0 %v5470_v15  ;;  %v2867_v63 = vld [vmem:[%s5940_s15 + $0x538] sm:$0xff]  ;;  %v2852_v15 = vld [vmem:[%s5940_s15 + $0x4c0] sm:$0xff]  ;;  %v5486_v60 = vpack.c.bf16 %v2869_v21, %v2868_v11  ;;  %v2890_v43 = vld [vmem:[%s5940_s15 + $0x5f0] sm:$0xff] }
0x16cd   : > { %5441 = vmatprep.subr.bf16.mxu1 %v5440_v36  ;;  %5473 = vmatprep.subr.bf16.mxu0 %v5472_v39  ;;  %v2853_v36 = vld [vmem:[%s5940_s15 + $0x4c8] sm:$0xff]  ;;  %v2884_v39 = vld [vmem:[%s5940_s15 + $0x5c0] sm:$0xff]  ;;  %v5482_v59 = vpack.c.bf16 %v2867_v63, %v2866_v62  ;;  %v2842_v63 = vld [vmem:[%s5940_s15 + $0x470] sm:$0xff] }
0x16ce   : > { %3919 = vmatmul.mubr.f32.gmra.mrb[40].mxu1 %v3681_v24  ;;  %3994 = vmatmul.mubr.f32.gmra.mrb[40].mxu0 %v3683_v34  ;;  %v5452_v5 = vpack.c.bf16 %v2853_v36, %v2852_v15  ;;  %v5484_v19 = vpack.c.bf16 %v2885_v9, %v2884_v39  ;;  %v2839_v24 = vld [vmem:[%s5940_s15 + $0x458] sm:$0xff]  ;;  %v5456_v34 = vpack.c.bf16 %v2855_v22, %v2854_v48  ;;  %v2856_v20 = vld [vmem:[%s5940_s15 + $0x4e0] sm:$0xff]  ;;  %v2909_v14 = vld [vmem:[%s5940_s15 + $0x688] sm:$0xff] }
0x16cf   : > { %4063 = vmatprep.mubr.f32.mxu1 %v3670_v0  ;;  %4138 = vmatprep.mubr.f32.mxu0 %v3672_v1  ;;  %v2857_v0 = vld [vmem:[%s5940_s15 + $0x4e8] sm:$0xff]  ;;  %v2888_v1 = vld [vmem:[%s5940_s15 + $0x5e0] sm:$0xff]  ;;  %v2843_v15 = vld [vmem:[%s5940_s15 + $0x478] sm:$0xff]  ;;  %v2994_v36 = vrot.slane %v6466_v2, %v2961_v52 }
0x16d0   : > { %5443 = vmatpush3.bf16.msra.mxu1 %v5442_v40  ;;  %5475 = vmatpush3.bf16.msra.mxu0 %v5474_v53  ;;  %v5488_v40 = vpack.c.bf16 %v2887_v13, %v2886_v25  ;;  %v2870_v53 = vld [vmem:[%s5940_s15 + $0x550] sm:$0xff]  ;;  %v2840_v55 = vld [vmem:[%s5940_s15 + $0x460] sm:$0xff]  ;;  %v5460_v31 = vpack.c.bf16 %v2857_v0, %v2856_v20  ;;  %v5466_v50 = vpack.c.bf16 %v2843_v15, %v2842_v63  ;;  %v2893_v22 = vld [vmem:[%s5940_s15 + $0x608] sm:$0xff] }
0x16d1   : > { %5445 = vmatprep.subr.bf16.mxu1 %v5444_v27  ;;  %5477 = vmatprep.subr.bf16.mxu0 %v5476_v26  ;;  %v2889_v27 = vld [vmem:[%s5940_s15 + $0x5e8] sm:$0xff]  ;;  %v5458_v26 = vpack.c.bf16 %v2839_v24, %v2838_v58  ;;  %v5490_v57 = vpack.c.bf16 %v2871_v54, %v2870_v53  ;;  %v2872_v35 = vld [vmem:[%s5940_s15 + $0x560] sm:$0xff]  ;;  %v3420_v2 = vadd.f32 %v6493_v28, %v2994_v36  ;;  %v2910_v58 = vld [vmem:[%s5940_s15 + $0x690] sm:$0xff] }
0x16d2   : > { %v5492_v32 = vpack.c.bf16 %v2889_v27, %v2888_v1  ;;  %v2908_v4 = vld [vmem:[%s5940_s15 + $0x680] sm:$0xff]  ;;  %v3428_v25 = vadd.f32 %v6520_v7, %v6586_v46  ;;  %v3505_v13 = vadd.f32 %v6522_v8, %v6591_v47  ;;  %v2911_v24 = vld [vmem:[%s5940_s15 + $0x698] sm:$0xff]  ;;  %v3671_v7 = vmax.f32 %v6497_v33, 0.0  ;;  %v2894_v47 = vld [vmem:[%s5940_s15 + $0x610] sm:$0xff] }
0x16d3   : > { %v5500_v11 = vpack.c.bf16 %v2909_v14, %v2908_v4  ;;  %v2892_v48 = vld [vmem:[%s5940_s15 + $0x600] sm:$0xff]  ;;  %v2943_v28 = vld [vmem:[%s5940_s15 + $0x798] sm:$0xff]  ;;  %v3669_v53 = vmax.f32 %v3420_v2, 0.0  ;;  %v3426_v8 = vadd.f32 %v6511_v61, %v2994_v36  ;;  %v5504_v1 = vpack.c.bf16 %v2911_v24, %v2910_v58  ;;  %v2913_v33 = vld [vmem:[%s5940_s15 + $0x6a8] sm:$0xff] }
0x16d4   : > { %5447 = vmatpush3.bf16.msra.mxu1 %v5446_v10  ;;  %5479 = vmatpush3.bf16.msra.mxu0 %v5478_v41  ;;  %v2873_v10 = vld [vmem:[%s5940_s15 + $0x568] sm:$0xff]  ;;  %v2858_v41 = vld [vmem:[%s5940_s15 + $0x4f0] sm:$0xff]  ;;  %v2895_v54 = vld [vmem:[%s5940_s15 + $0x618] sm:$0xff]  ;;  %v3686_v20 = vmax.f32 %v3428_v25, 0.0  ;;  %v3688_v0 = vmax.f32 %v3505_v13, 0.0 }
0x16d5   : > { %5449 = vmatprep.subr.bf16.mxu1 %v5448_v49  ;;  %5481 = vmatprep.subr.bf16.mxu0 %v5480_v12  ;;  %v2891_v49 = vld [vmem:[%s5940_s15 + $0x5f8] sm:$0xff]  ;;  %v5462_v12 = vpack.c.bf16 %v2841_v30, %v2840_v55  ;;  %v5494_v62 = vpack.c.bf16 %v2873_v10, %v2872_v35  ;;  %v5464_v39 = vpack.c.bf16 %v2859_v42, %v2858_v41  ;;  %v2912_v55 = vld [vmem:[%s5940_s15 + $0x6a0] sm:$0xff]  ;;  %v2945_v30 = vld [vmem:[%s5940_s15 + $0x7a8] sm:$0xff] }
0x16d6   : > { %v5496_v9 = vpack.c.bf16 %v2891_v49, %v2890_v43  ;;  %v2944_v61 = vld [vmem:[%s5940_s15 + $0x7a0] sm:$0xff]  ;;  %v5506_v35 = vpack.c.bf16 %v2895_v54, %v2894_v47  ;;  %v2897_v42 = vld [vmem:[%s5940_s15 + $0x628] sm:$0xff]  ;;  %v3674_v43 = vmax.f32 %v6545_v44, 0.0  ;;  %v3676_v49 = vmax.f32 %v6547_v51, 0.0  ;;  %v2914_v15 = vld [vmem:[%s5940_s15 + $0x6b0] sm:$0xff] }
0x16d7   : > { %v2896_v41 = vld [vmem:[%s5940_s15 + $0x620] sm:$0xff]  ;;  %v2929_v63 = vld [vmem:[%s5940_s15 + $0x728] sm:$0xff]  ;;  %v2915_v36 = vld [vmem:[%s5940_s15 + $0x6b8] sm:$0xff] }
0x16d8   : > { %5451 = vmatpush3.bf16.msra.mxu1 %v5450_v3  ;;  %5483 = vmatpush3.bf16.msra.mxu0 %v5482_v59  ;;  %v2874_v3 = vld [vmem:[%s5940_s15 + $0x570] sm:$0xff]  ;;  %v2875_v59 = vld [vmem:[%s5940_s15 + $0x578] sm:$0xff]  ;;  %v5510_v44 = vpack.c.bf16 %v2897_v42, %v2896_v41  ;;  %v5512_v4 = vpack.c.bf16 %v2915_v36, %v2914_v15  ;;  %v2948_v2 = vld [vmem:[%s5940_s15 + $0x7c0] sm:$0xff] }
0x16d9   : > { %5453 = vmatprep.subr.bf16.mxu1 %v5452_v5  ;;  %5485 = vmatprep.subr.bf16.mxu0 %v5484_v19  ;;  %v2940_v5 = vld [vmem:[%s5940_s15 + $0x780] sm:$0xff]  ;;  %v2941_v19 = vld [vmem:[%s5940_s15 + $0x788] sm:$0xff]  ;;  %v5498_v52 = vpack.c.bf16 %v2875_v59, %v2874_v3  ;;  %v2898_v3 = vld [vmem:[%s5940_s15 + $0x630] sm:$0xff] }
0x16da   : > { %v5532_v21 = vpack.c.bf16 %v2941_v19, %v2940_v5  ;;  %v2899_v59 = vld [vmem:[%s5940_s15 + $0x638] sm:$0xff]  ;;  %v2930_v5 = vld [vmem:[%s5940_s15 + $0x730] sm:$0xff]  ;;  %v2901_v25 = vld [vmem:[%s5940_s15 + $0x648] sm:$0xff] }
0x16db   : > { %v2931_v19 = vld [vmem:[%s5940_s15 + $0x738] sm:$0xff]  ;;  %v2933_v58 = vld [vmem:[%s5940_s15 + $0x748] sm:$0xff]  ;;  %v2918_v24 = vld [vmem:[%s5940_s15 + $0x6d0] sm:$0xff] }
0x16dc   : > { %5455 = vmatpush3.bf16.msra.mxu1 %v5454_v17  ;;  %5487 = vmatpush3.bf16.msra.mxu0 %v5486_v60  ;;  %v2924_v17 = vld [vmem:[%s5940_s15 + $0x700] sm:$0xff]  ;;  %v2925_v60 = vld [vmem:[%s5940_s15 + $0x708] sm:$0xff]  ;;  %v2922_v41 = vld [vmem:[%s5940_s15 + $0x6f0] sm:$0xff] }
0x16dd   : > { %5457 = vmatprep.subr.bf16.mxu1 %v5456_v34  ;;  %5489 = vmatprep.subr.bf16.mxu0 %v5488_v40  ;;  %v2942_v34 = vld [vmem:[%s5940_s15 + $0x790] sm:$0xff]  ;;  %v5502_v40 = vpack.c.bf16 %v2893_v22, %v2892_v48  ;;  %v5534_v46 = vpack.c.bf16 %v2925_v60, %v2924_v17  ;;  %v5546_v48 = vpack.c.bf16 %v2931_v19, %v2930_v5  ;;  %v2900_v22 = vld [vmem:[%s5940_s15 + $0x640] sm:$0xff]  ;;  %v2923_v42 = vld [vmem:[%s5940_s15 + $0x6f8] sm:$0xff]  ;;  %v3689_v5 = vmax.f32 %v6556_v45, 0.0 }
0x16de   : > { %v5536_v27 = vpack.c.bf16 %v2943_v28, %v2942_v34  ;;  %v2932_v60 = vld [vmem:[%s5940_s15 + $0x740] sm:$0xff]  ;;  %v2919_v34 = vld [vmem:[%s5940_s15 + $0x6d8] sm:$0xff]  ;;  %v2950_v28 = vld [vmem:[%s5940_s15 + $0x7d0] sm:$0xff]  ;;  %v3691_v19 = vmax.f32 %v6558_v56, 0.0 }
0x16df   : > { %v5520_v47 = vpack.c.bf16 %v2919_v34, %v2918_v24  ;;  %v2907_v36 = vld [vmem:[%s5940_s15 + $0x678] sm:$0xff] }
0x16e0   : > { %5459 = vmatpush3.bf16.msra.mxu1 %v5458_v26  ;;  %5491 = vmatpush3.bf16.msra.mxu0 %v5490_v57  ;;  %v2926_v26 = vld [vmem:[%s5940_s15 + $0x710] sm:$0xff]  ;;  %v2927_v57 = vld [vmem:[%s5940_s15 + $0x718] sm:$0xff] }
0x16e1   : > { %5461 = vmatprep.subr.bf16.mxu1 %v5460_v31  ;;  %5493 = vmatprep.subr.bf16.mxu0 %v5492_v32  ;;  %v3685_v31 = vmax.f32 %v3426_v8, 0.0  ;;  %v3687_v32 = vmax.f32 %v6518_v6, 0.0  ;;  %v5538_v10 = vpack.c.bf16 %v2927_v57, %v2926_v26  ;;  %v2928_v6 = vld [vmem:[%s5940_s15 + $0x720] sm:$0xff]  ;;  %v2902_v8 = vld [vmem:[%s5940_s15 + $0x650] sm:$0xff]  ;;  %v2953_v57 = vld [vmem:[%s5940_s15 + $0x7e8] sm:$0xff] }
0x16e2   : > { %v5542_v51 = vpack.c.bf16 %v2929_v63, %v2928_v6  ;;  %v2952_v26 = vld [vmem:[%s5940_s15 + $0x7e0] sm:$0xff]  ;;  %v2906_v6 = vld [vmem:[%s5940_s15 + $0x670] sm:$0xff]  ;;  %v5528_v63 = vpack.c.bf16 %v2923_v42, %v2922_v41 }
0x16e4   : > { %5463 = vmatpush3.bf16.msra.mxu1 %v5462_v12  ;;  %5495 = vmatpush3.bf16.msra.mxu0 %v5494_v62  ;;  %v5508_v12 = vpack.c.bf16 %v2913_v33, %v2912_v55  ;;  %v5540_v62 = vpack.c.bf16 %v2945_v30, %v2944_v61  ;;  %v2904_v61 = vld [vmem:[%s5940_s15 + $0x660] sm:$0xff]  ;;  %v2905_v30 = vld [vmem:[%s5940_s15 + $0x668] sm:$0xff] }
0x16e5   : > { %5465 = vmatprep.subr.bf16.mxu1 %v5464_v39  ;;  %5497 = vmatprep.subr.bf16.mxu0 %v5496_v9  ;;  %v2946_v39 = vld [vmem:[%s5940_s15 + $0x7b0] sm:$0xff]  ;;  %v2947_v9 = vld [vmem:[%s5940_s15 + $0x7b8] sm:$0xff] }
0x16e6   : > { %v5544_v14 = vpack.c.bf16 %v2947_v9, %v2946_v39  ;;  %v2938_v39 = vld [vmem:[%s5940_s15 + $0x770] sm:$0xff]  ;;  %v2939_v9 = vld [vmem:[%s5940_s15 + $0x778] sm:$0xff] }
0x16e8   : > { %5467 = vmatpush3.bf16.msra.mxu1 %v5466_v50  ;;  %5499 = vmatpush3.bf16.msra.mxu0 %v5498_v52  ;;  %v2916_v50 = vld [vmem:[%s5940_s15 + $0x6c0] sm:$0xff]  ;;  %v2917_v52 = vld [vmem:[%s5940_s15 + $0x6c8] sm:$0xff] }
0x16e9   : > { %5501 = vmatprep.subr.bf16.mxu1 %v5500_v11  ;;  %5533 = vmatprep.subr.bf16.mxu0 %v5532_v21  ;;  %v2949_v11 = vld [vmem:[%s5940_s15 + $0x7c8] sm:$0xff]  ;;  %v5514_v21 = vpack.c.bf16 %v2899_v59, %v2898_v3  ;;  %v5516_v13 = vpack.c.bf16 %v2917_v52, %v2916_v50  ;;  %v3673_v3 = vmax.f32 %v6538_v29, 0.0  ;;  %v3675_v59 = vmax.f32 %v6540_v23, 0.0  ;;  %v4622_v29 = vld [vmem:[%s675_s26] ss:$0 sm:$0xff] }
0x16ea   : > { %v5548_v17 = vpack.c.bf16 %v2949_v11, %v2948_v2 }
0x16eb   : > { %4064 = vmatmul.mubr.f32.vlgmr.msra.gmra.mrb[42].mxu1 %v3669_v53  ;;  %4139 = vmatmul.mubr.f32.vlgmr.msra.gmra.mrb[42].mxu0 %v3671_v7  ;;  %v5518_v53 = vpack.c.bf16 %v2901_v25, %v2900_v22  ;;  %v5550_v7 = vpack.c.bf16 %v2933_v58, %v2932_v60 }
0x16ec   : > { %4068 = vmatprep.mubr.f32.mxu1 %v3686_v20  ;;  %4143 = vmatprep.mubr.f32.mxu0 %v3688_v0  ;;  %v2934_v20 = vld [vmem:[%s5940_s15 + $0x750] sm:$0xff]  ;;  %v2935_v0 = vld [vmem:[%s5940_s15 + $0x758] sm:$0xff] }
0x16ed   : > { %5503 = vmatpush3.bf16.msra.mxu1 %v5502_v40  ;;  %5535 = vmatpush3.bf16.msra.mxu0 %v5534_v46  ;;  %v2951_v40 = vld [vmem:[%s5940_s15 + $0x7d8] sm:$0xff]  ;;  %v5554_v33 = vpack.c.bf16 %v2935_v0, %v2934_v20 }
0x16ee   : > { %5505 = vmatprep.subr.bf16.mxu1 %v5504_v1  ;;  %5537 = vmatprep.subr.bf16.mxu0 %v5536_v27  ;;  %v2903_v46 = vld [vmem:[%s5940_s15 + $0x658] sm:$0xff]  ;;  %v5552_v54 = vpack.c.bf16 %v2951_v40, %v2950_v28  ;;  %v2920_v1 = vld [vmem:[%s5940_s15 + $0x6e0] sm:$0xff]  ;;  %v2921_v27 = vld [vmem:[%s5940_s15 + $0x6e8] sm:$0xff] }
0x16ef   : > { %4069 = vmatmul.mubr.f32.gmra.mrb[44].mxu1 %v3685_v31  ;;  %4144 = vmatmul.mubr.f32.gmra.mrb[44].mxu0 %v3687_v32  ;;  %v5522_v55 = vpack.c.bf16 %v2903_v46, %v2902_v8  ;;  %v5524_v31 = vpack.c.bf16 %v2921_v27, %v2920_v1  ;;  %v5556_v32 = vpack.c.bf16 %v2953_v57, %v2952_v26 }
0x16f0   : > { %4213 = vmatprep.mubr.f32.mxu1 %v3674_v43  ;;  %4288 = vmatprep.mubr.f32.mxu0 %v3676_v49  ;;  %v2954_v43 = vld [vmem:[%s5940_s15 + $0x7f0] sm:$0xff]  ;;  %v2955_v49 = vld [vmem:[%s5940_s15 + $0x7f8] sm:$0xff] }
0x16f1   : > { %5507 = vmatpush3.bf16.msra.mxu1 %v5506_v35  ;;  %5539 = vmatpush3.bf16.msra.mxu0 %v5538_v10  ;;  %v2936_v35 = vld [vmem:[%s5940_s15 + $0x760] sm:$0xff]  ;;  %v2937_v10 = vld [vmem:[%s5940_s15 + $0x768] sm:$0xff]  ;;  %v5560_v15 = vpack.c.bf16 %v2955_v49, %v2954_v43 }
0x16f2   : > { %5509 = vmatprep.subr.bf16.mxu1 %v5508_v12  ;;  %5541 = vmatprep.subr.bf16.mxu0 %v5540_v62  ;;  %v5526_v12 = vpack.c.bf16 %v2905_v30, %v2904_v61  ;;  %v5558_v62 = vpack.c.bf16 %v2937_v10, %v2936_v35 }
0x16f5   : > { %5511 = vmatpush3.bf16.msra.mxu1 %v5510_v44  ;;  %5543 = vmatpush3.bf16.msra.mxu0 %v5542_v51  ;;  %v5530_v44 = vpack.c.bf16 %v2907_v36, %v2906_v6  ;;  %v5562_v51 = vpack.c.bf16 %v2939_v9, %v2938_v39 }
0x16f6   : > { %5513 = vmatprep.subr.bf16.mxu1 %v5512_v4  ;;  %5545 = vmatprep.subr.bf16.mxu0 %v5544_v14  ;;  %v3690_v4 = vmax.f32 %v6563_v37, 0.0  ;;  %v3692_v14 = vmax.f32 %v6565_v18, 0.0 }
0x16f9   : > { %5515 = vmatpush3.bf16.msra.mxu1 %v5514_v21  ;;  %5547 = vmatpush3.bf16.msra.mxu0 %v5546_v48 }
0x16fa   : > { %5517 = vmatprep.subr.bf16.mxu1 %v5516_v13  ;;  %5549 = vmatprep.subr.bf16.mxu0 %v5548_v17 }
0x16fd   : > { %5519 = vmatpush3.bf16.msra.mxu1 %v5518_v53  ;;  %5551 = vmatpush3.bf16.msra.mxu0 %v5550_v7 }
0x16fe   : > { %5521 = vmatprep.subr.bf16.mxu1 %v5520_v47  ;;  %5553 = vmatprep.subr.bf16.mxu0 %v5552_v54 }
0x1701   : > { %5523 = vmatpush3.bf16.msra.mxu1 %v5522_v55  ;;  %5555 = vmatpush3.bf16.msra.mxu0 %v5554_v33 }
0x1702   : > { %5525 = vmatprep.subr.bf16.mxu1 %v5524_v31  ;;  %5557 = vmatprep.subr.bf16.mxu0 %v5556_v32 }
0x1705   : > { %5527 = vmatpush3.bf16.msra.mxu1 %v5526_v12  ;;  %5559 = vmatpush3.bf16.msra.mxu0 %v5558_v62 }
0x1706   : > { %5529 = vmatprep.subr.bf16.mxu1 %v5528_v63  ;;  %5561 = vmatprep.subr.bf16.mxu0 %v5560_v15 }
0x1709   : > { %5531 = vmatpush3.bf16.msra.mxu1 %v5530_v44  ;;  %5563 = vmatpush3.bf16.msra.mxu0 %v5562_v51 }
0x170c   : > { %4214 = vmatmul.mubr.f32.vlgmr.msra.gmra.mrb[46].mxu1 %v3673_v3  ;;  %4289 = vmatmul.mubr.f32.vlgmr.msra.gmra.mrb[46].mxu0 %v3675_v59 }
0x170d   : > { %4218 = vmatprep.mubr.f32.mxu1 %v3690_v4  ;;  %4293 = vmatprep.mubr.f32.mxu0 %v3692_v14 }
0x1710   : > { %4219 = vmatmul.mubr.f32.gmra.mrb[48].mxu1 %v3689_v5  ;;  %4294 = vmatmul.mubr.f32.gmra.mrb[48].mxu0 %v3691_v19 }
0x177d   : > { %v4742_v50 = vpop.f32.mrb[34].mxu1  ;;  %v4780_v52 = vpop.f32.mrb[34].mxu0 }
0x177e   : > { %v4743_v23 = vpop.f32.mrb[35].mxu1  ;;  %v4781_v37 = vpop.f32.mrb[35].mxu0 }
0x177f   : > { %v4744_v18 = vadd.f32 %v4743_v23, %v4742_v50  ;;  %v4782_v2 = vadd.f32 %v4781_v37, %v4780_v52 }
0x1781   : > { %v3766_v11 = vadd.f32 %v4744_v18, %v4622_v29  ;;  %v4745_v21 = vpop.f32.mrb[36].mxu1  ;;  %v4783_v48 = vpop.f32.mrb[36].mxu0 }
0x1782   : > { %v4746_v22 = vpop.f32.mrb[37].mxu1  ;;  %v4784_v45 = vpop.f32.mrb[37].mxu0 }
0x1783   : > { %v3841_v25 = vadd.f32 %v4782_v2, %v3766_v11  ;;  %v4747_v56 = vadd.f32 %v4746_v22, %v4745_v21  ;;  %v4785_v13 = vadd.f32 %v4784_v45, %v4783_v48 }
0x1785   : > { %v3771_v17 = vadd.f32 %v4747_v56, %v4622_v29 }
0x1787   : > { %v3846_v60 = vadd.f32 %v4785_v13, %v3771_v17 }
0x179d   : > { %v4818_v58 = vpop.f32.mrb[38].mxu1  ;;  %v4856_v24 = vpop.f32.mrb[38].mxu0 }
0x179e   : > { %v4819_v34 = vpop.f32.mrb[39].mxu1  ;;  %v4857_v28 = vpop.f32.mrb[39].mxu0 }
0x179f   : > { %v4820_v40 = vadd.f32 %v4819_v34, %v4818_v58  ;;  %v4858_v53 = vadd.f32 %v4857_v28, %v4856_v24 }
0x17a1   : > { %v3916_v7 = vadd.f32 %v4820_v40, %v3841_v25  ;;  %v4821_v8 = vpop.f32.mrb[40].mxu1  ;;  %v4859_v46 = vpop.f32.mrb[40].mxu0 }
0x17a2   : > { %v4822_v47 = vpop.f32.mrb[41].mxu1  ;;  %v4860_v54 = vpop.f32.mrb[41].mxu0 }
0x17a3   : > { %v3991_v20 = vadd.f32 %v4858_v53, %v3916_v7  ;;  %v4823_v0 = vadd.f32 %v4822_v47, %v4821_v8  ;;  %v4861_v1 = vadd.f32 %v4860_v54, %v4859_v46  ;;  %v4623_v53 = vld [vmem:[%s6831_s16] ss:$0 sm:$0xff] }
0x17a4   : > { %v4624_v8 = vld [vmem:[%s681_s0] ss:$0 sm:$0xff]  ;;  %s6832_s0 = sld [smem:[#allocation8_spill]] (!%p4625_p5) }
0x17a5   : > { %v3921_v27 = vadd.f32 %v4823_v0, %v3846_v60 }
0x17a7   : > { %v3996_v26 = vadd.f32 %v4861_v1, %v3921_v27 }
0x17be   : > { %v4894_v57 = vpop.f32.mrb[42].mxu1  ;;  %v4932_v55 = vpop.f32.mrb[42].mxu0 }
0x17bf   : > { %v4895_v33 = vpop.f32.mrb[43].mxu1  ;;  %v4933_v61 = vpop.f32.mrb[43].mxu0 }
0x17c0   : > { %v4896_v30 = vadd.f32 %v4895_v33, %v4894_v57  ;;  %v4934_v31 = vadd.f32 %v4933_v61, %v4932_v55 }
0x17c2   : > { %v4066_v32 = vadd.f32 %v4896_v30, %v3991_v20  ;;  %v4897_v35 = vpop.f32.mrb[44].mxu1  ;;  %v4935_v10 = vpop.f32.mrb[44].mxu0 }
0x17c3   : > { %v4898_v41 = vpop.f32.mrb[45].mxu1  ;;  %v4936_v42 = vpop.f32.mrb[45].mxu0 }
0x17c4   : > { %v4141_v43 = vadd.f32 %v4934_v31, %v4066_v32  ;;  %v4899_v49 = vadd.f32 %v4898_v41, %v4897_v35  ;;  %v4937_v12 = vadd.f32 %v4936_v42, %v4935_v10 }
0x17c6   : > { %v4071_v62 = vadd.f32 %v4899_v49, %v3996_v26 }
0x17c8   : > { %v4146_v6 = vadd.f32 %v4937_v12, %v4071_v62 }
0x17df   : > { %v4970_v63 = vpop.f32.mrb[46].mxu1  ;;  %v5008_v15 = vpop.f32.mrb[46].mxu0 }
0x17e0   : > { %v4971_v36 = vpop.f32.mrb[47].mxu1  ;;  %v5009_v39 = vpop.f32.mrb[47].mxu0 }
0x17e1   : > { %v4972_v9 = vadd.f32 %v4971_v36, %v4970_v63  ;;  %v5010_v44 = vadd.f32 %v5009_v39, %v5008_v15  ;;  %v4626_v15 = vld [vmem:[%s6832_s0] ss:$0 sm:$0xff] (!%p4625_p5) }
0x17e2   : > { %v4627_v39 = vld [vmem:[%s6833_s21] ss:$0 sm:$0xff] (!%p4625_p5) }
0x17e3   : > { %v4216_v51 = vadd.f32 %v4972_v9, %v4141_v43  ;;  %v4973_v3 = vpop.f32.mrb[48].mxu1  ;;  %v5011_v59 = vpop.f32.mrb[48].mxu0 }
0x17e4   : > { %v4974_v4 = vpop.f32.mrb[49].mxu1  ;;  %v5012_v14 = vpop.f32.mrb[49].mxu0 }
0x17e5   : > { %v4291_v5 = vadd.f32 %v5010_v44, %v4216_v51  ;;  %v4975_v19 = vadd.f32 %v4974_v4, %v4973_v3  ;;  %v5013_v50 = vadd.f32 %v5012_v14, %v5011_v59 }
0x17e7   : > { %v4221_v52 = vadd.f32 %v4975_v19, %v4146_v6  ;;  %v4299_v29 = vadd.f32 %v4291_v5, %v6254_v16 }
0x17e9   : > { %v4296_v23 = vadd.f32 %v5013_v50, %v4221_v52  ;;  %v4303_v37 = vsel %vm711_vm1, %v4299_v29, 0.0 }
0x17ea   : > { %4304 = vadd.xlane.f32.xlu1 %v4303_v37 }
0x17eb   : > { %v4300_v18 = vadd.f32 %v4296_v23, %v6269_v38 }
0x17ed   : > { %v4306_v2 = vsel %vm711_vm1, %v4300_v18, 0.0 }
0x17ee   : > { %4307 = vadd.xlane.f32.xlu0 %v4306_v2 }
0x1877   : > { %v4305_v11 = vpop.xlane.xlu1 %4304 }
0x1878   : > { %v4309_v21 = vmul.f32 0.03125, %v4305_v11 }
0x187a   : > { %v4311_v48 = vsub.f32 %v4299_v29, %v4309_v21 }
0x187b   : > { %v4308_v22 = vpop.xlane.xlu0 %4307 }
0x187c   : > { %v4310_v45 = vmul.f32 0.03125, %v4308_v22  ;;  %v4313_v25 = vmul.f32 %v4311_v48, %v4311_v48 }
0x187e   : > { %v4312_v56 = vsub.f32 %v4300_v18, %v4310_v45  ;;  %v4315_v13 = vsel %vm711_vm1, %v4313_v25, 0.0 }
0x187f   : > { %4316 = vadd.xlane.f32.xlu1 %v4315_v13 }
0x1880   : > { %v4314_v16 = vmul.f32 %v4312_v56, %v4312_v56 }
0x1882   : > { %v4318_v17 = vsel %vm711_vm1, %v4314_v16, 0.0 }
0x1883   : > { %4319 = vadd.xlane.f32.xlu0 %v4318_v17 }
0x190c   : > { %v4317_v38 = vpop.xlane.xlu1 %4316 }
0x190d   : > { %v4321_v60 = vmul.f32 0.03125, %v4317_v38 }
0x190f   : > { %v4323_v58 = vadd.f32 1e-05, %v4321_v60 }
0x1910   : > { %v4320_v24 = vpop.xlane.xlu0 %4319 }
0x1911   : > { %5751 = vrsqrt.f32 %v4323_v58  ;;  %v4322_v34 = vmul.f32 0.03125, %v4320_v24 }
0x1913   : > { %v4324_v28 = vadd.f32 1e-05, %v4322_v34 }
0x1915   : > { %5753 = vrsqrt.f32 %v4324_v28 }
0x191b   : > { %v5752_v40 = vpop.eup %5751 }
0x191c   : > { %v4327_v7 = vmul.f32 %v5752_v40, %v4311_v48 }
0x191e   : > { %v4335_v46 = vmul.f32 %v4623_v53, %v4327_v7 }
0x191f   : > { %v5754_v47 = vpop.eup %5753 }
0x1920   : > { %v4343_v54 = vadd.f32 %v4624_v8, %v4335_v46  ;;  %v4328_v20 = vmul.f32 %v5754_v47, %v4312_v56  ;;  %4350 = sbr.rel (%p4625_p5) target bundleno = 6752 (0x1a60), region = 92 }
0x1922   : > { %4345 = vst.msk [vmem:[%s6823_s8] sm:$0xff] %vm711_vm1, %v4343_v54  ;;  %v4336_v0 = vmul.f32 %v4623_v53, %v4328_v20  ;;  %v4353_v27 = vsel (!%p4625_p5), %vm711_vm1, %v4343_v54, 0.0 }
0x1923   : > { %4354 = vadd.xlane.f32.xlu0 (!%p4625_p5), %v4353_v27 }
0x1924   : > { %v4344_v1 = vadd.f32 %v4624_v8, %v4336_v0 }
0x1926   : > { %4346 = vst.msk [vmem:[%s6823_s8 + $0x8] sm:$0xff] %vm711_vm1, %v4344_v1  ;;  %v4356_v26 = vsel (!%p4625_p5), %vm711_vm1, %v4344_v1, 0.0 }
0x1927   : > { %4357 = vadd.xlane.f32.xlu0 %v4356_v26 }
0x19b0   : > { %v4355_v57 = vpop.xlane.xlu0 %4354 }
0x19b1   : > { %v4359_v55 = vmul.f32 0.03125, %v4355_v57 }
0x19b3   : > { %v4361_v33 = vsub.f32 %v4343_v54, %v4359_v55 }
0x19b4   : > { %v4358_v61 = vpop.xlane.xlu0 %4357 }
0x19b5   : > { %v4360_v30 = vmul.f32 0.03125, %v4358_v61  ;;  %v4363_v31 = vmul.f32 %v4361_v33, %v4361_v33 }
0x19b7   : > { %v4362_v32 = vsub.f32 %v4344_v1, %v4360_v30  ;;  %v4365_v35 = vsel %vm711_vm1, %v4363_v31, 0.0 }
0x19b8   : > { %4366 = vadd.xlane.f32.xlu1 %v4365_v35 }
0x19b9   : > { %v4364_v10 = vmul.f32 %v4362_v32, %v4362_v32 }
0x19bb   : > { %v4368_v41 = vsel %vm711_vm1, %v4364_v10, 0.0 }
0x19bc   : > { %4369 = vadd.xlane.f32.xlu1 %v4368_v41 }
0x1a45   : > { %v4367_v42 = vpop.xlane.xlu1 %4366 }
0x1a46   : > { %v4371_v43 = vmul.f32 0.03125, %v4367_v42 }
0x1a48   : > { %v4373_v49 = vadd.f32 1e-05, %v4371_v43 }
0x1a49   : > { %v4370_v12 = vpop.xlane.xlu1 %4369 }
0x1a4a   : > { %5757 = vrsqrt.f32 %v4373_v49  ;;  %v4372_v62 = vmul.f32 0.03125, %v4370_v12 }
0x1a4c   : > { %v4374_v6 = vadd.f32 1e-05, %v4372_v62 }
0x1a4e   : > { %5759 = vrsqrt.f32 %v4374_v6 }
0x1a54   : > { %v5758_v63 = vpop.eup %5757 }
0x1a55   : > { %v4377_v36 = vmul.f32 %v5758_v63, %v4361_v33 }
0x1a57   : > { %v4385_v9 = vmul.f32 %v4626_v15, %v4377_v36 }
0x1a58   : > { %v5760_v44 = vpop.eup %5759 }
0x1a59   : > { %v4393_v51 = vadd.f32 %v4627_v39, %v4385_v9  ;;  %v4378_v3 = vmul.f32 %v5760_v44, %v4362_v32 }
0x1a5b   : > { %4395 = vst.msk [vmem:[%s6834_s18] sm:$0xff] %vm711_vm1, %v4393_v51  ;;  %v4386_v59 = vmul.f32 %v4626_v15, %v4378_v3 }
0x1a5d   : > { %v4394_v4 = vadd.f32 %v4627_v39, %v4386_v59 }
0x1a5f   : > { %4396 = vst.msk [vmem:[%s6834_s18 + $0x8] sm:$0xff] %vm711_vm1, %v4394_v4 }
0x1a60 PF: > { %s6835_s26 = sld [smem:[#allocation2_spill]] }
0x1a66   : > { %s26_s21 = sadd.s32 1, %s6835_s26  }
0x1a67   : > { %p23_p6 = scmp.ge.s32.totalorder %s26_s21, 8  }
0x1a69   :  { %25 = sbr.rel (!%p23_p6) target bundleno = 9 (0x9), region = 151 }

// kernel: translation_model_forward.3
= control target key start
LH: loop header
LB: loop body
LE: loop exit
PB: predicated region body
PF: predicated region fallthrough
CT: control target
= control target key end

     0   :  { %s10344_s0 = inlined_call_operand.vmem [shape: f32[16,32], index: 0, kind: input, shape index: {}]   ;;  %s10345_s1 = inlined_call_operand.vmem [shape: f32[16,32], index: 1, kind: input, shape index: {}]   ;;  %s10346_s2 = inlined_call_operand.vmem [shape: f32[16,16], index: 2, kind: input, shape index: {}]   ;;  %s10347_s3 = inlined_call_operand.vmem [shape: f32[16,16], index: 3, kind: input, shape index: {}]   ;;  %s10348_s4 = inlined_call_operand.vmem [shape: f32[6,32,96], index: 4, kind: input, shape index: {}]   ;;  %s10349_s5 = inlined_call_operand.vmem [shape: f32[6,1,96], index: 5, kind: input, shape index: {}]   ;;  %s10350_s6 = inlined_call_operand.vmem [shape: f32[6,32,32], index: 6, kind: input, shape index: {}]   ;;  %s10351_s7 = inlined_call_operand.vmem [shape: f32[6,1,32], index: 7, kind: input, shape index: {}]   ;;  %s10352_s8 = inlined_call_operand.vmem [shape: f32[6,1,32], index: 8, kind: input, shape index: {}]   ;;  %s10353_s9 = inlined_call_operand.vmem [shape: f32[6,1,32], index: 9, kind: input, shape index: {}]   ;;  %s10354_s10 = inlined_call_operand.vmem [shape: f32[6,32,32], index: 10, kind: input, shape index: {}]   ;;  %s10355_s11 = inlined_call_operand.vmem [shape: f32[6,1,32], index: 11, kind: input, shape index: {}]   ;;  %s10356_s12 = inlined_call_operand.vmem [shape: f32[6,32,64], index: 12, kind: input, shape index: {}]   ;;  %s10357_s13 = inlined_call_operand.vmem [shape: f32[6,1,64], index: 13, kind: input, shape index: {}]   ;;  %s10358_s14 = inlined_call_operand.vmem [shape: f32[6,32,32], index: 14, kind: input, shape index: {}]   ;;  %s10359_s15 = inlined_call_operand.vmem [shape: f32[6,1,32], index: 15, kind: input, shape index: {}]   ;;  %s10360_s16 = inlined_call_operand.vmem [shape: f32[6,1,32], index: 16, kind: input, shape index: {}]   ;;  %s10361_s17 = inlined_call_operand.vmem [shape: f32[6,1,32], index: 17, kind: input, shape index: {}]   ;;  %s10362_s18 = inlined_call_operand.vmem [shape: f32[6,32,2048], index: 18, kind: input, shape index: {}]   ;;  %s10363_s19 = inlined_call_operand.vmem [shape: f32[6,1,2048], index: 19, kind: input, shape index: {}]   ;;  %s10364_s20 = inlined_call_operand.vmem [shape: f32[6,2048,32], index: 20, kind: input, shape index: {}]   ;;  %s10365_s21 = inlined_call_operand.vmem [shape: f32[6,1,32], index: 21, kind: input, shape index: {}]   ;;  %s10366_s22 = inlined_call_operand.vmem [shape: f32[6,1,32], index: 22, kind: input, shape index: {}]   ;;  %s10367_s23 = inlined_call_operand.vmem [shape: f32[6,1,32], index: 23, kind: input, shape index: {}]   ;;  %s10368_s24 = inlined_call_operand.vmem [shape: f32[1,32], index: 24, kind: input, shape index: {}]   ;;  %s10369_s25 = inlined_call_operand.vmem [shape: f32[1,32], index: 25, kind: input, shape index: {}]   ;;  %s10370_s26 = inlined_call_operand.hbm [shape: f32[16,32], index: 26, kind: output, shape index: {}]  }
   0x1   :  { %10401 = sst [smem:[#allocation8_spill]] %s10344_s0 }
   0x2   :  { %10402 = sst [smem:[#allocation9_spill]] %s10345_s1 }
   0x3   :  { %10403 = sst [smem:[#allocation10_spill]] %s10346_s2 }
   0x4   :  { %10404 = sst [smem:[#allocation11_spill]] %s10347_s3 }
   0x5   :  { %10405 = sst [smem:[#allocation12_spill]] %s10348_s4 }
   0x6   :  { %10406 = sst [smem:[#allocation13_spill]] %s10349_s5 }
   0x7   :  { %10407 = sst [smem:[#allocation14_spill]] %s10350_s6 }
   0x8   :  { %10408 = sst [smem:[#allocation15_spill]] %s10351_s7 }
   0x9   :  { %10409 = sst [smem:[#allocation16_spill]] %s10352_s8 }
   0xa   :  { %10410 = sst [smem:[#allocation17_spill]] %s10353_s9 }
   0xb   :  { %10411 = sst [smem:[#allocation18_spill]] %s10354_s10 }
   0xc   :  { %10412 = sst [smem:[#allocation19_spill]] %s10356_s12 }
   0xd   :  { %10413 = sst [smem:[#allocation20_spill]] %s10358_s14 }
   0xe   :  { %10414 = sst [smem:[#allocation21_spill]] %s10361_s17 }
   0xf   :  { %10415 = sst [smem:[#allocation22_spill]] %s10362_s18 }
  0x10   :  { %10416 = sst [smem:[#allocation23_spill]] %s10363_s19 }
  0x11   :  { %10417 = sst [smem:[#allocation24_spill]] %s10365_s21 }
  0x12   :  { %10418 = sst [smem:[#allocation25_spill]] %s10366_s22 }
  0x13   :  { %10419 = sst [smem:[#allocation26_spill]] %s10367_s23 }
  0x14   :  { %10420 = sst [smem:[#allocation27_spill]] %s10368_s24 }
  0x15   :  { %10421 = sst [smem:[#allocation28_spill]] %s10369_s25 }
  0x16   :  { %10422 = sst [smem:[#allocation29_spill]] %s10370_s26 }
  0x17   :  { %31 = vsyncpa [#allocation3], 0  ;;  %s9045_s27 = smov 0  }
  0x18 LB: > { %10423 = sst [smem:[#allocation5_spill]] %s8875_s27  ;;  %s9051_s3 = sadd.s32 4294967295, %s8875_s27   ;;  %s8875_s27 = sphi %s9045_s27, %s37_s27  }
  0x19   : > { %10424 = sst [smem:[#allocation6_spill]] %s9051_s3  ;;  %p7065_p0 = scmp.ge.s32.totalorder %s8875_s27, 1 }
  0x1a   : > { %p873_p1 = scmp.lt.s32.totalorder %s8875_s27, 7 }
  0x1c   : > { %p874_p2 = pnand %p7065_p0, %p873_p1 }
  0x1e   : > { %877 = sbr.rel (%p874_p2) target bundleno = 11813 (0x2e25), region = 124 }
  0x25   : > { %p1008_p3 = scmp.lt.s32.totalorder %s9051_s3, 5  ;;  %s10426_s2 = sld [smem:[#allocation12_spill]] }
  0x26   : > { %s10428_s1 = sld [smem:[#allocation14_spill]]  ;;  %s10432_s21 = sld [smem:[#allocation18_spill]] }
  0x27   : > { %s9057_s7 = scalar_select %p1008_p3, %s9051_s3, 5 }
  0x28   : > { %s10433_s12 = sld [smem:[#allocation19_spill]]  ;;  %s10434_s14 = sld [smem:[#allocation20_spill]] }
  0x29   : > { %s7223_s28 = sshll.u32 %s9057_s7, 5  ;;  %s7228_s3 = sshll.u32 %s9057_s7, 9 }
  0x2a   : > { %s10436_s18 = sld [smem:[#allocation22_spill]]  ;;  %s10437_s19 = sld [smem:[#allocation23_spill]] }
  0x2b   : > { %s9067_s5 = scalar_lea.vmem %s10426_s2, %s7223_s28  ;;  %s7229_s2 = sshll.u32 %s9057_s7, 11 }
  0x2c   : > { %10427 = sst [smem:[#allocation7_spill]] %s9067_s5  ;;  %s9072_s27 = scalar_lea.vmem %s10428_s1, %s7223_s28 }
  0x2d   : > { %s9089_s10 = scalar_lea.vmem %s10432_s21, %s7223_s28  ;;  %s9137_s1 = scalar_lea.vmem %s10364_s20, %s7229_s2 }
  0x2e   : > { %s9098_s22 = scalar_lea.vmem %s10433_s12, %s7223_s28  ;;  %s9107_s5 = scalar_lea.vmem %s10434_s14, %s7223_s28 }
  0x2f   : > { %s7078_s28 = sshll.u32 %s9057_s7, 4 }
  0x30   : > { %s9125_s8 = scalar_lea.vmem %s10436_s18, %s7228_s3  ;;  %s9131_s21 = scalar_lea.vmem %s10437_s19, %s7078_s28 }
  0x31   : > { %s10441_s28 = sld [smem:[#allocation6_spill]] }
  0x37   : > { %p7081_p4 = scmp.ne.s32.totalorder %s10441_s28, 0 }
  0x38   : > { %s10442_s6 = sld [smem:[#allocation8_spill]] (!%p7081_p4)  ;;  %vm1089_vm0 = vcmask (!%p7081_p4), 261120  }
  0x39   : > { %1086 = sbr.rel (%p7081_p4) target bundleno = 64 (0x40), region = 128 }
  0x3e   : > { %v1087_v0 = vld [vmem:[%s10442_s6] sm:$0xff] (!%p7081_p4)  ;;  %v1088_v1 = vld [vmem:[%s10442_s6 + $0x8] sm:$0xff] (!%p7081_p4) }
  0x3f   : > { %1090 = vst.msk [vmem:[#allocation2] sm:$0xff] (!%p7081_p4), %vm1089_vm0, %v1087_v0  ;;  %1091 = vst.msk [vmem:[#allocation2 + $0x8] sm:$0xff] (!%p7081_p4), %vm1089_vm0, %v1088_v1 }
  0x40 PF: > { %s10443_s12 = sld [smem:[#allocation7_spill]]  ;;  %vm1114_vm1 = vcmask 261120   ;;  %s10444_s18 = sld [smem:[#allocation13_spill]]  ;;  %vm1202_vm2 = vcmask 31744   ;;  %vm1290_vm4 = vcmask 130048   ;;  %vm2886_vm5 = vcmask 64512  }
  0x41   : > { %s8877_s4 = smov 96   ;;  %vm9183_vm3 = vmpackc.low %vm1202_vm2, %vm1202_vm2  ;;  %s10448_s23 = sld [smem:[#allocation10_spill]]  ;;  %vm2889_vm6 = vcmask 97280   ;;  %vm2894_vm7 = vcmask 162816   ;;  %vm2897_vm8 = vcmask 195584   ;;  %vm2900_vm9 = vcmask 228352  }
  0x42   : > { %s8878_s9 = smov 64   ;;  %s8879_s2 = smov 92  }
  0x43   : > { %s8880_s24 = smov 124   ;;  %s8882_s14 = smov 88  }
  0x44   : > { %s8883_s17 = smov 120   ;;  %s8886_s25 = smov 56  }
  0x45   : > { %s8887_s26 = smov 80   ;;  %s8888_s3 = smov 112  }
  0x46   : > { %v1098_v2 = vld [vmem:[%s10443_s12] sm:$0xff]  ;;  %v1099_v3 = vld [vmem:[%s10443_s12 + $0x8] sm:$0xff]  ;;  %v1100_v4 = vld [vmem:[%s10443_s12 + $0x10] sm:$0xff]  ;;  %s10445_s19 = scalar_lea.vmem %s10444_s18, %s9057_s7  ;;  %s8884_s18 = smov 84  }
  0x47   : > { %v7971_v5 = vpack.c.bf16 %v1099_v3, %v1098_v2  ;;  %v1101_v6 = vld [vmem:[%s10443_s12 + $0x18] sm:$0xff]  ;;  %v1092_v7 = vld [vmem:[#allocation2] sm:$0xff]  ;;  %v1093_v9 = vld [vmem:[#allocation2 + $0x8] sm:$0xff]  ;;  %s8881_s12 = smov 60   ;;  %s8889_s28 = smov 52  }
  0x48   : > { %v7975_v8 = vpack.c.bf16 %v1101_v6, %v1100_v4  ;;  %7700 = vmatprep.mubr.msk.f32.mxu0 %vm1114_vm1, %v1092_v7  ;;  %v7082_v10 = vld [vmem:[%s10445_s19] ss:$0 sm:$0xff]  ;;  %v9196_v22 = vld [vmem:[%s10448_s23 + $0x8] sm:$0xff]  ;;  %s8885_s19 = smov 116   ;;  %s8895_s29 = smov 44  }
  0x49   : > { %7972 = vmatprep.subr.bf16.mxu0 %v7971_v5  ;;  %v9201_v25 = vld [vmem:[%s10448_s23] sm:$0xff]  ;;  %s10381_s0 = smov 100   ;;  %s8898_s30 = smov 40  }
  0x4a   : > { %7974 = vmatpush3.bf16.msra.mxu0 %v7971_v5 }
  0x4b   : > { %7976 = vmatprep.subr.bf16.mxu0 %v7975_v8 }
  0x4e   : > { %7978 = vmatpush3.bf16.msra.mxu0 %v7975_v8 }
  0x51   : > { %7701 = vmatmul.mubr.msk.f32.vlgmr.msra.gmra.mrb[0].mxu0 %vm1114_vm1, %v1093_v9 }
 0x124   : > { %v7702_v11 = vpop.f32.mrb[0].mxu0 }
 0x125   : > { %v9169_v12 = vadd.f32 %v7702_v11, %v7082_v10  ;;  %v1187_v13 = vpop.f32.mrb[1].mxu0 }
 0x126   : > { %v9171_v14 = vadd.f32 %v7082_v10, %v1187_v13 }
 0x128   : > { %7707 = vmatprep.mubr.msk.f32.mxu1 %vm1202_vm2, %v9171_v14  ;;  %v9177_v15 = vpack.i.bf16 %v9169_v12, %v9171_v14 }
 0x12a   : > { %8539 = vrot.lane.b32.xlu0 %v9177_v15, %s8877_s4 }
 0x19c   : > { %v8540_v16 = vpop.permute.xlu0 %8539 }
 0x19d   : > { %v8542_v17 = vunpack.i.h.bf16 %v8540_v16  ;;  %v8541_v18 = vunpack.i.l.bf16 %v8540_v16 }
 0x19f   : > { %v7979_v20 = vpack.c.bf16 %v8542_v17, %v8541_v18 }
 0x1a1   : > { %7981 = vmatprep.subr.msk.bf16.mxu1 %vm9183_vm3, %v7979_v20 }
 0x1a2   : > { %7984 = vmatpush3.bf16.xpose.msk.msra.mxu1 %vm9183_vm3, %v7979_v20 }
 0x1a9   : > { %7708 = vmatmul.mubr.msk.f32.vlgmr.msra.gmra.mrb[0].mxu1 %vm1202_vm2, %v9169_v12 }
 0x27c   : > { %v7709_v21 = vpop.f32.mrb[0].mxu1 }
 0x27d   : > { %v1287_v23 = vmul.f32 0.5, %v7709_v21  ;;  %v1277_v24 = vpop.f32.mrb[1].mxu1 }
 0x27e   : > { %v1286_v26 = vmul.f32 0.5, %v1277_v24 }
 0x27f   : > { %v1289_v27 = vadd.f32 %v1287_v23, %v9196_v22 }
 0x280   : > { %v1288_v28 = vadd.f32 %v1286_v26, %v9201_v25 }
 0x281   : > { %v1294_v29 = vsel %vm1290_vm4, %v1289_v27, -inf }
 0x282   : > { %1295 = vmax.xlane.f32.xlu1 %v1294_v29  ;;  %v1291_v30 = vsel %vm1290_vm4, %v1288_v28, -inf }
 0x283   : > { %1292 = vmax.xlane.f32.xlu0 %v1291_v30 }
 0x293   : > { %8544 = vrot.lane.b32.xlu1 %v9177_v15, %s8878_s9  ;;  %s10400_s9 = smov 76  }
 0x297   : > { %8549 = vrot.lane.b32.xlu1 %v9177_v15, %s8879_s2 }
 0x299   : > { %1402 = vrot.lane.b32.xlu0 %v9169_v12, %s8880_s24 }
 0x30f   : > { %v1296_v31 = vpop.xlane.xlu1 %1295 }
 0x310   : > { %v1298_v32 = vsub.f32 %v1289_v27, %v1296_v31  ;;  %v1293_v33 = vpop.xlane.xlu0 %1292 }
 0x311   : > { %v1297_v34 = vsub.f32 %v1288_v28, %v1293_v33 }
 0x312   : > { %v1301_v35 = vmul.f32 1.442695, %v1298_v32 }
 0x313   : > { %v1299_v36 = vmul.f32 1.442695, %v1297_v34  ;;  %v8545_v37 = vpop.permute.xlu1 %8544 }
 0x314   : > { %8693 = vpow2.f32 %v1301_v35  ;;  %v8547_v38 = vunpack.i.h.bf16 %v8545_v37  ;;  %v8546_v39 = vunpack.i.l.bf16 %v8545_v37  ;;  %v1403_v56 = vpop.permute.xlu0 %1402 }
 0x315   : > { %8695 = vpow2.f32 %v1299_v36 }
 0x316   : > { %v7985_v40 = vpack.c.bf16 %v8547_v38, %v8546_v39 }
 0x317   : > { %v8550_v41 = vpop.permute.xlu1 %8549 }
 0x318   : > { %v8552_v42 = vunpack.i.h.bf16 %v8550_v41  ;;  %v8551_v43 = vunpack.i.l.bf16 %v8550_v41  ;;  %7986 = vmatprep.subr.bf16.mxu1 %v7985_v40 }
 0x319   : > { %7988 = vmatpush3.bf16.msra.mxu1 %v7985_v40 }
 0x31a   : > { %v7989_v44 = vpack.c.bf16 %v8552_v42, %v8551_v43 }
 0x31c   : > { %7991 = vmatprep.subr.msk.bf16.mxu1 %vm9183_vm3, %v7989_v44 }
 0x31e   : > { %v8694_v45 = vpop.eup %8693 }
 0x31f   : > { %v1306_v46 = vsel %vm1290_vm4, %v8694_v45, 0.0  ;;  %v8696_v47 = vpop.eup %8695 }
 0x320   : > { %1307 = vadd.xlane.f32.xlu1 %v1306_v46  ;;  %v1303_v48 = vsel %vm1290_vm4, %v8696_v47, 0.0 }
 0x324   : > { %1304 = vadd.xlane.f32.xlu1 %v1303_v48 }
 0x335   : > { %1400 = vrot.lane.b32.xlu1 %v9171_v14, %s8880_s24 }
 0x3ad   : > { %v1308_v49 = vpop.xlane.xlu1 %1307 }
 0x3ae   : > { %8697 = vrcp.f32 %v1308_v49 }
 0x3b1   : > { %v1305_v50 = vpop.xlane.xlu1 %1304 }
 0x3b2   : > { %8699 = vrcp.f32 %v1305_v50 }
 0x3b5   : > { %v1401_v55 = vpop.permute.xlu1 %1400 }
 0x3b8   : > { %v8698_v51 = vpop.eup %8697 }
 0x3b9   : > { %v1312_v54 = vmul.f32 %v8698_v51, %v8694_v45 }
 0x3bc   : > { %v8700_v52 = vpop.eup %8699 }
 0x3bd   : > { %v1311_v53 = vmul.f32 %v8700_v52, %v8696_v47 }
 0x3bf   : > { %7714 = vmatprep.mubr.msk.f32.mxu1 %vm1290_vm4, %v1311_v53 }
 0x3c0   : > { %7715 = vmatmul.mubr.msk.f32.vlgmr.msra.gmra.mrb[2].mxu1 %vm1290_vm4, %v1312_v54 }
 0x3c1   : > { %7994 = vmatpush3.bf16.xpose.msk.msra.mxu1 %vm9183_vm3, %v7989_v44  ;;  %7721 = vmatprep.mubr.msk.f32.mxu1 %vm1202_vm2, %v1401_v55 }
 0x3c8   : > { %7722 = vmatmul.mubr.msk.f32.vlgmr.msra.gmra.mrb[4].mxu1 %vm1202_vm2, %v1403_v56 }
 0x493   : > { %v9224_v57 = vpop.f32.mrb[2].mxu1 }
 0x494   : > { %v9226_v58 = vpop.f32.mrb[3].mxu1 }
 0x49b   : > { %v7723_v59 = vpop.f32.mrb[4].mxu1 }
 0x49c   : > { %v1492_v60 = vmul.f32 0.5, %v7723_v59  ;;  %v1482_v61 = vpop.f32.mrb[5].mxu1 }
 0x49d   : > { %v1491_v62 = vmul.f32 0.5, %v1482_v61 }
 0x49e   : > { %v1494_v63 = vadd.f32 %v1492_v60, %v9196_v22 }
 0x49f   : > { %v1493_v0 = vadd.f32 %v1491_v62, %v9201_v25 }
 0x4a0   : > { %v1498_v1 = vsel %vm1290_vm4, %v1494_v63, -inf }
 0x4a1   : > { %1499 = vmax.xlane.f32.xlu0 %v1498_v1  ;;  %v1495_v2 = vsel %vm1290_vm4, %v1493_v0, -inf }
 0x4a2   : > { %1496 = vmax.xlane.f32.xlu1 %v1495_v2 }
 0x4b3   : > { %8554 = vrot.lane.b32.xlu1 %v9177_v15, %s8881_s12  ;;  %s8891_s12 = smov 108  }
 0x4b7   : > { %8559 = vrot.lane.b32.xlu0 %v9177_v15, %s8882_s14  ;;  %1604 = vrot.lane.b32.xlu1 %v9171_v14, %s8883_s17 }
 0x52e   : > { %v1500_v3 = vpop.xlane.xlu0 %1499 }
 0x52f   : > { %v1502_v4 = vsub.f32 %v1494_v63, %v1500_v3  ;;  %v1497_v5 = vpop.xlane.xlu1 %1496 }
 0x530   : > { %v1501_v6 = vsub.f32 %v1493_v0, %v1497_v5 }
 0x531   : > { %v1505_v7 = vmul.f32 1.442695, %v1502_v4 }
 0x532   : > { %v1503_v8 = vmul.f32 1.442695, %v1501_v6  ;;  %v8560_v9 = vpop.permute.xlu0 %8559 }
 0x533   : > { %8701 = vpow2.f32 %v1505_v7  ;;  %v8555_v10 = vpop.permute.xlu1 %8554  ;;  %v8562_v11 = vunpack.i.h.bf16 %v8560_v9  ;;  %v8561_v13 = vunpack.i.l.bf16 %v8560_v9 }
 0x534   : > { %v8557_v16 = vunpack.i.h.bf16 %v8555_v10  ;;  %v8556_v17 = vunpack.i.l.bf16 %v8555_v10  ;;  %8703 = vpow2.f32 %v1503_v8 }
 0x535   : > { %v7999_v20 = vpack.c.bf16 %v8562_v11, %v8561_v13 }
 0x536   : > { %v7995_v18 = vpack.c.bf16 %v8557_v16, %v8556_v17 }
 0x537   : > { %v1605_v27 = vpop.permute.xlu1 %1604 }
 0x538   : > { %7996 = vmatprep.subr.bf16.mxu0 %v7995_v18 }
 0x539   : > { %7998 = vmatpush3.bf16.msra.mxu0 %v7995_v18 }
 0x53a   : > { %8001 = vmatprep.subr.msk.bf16.mxu0 %vm9183_vm3, %v7999_v20 }
 0x53d   : > { %v8702_v21 = vpop.eup %8701 }
 0x53e   : > { %v1510_v23 = vsel %vm1290_vm4, %v8702_v21, 0.0  ;;  %v8704_v24 = vpop.eup %8703 }
 0x53f   : > { %1511 = vadd.xlane.f32.xlu1 %v1510_v23  ;;  %v1507_v26 = vsel %vm1290_vm4, %v8704_v24, 0.0 }
 0x543   : > { %1508 = vadd.xlane.f32.xlu1 %v1507_v26 }
 0x554   : > { %1606 = vrot.lane.b32.xlu1 %v9169_v12, %s8883_s17 }
 0x5cc   : > { %v1512_v28 = vpop.xlane.xlu1 %1511 }
 0x5cd   : > { %8705 = vrcp.f32 %v1512_v28 }
 0x5d0   : > { %v1509_v29 = vpop.xlane.xlu1 %1508 }
 0x5d1   : > { %8707 = vrcp.f32 %v1509_v29 }
 0x5d4   : > { %v1607_v34 = vpop.permute.xlu1 %1606 }
 0x5d7   : > { %v8706_v30 = vpop.eup %8705 }
 0x5d8   : > { %v1516_v33 = vmul.f32 %v8706_v30, %v8702_v21 }
 0x5db   : > { %v8708_v31 = vpop.eup %8707 }
 0x5dc   : > { %v1515_v32 = vmul.f32 %v8708_v31, %v8704_v24 }
 0x5de   : > { %7728 = vmatprep.mubr.msk.f32.mxu0 %vm1290_vm4, %v1515_v32 }
 0x5df   : > { %7729 = vmatmul.mubr.msk.f32.vlgmr.msra.gmra.mrb[2].mxu0 %vm1290_vm4, %v1516_v33 }
 0x5e0   : > { %8004 = vmatpush3.bf16.xpose.msk.msra.mxu0 %vm9183_vm3, %v7999_v20  ;;  %7735 = vmatprep.mubr.msk.f32.mxu0 %vm1202_vm2, %v1605_v27 }
 0x5e7   : > { %7736 = vmatmul.mubr.msk.f32.vlgmr.msra.gmra.mrb[4].mxu0 %vm1202_vm2, %v1607_v34 }
 0x6b2   : > { %v9249_v35 = vpop.f32.mrb[2].mxu0 }
 0x6b3   : > { %v9251_v36 = vpop.f32.mrb[3].mxu0 }
 0x6ba   : > { %v7737_v37 = vpop.f32.mrb[4].mxu0 }
 0x6bb   : > { %v1696_v38 = vmul.f32 0.5, %v7737_v37  ;;  %v1686_v39 = vpop.f32.mrb[5].mxu0 }
 0x6bc   : > { %v1695_v40 = vmul.f32 0.5, %v1686_v39 }
 0x6bd   : > { %v1698_v41 = vadd.f32 %v1696_v38, %v9196_v22 }
 0x6be   : > { %v1697_v42 = vadd.f32 %v1695_v40, %v9201_v25 }
 0x6bf   : > { %v1702_v43 = vsel %vm1290_vm4, %v1698_v41, -inf }
 0x6c0   : > { %1703 = vmax.xlane.f32.xlu0 %v1702_v43  ;;  %v1699_v44 = vsel %vm1290_vm4, %v1697_v42, -inf }
 0x6c1   : > { %1700 = vmax.xlane.f32.xlu1 %v1699_v44 }
 0x74d   : > { %v1704_v45 = vpop.xlane.xlu0 %1703 }
 0x74e   : > { %v1706_v46 = vsub.f32 %v1698_v41, %v1704_v45  ;;  %v1701_v47 = vpop.xlane.xlu1 %1700 }
 0x74f   : > { %v1705_v48 = vsub.f32 %v1697_v42, %v1701_v47 }
 0x750   : > { %v1709_v49 = vmul.f32 1.442695, %v1706_v46 }
 0x751   : > { %v1707_v50 = vmul.f32 1.442695, %v1705_v48 }
 0x752   : > { %8709 = vpow2.f32 %v1709_v49 }
 0x753   : > { %8711 = vpow2.f32 %v1707_v50 }
 0x75c   : > { %v8710_v51 = vpop.eup %8709 }
 0x75d   : > { %v8712_v52 = vpop.eup %8711  ;;  %v1714_v53 = vsel %vm1290_vm4, %v8710_v51, 0.0 }
 0x75e   : > { %1715 = vadd.xlane.f32.xlu1 %v1714_v53  ;;  %v1711_v54 = vsel %vm1290_vm4, %v8712_v52, 0.0 }
 0x75f   : > { %1712 = vadd.xlane.f32.xlu0 %v1711_v54 }
 0x76f   : > { %8569 = vrot.lane.b32.xlu1 %v9177_v15, %s8884_s18 }
 0x773   : > { %1808 = vrot.lane.b32.xlu1 %v9171_v14, %s8885_s19 }
 0x775   : > { %8564 = vrot.lane.b32.xlu0 %v9177_v15, %s8886_s25  ;;  %s8892_s25 = smov 48  }
 0x779   : > { %1810 = vrot.lane.b32.xlu0 %v9169_v12, %s8885_s19 }
 0x7eb   : > { %v1716_v55 = vpop.xlane.xlu1 %1715 }
 0x7ec   : > { %8713 = vrcp.f32 %v1716_v55  ;;  %v1713_v56 = vpop.xlane.xlu0 %1712 }
 0x7ed   : > { %8715 = vrcp.f32 %v1713_v56 }
 0x7ef   : > { %v8570_v59 = vpop.permute.xlu1 %8569 }
 0x7f0   : > { %v8565_v60 = vpop.permute.xlu0 %8564  ;;  %v8572_v61 = vunpack.i.h.bf16 %v8570_v59  ;;  %v8571_v62 = vunpack.i.l.bf16 %v8570_v59 }
 0x7f1   : > { %v8567_v63 = vunpack.i.h.bf16 %v8565_v60  ;;  %v8566_v0 = vunpack.i.l.bf16 %v8565_v60 }
 0x7f2   : > { %v8009_v2 = vpack.c.bf16 %v8572_v61, %v8571_v62 }
 0x7f3   : > { %v8005_v1 = vpack.c.bf16 %v8567_v63, %v8566_v0  ;;  %v1809_v7 = vpop.permute.xlu1 %1808 }
 0x7f4   : > { %v1811_v8 = vpop.permute.xlu0 %1810 }
 0x7f5   : > { %8006 = vmatprep.subr.bf16.mxu1 %v8005_v1 }
 0x7f6   : > { %v8714_v3 = vpop.eup %8713  ;;  %8008 = vmatpush3.bf16.msra.mxu1 %v8005_v1 }
 0x7f7   : > { %v8716_v4 = vpop.eup %8715  ;;  %8011 = vmatprep.subr.msk.bf16.mxu1 %vm9183_vm3, %v8009_v2  ;;  %v1720_v6 = vmul.f32 %v8714_v3, %v8710_v51 }
 0x7f8   : > { %v1719_v5 = vmul.f32 %v8716_v4, %v8712_v52 }
 0x7fa   : > { %7742 = vmatprep.mubr.msk.f32.mxu1 %vm1290_vm4, %v1719_v5 }
 0x7fb   : > { %7743 = vmatmul.mubr.msk.f32.vlgmr.msra.gmra.mrb[6].mxu1 %vm1290_vm4, %v1720_v6 }
 0x7fc   : > { %7749 = vmatprep.mubr.msk.f32.mxu1 %vm1202_vm2, %v1809_v7 }
 0x7ff   : > { %8014 = vmatpush3.bf16.xpose.msk.msra.mxu1 %vm9183_vm3, %v8009_v2 }
 0x806   : > { %7750 = vmatmul.mubr.msk.f32.vlgmr.msra.gmra.mrb[8].mxu1 %vm1202_vm2, %v1811_v8 }
 0x8ce   : > { %v9274_v9 = vpop.f32.mrb[6].mxu1 }
 0x8cf   : > { %v9276_v10 = vpop.f32.mrb[7].mxu1 }
 0x8d9   : > { %v7751_v11 = vpop.f32.mrb[8].mxu1 }
 0x8da   : > { %v1900_v13 = vmul.f32 0.5, %v7751_v11  ;;  %v1890_v16 = vpop.f32.mrb[9].mxu1 }
 0x8db   : > { %v1899_v17 = vmul.f32 0.5, %v1890_v16 }
 0x8dc   : > { %v1902_v18 = vadd.f32 %v1900_v13, %v9196_v22 }
 0x8dd   : > { %v1901_v20 = vadd.f32 %v1899_v17, %v9201_v25 }
 0x8de   : > { %v1906_v21 = vsel %vm1290_vm4, %v1902_v18, -inf }
 0x8df   : > { %1907 = vmax.xlane.f32.xlu0 %v1906_v21  ;;  %v1903_v23 = vsel %vm1290_vm4, %v1901_v20, -inf }
 0x8e0   : > { %1904 = vmax.xlane.f32.xlu1 %v1903_v23 }
 0x96c   : > { %v1908_v24 = vpop.xlane.xlu0 %1907 }
 0x96d   : > { %v1910_v26 = vsub.f32 %v1902_v18, %v1908_v24  ;;  %v1905_v27 = vpop.xlane.xlu1 %1904 }
 0x96e   : > { %v1909_v28 = vsub.f32 %v1901_v20, %v1905_v27 }
 0x96f   : > { %v1913_v29 = vmul.f32 1.442695, %v1910_v26 }
 0x970   : > { %v1911_v30 = vmul.f32 1.442695, %v1909_v28 }
 0x971   : > { %8717 = vpow2.f32 %v1913_v29 }
 0x972   : > { %8719 = vpow2.f32 %v1911_v30 }
 0x97b   : > { %v8718_v31 = vpop.eup %8717 }
 0x97c   : > { %v8720_v32 = vpop.eup %8719  ;;  %v1918_v33 = vsel %vm1290_vm4, %v8718_v31, 0.0 }
 0x97d   : > { %1919 = vadd.xlane.f32.xlu1 %v1918_v33  ;;  %v1915_v34 = vsel %vm1290_vm4, %v8720_v32, 0.0 }
 0x97e   : > { %1916 = vadd.xlane.f32.xlu0 %v1915_v34 }
 0x98e   : > { %8579 = vrot.lane.b32.xlu1 %v9177_v15, %s8887_s26 }
 0x992   : > { %2012 = vrot.lane.b32.xlu1 %v9171_v14, %s8888_s3 }
 0x994   : > { %8574 = vrot.lane.b32.xlu0 %v9177_v15, %s8889_s28  ;;  %s10383_s28 = smov 72  }
 0x998   : > { %2014 = vrot.lane.b32.xlu0 %v9169_v12, %s8888_s3 }
 0xa0a   : > { %v1920_v37 = vpop.xlane.xlu1 %1919 }
 0xa0b   : > { %8721 = vrcp.f32 %v1920_v37  ;;  %v1917_v38 = vpop.xlane.xlu0 %1916 }
 0xa0c   : > { %8723 = vrcp.f32 %v1917_v38 }
 0xa0e   : > { %v8580_v39 = vpop.permute.xlu1 %8579 }
 0xa0f   : > { %v8575_v40 = vpop.permute.xlu0 %8574  ;;  %v8582_v41 = vunpack.i.h.bf16 %v8580_v39  ;;  %v8581_v42 = vunpack.i.l.bf16 %v8580_v39 }
 0xa10   : > { %v8577_v43 = vunpack.i.h.bf16 %v8575_v40  ;;  %v8576_v44 = vunpack.i.l.bf16 %v8575_v40 }
 0xa11   : > { %v8019_v46 = vpack.c.bf16 %v8582_v41, %v8581_v42 }
 0xa12   : > { %v8015_v45 = vpack.c.bf16 %v8577_v43, %v8576_v44  ;;  %v2013_v51 = vpop.permute.xlu1 %2012 }
 0xa13   : > { %v2015_v52 = vpop.permute.xlu0 %2014 }
 0xa14   : > { %8016 = vmatprep.subr.bf16.mxu0 %v8015_v45 }
 0xa15   : > { %v8722_v47 = vpop.eup %8721  ;;  %8018 = vmatpush3.bf16.msra.mxu0 %v8015_v45 }
 0xa16   : > { %v8724_v48 = vpop.eup %8723  ;;  %8021 = vmatprep.subr.msk.bf16.mxu0 %vm9183_vm3, %v8019_v46  ;;  %v1924_v50 = vmul.f32 %v8722_v47, %v8718_v31 }
 0xa17   : > { %v1923_v49 = vmul.f32 %v8724_v48, %v8720_v32 }
 0xa19   : > { %7756 = vmatprep.mubr.msk.f32.mxu0 %vm1290_vm4, %v1923_v49 }
 0xa1a   : > { %7757 = vmatmul.mubr.msk.f32.vlgmr.msra.gmra.mrb[6].mxu0 %vm1290_vm4, %v1924_v50 }
 0xa1b   : > { %7763 = vmatprep.mubr.msk.f32.mxu0 %vm1202_vm2, %v2013_v51 }
 0xa1e   : > { %8024 = vmatpush3.bf16.xpose.msk.msra.mxu0 %vm9183_vm3, %v8019_v46 }
 0xa25   : > { %7764 = vmatmul.mubr.msk.f32.vlgmr.msra.gmra.mrb[8].mxu0 %vm1202_vm2, %v2015_v52 }
 0xaed   : > { %v9299_v53 = vpop.f32.mrb[6].mxu0 }
 0xaee   : > { %v9301_v54 = vpop.f32.mrb[7].mxu0 }
 0xaf8   : > { %v7765_v55 = vpop.f32.mrb[8].mxu0 }
 0xaf9   : > { %v2104_v56 = vmul.f32 0.5, %v7765_v55  ;;  %v2094_v59 = vpop.f32.mrb[9].mxu0 }
 0xafa   : > { %v2103_v60 = vmul.f32 0.5, %v2094_v59 }
 0xafb   : > { %v2106_v61 = vadd.f32 %v2104_v56, %v9196_v22 }
 0xafc   : > { %v2105_v62 = vadd.f32 %v2103_v60, %v9201_v25 }
 0xafd   : > { %v2110_v63 = vsel %vm1290_vm4, %v2106_v61, -inf }
 0xafe   : > { %2111 = vmax.xlane.f32.xlu0 %v2110_v63  ;;  %v2107_v0 = vsel %vm1290_vm4, %v2105_v62, -inf }
 0xaff   : > { %2108 = vmax.xlane.f32.xlu1 %v2107_v0 }
 0xb8b   : > { %v2112_v1 = vpop.xlane.xlu0 %2111 }
 0xb8c   : > { %v2114_v2 = vsub.f32 %v2106_v61, %v2112_v1  ;;  %v2109_v3 = vpop.xlane.xlu1 %2108 }
 0xb8d   : > { %v2113_v4 = vsub.f32 %v2105_v62, %v2109_v3 }
 0xb8e   : > { %v2117_v5 = vmul.f32 1.442695, %v2114_v2 }
 0xb8f   : > { %v2115_v6 = vmul.f32 1.442695, %v2113_v4 }
 0xb90   : > { %8725 = vpow2.f32 %v2117_v5 }
 0xb91   : > { %8727 = vpow2.f32 %v2115_v6 }
 0xb9a   : > { %v8726_v7 = vpop.eup %8725 }
 0xb9b   : > { %v8728_v8 = vpop.eup %8727  ;;  %v2122_v11 = vsel %vm1290_vm4, %v8726_v7, 0.0 }
 0xb9c   : > { %2123 = vadd.xlane.f32.xlu1 %v2122_v11  ;;  %v2119_v13 = vsel %vm1290_vm4, %v8728_v8, 0.0 }
 0xb9d   : > { %2120 = vadd.xlane.f32.xlu0 %v2119_v13 }
 0xbad   : > { %8589 = vrot.lane.b32.xlu1 %v9177_v15, %s10400_s9 }
 0xbb1   : > { %2216 = vrot.lane.b32.xlu1 %v9171_v14, %s8891_s12 }
 0xbb3   : > { %8584 = vrot.lane.b32.xlu0 %v9177_v15, %s8892_s25  ;;  %s10384_s25 = smov 104  }
 0xbb7   : > { %2218 = vrot.lane.b32.xlu0 %v9169_v12, %s8891_s12 }
 0xc29   : > { %v2124_v16 = vpop.xlane.xlu1 %2123 }
 0xc2a   : > { %8729 = vrcp.f32 %v2124_v16  ;;  %v2121_v17 = vpop.xlane.xlu0 %2120 }
 0xc2b   : > { %8731 = vrcp.f32 %v2121_v17 }
 0xc2d   : > { %v8590_v18 = vpop.permute.xlu1 %8589 }
 0xc2e   : > { %v8585_v20 = vpop.permute.xlu0 %8584  ;;  %v8592_v21 = vunpack.i.h.bf16 %v8590_v18  ;;  %v8591_v23 = vunpack.i.l.bf16 %v8590_v18 }
 0xc2f   : > { %v8587_v24 = vunpack.i.h.bf16 %v8585_v20  ;;  %v8586_v26 = vunpack.i.l.bf16 %v8585_v20 }
 0xc30   : > { %v8029_v28 = vpack.c.bf16 %v8592_v21, %v8591_v23 }
 0xc31   : > { %v8025_v27 = vpack.c.bf16 %v8587_v24, %v8586_v26  ;;  %v2217_v33 = vpop.permute.xlu1 %2216 }
 0xc32   : > { %v2219_v34 = vpop.permute.xlu0 %2218 }
 0xc33   : > { %8026 = vmatprep.subr.bf16.mxu1 %v8025_v27 }
 0xc34   : > { %v8730_v29 = vpop.eup %8729  ;;  %8028 = vmatpush3.bf16.msra.mxu1 %v8025_v27 }
 0xc35   : > { %v8732_v30 = vpop.eup %8731  ;;  %8031 = vmatprep.subr.msk.bf16.mxu1 %vm9183_vm3, %v8029_v28  ;;  %v2128_v32 = vmul.f32 %v8730_v29, %v8726_v7 }
 0xc36   : > { %v2127_v31 = vmul.f32 %v8732_v30, %v8728_v8 }
 0xc38   : > { %7770 = vmatprep.mubr.msk.f32.mxu1 %vm1290_vm4, %v2127_v31 }
 0xc39   : > { %7771 = vmatmul.mubr.msk.f32.vlgmr.msra.gmra.mrb[10].mxu1 %vm1290_vm4, %v2128_v32 }
 0xc3a   : > { %7777 = vmatprep.mubr.msk.f32.mxu1 %vm1202_vm2, %v2217_v33 }
 0xc3d   : > { %8034 = vmatpush3.bf16.xpose.msk.msra.mxu1 %vm9183_vm3, %v8029_v28 }
 0xc44   : > { %7778 = vmatmul.mubr.msk.f32.vlgmr.msra.gmra.mrb[12].mxu1 %vm1202_vm2, %v2219_v34 }
 0xd0c   : > { %v9324_v37 = vpop.f32.mrb[10].mxu1 }
 0xd0d   : > { %v9326_v38 = vpop.f32.mrb[11].mxu1 }
 0xd17   : > { %v7779_v39 = vpop.f32.mrb[12].mxu1 }
 0xd18   : > { %v2308_v40 = vmul.f32 0.5, %v7779_v39  ;;  %v2298_v41 = vpop.f32.mrb[13].mxu1 }
 0xd19   : > { %v2307_v42 = vmul.f32 0.5, %v2298_v41 }
 0xd1a   : > { %v2310_v43 = vadd.f32 %v2308_v40, %v9196_v22 }
 0xd1b   : > { %v2309_v44 = vadd.f32 %v2307_v42, %v9201_v25 }
 0xd1c   : > { %v2314_v45 = vsel %vm1290_vm4, %v2310_v43, -inf }
 0xd1d   : > { %2315 = vmax.xlane.f32.xlu0 %v2314_v45  ;;  %v2311_v46 = vsel %vm1290_vm4, %v2309_v44, -inf }
 0xd1e   : > { %2312 = vmax.xlane.f32.xlu1 %v2311_v46 }
 0xdaa   : > { %v2316_v47 = vpop.xlane.xlu0 %2315 }
 0xdab   : > { %v2318_v48 = vsub.f32 %v2310_v43, %v2316_v47  ;;  %v2313_v49 = vpop.xlane.xlu1 %2312 }
 0xdac   : > { %v2317_v50 = vsub.f32 %v2309_v44, %v2313_v49 }
 0xdad   : > { %v2321_v51 = vmul.f32 1.442695, %v2318_v48 }
 0xdae   : > { %v2319_v52 = vmul.f32 1.442695, %v2317_v50 }
 0xdaf   : > { %8733 = vpow2.f32 %v2321_v51 }
 0xdb0   : > { %8735 = vpow2.f32 %v2319_v52 }
 0xdb9   : > { %v8734_v55 = vpop.eup %8733 }
 0xdba   : > { %v8736_v56 = vpop.eup %8735  ;;  %v2326_v59 = vsel %vm1290_vm4, %v8734_v55, 0.0 }
 0xdbb   : > { %2327 = vadd.xlane.f32.xlu1 %v2326_v59  ;;  %v2323_v60 = vsel %vm1290_vm4, %v8736_v56, 0.0 }
 0xdbc   : > { %2324 = vadd.xlane.f32.xlu0 %v2323_v60 }
 0xdcc   : > { %8599 = vrot.lane.b32.xlu1 %v9177_v15, %s10383_s28  ;;  %s10396_s28 = smov 12  }
 0xdd0   : > { %2420 = vrot.lane.b32.xlu1 %v9171_v14, %s10384_s25 }
 0xdd2   : > { %8594 = vrot.lane.b32.xlu0 %v9177_v15, %s8895_s29  ;;  %s10380_s29 = smov 68  }
 0xdd6   : > { %2422 = vrot.lane.b32.xlu0 %v9169_v12, %s10384_s25  ;;  %s10394_s25 = smov 16  }
 0xe48   : > { %v2328_v61 = vpop.xlane.xlu1 %2327 }
 0xe49   : > { %8737 = vrcp.f32 %v2328_v61  ;;  %v2325_v62 = vpop.xlane.xlu0 %2324 }
 0xe4a   : > { %8739 = vrcp.f32 %v2325_v62 }
 0xe4c   : > { %v8600_v63 = vpop.permute.xlu1 %8599 }
 0xe4d   : > { %v8595_v0 = vpop.permute.xlu0 %8594  ;;  %v8602_v1 = vunpack.i.h.bf16 %v8600_v63  ;;  %v8601_v2 = vunpack.i.l.bf16 %v8600_v63 }
 0xe4e   : > { %v8597_v3 = vunpack.i.h.bf16 %v8595_v0  ;;  %v8596_v4 = vunpack.i.l.bf16 %v8595_v0 }
 0xe4f   : > { %v8039_v6 = vpack.c.bf16 %v8602_v1, %v8601_v2 }
 0xe50   : > { %v8035_v5 = vpack.c.bf16 %v8597_v3, %v8596_v4  ;;  %v2421_v16 = vpop.permute.xlu1 %2420 }
 0xe51   : > { %v2423_v17 = vpop.permute.xlu0 %2422 }
 0xe52   : > { %8036 = vmatprep.subr.bf16.mxu0 %v8035_v5 }
 0xe53   : > { %v8738_v7 = vpop.eup %8737  ;;  %8038 = vmatpush3.bf16.msra.mxu0 %v8035_v5 }
 0xe54   : > { %v8740_v8 = vpop.eup %8739  ;;  %8041 = vmatprep.subr.msk.bf16.mxu0 %vm9183_vm3, %v8039_v6  ;;  %v2332_v13 = vmul.f32 %v8738_v7, %v8734_v55 }
 0xe55   : > { %v2331_v11 = vmul.f32 %v8740_v8, %v8736_v56 }
 0xe57   : > { %7784 = vmatprep.mubr.msk.f32.mxu0 %vm1290_vm4, %v2331_v11 }
 0xe58   : > { %7785 = vmatmul.mubr.msk.f32.vlgmr.msra.gmra.mrb[10].mxu0 %vm1290_vm4, %v2332_v13 }
 0xe59   : > { %7791 = vmatprep.mubr.msk.f32.mxu0 %vm1202_vm2, %v2421_v16 }
 0xe5c   : > { %8044 = vmatpush3.bf16.xpose.msk.msra.mxu0 %vm9183_vm3, %v8039_v6 }
 0xe63   : > { %7792 = vmatmul.mubr.msk.f32.vlgmr.msra.gmra.mrb[12].mxu0 %vm1202_vm2, %v2423_v17 }
 0xf2b   : > { %v9349_v18 = vpop.f32.mrb[10].mxu0 }
 0xf2c   : > { %v9351_v20 = vpop.f32.mrb[11].mxu0 }
 0xf36   : > { %v7793_v21 = vpop.f32.mrb[12].mxu0 }
 0xf37   : > { %v2512_v23 = vmul.f32 0.5, %v7793_v21  ;;  %v2502_v24 = vpop.f32.mrb[13].mxu0 }
 0xf38   : > { %v2511_v26 = vmul.f32 0.5, %v2502_v24 }
 0xf39   : > { %v2514_v27 = vadd.f32 %v2512_v23, %v9196_v22 }
 0xf3a   : > { %v2513_v28 = vadd.f32 %v2511_v26, %v9201_v25 }
 0xf3b   : > { %v2518_v29 = vsel %vm1290_vm4, %v2514_v27, -inf }
 0xf3c   : > { %2519 = vmax.xlane.f32.xlu0 %v2518_v29  ;;  %v2515_v30 = vsel %vm1290_vm4, %v2513_v28, -inf }
 0xf3d   : > { %2516 = vmax.xlane.f32.xlu1 %v2515_v30  ;;  %v1106_v30 = vld [vmem:[%s9072_s27 + $0x18] sm:$0xff] }
 0xfc9   : > { %v2520_v31 = vpop.xlane.xlu0 %2519 }
 0xfca   : > { %v2522_v32 = vsub.f32 %v2514_v27, %v2520_v31  ;;  %v2517_v33 = vpop.xlane.xlu1 %2516  ;;  %v1104_v27 = vld [vmem:[%s9072_s27 + $0x8] sm:$0xff] }
 0xfcb   : > { %v2521_v34 = vsub.f32 %v2513_v28, %v2517_v33  ;;  %v1105_v28 = vld [vmem:[%s9072_s27 + $0x10] sm:$0xff] }
 0xfcc   : > { %v2525_v39 = vmul.f32 1.442695, %v2522_v32  ;;  %v8063_v31 = vpack.c.bf16 %v1106_v30, %v1105_v28  ;;  %v3037_v28 = vld [vmem:[%s9089_s10] sm:$0xff] }
 0xfcd   : > { %v2523_v40 = vmul.f32 1.442695, %v2521_v34 }
 0xfce   : > { %8741 = vpow2.f32 %v2525_v39 }
 0xfcf   : > { %8743 = vpow2.f32 %v2523_v40 }
 0xfd8   : > { %v8742_v41 = vpop.eup %8741 }
 0xfd9   : > { %v8744_v42 = vpop.eup %8743  ;;  %v2530_v43 = vsel %vm1290_vm4, %v8742_v41, 0.0 }
 0xfda   : > { %2531 = vadd.xlane.f32.xlu1 %v2530_v43  ;;  %v2527_v44 = vsel %vm1290_vm4, %v8744_v42, 0.0 }
 0xfdb   : > { %2528 = vadd.xlane.f32.xlu0 %v2527_v44 }
 0xfeb   : > { %8609 = vrot.lane.b32.xlu1 %v9177_v15, %s10380_s29  ;;  %s8900_s29 = smov 36  }
 0xfef   : > { %2624 = vrot.lane.b32.xlu1 %v9171_v14, %s10381_s0 }
 0xff1   : > { %8604 = vrot.lane.b32.xlu0 %v9177_v15, %s8898_s30  ;;  %s10398_s30 = smov 4  }
 0xff5   : > { %2626 = vrot.lane.b32.xlu0 %v9169_v12, %s10381_s0  ;;  %s10386_s0 = smov 8  }
0x1067   : > { %v2532_v45 = vpop.xlane.xlu1 %2531 }
0x1068   : > { %8745 = vrcp.f32 %v2532_v45  ;;  %v2529_v46 = vpop.xlane.xlu0 %2528 }
0x1069   : > { %8747 = vrcp.f32 %v2529_v46 }
0x106b   : > { %v8610_v47 = vpop.permute.xlu1 %8609 }
0x106c   : > { %v8605_v48 = vpop.permute.xlu0 %8604  ;;  %v8612_v49 = vunpack.i.h.bf16 %v8610_v47  ;;  %v8611_v50 = vunpack.i.l.bf16 %v8610_v47 }
0x106d   : > { %v8607_v51 = vunpack.i.h.bf16 %v8605_v48  ;;  %v8606_v52 = vunpack.i.l.bf16 %v8605_v48 }
0x106e   : > { %v8049_v56 = vpack.c.bf16 %v8612_v49, %v8611_v50 }
0x106f   : > { %v8045_v55 = vpack.c.bf16 %v8607_v51, %v8606_v52  ;;  %v2625_v61 = vpop.permute.xlu1 %2624 }
0x1070   : > { %v2627_v62 = vpop.permute.xlu0 %2626 }
0x1071   : > { %8046 = vmatprep.subr.bf16.mxu1 %v8045_v55 }
0x1072   : > { %v8746_v14 = vpop.eup %8745  ;;  %8048 = vmatpush3.bf16.msra.mxu1 %v8045_v55 }
0x1073   : > { %v8748_v59 = vpop.eup %8747  ;;  %8051 = vmatprep.subr.msk.bf16.mxu1 %vm9183_vm3, %v8049_v56  ;;  %v2536_v60 = vmul.f32 %v8746_v14, %v8742_v41 }
0x1074   : > { %v2535_v12 = vmul.f32 %v8748_v59, %v8744_v42 }
0x1076   : > { %7798 = vmatprep.mubr.msk.f32.mxu1 %vm1290_vm4, %v2535_v12 }
0x1077   : > { %7799 = vmatmul.mubr.msk.f32.vlgmr.msra.gmra.mrb[14].mxu1 %vm1290_vm4, %v2536_v60 }
0x1078   : > { %7805 = vmatprep.mubr.msk.f32.mxu1 %vm1202_vm2, %v2625_v61 }
0x107b   : > { %8054 = vmatpush3.bf16.xpose.msk.msra.mxu1 %vm9183_vm3, %v8049_v56 }
0x1082   : > { %7806 = vmatmul.mubr.msk.f32.vlgmr.msra.gmra.mrb[16].mxu1 %vm1202_vm2, %v2627_v62 }
0x114a   : > { %v7800_v63 = vpop.f32.mrb[14].mxu1 }
0x114b   : > { %v2615_v0 = vpop.f32.mrb[15].mxu1 }
0x1155   : > { %v7807_v1 = vpop.f32.mrb[16].mxu1 }
0x1156   : > { %v2716_v2 = vmul.f32 0.5, %v7807_v1  ;;  %v2706_v3 = vpop.f32.mrb[17].mxu1 }
0x1157   : > { %v2715_v4 = vmul.f32 0.5, %v2706_v3 }
0x1158   : > { %v2718_v5 = vadd.f32 %v2716_v2, %v9196_v22 }
0x1159   : > { %v2717_v6 = vadd.f32 %v2715_v4, %v9201_v25 }
0x115a   : > { %v2722_v7 = vsel %vm1290_vm4, %v2718_v5, -inf }
0x115b   : > { %2723 = vmax.xlane.f32.xlu0 %v2722_v7  ;;  %v2719_v8 = vsel %vm1290_vm4, %v2717_v6, -inf  ;;  %v8833_v7 = vld [vmem:[#allocation2 + $0x8] sm:$0xff] }
0x115c   : > { %2720 = vmax.xlane.f32.xlu1 %v2719_v8 }
0x11e8   : > { %v2724_v11 = vpop.xlane.xlu0 %2723 }
0x11e9   : > { %v2726_v13 = vsub.f32 %v2718_v5, %v2724_v11  ;;  %v2721_v16 = vpop.xlane.xlu1 %2720  ;;  %v8834_v11 = vld [vmem:[#allocation2] sm:$0xff] }
0x11ea   : > { %v2725_v17 = vsub.f32 %v2717_v6, %v2721_v16 }
0x11eb   : > { %v2729_v21 = vmul.f32 1.442695, %v2726_v13 }
0x11ec   : > { %v2727_v23 = vmul.f32 1.442695, %v2725_v17 }
0x11ed   : > { %8749 = vpow2.f32 %v2729_v21 }
0x11ee   : > { %8751 = vpow2.f32 %v2727_v23 }
0x11f7   : > { %v8750_v24 = vpop.eup %8749 }
0x11f8   : > { %v8752_v26 = vpop.eup %8751  ;;  %v2734_v22 = vsel %vm1290_vm4, %v8750_v24, 0.0 }
0x11f9   : > { %2735 = vadd.xlane.f32.xlu1 %v2734_v22  ;;  %v2731_v25 = vsel %vm1290_vm4, %v8752_v26, 0.0 }
0x11fa   : > { %2732 = vadd.xlane.f32.xlu0 %v2731_v25 }
0x120a   : > { %2830 = vrot.lane.b32.xlu1 %v9251_v36, %s10398_s30 }
0x120e   : > { %2832 = vrot.lane.b32.xlu1 %v9249_v35, %s10398_s30  ;;  %s10454_s30 = sld [smem:[#allocation17_spill]] }
0x1210   : > { %8614 = vrot.lane.b32.xlu0 %v9177_v15, %s8900_s29  ;;  %s10392_s29 = smov 20  }
0x1212   : > { %2840 = vrot.lane.b32.xlu1 %v9274_v9, %s10386_s0 }
0x1214   : > { %2838 = vrot.lane.b32.xlu0 %v9276_v10, %s10386_s0  ;;  %s10388_s0 = smov 24   ;;  %s10455_s9 = scalar_lea.vmem %s10454_s30, %s9057_s7 }
0x1215   : > { %s10470_s30 = smov 28  }
0x1216   : > { %2848 = vrot.lane.b32.xlu1 %v9299_v53, %s10396_s28 }
0x1218   : > { %2846 = vrot.lane.b32.xlu0 %v9301_v54, %s10396_s28  ;;  %s10472_s28 = scalar_lea.vmem %s10360_s16, %s9057_s7 }
0x121a   : > { %2856 = vrot.lane.b32.xlu1 %v9324_v37, %s10394_s25 }
0x121c   : > { %2854 = vrot.lane.b32.xlu0 %v9326_v38, %s10394_s25 }
0x121e   : > { %2864 = vrot.lane.b32.xlu1 %v9349_v18, %s10392_s29 }
0x1220   : > { %2862 = vrot.lane.b32.xlu0 %v9351_v20, %s10392_s29  ;;  %v1103_v20 = vld [vmem:[%s9072_s27] sm:$0xff]  ;;  %s10449_s29 = sld [smem:[#allocation15_spill]] }
0x1221   : > { %v8059_v29 = vpack.c.bf16 %v1104_v27, %v1103_v20 }
0x1222   : > { %2872 = vrot.lane.b32.xlu1 %v7800_v63, %s10388_s0 }
0x1224   : > { %2870 = vrot.lane.b32.xlu0 %v2615_v0, %s10388_s0  ;;  %s10390_s0 = smov 28  }
0x1226   : > { %s10450_s25 = scalar_lea.vmem %s10449_s29, %s9057_s7  ;;  %s10451_s29 = sld [smem:[#allocation9_spill]] }
0x1227   : > { %v7133_v2 = vld [vmem:[%s10450_s25] ss:$0 sm:$0xff] }
0x122c   : > { %v1094_v20 = vld [vmem:[%s10451_s29] sm:$0xff]  ;;  %v1095_v27 = vld [vmem:[%s10451_s29 + $0x8] sm:$0xff] }
0x1286   : > { %v2736_v15 = vpop.xlane.xlu1 %2735 }
0x1287   : > { %8753 = vrcp.f32 %v2736_v15  ;;  %v2733_v35 = vpop.xlane.xlu0 %2732 }
0x1288   : > { %8755 = vrcp.f32 %v2733_v35 }
0x128a   : > { %v2831_v34 = vpop.permute.xlu1 %2830 }
0x128b   : > { %v8615_v36 = vpop.permute.xlu0 %8614  ;;  %v2884_v48 = vsel %vm1202_vm2, %v9226_v58, %v2831_v34 }
0x128c   : > { %v8617_v9 = vunpack.i.h.bf16 %v8615_v36  ;;  %v8616_v10 = vunpack.i.l.bf16 %v8615_v36 }
0x128e   : > { %v8055_v53 = vpack.c.bf16 %v8617_v9, %v8616_v10  ;;  %v2833_v39 = vpop.permute.xlu1 %2832  ;;  %v3129_v10 = vld [vmem:[%s9098_s22] sm:$0xff] }
0x128f   : > { %v2839_v41 = vpop.permute.xlu0 %2838  ;;  %v2885_v50 = vsel %vm1202_vm2, %v9224_v57, %v2833_v39 }
0x1290   : > { %8056 = vmatprep.subr.bf16.mxu0 %v8055_v53  ;;  %v2887_v51 = vsel %vm2886_vm5, %v2884_v48, %v2839_v41 }
0x1291   : > { %v8754_v54 = vpop.eup %8753  ;;  %8058 = vmatpush3.bf16.msra.mxu0 %v8055_v53  ;;  %v3130_v53 = vld [vmem:[%s9098_s22 + $0x8] sm:$0xff] }
0x1292   : > { %v8756_v37 = vpop.eup %8755  ;;  %v2740_v18 = vmul.f32 %v8754_v54, %v8750_v24  ;;  %8060 = vmatprep.subr.bf16.mxu0 %v8059_v29  ;;  %v2841_v40 = vpop.permute.xlu1 %2840  ;;  %v8075_v54 = vpack.c.bf16 %v3130_v53, %v3129_v10 }
0x1293   : > { %v2739_v38 = vmul.f32 %v8756_v37, %v8752_v26  ;;  %v2847_v43 = vpop.permute.xlu0 %2846  ;;  %v2888_v55 = vsel %vm2886_vm5, %v2885_v50, %v2841_v40  ;;  %v3131_v37 = vld [vmem:[%s9098_s22 + $0x10] sm:$0xff] }
0x1294   : > { %v2890_v56 = vsel %vm2889_vm6, %v2887_v51, %v2847_v43 }
0x1295   : > { %7812 = vmatprep.mubr.msk.f32.mxu0 %vm1290_vm4, %v2739_v38  ;;  %v3132_v38 = vld [vmem:[%s9098_s22 + $0x18] sm:$0xff]  ;;  %s10458_s22 = sld [smem:[#allocation11_spill]] }
0x1296   : > { %7813 = vmatmul.mubr.msk.f32.vlgmr.msra.gmra.mrb[14].mxu0 %vm1290_vm4, %v2740_v18  ;;  %v2849_v42 = vpop.permute.xlu1 %2848  ;;  %v8079_v18 = vpack.c.bf16 %v3132_v38, %v3131_v37 }
0x1297   : > { %8062 = vmatpush3.bf16.msra.mxu0 %v8059_v29  ;;  %v2855_v45 = vpop.permute.xlu0 %2854  ;;  %v2891_v14 = vsel %vm2889_vm6, %v2888_v55, %v2849_v42  ;;  %v3038_v29 = vld [vmem:[%s9089_s10 + $0x8] sm:$0xff] }
0x1298   : > { %8064 = vmatprep.subr.bf16.mxu0 %v8063_v31  ;;  %v2892_v59 = vsel %vm1290_vm4, %v2890_v56, %v2855_v45  ;;  %v8067_v30 = vpack.c.bf16 %v3038_v29, %v3037_v28 }
0x129a   : > { %v2857_v44 = vpop.permute.xlu1 %2856  ;;  %8068 = vmatprep.subr.bf16.mxu1 %v8067_v30 }
0x129b   : > { %8066 = vmatpush3.bf16.msra.mxu0 %v8063_v31  ;;  %v2863_v47 = vpop.permute.xlu0 %2862  ;;  %v2893_v58 = vsel %vm1290_vm4, %v2891_v14, %v2857_v44  ;;  %8070 = vmatpush3.bf16.msra.mxu1 %v8067_v30  ;;  %v3039_v31 = vld [vmem:[%s9089_s10 + $0x10] sm:$0xff] }
0x129c   : > { %v2895_v12 = vsel %vm2894_vm7, %v2892_v59, %v2863_v47  ;;  %8076 = vmatprep.subr.bf16.mxu0 %v8075_v54  ;;  %v7137_v47 = vld [vmem:[%s10455_s9] ss:$0 sm:$0xff]  ;;  %s10469_s9 = smov 24  }
0x129e   : > { %v2865_v46 = vpop.permute.xlu1 %2864 }
0x129f   : > { %v2871_v52 = vpop.permute.xlu0 %2870  ;;  %v2896_v60 = vsel %vm2894_vm7, %v2893_v58, %v2865_v46 }
0x12a0   : > { %v2898_v61 = vsel %vm2897_vm8, %v2895_v12, %v2871_v52 }
0x12a2   : > { %v2873_v49 = vpop.permute.xlu1 %2872 }
0x12a3   : > { %v2899_v63 = vsel %vm2897_vm8, %v2896_v60, %v2873_v49 }
0x1369   : > { %v7814_v32 = vpop.f32.mrb[14].mxu0 }
0x136a   : > { %2880 = vrot.lane.b32.xlu1 %v7814_v32, %s10390_s0  ;;  %v2819_v33 = vpop.f32.mrb[15].mxu0  ;;  %v3040_v32 = vld [vmem:[%s9089_s10 + $0x18] sm:$0xff]  ;;  %s10471_s10 = scalar_lea.vmem %s10359_s15, %s9057_s7 }
0x136b   : > { %2878 = vrot.lane.b32.xlu0 %v2819_v33, %s10390_s0  ;;  %v8071_v33 = vpack.c.bf16 %v3040_v32, %v3039_v31  ;;  %s10452_s0 = sld [smem:[#allocation16_spill]] }
0x136d   : > { %8072 = vmatprep.subr.bf16.mxu1 %v8071_v33 }
0x136e   : > { %8074 = vmatpush3.bf16.msra.mxu1 %v8071_v33 }
0x1371   : > { %s10453_s25 = scalar_lea.vmem %s10452_s0, %s9057_s7  ;;  %s10456_s0 = scalar_lea.vmem %s10357_s13, %s9057_s7 }
0x1372   : > { %v7136_v45 = vld [vmem:[%s10453_s25] ss:$0 sm:$0xff]  ;;  %s10457_s25 = scalar_lea.vmem %s10355_s11, %s9057_s7 }
0x1373   : > { %v7141_v56 = vld [vmem:[%s10456_s0] ss:$0 sm:$0xff]  ;;  %s10468_s0 = smov 20  }
0x13dc   : > { %v2881_v57 = vpop.permute.xlu1 %2880 }
0x13dd   : > { %v2879_v62 = vpop.permute.xlu0 %2878  ;;  %v2902_v1 = vsel %vm2900_vm9, %v2899_v63, %v2881_v57 }
0x13de   : > { %v2901_v0 = vsel %vm2900_vm9, %v2898_v61, %v2879_v62 }
0x13df   : > { %7823 = vmatprep.mubr.msk.f32.mxu0 %vm1114_vm1, %v2901_v0 }
0x13e0   : > { %7824 = vmatmul.mubr.msk.f32.vlgmr.msra.gmra.mrb[16].mxu0 %vm1114_vm1, %v2902_v1  ;;  %v7138_v1 = vld [vmem:[%s10457_s25] ss:$0 sm:$0xff]  ;;  %s10481_s25 = sld [smem:[#allocation6_spill]] }
0x13e1   : > { %8078 = vmatpush3.bf16.msra.mxu0 %v8075_v54  ;;  %7845 = vmatprep.mubr.msk.f32.mxu0 %vm1114_vm1, %v1094_v20 }
0x13e2   : > { %8080 = vmatprep.subr.bf16.mxu0 %v8079_v18 }
0x13e5   : > { %8082 = vmatpush3.bf16.msra.mxu0 %v8079_v18 }
0x13e6   : > { %p7216_p5 = scmp.ne.s32.totalorder %s10481_s25, 5 }
0x13e7   : > { %s10482_s27 = sld [smem:[#allocation27_spill]] (!%p7216_p5) }
0x13e8   : > { %7846 = vmatmul.mubr.msk.f32.vlgmr.msra.gmra.mrb[18].mxu0 %vm1114_vm1, %v1095_v27 }
0x14b3   : > { %v7825_v3 = vpop.f32.mrb[16].mxu0 }
0x14b4   : > { %v2987_v4 = vadd.f32 %v7825_v3, %v7133_v2  ;;  %v2981_v5 = vpop.f32.mrb[17].mxu0 }
0x14b5   : > { %v2982_v6 = vadd.f32 %v7133_v2, %v2981_v5 }
0x14b6   : > { %v2991_v8 = vadd.f32 %v8833_v7, %v2987_v4 }
0x14b7   : > { %v2990_v13 = vadd.f32 %v8834_v11, %v2982_v6  ;;  %v9511_v11 = vld [vmem:[%s10458_s22 + $0x8] sm:$0xff] }
0x14b8   : > { %v2997_v16 = vsel %vm1114_vm1, %v2991_v8, 0.0 }
0x14b9   : > { %2998 = vadd.xlane.f32.xlu1 %v2997_v16  ;;  %v2994_v17 = vsel %vm1114_vm1, %v2990_v13, 0.0 }
0x14ba   : > { %2995 = vadd.xlane.f32.xlu0 %v2994_v17  ;;  %v9516_v17 = vld [vmem:[%s10458_s22] sm:$0xff] }
0x14bb   : > { %v7847_v14 = vpop.f32.mrb[18].mxu0 }
0x14bc   : > { %v3218_v59 = vadd.f32 %v7847_v14, %v7141_v56  ;;  %v3212_v58 = vpop.f32.mrb[19].mxu0 }
0x14bd   : > { %v3213_v12 = vadd.f32 %v7141_v56, %v3212_v58 }
0x14bf   : > { %v9477_v57 = vpack.i.bf16 %v3218_v59, %v3213_v12  ;;  %v8083_v60 = vpack.c.bf16 %v3218_v59, %v3213_v12 }
0x14c1   : > { %8085 = vmatprep.subr.msk.bf16.mxu1 %vm9183_vm3, %v8083_v60 }
0x14ca   : > { %8619 = vrot.lane.b32.xlu1 %v9477_v57, %s8880_s24 }
0x1546   : > { %v2999_v21 = vpop.xlane.xlu1 %2998 }
0x1547   : > { %v3002_v23 = vmul.f32 0.03125, %v2999_v21  ;;  %v2996_v24 = vpop.xlane.xlu0 %2995 }
0x1548   : > { %v3001_v26 = vmul.f32 0.03125, %v2996_v24 }
0x1549   : > { %v3004_v22 = vsub.f32 %v2991_v8, %v3002_v23 }
0x154a   : > { %v3003_v25 = vsub.f32 %v2990_v13, %v3001_v26  ;;  %v8620_v61 = vpop.permute.xlu1 %8619 }
0x154b   : > { %v3006_v36 = vmul.f32 %v3004_v22, %v3004_v22  ;;  %v8622_v62 = vunpack.i.h.bf16 %v8620_v61  ;;  %v8621_v63 = vunpack.i.l.bf16 %v8620_v61 }
0x154c   : > { %v3005_v15 = vmul.f32 %v3003_v25, %v3003_v25 }
0x154d   : > { %v3010_v9 = vsel %vm1114_vm1, %v3006_v36, 0.0  ;;  %v8093_v0 = vpack.c.bf16 %v8622_v62, %v8621_v63 }
0x154e   : > { %v3007_v35 = vsel %vm1114_vm1, %v3005_v15, 0.0 }
0x154f   : > { %3008 = vadd.xlane.f32.xlu0 %v3007_v35 }
0x1553   : > { %3011 = vadd.xlane.f32.xlu0 %v3010_v9 }
0x15dc   : > { %v3009_v34 = vpop.xlane.xlu0 %3008 }
0x15dd   : > { %v3013_v39 = vmul.f32 0.03125, %v3009_v34 }
0x15df   : > { %v3015_v40 = vadd.f32 1e-05, %v3013_v39 }
0x15e0   : > { %v3012_v41 = vpop.xlane.xlu0 %3011 }
0x15e1   : > { %8757 = vrsqrt.f32 %v3015_v40  ;;  %v3014_v42 = vmul.f32 0.03125, %v3012_v41 }
0x15e3   : > { %v3016_v43 = vadd.f32 1e-05, %v3014_v42 }
0x15e5   : > { %8759 = vrsqrt.f32 %v3016_v43 }
0x15eb   : > { %v8758_v44 = vpop.eup %8757 }
0x15ec   : > { %v3019_v46 = vmul.f32 %v8758_v44, %v3003_v25 }
0x15ee   : > { %v3027_v48 = vmul.f32 %v7136_v45, %v3019_v46 }
0x15ef   : > { %v8760_v49 = vpop.eup %8759 }
0x15f0   : > { %v3020_v50 = vmul.f32 %v8760_v49, %v3004_v22  ;;  %v9464_v51 = vadd.f32 %v7137_v47, %v3027_v48 }
0x15f2   : > { %v3028_v52 = vmul.f32 %v7136_v45, %v3020_v50  ;;  %7834 = vmatprep.mubr.msk.f32.mxu1 %vm1114_vm1, %v9464_v51 }
0x15f4   : > { %v9468_v55 = vadd.f32 %v7137_v47, %v3028_v52 }
0x15f6   : > { %7835 = vmatmul.mubr.msk.f32.vlgmr.msra.gmra.mrb[18].mxu1 %vm1114_vm1, %v9468_v55 }
0x15f7   : > { %8088 = vmatpush3.bf16.xpose.msk.msra.mxu1 %vm9183_vm3, %v8083_v60 }
0x15f8   : > { %8095 = vmatprep.subr.msk.bf16.mxu1 %vm9183_vm3, %v8093_v0 }
0x16c9   : > { %v7836_v2 = vpop.f32.mrb[18].mxu1 }
0x16ca   : > { %v9492_v3 = vadd.f32 %v7836_v2, %v7138_v1  ;;  %v3120_v4 = vpop.f32.mrb[19].mxu1 }
0x16cb   : > { %v9494_v5 = vadd.f32 %v7138_v1, %v3120_v4 }
0x16cc   : > { %3425 = vrot.lane.b32.xlu1 %v9492_v3, %s8880_s24 }
0x16cd   : > { %3423 = vrot.lane.b32.xlu0 %v9494_v5, %s8880_s24  ;;  %7852 = vmatprep.mubr.msk.f32.mxu1 %vm1202_vm2, %v9494_v5 }
0x16ce   : > { %7853 = vmatmul.mubr.msk.f32.vlgmr.msra.gmra.mrb[20].mxu1 %vm1202_vm2, %v9492_v3 }
0x16cf   : > { %8098 = vmatpush3.bf16.xpose.msk.msra.mxu1 %vm9183_vm3, %v8093_v0 }
0x173e   : > { %v3426_v7 = vpop.permute.xlu1 %3425 }
0x173f   : > { %v3424_v6 = vpop.permute.xlu0 %3423 }
0x1740   : > { %7866 = vmatprep.mubr.msk.f32.mxu1 %vm1202_vm2, %v3424_v6 }
0x1741   : > { %7867 = vmatmul.mubr.msk.f32.vlgmr.msra.gmra.mrb[22].mxu1 %vm1202_vm2, %v3426_v7 }
0x17a1   : > { %v7854_v8 = vpop.f32.mrb[20].mxu1 }
0x17a2   : > { %v3311_v13 = vmul.f32 0.5, %v7854_v8  ;;  %v3301_v16 = vpop.f32.mrb[21].mxu1 }
0x17a3   : > { %v3310_v21 = vmul.f32 0.5, %v3301_v16 }
0x17a4   : > { %v3313_v23 = vadd.f32 %v3311_v13, %v9511_v11 }
0x17a5   : > { %v3312_v24 = vadd.f32 %v3310_v21, %v9516_v17 }
0x17a6   : > { %v3317_v26 = vsel %vm1290_vm4, %v3313_v23, -inf }
0x17a7   : > { %3318 = vmax.xlane.f32.xlu0 %v3317_v26  ;;  %v3314_v22 = vsel %vm1290_vm4, %v3312_v24, -inf }
0x17a8   : > { %3315 = vmax.xlane.f32.xlu1 %v3314_v22 }
0x1814   : > { %v7868_v25 = vpop.f32.mrb[22].mxu1 }
0x1815   : > { %v3515_v15 = vmul.f32 0.5, %v7868_v25  ;;  %v3505_v35 = vpop.f32.mrb[23].mxu1 }
0x1816   : > { %v3514_v36 = vmul.f32 0.5, %v3505_v35 }
0x1817   : > { %v3517_v9 = vadd.f32 %v3515_v15, %v9511_v11 }
0x1818   : > { %v3516_v10 = vadd.f32 %v3514_v36, %v9516_v17 }
0x1819   : > { %v3521_v53 = vsel %vm1290_vm4, %v3517_v9, -inf }
0x181a   : > { %3522 = vmax.xlane.f32.xlu1 %v3521_v53  ;;  %v3518_v54 = vsel %vm1290_vm4, %v3516_v10, -inf }
0x181b   : > { %3519 = vmax.xlane.f32.xlu0 %v3518_v54 }
0x1834   : > { %v3319_v37 = vpop.xlane.xlu0 %3318 }
0x1835   : > { %v3321_v38 = vsub.f32 %v3313_v23, %v3319_v37  ;;  %v3316_v18 = vpop.xlane.xlu1 %3315 }
0x1836   : > { %v3320_v20 = vsub.f32 %v3312_v24, %v3316_v18 }
0x1837   : > { %v3324_v27 = vmul.f32 1.442695, %v3321_v38 }
0x1838   : > { %v3322_v28 = vmul.f32 1.442695, %v3320_v20 }
0x1839   : > { %8761 = vpow2.f32 %v3324_v27 }
0x183a   : > { %8763 = vpow2.f32 %v3322_v28 }
0x1843   : > { %v8762_v29 = vpop.eup %8761 }
0x1844   : > { %v8764_v30 = vpop.eup %8763  ;;  %v3329_v31 = vsel %vm1290_vm4, %v8762_v29, 0.0 }
0x1845   : > { %3330 = vadd.xlane.f32.xlu1 %v3329_v31  ;;  %v3326_v32 = vsel %vm1290_vm4, %v8764_v30, 0.0 }
0x1846   : > { %3327 = vadd.xlane.f32.xlu0 %v3326_v32 }
0x18a7   : > { %v3523_v33 = vpop.xlane.xlu1 %3522 }
0x18a8   : > { %v3525_v34 = vsub.f32 %v3517_v9, %v3523_v33  ;;  %v3520_v39 = vpop.xlane.xlu0 %3519 }
0x18a9   : > { %v3524_v40 = vsub.f32 %v3516_v10, %v3520_v39 }
0x18aa   : > { %v3528_v41 = vmul.f32 1.442695, %v3525_v34 }
0x18ab   : > { %v3526_v42 = vmul.f32 1.442695, %v3524_v40 }
0x18ac   : > { %8765 = vpow2.f32 %v3528_v41 }
0x18ad   : > { %8767 = vpow2.f32 %v3526_v42 }
0x18b6   : > { %v8766_v43 = vpop.eup %8765 }
0x18b7   : > { %v8768_v44 = vpop.eup %8767  ;;  %v3533_v45 = vsel %vm1290_vm4, %v8766_v43, 0.0 }
0x18b8   : > { %3534 = vadd.xlane.f32.xlu1 %v3533_v45  ;;  %v3530_v46 = vsel %vm1290_vm4, %v8768_v44, 0.0 }
0x18b9   : > { %3531 = vadd.xlane.f32.xlu0 %v3530_v46 }
0x18c9   : > { %8629 = vrot.lane.b32.xlu1 %v9477_v57, %s8879_s2  ;;  %s10460_s2 = smov 104  }
0x18cd   : > { %8634 = vrot.lane.b32.xlu1 %v9477_v57, %s8883_s17 }
0x18cf   : > { %8624 = vrot.lane.b32.xlu0 %v9477_v57, %s8877_s4  ;;  %s10459_s4 = smov 76  }
0x18d1   : > { %3629 = vrot.lane.b32.xlu1 %v9492_v3, %s8883_s17 }
0x18d2   : > { %v3331_v50 = vpop.xlane.xlu1 %3330 }
0x18d3   : > { %3627 = vrot.lane.b32.xlu0 %v9494_v5, %s8883_s17  ;;  %v3328_v47 = vpop.xlane.xlu0 %3327  ;;  %s10462_s17 = smov 100  }
0x18d4   : > { %8769 = vrcp.f32 %v3328_v47 }
0x18d5   : > { %8771 = vrcp.f32 %v3331_v50 }
0x18de   : > { %v8770_v48 = vpop.eup %8769 }
0x18df   : > { %v3334_v49 = vmul.f32 %v8770_v48, %v8764_v30  ;;  %v8772_v0 = vpop.eup %8771 }
0x18e0   : > { %v3335_v7 = vmul.f32 %v8772_v0, %v8762_v29 }
0x18e1   : > { %7859 = vmatprep.mubr.msk.f32.mxu0 %vm1290_vm4, %v3334_v49 }
0x1945   : > { %v3535_v52 = vpop.xlane.xlu1 %3534 }
0x1946   : > { %v3532_v56 = vpop.xlane.xlu0 %3531 }
0x1947   : > { %8773 = vrcp.f32 %v3532_v56 }
0x1948   : > { %8775 = vrcp.f32 %v3535_v52 }
0x1949   : > { %v8630_v14 = vpop.permute.xlu1 %8629 }
0x194a   : > { %v8625_v59 = vpop.permute.xlu0 %8624  ;;  %v8632_v58 = vunpack.i.h.bf16 %v8630_v14  ;;  %v8631_v12 = vunpack.i.l.bf16 %v8630_v14 }
0x194b   : > { %v8627_v60 = vunpack.i.h.bf16 %v8625_v59  ;;  %v8626_v61 = vunpack.i.l.bf16 %v8625_v59 }
0x194c   : > { %v8099_v1 = vpack.c.bf16 %v8632_v58, %v8631_v12 }
0x194d   : > { %v8089_v62 = vpack.c.bf16 %v8627_v60, %v8626_v61  ;;  %v8635_v63 = vpop.permute.xlu1 %8634 }
0x194e   : > { %v8637_v2 = vunpack.i.h.bf16 %v8635_v63  ;;  %v8636_v4 = vunpack.i.l.bf16 %v8635_v63  ;;  %v3628_v23 = vpop.permute.xlu0 %3627 }
0x194f   : > { %8090 = vmatprep.subr.bf16.mxu0 %v8089_v62 }
0x1950   : > { %8092 = vmatpush3.bf16.msra.mxu0 %v8089_v62  ;;  %v8103_v16 = vpack.c.bf16 %v8637_v2, %v8636_v4 }
0x1951   : > { %v8774_v6 = vpop.eup %8773  ;;  %8100 = vmatprep.subr.bf16.mxu0 %v8099_v1  ;;  %v3630_v24 = vpop.permute.xlu1 %3629 }
0x1952   : > { %v8776_v8 = vpop.eup %8775  ;;  %v3538_v13 = vmul.f32 %v8774_v6, %v8768_v44 }
0x1953   : > { %7860 = vmatmul.mubr.msk.f32.vlgmr.msra.gmra.mrb[20].mxu0 %vm1290_vm4, %v3335_v7  ;;  %v3539_v21 = vmul.f32 %v8776_v8, %v8766_v43 }
0x1954   : > { %8102 = vmatpush3.bf16.msra.mxu0 %v8099_v1  ;;  %7873 = vmatprep.mubr.msk.f32.mxu0 %vm1290_vm4, %v3538_v13 }
0x1955   : > { %8105 = vmatprep.subr.msk.bf16.mxu0 %vm9183_vm3, %v8103_v16 }
0x1957   : > { %7874 = vmatmul.mubr.msk.f32.vlgmr.msra.gmra.mrb[22].mxu0 %vm1290_vm4, %v3539_v21 }
0x1958   : > { %7880 = vmatprep.mubr.msk.f32.mxu0 %vm1202_vm2, %v3628_v23 }
0x195d   : > { %8108 = vmatpush3.bf16.xpose.msk.msra.mxu0 %vm9183_vm3, %v8103_v16 }
0x1964   : > { %7881 = vmatmul.mubr.msk.f32.vlgmr.msra.gmra.mrb[24].mxu0 %vm1202_vm2, %v3630_v24 }
0x1a26   : > { %v9550_v26 = vpop.f32.mrb[20].mxu0 }
0x1a27   : > { %v9552_v22 = vpop.f32.mrb[21].mxu0 }
0x1a2a   : > { %v9554_v25 = vpop.f32.mrb[22].mxu0 }
0x1a2b   : > { %v9556_v15 = vpop.f32.mrb[23].mxu0 }
0x1a37   : > { %v7882_v35 = vpop.f32.mrb[24].mxu0 }
0x1a38   : > { %v3719_v36 = vmul.f32 0.5, %v7882_v35  ;;  %v3709_v9 = vpop.f32.mrb[25].mxu0 }
0x1a39   : > { %v3718_v10 = vmul.f32 0.5, %v3709_v9 }
0x1a3a   : > { %v3721_v53 = vadd.f32 %v3719_v36, %v9511_v11 }
0x1a3b   : > { %v3720_v54 = vadd.f32 %v3718_v10, %v9516_v17 }
0x1a3c   : > { %v3725_v37 = vsel %vm1290_vm4, %v3721_v53, -inf }
0x1a3d   : > { %3726 = vmax.xlane.f32.xlu1 %v3725_v37  ;;  %v3722_v38 = vsel %vm1290_vm4, %v3720_v54, -inf }
0x1a3e   : > { %3723 = vmax.xlane.f32.xlu0 %v3722_v38 }
0x1a4e   : > { %8639 = vrot.lane.b32.xlu1 %v9477_v57, %s8882_s14  ;;  %s10461_s14 = smov 72  }
0x1a52   : > { %3831 = vrot.lane.b32.xlu1 %v9494_v5, %s8885_s19 }
0x1a56   : > { %3833 = vrot.lane.b32.xlu1 %v9492_v3, %s8885_s19 }
0x1aca   : > { %v3727_v18 = vpop.xlane.xlu1 %3726 }
0x1acb   : > { %v3729_v20 = vsub.f32 %v3721_v53, %v3727_v18  ;;  %v3724_v27 = vpop.xlane.xlu0 %3723 }
0x1acc   : > { %v3728_v28 = vsub.f32 %v3720_v54, %v3724_v27 }
0x1acd   : > { %v3732_v29 = vmul.f32 1.442695, %v3729_v20 }
0x1ace   : > { %v3730_v30 = vmul.f32 1.442695, %v3728_v28  ;;  %v8640_v31 = vpop.permute.xlu1 %8639 }
0x1acf   : > { %8777 = vpow2.f32 %v3732_v29  ;;  %v8642_v32 = vunpack.i.h.bf16 %v8640_v31  ;;  %v8641_v33 = vunpack.i.l.bf16 %v8640_v31 }
0x1ad0   : > { %8779 = vpow2.f32 %v3730_v30 }
0x1ad1   : > { %v8109_v34 = vpack.c.bf16 %v8642_v32, %v8641_v33 }
0x1ad2   : > { %v3832_v14 = vpop.permute.xlu1 %3831 }
0x1ad3   : > { %8110 = vmatprep.subr.bf16.mxu1 %v8109_v34 }
0x1ad4   : > { %8112 = vmatpush3.bf16.msra.mxu1 %v8109_v34 }
0x1ad6   : > { %v3834_v59 = vpop.permute.xlu1 %3833 }
0x1ad9   : > { %v8778_v39 = vpop.eup %8777 }
0x1ada   : > { %v3737_v40 = vsel %vm1290_vm4, %v8778_v39, 0.0  ;;  %v8780_v41 = vpop.eup %8779 }
0x1adb   : > { %3738 = vadd.xlane.f32.xlu0 %v3737_v40  ;;  %v3734_v42 = vsel %vm1290_vm4, %v8780_v41, 0.0 }
0x1adf   : > { %3735 = vadd.xlane.f32.xlu0 %v3734_v42 }
0x1af5   : > { %8644 = vrot.lane.b32.xlu0 %v9477_v57, %s8885_s19  ;;  %s10464_s19 = smov 4  }
0x1b68   : > { %v3739_v43 = vpop.xlane.xlu0 %3738 }
0x1b69   : > { %8781 = vrcp.f32 %v3739_v43 }
0x1b6c   : > { %v3736_v44 = vpop.xlane.xlu0 %3735 }
0x1b6d   : > { %8783 = vrcp.f32 %v3736_v44 }
0x1b70   : > { %v8645_v45 = vpop.permute.xlu0 %8644 }
0x1b71   : > { %v8647_v46 = vunpack.i.h.bf16 %v8645_v45  ;;  %v8646_v47 = vunpack.i.l.bf16 %v8645_v45 }
0x1b73   : > { %v8113_v48 = vpack.c.bf16 %v8647_v46, %v8646_v47  ;;  %v8782_v49 = vpop.eup %8781 }
0x1b74   : > { %v3743_v56 = vmul.f32 %v8782_v49, %v8778_v39 }
0x1b75   : > { %8115 = vmatprep.subr.msk.bf16.mxu1 %vm9183_vm3, %v8113_v48 }
0x1b77   : > { %v8784_v50 = vpop.eup %8783 }
0x1b78   : > { %v3742_v52 = vmul.f32 %v8784_v50, %v8780_v41 }
0x1b7a   : > { %7887 = vmatprep.mubr.msk.f32.mxu1 %vm1290_vm4, %v3742_v52 }
0x1b7b   : > { %7888 = vmatmul.mubr.msk.f32.vlgmr.msra.gmra.mrb[24].mxu1 %vm1290_vm4, %v3743_v56 }
0x1b7c   : > { %8118 = vmatpush3.bf16.xpose.msk.msra.mxu1 %vm9183_vm3, %v8113_v48  ;;  %7894 = vmatprep.mubr.msk.f32.mxu1 %vm1202_vm2, %v3832_v14 }
0x1b83   : > { %7895 = vmatmul.mubr.msk.f32.vlgmr.msra.gmra.mrb[26].mxu1 %vm1202_vm2, %v3834_v59 }
0x1c4e   : > { %v9580_v58 = vpop.f32.mrb[24].mxu1 }
0x1c4f   : > { %v9582_v12 = vpop.f32.mrb[25].mxu1 }
0x1c56   : > { %v7896_v60 = vpop.f32.mrb[26].mxu1 }
0x1c57   : > { %v3923_v61 = vmul.f32 0.5, %v7896_v60  ;;  %v3913_v62 = vpop.f32.mrb[27].mxu1 }
0x1c58   : > { %v3922_v63 = vmul.f32 0.5, %v3913_v62 }
0x1c59   : > { %v3925_v0 = vadd.f32 %v3923_v61, %v9511_v11 }
0x1c5a   : > { %v3924_v1 = vadd.f32 %v3922_v63, %v9516_v17 }
0x1c5b   : > { %v3929_v2 = vsel %vm1290_vm4, %v3925_v0, -inf }
0x1c5c   : > { %3930 = vmax.xlane.f32.xlu1 %v3929_v2  ;;  %v3926_v4 = vsel %vm1290_vm4, %v3924_v1, -inf }
0x1c5d   : > { %3927 = vmax.xlane.f32.xlu0 %v3926_v4 }
0x1c6d   : > { %8649 = vrot.lane.b32.xlu1 %v9477_v57, %s8884_s18  ;;  %s10463_s18 = smov 68  }
0x1c71   : > { %4035 = vrot.lane.b32.xlu1 %v9494_v5, %s8888_s3 }
0x1c75   : > { %4037 = vrot.lane.b32.xlu1 %v9492_v3, %s8888_s3 }
0x1ce9   : > { %v3931_v6 = vpop.xlane.xlu1 %3930 }
0x1cea   : > { %v3933_v7 = vsub.f32 %v3925_v0, %v3931_v6  ;;  %v3928_v8 = vpop.xlane.xlu0 %3927 }
0x1ceb   : > { %v3932_v13 = vsub.f32 %v3924_v1, %v3928_v8 }
0x1cec   : > { %v3936_v16 = vmul.f32 1.442695, %v3933_v7 }
0x1ced   : > { %v3934_v21 = vmul.f32 1.442695, %v3932_v13  ;;  %v8650_v23 = vpop.permute.xlu1 %8649 }
0x1cee   : > { %8785 = vpow2.f32 %v3936_v16  ;;  %v8652_v24 = vunpack.i.h.bf16 %v8650_v23  ;;  %v8651_v35 = vunpack.i.l.bf16 %v8650_v23 }
0x1cef   : > { %8787 = vpow2.f32 %v3934_v21 }
0x1cf0   : > { %v8119_v36 = vpack.c.bf16 %v8652_v24, %v8651_v35 }
0x1cf1   : > { %v4036_v33 = vpop.permute.xlu1 %4035 }
0x1cf2   : > { %8120 = vmatprep.subr.bf16.mxu0 %v8119_v36 }
0x1cf3   : > { %8122 = vmatpush3.bf16.msra.mxu0 %v8119_v36 }
0x1cf5   : > { %v4038_v34 = vpop.permute.xlu1 %4037 }
0x1cf8   : > { %v8786_v9 = vpop.eup %8785 }
0x1cf9   : > { %v3941_v10 = vsel %vm1290_vm4, %v8786_v9, 0.0  ;;  %v8788_v53 = vpop.eup %8787 }
0x1cfa   : > { %3942 = vadd.xlane.f32.xlu0 %v3941_v10  ;;  %v3938_v54 = vsel %vm1290_vm4, %v8788_v53, 0.0 }
0x1cfe   : > { %3939 = vadd.xlane.f32.xlu0 %v3938_v54 }
0x1d14   : > { %8654 = vrot.lane.b32.xlu0 %v9477_v57, %s8888_s3  ;;  %s10466_s3 = smov 12  }
0x1d87   : > { %v3943_v37 = vpop.xlane.xlu0 %3942 }
0x1d88   : > { %8789 = vrcp.f32 %v3943_v37 }
0x1d8b   : > { %v3940_v38 = vpop.xlane.xlu0 %3939 }
0x1d8c   : > { %8791 = vrcp.f32 %v3940_v38 }
0x1d8f   : > { %v8655_v18 = vpop.permute.xlu0 %8654 }
0x1d90   : > { %v8657_v20 = vunpack.i.h.bf16 %v8655_v18  ;;  %v8656_v27 = vunpack.i.l.bf16 %v8655_v18 }
0x1d92   : > { %v8123_v28 = vpack.c.bf16 %v8657_v20, %v8656_v27  ;;  %v8790_v29 = vpop.eup %8789 }
0x1d93   : > { %v3947_v32 = vmul.f32 %v8790_v29, %v8786_v9 }
0x1d94   : > { %8125 = vmatprep.subr.msk.bf16.mxu0 %vm9183_vm3, %v8123_v28 }
0x1d96   : > { %v8792_v30 = vpop.eup %8791 }
0x1d97   : > { %v3946_v31 = vmul.f32 %v8792_v30, %v8788_v53 }
0x1d99   : > { %7901 = vmatprep.mubr.msk.f32.mxu0 %vm1290_vm4, %v3946_v31 }
0x1d9a   : > { %7902 = vmatmul.mubr.msk.f32.vlgmr.msra.gmra.mrb[26].mxu0 %vm1290_vm4, %v3947_v32 }
0x1d9b   : > { %8128 = vmatpush3.bf16.xpose.msk.msra.mxu0 %vm9183_vm3, %v8123_v28  ;;  %7908 = vmatprep.mubr.msk.f32.mxu0 %vm1202_vm2, %v4036_v33 }
0x1da2   : > { %7909 = vmatmul.mubr.msk.f32.vlgmr.msra.gmra.mrb[28].mxu0 %vm1202_vm2, %v4038_v34 }
0x1e6d   : > { %v9606_v39 = vpop.f32.mrb[26].mxu0 }
0x1e6e   : > { %v9608_v40 = vpop.f32.mrb[27].mxu0 }
0x1e75   : > { %v7910_v41 = vpop.f32.mrb[28].mxu0 }
0x1e76   : > { %v4127_v42 = vmul.f32 0.5, %v7910_v41  ;;  %v4117_v43 = vpop.f32.mrb[29].mxu0 }
0x1e77   : > { %v4126_v44 = vmul.f32 0.5, %v4117_v43 }
0x1e78   : > { %v4129_v45 = vadd.f32 %v4127_v42, %v9511_v11 }
0x1e79   : > { %v4128_v46 = vadd.f32 %v4126_v44, %v9516_v17 }
0x1e7a   : > { %v4133_v47 = vsel %vm1290_vm4, %v4129_v45, -inf }
0x1e7b   : > { %4134 = vmax.xlane.f32.xlu1 %v4133_v47  ;;  %v4130_v48 = vsel %vm1290_vm4, %v4128_v46, -inf }
0x1e7c   : > { %4131 = vmax.xlane.f32.xlu0 %v4130_v48 }
0x1e8c   : > { %8659 = vrot.lane.b32.xlu1 %v9477_v57, %s8887_s26  ;;  %s10465_s26 = smov 8  }
0x1e90   : > { %4239 = vrot.lane.b32.xlu1 %v9494_v5, %s8891_s12 }
0x1e94   : > { %4241 = vrot.lane.b32.xlu1 %v9492_v3, %s8891_s12 }
0x1f08   : > { %v4135_v49 = vpop.xlane.xlu1 %4134 }
0x1f09   : > { %v4137_v50 = vsub.f32 %v4129_v45, %v4135_v49  ;;  %v4132_v52 = vpop.xlane.xlu0 %4131 }
0x1f0a   : > { %v4136_v56 = vsub.f32 %v4128_v46, %v4132_v52 }
0x1f0b   : > { %v4140_v14 = vmul.f32 1.442695, %v4137_v50 }
0x1f0c   : > { %v4138_v59 = vmul.f32 1.442695, %v4136_v56  ;;  %v8660_v60 = vpop.permute.xlu1 %8659 }
0x1f0d   : > { %8793 = vpow2.f32 %v4140_v14  ;;  %v8662_v61 = vunpack.i.h.bf16 %v8660_v60  ;;  %v8661_v62 = vunpack.i.l.bf16 %v8660_v60 }
0x1f0e   : > { %8795 = vpow2.f32 %v4138_v59 }
0x1f0f   : > { %v8129_v63 = vpack.c.bf16 %v8662_v61, %v8661_v62 }
0x1f10   : > { %v4240_v9 = vpop.permute.xlu1 %4239 }
0x1f11   : > { %8130 = vmatprep.subr.bf16.mxu1 %v8129_v63 }
0x1f12   : > { %8132 = vmatpush3.bf16.msra.mxu1 %v8129_v63 }
0x1f14   : > { %v4242_v10 = vpop.permute.xlu1 %4241 }
0x1f17   : > { %v8794_v0 = vpop.eup %8793 }
0x1f18   : > { %v4145_v1 = vsel %vm1290_vm4, %v8794_v0, 0.0  ;;  %v8796_v2 = vpop.eup %8795 }
0x1f19   : > { %4146 = vadd.xlane.f32.xlu0 %v4145_v1  ;;  %v4142_v4 = vsel %vm1290_vm4, %v8796_v2, 0.0 }
0x1f1d   : > { %4143 = vadd.xlane.f32.xlu0 %v4142_v4 }
0x1f33   : > { %8664 = vrot.lane.b32.xlu0 %v9477_v57, %s8891_s12  ;;  %s10467_s12 = smov 16  }
0x1fa6   : > { %v4147_v6 = vpop.xlane.xlu0 %4146 }
0x1fa7   : > { %8797 = vrcp.f32 %v4147_v6 }
0x1faa   : > { %v4144_v7 = vpop.xlane.xlu0 %4143 }
0x1fab   : > { %8799 = vrcp.f32 %v4144_v7 }
0x1fae   : > { %v8665_v8 = vpop.permute.xlu0 %8664 }
0x1faf   : > { %v8667_v13 = vunpack.i.h.bf16 %v8665_v8  ;;  %v8666_v16 = vunpack.i.l.bf16 %v8665_v8 }
0x1fb1   : > { %v8133_v21 = vpack.c.bf16 %v8667_v13, %v8666_v16  ;;  %v8798_v23 = vpop.eup %8797 }
0x1fb2   : > { %v4151_v36 = vmul.f32 %v8798_v23, %v8794_v0 }
0x1fb3   : > { %8135 = vmatprep.subr.msk.bf16.mxu1 %vm9183_vm3, %v8133_v21 }
0x1fb5   : > { %v8800_v24 = vpop.eup %8799 }
0x1fb6   : > { %v4150_v35 = vmul.f32 %v8800_v24, %v8796_v2 }
0x1fb8   : > { %7915 = vmatprep.mubr.msk.f32.mxu1 %vm1290_vm4, %v4150_v35 }
0x1fb9   : > { %7916 = vmatmul.mubr.msk.f32.vlgmr.msra.gmra.mrb[28].mxu1 %vm1290_vm4, %v4151_v36 }
0x1fba   : > { %8138 = vmatpush3.bf16.xpose.msk.msra.mxu1 %vm9183_vm3, %v8133_v21  ;;  %7922 = vmatprep.mubr.msk.f32.mxu1 %vm1202_vm2, %v4240_v9 }
0x1fc1   : > { %7923 = vmatmul.mubr.msk.f32.vlgmr.msra.gmra.mrb[30].mxu1 %vm1202_vm2, %v4242_v10 }
0x208c   : > { %v9632_v53 = vpop.f32.mrb[28].mxu1 }
0x208d   : > { %v9634_v54 = vpop.f32.mrb[29].mxu1 }
0x2094   : > { %v7924_v37 = vpop.f32.mrb[30].mxu1 }
0x2095   : > { %v4331_v38 = vmul.f32 0.5, %v7924_v37  ;;  %v4321_v18 = vpop.f32.mrb[31].mxu1 }
0x2096   : > { %v4330_v20 = vmul.f32 0.5, %v4321_v18 }
0x2097   : > { %v4333_v27 = vadd.f32 %v4331_v38, %v9511_v11 }
0x2098   : > { %v4332_v28 = vadd.f32 %v4330_v20, %v9516_v17 }
0x2099   : > { %v4337_v29 = vsel %vm1290_vm4, %v4333_v27, -inf }
0x209a   : > { %4338 = vmax.xlane.f32.xlu1 %v4337_v29  ;;  %v4334_v30 = vsel %vm1290_vm4, %v4332_v28, -inf }
0x209b   : > { %4335 = vmax.xlane.f32.xlu0 %v4334_v30 }
0x20ab   : > { %8669 = vrot.lane.b32.xlu1 %v9477_v57, %s10459_s4  ;;  %s10483_s4 = sld [smem:[#allocation28_spill]] (!%p7216_p5) }
0x20af   : > { %4443 = vrot.lane.b32.xlu1 %v9494_v5, %s10460_s2 }
0x20b3   : > { %4445 = vrot.lane.b32.xlu1 %v9492_v3, %s10460_s2 }
0x2127   : > { %v4339_v31 = vpop.xlane.xlu1 %4338 }
0x2128   : > { %v4341_v32 = vsub.f32 %v4333_v27, %v4339_v31  ;;  %v4336_v33 = vpop.xlane.xlu0 %4335 }
0x2129   : > { %v4340_v34 = vsub.f32 %v4332_v28, %v4336_v33 }
0x212a   : > { %v4344_v41 = vmul.f32 1.442695, %v4341_v32 }
0x212b   : > { %v4342_v42 = vmul.f32 1.442695, %v4340_v34  ;;  %v8670_v43 = vpop.permute.xlu1 %8669 }
0x212c   : > { %8801 = vpow2.f32 %v4344_v41  ;;  %v8672_v44 = vunpack.i.h.bf16 %v8670_v43  ;;  %v8671_v45 = vunpack.i.l.bf16 %v8670_v43 }
0x212d   : > { %8803 = vpow2.f32 %v4342_v42 }
0x212e   : > { %v8139_v46 = vpack.c.bf16 %v8672_v44, %v8671_v45 }
0x212f   : > { %v4444_v2 = vpop.permute.xlu1 %4443 }
0x2130   : > { %8140 = vmatprep.subr.bf16.mxu0 %v8139_v46 }
0x2131   : > { %8142 = vmatpush3.bf16.msra.mxu0 %v8139_v46 }
0x2133   : > { %v4446_v4 = vpop.permute.xlu1 %4445 }
0x2136   : > { %v8802_v47 = vpop.eup %8801 }
0x2137   : > { %v4349_v48 = vsel %vm1290_vm4, %v8802_v47, 0.0  ;;  %v8804_v49 = vpop.eup %8803 }
0x2138   : > { %4350 = vadd.xlane.f32.xlu0 %v4349_v48  ;;  %v4346_v50 = vsel %vm1290_vm4, %v8804_v49, 0.0 }
0x213c   : > { %4347 = vadd.xlane.f32.xlu0 %v4346_v50 }
0x2152   : > { %8674 = vrot.lane.b32.xlu0 %v9477_v57, %s10460_s2 }
0x21c5   : > { %v4351_v52 = vpop.xlane.xlu0 %4350 }
0x21c6   : > { %8805 = vrcp.f32 %v4351_v52 }
0x21c9   : > { %v4348_v56 = vpop.xlane.xlu0 %4347 }
0x21ca   : > { %8807 = vrcp.f32 %v4348_v56 }
0x21cd   : > { %v8675_v14 = vpop.permute.xlu0 %8674 }
0x21ce   : > { %v8677_v59 = vunpack.i.h.bf16 %v8675_v14  ;;  %v8676_v60 = vunpack.i.l.bf16 %v8675_v14 }
0x21d0   : > { %v8143_v61 = vpack.c.bf16 %v8677_v59, %v8676_v60  ;;  %v8806_v62 = vpop.eup %8805 }
0x21d1   : > { %v4355_v1 = vmul.f32 %v8806_v62, %v8802_v47 }
0x21d2   : > { %8145 = vmatprep.subr.msk.bf16.mxu0 %vm9183_vm3, %v8143_v61 }
0x21d4   : > { %v8808_v63 = vpop.eup %8807 }
0x21d5   : > { %v4354_v0 = vmul.f32 %v8808_v63, %v8804_v49 }
0x21d7   : > { %7929 = vmatprep.mubr.msk.f32.mxu0 %vm1290_vm4, %v4354_v0 }
0x21d8   : > { %7930 = vmatmul.mubr.msk.f32.vlgmr.msra.gmra.mrb[30].mxu0 %vm1290_vm4, %v4355_v1 }
0x21d9   : > { %8148 = vmatpush3.bf16.xpose.msk.msra.mxu0 %vm9183_vm3, %v8143_v61  ;;  %7936 = vmatprep.mubr.msk.f32.mxu0 %vm1202_vm2, %v4444_v2 }
0x21e0   : > { %7937 = vmatmul.mubr.msk.f32.vlgmr.msra.gmra.mrb[32].mxu0 %vm1202_vm2, %v4446_v4 }
0x22ab   : > { %v9658_v6 = vpop.f32.mrb[30].mxu0 }
0x22ac   : > { %v9660_v7 = vpop.f32.mrb[31].mxu0 }
0x22b3   : > { %v7938_v8 = vpop.f32.mrb[32].mxu0 }
0x22b4   : > { %v4535_v13 = vmul.f32 0.5, %v7938_v8  ;;  %v4525_v16 = vpop.f32.mrb[33].mxu0 }
0x22b5   : > { %v4534_v21 = vmul.f32 0.5, %v4525_v16 }
0x22b6   : > { %v4537_v23 = vadd.f32 %v4535_v13, %v9511_v11 }
0x22b7   : > { %v4536_v24 = vadd.f32 %v4534_v21, %v9516_v17 }
0x22b8   : > { %v4541_v35 = vsel %vm1290_vm4, %v4537_v23, -inf }
0x22b9   : > { %4542 = vmax.xlane.f32.xlu1 %v4541_v35  ;;  %v4538_v36 = vsel %vm1290_vm4, %v4536_v24, -inf  ;;  %v4921_v35 = vld [vmem:[%s9107_s5] sm:$0xff] }
0x22ba   : > { %4539 = vmax.xlane.f32.xlu0 %v4538_v36  ;;  %v4923_v36 = vld [vmem:[%s9107_s5 + $0x10] sm:$0xff] }
0x22ca   : > { %8679 = vrot.lane.b32.xlu1 %v9477_v57, %s10461_s14  ;;  %s10473_s14 = sld [smem:[#allocation21_spill]] }
0x22ce   : > { %4647 = vrot.lane.b32.xlu1 %v9494_v5, %s10462_s17 }
0x22d2   : > { %4649 = vrot.lane.b32.xlu1 %v9492_v3, %s10462_s17 }
0x2346   : > { %v4543_v9 = vpop.xlane.xlu1 %4542 }
0x2347   : > { %v4545_v10 = vsub.f32 %v4537_v23, %v4543_v9  ;;  %v4540_v37 = vpop.xlane.xlu0 %4539 }
0x2348   : > { %v4544_v38 = vsub.f32 %v4536_v24, %v4540_v37 }
0x2349   : > { %v4548_v18 = vmul.f32 1.442695, %v4545_v10 }
0x234a   : > { %v4546_v20 = vmul.f32 1.442695, %v4544_v38  ;;  %v8680_v27 = vpop.permute.xlu1 %8679 }
0x234b   : > { %8809 = vpow2.f32 %v4548_v18  ;;  %v8682_v28 = vunpack.i.h.bf16 %v8680_v27  ;;  %v8681_v29 = vunpack.i.l.bf16 %v8680_v27 }
0x234c   : > { %8811 = vpow2.f32 %v4546_v20 }
0x234d   : > { %v8149_v30 = vpack.c.bf16 %v8682_v28, %v8681_v29 }
0x234e   : > { %v4648_v49 = vpop.permute.xlu1 %4647 }
0x234f   : > { %8150 = vmatprep.subr.bf16.mxu1 %v8149_v30 }
0x2350   : > { %8152 = vmatpush3.bf16.msra.mxu1 %v8149_v30 }
0x2352   : > { %v4650_v50 = vpop.permute.xlu1 %4649 }
0x2355   : > { %v8810_v31 = vpop.eup %8809 }
0x2356   : > { %v4553_v5 = vsel %vm1290_vm4, %v8810_v31, 0.0  ;;  %v8812_v32 = vpop.eup %8811 }
0x2357   : > { %4554 = vadd.xlane.f32.xlu0 %v4553_v5  ;;  %v4550_v3 = vsel %vm1290_vm4, %v8812_v32, 0.0 }
0x235b   : > { %4551 = vadd.xlane.f32.xlu0 %v4550_v3 }
0x2371   : > { %8684 = vrot.lane.b32.xlu0 %v9477_v57, %s10462_s17  ;;  %s10474_s17 = scalar_lea.vmem %s10473_s14, %s9057_s7 }
0x23e4   : > { %v4555_v33 = vpop.xlane.xlu0 %4554 }
0x23e5   : > { %8813 = vrcp.f32 %v4555_v33 }
0x23e8   : > { %v4552_v34 = vpop.xlane.xlu0 %4551 }
0x23e9   : > { %8815 = vrcp.f32 %v4552_v34 }
0x23ec   : > { %v8685_v41 = vpop.permute.xlu0 %8684 }
0x23ed   : > { %v8687_v42 = vunpack.i.h.bf16 %v8685_v41  ;;  %v8686_v43 = vunpack.i.l.bf16 %v8685_v41 }
0x23ef   : > { %v8153_v44 = vpack.c.bf16 %v8687_v42, %v8686_v43  ;;  %v8814_v45 = vpop.eup %8813 }
0x23f0   : > { %v4559_v48 = vmul.f32 %v8814_v45, %v8810_v31 }
0x23f1   : > { %8155 = vmatprep.subr.msk.bf16.mxu1 %vm9183_vm3, %v8153_v44 }
0x23f3   : > { %v8816_v46 = vpop.eup %8815 }
0x23f4   : > { %v4558_v47 = vmul.f32 %v8816_v46, %v8812_v32 }
0x23f6   : > { %7943 = vmatprep.mubr.msk.f32.mxu1 %vm1290_vm4, %v4558_v47 }
0x23f7   : > { %7944 = vmatmul.mubr.msk.f32.vlgmr.msra.gmra.mrb[32].mxu1 %vm1290_vm4, %v4559_v48 }
0x23f8   : > { %8158 = vmatpush3.bf16.xpose.msk.msra.mxu1 %vm9183_vm3, %v8153_v44  ;;  %7950 = vmatprep.mubr.msk.f32.mxu1 %vm1202_vm2, %v4648_v49 }
0x23ff   : > { %7951 = vmatmul.mubr.msk.f32.vlgmr.msra.gmra.mrb[34].mxu1 %vm1202_vm2, %v4650_v50 }
0x24ca   : > { %v7945_v52 = vpop.f32.mrb[32].mxu1 }
0x24cb   : > { %v4638_v56 = vpop.f32.mrb[33].mxu1 }
0x24d2   : > { %v7952_v14 = vpop.f32.mrb[34].mxu1 }
0x24d3   : > { %v4739_v59 = vmul.f32 0.5, %v7952_v14  ;;  %v4729_v60 = vpop.f32.mrb[35].mxu1 }
0x24d4   : > { %v4738_v61 = vmul.f32 0.5, %v4729_v60  ;;  %v7192_v60 = vld [vmem:[%s10471_s10] ss:$0 sm:$0xff] }
0x24d5   : > { %v4741_v62 = vadd.f32 %v4739_v59, %v9511_v11 }
0x24d6   : > { %v4740_v63 = vadd.f32 %v4738_v61, %v9516_v17 }
0x24d7   : > { %v4745_v0 = vsel %vm1290_vm4, %v4741_v62, -inf }
0x24d8   : > { %4746 = vmax.xlane.f32.xlu1 %v4745_v0  ;;  %v4742_v19 = vsel %vm1290_vm4, %v4740_v63, -inf }
0x24d9   : > { %4743 = vmax.xlane.f32.xlu0 %v4742_v19 }
0x24e9   : > { %8689 = vrot.lane.b32.xlu1 %v9477_v57, %s10463_s18 }
0x24ed   : > { %4855 = vrot.lane.b32.xlu1 %v9554_v25, %s10464_s19 }
0x24f1   : > { %4861 = vrot.lane.b32.xlu1 %v9582_v12, %s10465_s26 }
0x24f5   : > { %4869 = vrot.lane.b32.xlu1 %v9608_v40, %s10466_s3 }
0x24f9   : > { %4877 = vrot.lane.b32.xlu1 %v9634_v54, %s10467_s12 }
0x24fd   : > { %4885 = vrot.lane.b32.xlu1 %v9660_v7, %s10468_s0 }
0x2501   : > { %4893 = vrot.lane.b32.xlu1 %v4638_v56, %s10469_s9 }
0x2565   : > { %v4747_v11 = vpop.xlane.xlu1 %4746 }
0x2566   : > { %v4749_v17 = vsub.f32 %v4741_v62, %v4747_v11  ;;  %v4744_v57 = vpop.xlane.xlu0 %4743 }
0x2567   : > { %v4748_v1 = vsub.f32 %v4740_v63, %v4744_v57 }
0x2568   : > { %v4752_v2 = vmul.f32 1.442695, %v4749_v17 }
0x2569   : > { %v4750_v25 = vmul.f32 1.442695, %v4748_v1  ;;  %v8690_v4 = vpop.permute.xlu1 %8689 }
0x256a   : > { %v8692_v8 = vunpack.i.h.bf16 %v8690_v4  ;;  %v8691_v12 = vunpack.i.l.bf16 %v8690_v4 }
0x256b   : > { %8817 = vpow2.f32 %v4750_v25 }
0x256c   : > { %v8159_v13 = vpack.c.bf16 %v8692_v8, %v8691_v12  ;;  %8819 = vpow2.f32 %v4752_v2 }
0x256d   : > { %v4856_v20 = vpop.permute.xlu1 %4855 }
0x256e   : > { %8160 = vmatprep.subr.bf16.mxu0 %v8159_v13  ;;  %v4908_v44 = vsel %vm1202_vm2, %v9550_v26, %v4856_v20  ;;  %v5107_v20 = vld [vmem:[%s9125_s8 + $0x180] sm:$0xff] }
0x256f   : > { %8162 = vmatpush3.bf16.msra.mxu0 %v8159_v13 }
0x2571   : > { %v4862_v28 = vpop.permute.xlu1 %4861 }
0x2575   : > { %v8818_v40 = vpop.eup %8817  ;;  %v4870_v30 = vpop.permute.xlu1 %4869 }
0x2576   : > { %v4754_v54 = vsel %vm1290_vm4, %v8818_v40, 0.0  ;;  %v8820_v7 = vpop.eup %8819 }
0x2577   : > { %4755 = vadd.xlane.f32.xlu0 %v4754_v54  ;;  %v4757_v16 = vsel %vm1290_vm4, %v8820_v7, 0.0  ;;  %v5060_v54 = vld [vmem:[%s9125_s8 + $0x8] sm:$0xff] }
0x2579   : > { %v4878_v5 = vpop.permute.xlu1 %4877 }
0x257b   : > { %4758 = vadd.xlane.f32.xlu0 %v4757_v16  ;;  %v5062_v16 = vld [vmem:[%s9125_s8 + $0x18] sm:$0xff] }
0x257d   : > { %v4886_v34 = vpop.permute.xlu1 %4885 }
0x2581   : > { %v4894_v45 = vpop.permute.xlu1 %4893 }
0x2591   : > { %4853 = vrot.lane.b32.xlu0 %v9556_v15, %s10464_s19 }
0x2595   : > { %4863 = vrot.lane.b32.xlu0 %v9580_v58, %s10465_s26 }
0x2599   : > { %4871 = vrot.lane.b32.xlu0 %v9606_v39, %s10466_s3  ;;  %s10477_s3 = sld [smem:[#allocation25_spill]] }
0x259d   : > { %4879 = vrot.lane.b32.xlu0 %v9632_v53, %s10467_s12  ;;  %v4922_v53 = vld [vmem:[%s9107_s5 + $0x8] sm:$0xff] }
0x259e   : > { %v8163_v9 = vpack.c.bf16 %v4922_v53, %v4921_v35  ;;  %v5061_v35 = vld [vmem:[%s9125_s8 + $0x10] sm:$0xff] }
0x259f   : > { %v5077_v53 = vld [vmem:[%s9125_s8 + $0x90] sm:$0xff]  ;;  %s10478_s12 = scalar_lea.vmem %s10477_s3, %s9057_s7 }
0x25a0   : > { %8164 = vmatprep.subr.bf16.mxu0 %v8163_v9 }
0x25a1   : > { %4887 = vrot.lane.b32.xlu0 %v9658_v6, %s10468_s0  ;;  %v4924_v6 = vld [vmem:[%s9107_s5 + $0x18] sm:$0xff] }
0x25a2   : > { %v8167_v10 = vpack.c.bf16 %v4924_v6, %v4923_v36  ;;  %v8181_v36 = vpack.c.bf16 %v5077_v53, %v5061_v35  ;;  %v5108_v6 = vld [vmem:[%s9125_s8 + $0x188] sm:$0xff] }
0x25a5   : > { %4895 = vrot.lane.b32.xlu0 %v7945_v52, %s10469_s9 }
0x2604   : > { %v4756_v21 = vpop.xlane.xlu0 %4755 }
0x2605   : > { %8821 = vrcp.f32 %v4756_v21 }
0x2608   : > { %v4759_v15 = vpop.xlane.xlu0 %4758 }
0x2609   : > { %8823 = vrcp.f32 %v4759_v15  ;;  %v5078_v15 = vld [vmem:[%s9125_s8 + $0x98] sm:$0xff] }
0x260c   : > { %v4854_v18 = vpop.permute.xlu0 %4853 }
0x260d   : > { %v4907_v32 = vsel %vm1202_vm2, %v9552_v22, %v4854_v18  ;;  %v5091_v18 = vld [vmem:[%s9125_s8 + $0x100] sm:$0xff] }
0x260e   : > { %v4909_v3 = vsel %vm2886_vm5, %v4907_v32, %v4862_v28  ;;  %v8177_v28 = vpack.c.bf16 %v5107_v20, %v5091_v18  ;;  %v5080_v32 = vld [vmem:[%s9125_s8 + $0xa8] sm:$0xff]  ;;  %v5099_v18 = vld [vmem:[%s9125_s8 + $0x140] sm:$0xff] }
0x260f   : > { %v8822_v23 = vpop.eup %8821  ;;  %v4911_v41 = vsel %vm2889_vm6, %v4909_v3, %v4870_v30  ;;  %v5109_v30 = vld [vmem:[%s9125_s8 + $0x190] sm:$0xff]  ;;  %v5066_v3 = vld [vmem:[%s9125_s8 + $0x38] sm:$0xff]  ;;  %v5115_v20 = vld [vmem:[%s9125_s8 + $0x1c0] sm:$0xff] }
0x2610   : > { %v4762_v58 = vmul.f32 %v8822_v23, %v8818_v40  ;;  %v4864_v27 = vpop.permute.xlu0 %4863  ;;  %v4913_v42 = vsel %vm1290_vm4, %v4911_v41, %v4878_v5  ;;  %v5059_v23 = vld [vmem:[%s9125_s8] sm:$0xff]  ;;  %v5064_v5 = vld [vmem:[%s9125_s8 + $0x28] sm:$0xff]  ;;  %v8907_v41 = vmov 0.0  }
0x2611   : > { %v4910_v46 = vsel %vm2886_vm5, %v4908_v44, %v4864_v27  ;;  %v4915_v47 = vsel %vm2894_vm7, %v4913_v42, %v4886_v34  ;;  %v5082_v34 = vld [vmem:[%s9125_s8 + $0xb8] sm:$0xff]  ;;  %5534 = vmatprep.mubr.f32.mxu1 %v8907_v41 }
0x2612   : > { %7957 = vmatprep.mubr.msk.f32.mxu0 %vm1290_vm4, %v4762_v58  ;;  %v4917_v56 = vsel %vm2897_vm8, %v4915_v47, %v4894_v45  ;;  %v5075_v58 = vld [vmem:[%s9125_s8 + $0x80] sm:$0xff]  ;;  %v8195_v42 = vpack.c.bf16 %v5082_v34, %v5066_v3  ;;  %v5090_v3 = vld [vmem:[%s9125_s8 + $0xf8] sm:$0xff] }
0x2613   : > { %v8824_v24 = vpop.eup %8823 }
0x2614   : > { %v4763_v39 = vmul.f32 %v8824_v24, %v8820_v7  ;;  %v4872_v29 = vpop.permute.xlu0 %4871  ;;  %v5076_v7 = vld [vmem:[%s9125_s8 + $0x88] sm:$0xff]  ;;  %v8179_v24 = vpack.c.bf16 %v5078_v15, %v5062_v16  ;;  %v5067_v15 = vld [vmem:[%s9125_s8 + $0x40] sm:$0xff] }
0x2615   : > { %v4912_v22 = vsel %vm2889_vm6, %v4910_v46, %v4872_v29  ;;  %v8171_v21 = vpack.c.bf16 %v5076_v7, %v5060_v54  ;;  %v5093_v29 = vld [vmem:[%s9125_s8 + $0x110] sm:$0xff]  ;;  %v5070_v54 = vld [vmem:[%s9125_s8 + $0x58] sm:$0xff] }
0x2616   : > { %7958 = vmatmul.mubr.msk.f32.vlgmr.msra.gmra.mrb[34].mxu0 %vm1290_vm4, %v4763_v39  ;;  %v8173_v39 = vpack.c.bf16 %v5075_v58, %v5059_v23  ;;  %v5086_v7 = vld [vmem:[%s9125_s8 + $0xd8] sm:$0xff]  ;;  %v5083_v58 = vld [vmem:[%s9125_s8 + $0xc0] sm:$0xff] }
0x2617   : > { %8166 = vmatpush3.bf16.msra.mxu0 %v8163_v9  ;;  %8172 = vmatprep.subr.bf16.mxu1 %v8171_v21  ;;  %v5092_v9 = vld [vmem:[%s9125_s8 + $0x108] sm:$0xff]  ;;  %v8211_v53 = vpack.c.bf16 %v5086_v7, %v5070_v54  ;;  %v5176_v54 = vld [vmem:[%s9137_s1 + $0x198] sm:$0xff] }
0x2618   : > { %8168 = vmatprep.subr.bf16.mxu0 %v8167_v10  ;;  %v4880_v31 = vpop.permute.xlu0 %4879  ;;  %8174 = vmatpush1.bf16.msra.mxu1 %v8173_v39  ;;  %v5085_v39 = vld [vmem:[%s9125_s8 + $0xd0] sm:$0xff] }
0x2619   : > { %v4914_v48 = vsel %vm1290_vm4, %v4912_v22, %v4880_v31  ;;  %v8185_v31 = vpack.c.bf16 %v5109_v30, %v5093_v29 }
0x261b   : > { %8170 = vmatpush3.bf16.msra.mxu0 %v8167_v10  ;;  %v5094_v10 = vld [vmem:[%s9125_s8 + $0x118] sm:$0xff] }
0x261c   : > { %v4888_v33 = vpop.permute.xlu0 %4887  ;;  %8180 = vmatprep.subr.bf16.mxu0 %v8179_v24  ;;  %v5069_v24 = vld [vmem:[%s9125_s8 + $0x50] sm:$0xff] }
0x261d   : > { %v4916_v50 = vsel %vm2894_vm7, %v4914_v48, %v4888_v33  ;;  %v8187_v33 = vpack.c.bf16 %v5080_v32, %v5064_v5  ;;  %v5088_v5 = vld [vmem:[%s9125_s8 + $0xe8] sm:$0xff]  ;;  %v5074_v32 = vld [vmem:[%s9125_s8 + $0x78] sm:$0xff] }
0x2620   : > { %v4896_v43 = vpop.permute.xlu0 %4895 }
0x2621   : > { %v4918_v14 = vsel %vm2897_vm8, %v4916_v50, %v4896_v43  ;;  %v7195_v50 = vld [vmem:[%s10472_s28] ss:$0 sm:$0xff] }
0x26e9   : > { %v7959_v37 = vpop.f32.mrb[34].mxu0 }
0x26ea   : > { %4903 = vrot.lane.b32.xlu0 %v7959_v37, %s10470_s30  ;;  %v4842_v38 = vpop.f32.mrb[35].mxu0  ;;  %v8175_v37 = vpack.c.bf16 %v5108_v6, %v5092_v9  ;;  %v5116_v9 = vld [vmem:[%s9125_s8 + $0x1c8] sm:$0xff]  ;;  %v5102_v6 = vld [vmem:[%s9125_s8 + $0x158] sm:$0xff] }
0x26eb   : > { %4901 = vrot.lane.b32.xlu1 %v4842_v38, %s10470_s30  ;;  %v5110_v38 = vld [vmem:[%s9125_s8 + $0x198] sm:$0xff]  ;;  %s10479_s30 = sld [smem:[#allocation26_spill]] }
0x26ec   : > { %v8183_v27 = vpack.c.bf16 %v5110_v38, %v5094_v10  ;;  %8176 = vmatprep.subr.bf16.mxu1 %v8175_v37  ;;  %v5118_v10 = vld [vmem:[%s9125_s8 + $0x1d8] sm:$0xff]  ;;  %v8205_v37 = vpack.c.bf16 %v5083_v58, %v5067_v15  ;;  %v8213_v38 = vpack.c.bf16 %v5085_v39, %v5069_v24  ;;  %v5159_v39 = vld [vmem:[%s9137_s1 + $0x110] sm:$0xff] }
0x26ed   : > { %8178 = vmatpush1.bf16.msra.mxu1 %v8177_v28  ;;  %v5117_v28 = vld [vmem:[%s9125_s8 + $0x1d0] sm:$0xff]  ;;  %v8215_v30 = vpack.c.bf16 %v5118_v10, %v5102_v6  ;;  %v5128_v15 = vld [vmem:[%s9137_s1 + $0x18] sm:$0xff]  ;;  %v5178_v6 = vld [vmem:[%s9137_s1 + $0x1a8] sm:$0xff] }
0x26ee   : > { %8188 = vmatprep.subr.bf16.mxu1 %v8187_v33  ;;  %v8209_v33 = vpack.c.bf16 %v5115_v20, %v5099_v18  ;;  %v5130_v18 = vld [vmem:[%s9137_s1 + $0x28] sm:$0xff] }
0x26f1   : > { %s10480_s5 = scalar_lea.vmem %s10479_s30, %s9057_s7 }
0x275c   : > { %v4904_v49 = vpop.permute.xlu0 %4903 }
0x275d   : > { %v4902_v52 = vpop.permute.xlu1 %4901  ;;  %v4920_v26 = vsel %vm2900_vm9, %v4918_v14, %v4904_v49 }
0x275e   : > { %v4919_v59 = vsel %vm2900_vm9, %v4917_v56, %v4902_v52  ;;  %v5063_v52 = vld [vmem:[%s9125_s8 + $0x20] sm:$0xff] }
0x275f   : > { %7968 = vmatprep.mubr.msk.f32.mxu0 %vm1114_vm1, %v4919_v59  ;;  %v5079_v59 = vld [vmem:[%s9125_s8 + $0xa0] sm:$0xff] }
0x2760   : > { %7969 = vmatmul.mubr.msk.f32.vlgmr.msra.gmra.mrb[36].mxu0 %vm1114_vm1, %v4920_v26  ;;  %v5065_v26 = vld [vmem:[%s9125_s8 + $0x30] sm:$0xff] }
0x2761   : > { %8182 = vmatpush1.bf16.msra.mxu0 %v8181_v36  ;;  %5611 = vmatprep.mubr.f32.mxu0 %v8907_v41  ;;  %v5100_v36 = vld [vmem:[%s9125_s8 + $0x148] sm:$0xff] }
0x2762   : > { %8184 = vmatprep.subr.bf16.mxu0 %v8183_v27  ;;  %v5101_v27 = vld [vmem:[%s9125_s8 + $0x150] sm:$0xff]  ;;  %v8207_v29 = vpack.c.bf16 %v5116_v9, %v5100_v36  ;;  %v5146_v36 = vld [vmem:[%s9137_s1 + $0xa8] sm:$0xff]  ;;  %v5177_v9 = vld [vmem:[%s9137_s1 + $0x1a0] sm:$0xff] }
0x2763   : > { %v8217_v34 = vpack.c.bf16 %v5117_v28, %v5101_v27  ;;  %v8275_v27 = vpack.c.bf16 %v5178_v6, %v5177_v9  ;;  %v5161_v28 = vld [vmem:[%s9137_s1 + $0x120] sm:$0xff]  ;;  %v5187_v9 = vld [vmem:[%s9137_s1 + $0x1f0] sm:$0xff] }
0x2765   : > { %8186 = vmatpush1.bf16.msra.mxu0 %v8185_v31  ;;  %v5072_v31 = vld [vmem:[%s9125_s8 + $0x68] sm:$0xff] }
0x2766   : > { %8196 = vmatprep.subr.bf16.mxu0 %v8195_v42  ;;  %v5071_v42 = vld [vmem:[%s9125_s8 + $0x60] sm:$0xff] }
0x2833   : > { %v7970_v61 = vpop.f32.mrb[36].mxu0 }
0x2834   : > { %v5010_v62 = vadd.f32 %v7970_v61, %v7192_v60  ;;  %v5004_v63 = vpop.f32.mrb[37].mxu0  ;;  %v7196_v61 = vld [vmem:[%s10474_s17] ss:$0 sm:$0xff] }
0x2835   : > { %v5005_v0 = vadd.f32 %v7192_v60, %v5004_v63  ;;  %v5081_v60 = vld [vmem:[%s9125_s8 + $0xb0] sm:$0xff] }
0x2836   : > { %v5014_v19 = vadd.f32 %v5010_v62, %v9468_v55  ;;  %v5096_v62 = vld [vmem:[%s9125_s8 + $0x128] sm:$0xff] }
0x2837   : > { %v5013_v11 = vadd.f32 %v5005_v0, %v9464_v51  ;;  %v5112_v0 = vld [vmem:[%s9125_s8 + $0x1a8] sm:$0xff] }
0x2838   : > { %v5020_v17 = vsel %vm1114_vm1, %v5014_v19, 0.0 }
0x2839   : > { %5021 = vadd.xlane.f32.xlu0 %v5020_v17  ;;  %v5017_v57 = vsel %vm1114_vm1, %v5013_v11, 0.0  ;;  %v8189_v17 = vpack.c.bf16 %v5079_v59, %v5063_v52  ;;  %v5119_v59 = vld [vmem:[%s9125_s8 + $0x1e0] sm:$0xff] }
0x283a   : > { %5018 = vadd.xlane.f32.xlu1 %v5017_v57  ;;  %v8197_v57 = vpack.c.bf16 %v5081_v60, %v5065_v26  ;;  %v5105_v26 = vld [vmem:[%s9125_s8 + $0x170] sm:$0xff] }
0x283b   : > { %v5121_v60 = vld [vmem:[%s9125_s8 + $0x1f0] sm:$0xff] }
0x28c6   : > { %v5022_v1 = vpop.xlane.xlu0 %5021 }
0x28c7   : > { %v5024_v2 = vmul.f32 0.03125, %v5022_v1  ;;  %v5019_v25 = vpop.xlane.xlu1 %5018  ;;  %v5095_v1 = vld [vmem:[%s9125_s8 + $0x120] sm:$0xff] }
0x28c8   : > { %v5023_v4 = vmul.f32 0.03125, %v5019_v25 }
0x28c9   : > { %v9749_v8 = vsub.f32 %v5014_v19, %v5024_v2  ;;  %v5098_v19 = vld [vmem:[%s9125_s8 + $0x138] sm:$0xff] }
0x28ca   : > { %v9751_v55 = vsub.f32 %v5013_v11, %v5023_v4  ;;  %v5114_v11 = vld [vmem:[%s9125_s8 + $0x1b8] sm:$0xff]  ;;  %v5111_v4 = vld [vmem:[%s9125_s8 + $0x1a0] sm:$0xff] }
0x28cb   : > { %v5028_v51 = vmul.f32 %v9749_v8, %v9749_v8  ;;  %v8193_v16 = vpack.c.bf16 %v5111_v4, %v5095_v1  ;;  %v5125_v1 = vld [vmem:[%s9137_s1] sm:$0xff] }
0x28cc   : > { %v5027_v12 = vmul.f32 %v9751_v55, %v9751_v55 }
0x28cd   : > { %v5032_v13 = vsel %vm1114_vm1, %v5028_v51, 0.0  ;;  %v8191_v51 = vpack.c.bf16 %v5112_v0, %v5096_v62  ;;  %v5142_v0 = vld [vmem:[%s9137_s1 + $0x88] sm:$0xff] }
0x28ce   : > { %5033 = vadd.xlane.f32.xlu1 %v5032_v13  ;;  %v5029_v40 = vsel %vm1114_vm1, %v5027_v12, 0.0  ;;  %v8199_v12 = vpack.c.bf16 %v5114_v11, %v5098_v19  ;;  %v5068_v13 = vld [vmem:[%s9125_s8 + $0x48] sm:$0xff]  ;;  %v5173_v19 = vld [vmem:[%s9137_s1 + $0x180] sm:$0xff] }
0x28cf   : > { %5030 = vadd.xlane.f32.xlu0 %v5029_v40  ;;  %v5084_v40 = vld [vmem:[%s9125_s8 + $0xc8] sm:$0xff] }
0x28d0   : > { %v8203_v35 = vpack.c.bf16 %v5084_v40, %v5068_v13  ;;  %v5174_v11 = vld [vmem:[%s9137_s1 + $0x188] sm:$0xff]  ;;  %v5144_v13 = vld [vmem:[%s9137_s1 + $0x98] sm:$0xff]  ;;  %v5175_v40 = vld [vmem:[%s9137_s1 + $0x190] sm:$0xff] }
0x28d1   : > { %v8271_v24 = vpack.c.bf16 %v5176_v54, %v5175_v40 }
0x295b   : > { %v5034_v43 = vpop.xlane.xlu1 %5033 }
0x295c   : > { %v5036_v44 = vmul.f32 0.03125, %v5034_v43  ;;  %v5031_v45 = vpop.xlane.xlu0 %5030  ;;  %v5087_v43 = vld [vmem:[%s9125_s8 + $0xe0] sm:$0xff] }
0x295d   : > { %v5035_v46 = vmul.f32 0.03125, %v5031_v45  ;;  %v5089_v45 = vld [vmem:[%s9125_s8 + $0xf0] sm:$0xff]  ;;  %v8221_v52 = vpack.c.bf16 %v5087_v43, %v5071_v42 }
0x295e   : > { %v5038_v47 = vadd.f32 1e-05, %v5036_v44  ;;  %v5073_v44 = vld [vmem:[%s9125_s8 + $0x70] sm:$0xff] }
0x295f   : > { %v5037_v22 = vadd.f32 1e-05, %v5035_v46  ;;  %v8219_v46 = vpack.c.bf16 %v5088_v5, %v5072_v31  ;;  %v5179_v31 = vld [vmem:[%s9137_s1 + $0x1b0] sm:$0xff]  ;;  %v5180_v5 = vld [vmem:[%s9137_s1 + $0x1b8] sm:$0xff] }
0x2960   : > { %8825 = vrsqrt.f32 %v5038_v47  ;;  %v8227_v47 = vpack.c.bf16 %v5090_v3, %v5074_v32  ;;  %v8279_v43 = vpack.c.bf16 %v5180_v5, %v5179_v31  ;;  %v5237_v31 = vld [vmem:[%s9137_s1 + $0x380] sm:$0xff] }
0x2961   : > { %8827 = vrsqrt.f32 %v5037_v22  ;;  %v5104_v22 = vld [vmem:[%s9125_s8 + $0x168] sm:$0xff] }
0x296a   : > { %v8826_v48 = vpop.eup %8825 }
0x296b   : > { %v8828_v49 = vpop.eup %8827  ;;  %v5042_v56 = vmul.f32 %v8826_v48, %v9749_v8  ;;  %v5097_v8 = vld [vmem:[%s9125_s8 + $0x130] sm:$0xff]  ;;  %v5120_v48 = vld [vmem:[%s9125_s8 + $0x1e8] sm:$0xff] }
0x296c   : > { %v5041_v14 = vmul.f32 %v8828_v49, %v9751_v55  ;;  %v5113_v55 = vld [vmem:[%s9125_s8 + $0x1b0] sm:$0xff]  ;;  %v5106_v49 = vld [vmem:[%s9125_s8 + $0x178] sm:$0xff] }
0x296d   : > { %v5050_v2 = vmul.f32 %v7195_v50, %v5042_v56  ;;  %v8201_v21 = vpack.c.bf16 %v5113_v55, %v5097_v8  ;;  %v8229_v56 = vpack.c.bf16 %v5089_v45, %v5073_v44  ;;  %v8267_v8 = vpack.c.bf16 %v5174_v11, %v5173_v19  ;;  %v5157_v55 = vld [vmem:[%s9137_s1 + $0x100] sm:$0xff]  ;;  %v5163_v44 = vld [vmem:[%s9137_s1 + $0x130] sm:$0xff]  ;;  %v5164_v45 = vld [vmem:[%s9137_s1 + $0x138] sm:$0xff] }
0x296e   : > { %v5049_v63 = vmul.f32 %v7195_v50, %v5041_v14  ;;  %v5122_v50 = vld [vmem:[%s9125_s8 + $0x1f8] sm:$0xff]  ;;  %v5103_v14 = vld [vmem:[%s9125_s8 + $0x160] sm:$0xff] }
0x296f   : > { %v9816_v23 = vadd.f32 %v7196_v61, %v5050_v2  ;;  %v8231_v62 = vpack.c.bf16 %v5122_v50, %v5106_v49  ;;  %v5126_v2 = vld [vmem:[%s9137_s1 + $0x8] sm:$0xff]  ;;  %v8281_v50 = vpack.c.bf16 %v5164_v45, %v5163_v44  ;;  %v9960_v44 = vld [vmem:[%s9131_s21] sm:$0xff] }
0x2970   : > { %v9802_v25 = vadd.f32 %v7196_v61, %v5049_v63  ;;  %v8223_v61 = vpack.c.bf16 %v5120_v48, %v5104_v22  ;;  %v5141_v63 = vld [vmem:[%s9137_s1 + $0x80] sm:$0xff]  ;;  %v8237_v7 = vpack.c.bf16 %v5126_v2, %v5125_v1  ;;  %v5182_v48 = vld [vmem:[%s9137_s1 + $0x1c8] sm:$0xff] }
0x2971   : > { %v8235_v4 = vpack.c.bf16 %v5142_v0, %v5141_v63  ;;  %v5181_v22 = vld [vmem:[%s9137_s1 + $0x1c0] sm:$0xff]  ;;  %v5183_v63 = vld [vmem:[%s9137_s1 + $0x1d0] sm:$0xff]  ;;  %v5184_v0 = vld [vmem:[%s9137_s1 + $0x1d8] sm:$0xff] }
0x2972   : > { %7197 = vmatmul.mubr.msk.f32.vlgmr.msra.gmra.mrb[36].mxu1 %vm1114_vm1, %v9802_v25  ;;  %7199 = vmatmul.mubr.msk.f32.vlgmr.msra.gmra.mrb[38].mxu0 %vm1114_vm1, %v9802_v25  ;;  %v8287_v2 = vpack.c.bf16 %v5184_v0, %v5183_v63 }
0x2973   : > { %8190 = vmatpush1.bf16.msra.mxu1 %v8189_v17  ;;  %8198 = vmatpush1.bf16.msra.mxu0 %v8197_v57  ;;  %v8225_v17 = vpack.c.bf16 %v5119_v59, %v5103_v14  ;;  %v8233_v57 = vpack.c.bf16 %v5121_v60, %v5105_v26  ;;  %v8283_v59 = vpack.c.bf16 %v5182_v48, %v5181_v22  ;;  %v5165_v26 = vld [vmem:[%s9137_s1 + $0x140] sm:$0xff]  ;;  %v5166_v60 = vld [vmem:[%s9137_s1 + $0x148] sm:$0xff] }
0x2974   : > { %5540 = vmatprep.mubr.f32.mxu1 %v8907_v41  ;;  %5617 = vmatprep.mubr.f32.mxu0 %v8907_v41  ;;  %v8285_v11 = vpack.c.bf16 %v5166_v60, %v5165_v26  ;;  %v5221_v26 = vld [vmem:[%s9137_s1 + $0x300] sm:$0xff]  ;;  %v5222_v60 = vld [vmem:[%s9137_s1 + $0x308] sm:$0xff] }
0x2975   : > { %8192 = vmatprep.subr.bf16.mxu1 %v8191_v51  ;;  %8200 = vmatprep.subr.bf16.mxu0 %v8199_v12  ;;  %v5158_v51 = vld [vmem:[%s9137_s1 + $0x108] sm:$0xff]  ;;  %v5143_v12 = vld [vmem:[%s9137_s1 + $0x90] sm:$0xff] }
0x2976   : > { %7198 = vmatmul.mubr.msk.f32.gmra.mrb[38].mxu1 %vm1114_vm1, %v9816_v23  ;;  %7200 = vmatmul.mubr.msk.f32.gmra.mrb[40].mxu0 %vm1114_vm1, %v9816_v23  ;;  %v8239_v58 = vpack.c.bf16 %v5144_v13, %v5143_v12  ;;  %v5185_v12 = vld [vmem:[%s9137_s1 + $0x1e0] sm:$0xff]  ;;  %v5186_v13 = vld [vmem:[%s9137_s1 + $0x1e8] sm:$0xff] }
0x2977   : > { %8194 = vmatpush1.bf16.msra.mxu1 %v8193_v16  ;;  %8202 = vmatpush1.bf16.msra.mxu0 %v8201_v21  ;;  %v8269_v16 = vpack.c.bf16 %v5158_v51, %v5157_v55  ;;  %v5127_v21 = vld [vmem:[%s9137_s1 + $0x10] sm:$0xff]  ;;  %v5153_v55 = vld [vmem:[%s9137_s1 + $0xe0] sm:$0xff]  ;;  %v5154_v51 = vld [vmem:[%s9137_s1 + $0xe8] sm:$0xff] }
0x2978   : > { %5688 = vmatprep.mubr.f32.mxu1 %v8907_v41  ;;  %5765 = vmatprep.mubr.f32.mxu0 %v8907_v41  ;;  %v8241_v10 = vpack.c.bf16 %v5128_v15, %v5127_v21  ;;  %v8291_v21 = vpack.c.bf16 %v5186_v13, %v5185_v12  ;;  %v5138_v15 = vld [vmem:[%s9137_s1 + $0x68] sm:$0xff]  ;;  %v5191_v12 = vld [vmem:[%s9137_s1 + $0x210] sm:$0xff] }
0x2979   : > { %8204 = vmatprep.subr.bf16.mxu1 %v8203_v35  ;;  %8212 = vmatprep.subr.bf16.mxu0 %v8211_v53  ;;  %v5160_v35 = vld [vmem:[%s9137_s1 + $0x118] sm:$0xff]  ;;  %v5145_v53 = vld [vmem:[%s9137_s1 + $0xa0] sm:$0xff] }
0x297a   : > { %7201 = vmatmul.mubr.msk.f32.vlgmr.msra.gmra.mrb[40].mxu1 %vm1114_vm1, %v9802_v25  ;;  %7203 = vmatmul.mubr.msk.f32.vlgmr.msra.gmra.mrb[42].mxu0 %vm1114_vm1, %v9802_v25  ;;  %v8243_v20 = vpack.c.bf16 %v5146_v36, %v5145_v53  ;;  %v5155_v53 = vld [vmem:[%s9137_s1 + $0xf0] sm:$0xff]  ;;  %v5156_v36 = vld [vmem:[%s9137_s1 + $0xf8] sm:$0xff] }
0x297b   : > { %8206 = vmatpush1.bf16.msra.mxu1 %v8205_v37  ;;  %8214 = vmatpush1.bf16.msra.mxu0 %v8213_v38  ;;  %v8273_v37 = vpack.c.bf16 %v5160_v35, %v5159_v39  ;;  %v5129_v38 = vld [vmem:[%s9137_s1 + $0x20] sm:$0xff]  ;;  %v8263_v6 = vpack.c.bf16 %v5156_v36, %v5155_v53 }
0x297c   : > { %5694 = vmatprep.mubr.f32.mxu1 %v8907_v41  ;;  %5771 = vmatprep.mubr.f32.mxu0 %v8907_v41  ;;  %v8245_v32 = vpack.c.bf16 %v5130_v18, %v5129_v38  ;;  %v5140_v38 = vld [vmem:[%s9137_s1 + $0x78] sm:$0xff] }
0x297d   : > { %8208 = vmatprep.subr.bf16.mxu1 %v8207_v29  ;;  %8216 = vmatprep.subr.bf16.mxu0 %v8215_v30  ;;  %v5162_v29 = vld [vmem:[%s9137_s1 + $0x128] sm:$0xff]  ;;  %v5147_v30 = vld [vmem:[%s9137_s1 + $0xb0] sm:$0xff] }
0x297e   : > { %7202 = vmatmul.mubr.msk.f32.gmra.mrb[42].mxu1 %vm1114_vm1, %v9816_v23  ;;  %7204 = vmatmul.mubr.msk.f32.gmra.mrb[44].mxu0 %vm1114_vm1, %v9816_v23  ;;  %v8277_v3 = vpack.c.bf16 %v5162_v29, %v5161_v28  ;;  %v5172_v28 = vld [vmem:[%s9137_s1 + $0x178] sm:$0xff] }
0x297f   : > { %8210 = vmatpush1.bf16.msra.mxu1 %v8209_v33  ;;  %8218 = vmatpush1.bf16.msra.mxu0 %v8217_v34  ;;  %v5131_v33 = vld [vmem:[%s9137_s1 + $0x30] sm:$0xff]  ;;  %v5132_v34 = vld [vmem:[%s9137_s1 + $0x38] sm:$0xff] }
0x2980   : > { %5842 = vmatprep.mubr.f32.mxu1 %v8907_v41  ;;  %5919 = vmatprep.mubr.f32.mxu0 %v8907_v41  ;;  %v8249_v49 = vpack.c.bf16 %v5132_v34, %v5131_v33  ;;  %v5384_v33 = vlaneseq }
0x2981   : > { %8220 = vmatprep.subr.bf16.mxu1 %v8219_v46  ;;  %8228 = vmatprep.subr.bf16.mxu0 %v8227_v47  ;;  %v5149_v46 = vld [vmem:[%s9137_s1 + $0xc0] sm:$0xff]  ;;  %v5150_v47 = vld [vmem:[%s9137_s1 + $0xc8] sm:$0xff] }
0x2982   : > { %7205 = vmatmul.mubr.msk.f32.vlgmr.msra.gmra.mrb[44].mxu1 %vm1114_vm1, %v9802_v25  ;;  %7207 = vmatmul.mubr.msk.f32.vlgmr.msra.gmra.mrb[46].mxu0 %vm1114_vm1, %v9802_v25  ;;  %v8251_v14 = vpack.c.bf16 %v5150_v47, %v5149_v46  ;;  %v9955_v34 = vshrl.u32 %v5384_v33, 7 }
0x2983   : > { %8222 = vmatpush1.bf16.msra.mxu1 %v8221_v52  ;;  %8230 = vmatpush1.bf16.msra.mxu0 %v8229_v56  ;;  %v5133_v52 = vld [vmem:[%s9137_s1 + $0x40] sm:$0xff]  ;;  %v5134_v56 = vld [vmem:[%s9137_s1 + $0x48] sm:$0xff] }
0x2984   : > { %5848 = vmatprep.mubr.f32.mxu1 %v8907_v41  ;;  %5925 = vmatprep.mubr.f32.mxu0 %v8907_v41  ;;  %v8253_v19 = vpack.c.bf16 %v5134_v56, %v5133_v52  ;;  %v5390_v45 = vsub.s32 1, %v9955_v34  ;;  %v5398_v46 = vsub.s32 3, %v9955_v34  ;;  %v5190_v52 = vld [vmem:[%s9137_s1 + $0x208] sm:$0xff]  ;;  %v5406_v56 = vsub.s32 5, %v9955_v34 }
0x2985   : > { %8224 = vmatprep.subr.bf16.mxu1 %v8223_v61  ;;  %8232 = vmatprep.subr.bf16.mxu0 %v8231_v62  ;;  %v5151_v61 = vld [vmem:[%s9137_s1 + $0xd0] sm:$0xff]  ;;  %v5152_v62 = vld [vmem:[%s9137_s1 + $0xd8] sm:$0xff] }
0x2986   : > { %7206 = vmatmul.mubr.msk.f32.gmra.mrb[46].mxu1 %vm1114_vm1, %v9816_v23  ;;  %7208 = vmatmul.mubr.msk.f32.gmra.mrb[48].mxu0 %vm1114_vm1, %v9816_v23  ;;  %v8255_v1 = vpack.c.bf16 %v5152_v62, %v5151_v61  ;;  %v5391_v48 = vrot.slane %v9960_v44, %v5390_v45  ;;  %v5207_v61 = vld [vmem:[%s9137_s1 + $0x290] sm:$0xff] }
0x2987   : > { %8226 = vmatpush1.bf16.msra.mxu1 %v8225_v17  ;;  %8234 = vmatpush1.bf16.msra.mxu0 %v8233_v57  ;;  %v5135_v17 = vld [vmem:[%s9137_s1 + $0x50] sm:$0xff]  ;;  %v5136_v57 = vld [vmem:[%s9137_s1 + $0x58] sm:$0xff] }
0x2988   : > { %5996 = vmatprep.mubr.f32.mxu1 %v8907_v41  ;;  %6073 = vmatprep.mubr.f32.mxu0 %v8907_v41  ;;  %v8257_v40 = vpack.c.bf16 %v5136_v57, %v5135_v17  ;;  %v5239_v17 = vld [vmem:[%s9137_s1 + $0x390] sm:$0xff]  ;;  %v5240_v57 = vld [vmem:[%s9137_s1 + $0x398] sm:$0xff] }
0x2989   : > { %8236 = vmatprep.subr.bf16.mxu1 %v8235_v4  ;;  %8268 = vmatprep.subr.bf16.mxu0 %v8267_v8  ;;  %v5167_v4 = vld [vmem:[%s9137_s1 + $0x150] sm:$0xff]  ;;  %v5168_v8 = vld [vmem:[%s9137_s1 + $0x158] sm:$0xff] }
0x298a   : > { %7209 = vmatmul.mubr.msk.f32.vlgmr.msra.gmra.mrb[48].mxu1 %vm1114_vm1, %v9802_v25  ;;  %7211 = vmatmul.mubr.msk.f32.vlgmr.msra.gmra.mrb[50].mxu0 %vm1114_vm1, %v9802_v25  ;;  %v8289_v54 = vpack.c.bf16 %v5168_v8, %v5167_v4  ;;  %v5414_v4 = vsub.s32 7, %v9955_v34 }
0x298b   : > { %6002 = vmatprep.mubr.f32.mxu1 %v8907_v41  ;;  %6079 = vmatprep.mubr.f32.mxu0 %v8907_v41  ;;  %v5148_v41 = vld [vmem:[%s9137_s1 + $0xb8] sm:$0xff] }
0x298c   : > { %8238 = vmatpush3.bf16.msra.mxu1 %v8237_v7  ;;  %8270 = vmatpush3.bf16.msra.mxu0 %v8269_v16  ;;  %v8247_v42 = vpack.c.bf16 %v5148_v41, %v5147_v30  ;;  %v5137_v7 = vld [vmem:[%s9137_s1 + $0x60] sm:$0xff]  ;;  %v8259_v16 = vpack.c.bf16 %v5154_v51, %v5153_v55  ;;  %v5206_v41 = vld [vmem:[%s9137_s1 + $0x288] sm:$0xff]  ;;  %v8333_v55 = vpack.c.bf16 %v5222_v60, %v5221_v26  ;;  %v5211_v60 = vld [vmem:[%s9137_s1 + $0x2b0] sm:$0xff] }
0x298d   : > { %8240 = vmatprep.subr.bf16.mxu1 %v8239_v58  ;;  %8272 = vmatprep.subr.bf16.mxu0 %v8271_v24  ;;  %v5169_v58 = vld [vmem:[%s9137_s1 + $0x160] sm:$0xff]  ;;  %v5170_v24 = vld [vmem:[%s9137_s1 + $0x168] sm:$0xff]  ;;  %v8261_v39 = vpack.c.bf16 %v5138_v15, %v5137_v7  ;;  %v9989_v51 = vrot.slane %v9960_v44, %v5406_v56  ;;  %v5192_v15 = vld [vmem:[%s9137_s1 + $0x218] sm:$0xff] }
0x298e   : > { %7210 = vmatmul.mubr.msk.f32.gmra.mrb[50].mxu1 %vm1114_vm1, %v9816_v23  ;;  %7212 = vmatmul.mubr.msk.f32.gmra.mrb[52].mxu0 %vm1114_vm1, %v9816_v23  ;;  %v8293_v35 = vpack.c.bf16 %v5170_v24, %v5169_v58  ;;  %v5205_v30 = vld [vmem:[%s9137_s1 + $0x280] sm:$0xff]  ;;  %v5223_v58 = vld [vmem:[%s9137_s1 + $0x310] sm:$0xff]  ;;  %v10013_v26 = vld [vmem:[%s9131_s21 + $0x8] sm:$0xff] }
0x298f   : > { %v8299_v5 = vpack.c.bf16 %v5206_v41, %v5205_v30  ;;  %v5194_v30 = vld [vmem:[%s9137_s1 + $0x228] sm:$0xff] }
0x2990   : > { %8242 = vmatpush3.bf16.msra.mxu1 %v8241_v10  ;;  %8274 = vmatpush3.bf16.msra.mxu0 %v8273_v37  ;;  %v5188_v10 = vld [vmem:[%s9137_s1 + $0x1f8] sm:$0xff]  ;;  %v5139_v37 = vld [vmem:[%s9137_s1 + $0x70] sm:$0xff] }
0x2991   : > { %8244 = vmatprep.subr.bf16.mxu1 %v8243_v20  ;;  %8276 = vmatprep.subr.bf16.mxu0 %v8275_v27  ;;  %v8295_v18 = vpack.c.bf16 %v5188_v10, %v5187_v9  ;;  %v8265_v20 = vpack.c.bf16 %v5140_v38, %v5139_v37  ;;  %v5171_v27 = vld [vmem:[%s9137_s1 + $0x170] sm:$0xff]  ;;  %v5209_v10 = vld [vmem:[%s9137_s1 + $0x2a0] sm:$0xff] }
0x2992   : > { %v8297_v29 = vpack.c.bf16 %v5172_v28, %v5171_v27  ;;  %v5241_v27 = vld [vmem:[%s9137_s1 + $0x3a0] sm:$0xff]  ;;  %v5242_v28 = vld [vmem:[%s9137_s1 + $0x3a8] sm:$0xff] }
0x2994   : > { %8246 = vmatpush3.bf16.msra.mxu1 %v8245_v32  ;;  %8278 = vmatpush3.bf16.msra.mxu0 %v8277_v3  ;;  %v5238_v32 = vld [vmem:[%s9137_s1 + $0x388] sm:$0xff] }
0x2995   : > { %8248 = vmatprep.subr.bf16.mxu1 %v8247_v42  ;;  %8280 = vmatprep.subr.bf16.mxu0 %v8279_v43  ;;  %v8331_v3 = vpack.c.bf16 %v5238_v32, %v5237_v31  ;;  %v5386_v42 = vsub.s32 0, %v9955_v34  ;;  %v5394_v43 = vsub.s32 2, %v9955_v34 }
0x2997   : > { %v5387_v47 = vrot.slane %v9960_v44, %v5386_v42  ;;  %v5395_v22 = vrot.slane %v9960_v44, %v5394_v43 }
0x2998   : > { %8250 = vmatpush3.bf16.msra.mxu1 %v8249_v49  ;;  %8282 = vmatpush3.bf16.msra.mxu0 %v8281_v50  ;;  %v5399_v49 = vrot.slane %v9960_v44, %v5398_v46  ;;  %v5189_v50 = vld [vmem:[%s9137_s1 + $0x200] sm:$0xff] }
0x2999   : > { %8252 = vmatprep.subr.bf16.mxu1 %v8251_v14  ;;  %8284 = vmatprep.subr.bf16.mxu0 %v8283_v59  ;;  %v8301_v8 = vpack.c.bf16 %v5190_v52, %v5189_v50 }
0x299c   : > { %8254 = vmatpush3.bf16.msra.mxu1 %v8253_v19  ;;  %8286 = vmatpush3.bf16.msra.mxu0 %v8285_v11  ;;  %v5208_v11 = vld [vmem:[%s9137_s1 + $0x298] sm:$0xff] }
0x299d   : > { %8256 = vmatprep.subr.bf16.mxu1 %v8255_v1  ;;  %8288 = vmatprep.subr.bf16.mxu0 %v8287_v2 }
0x29a0   : > { %8258 = vmatpush3.bf16.msra.mxu1 %v8257_v40  ;;  %8290 = vmatpush3.bf16.msra.mxu0 %v8289_v54 }
0x29a1   : > { %8260 = vmatprep.subr.bf16.mxu1 %v8259_v16  ;;  %8292 = vmatprep.subr.bf16.mxu0 %v8291_v21  ;;  %v8303_v16 = vpack.c.bf16 %v5208_v11, %v5207_v61  ;;  %v8335_v21 = vpack.c.bf16 %v5240_v57, %v5239_v17 }
0x29a4   : > { %8262 = vmatpush3.bf16.msra.mxu1 %v8261_v39  ;;  %8294 = vmatpush3.bf16.msra.mxu0 %v8293_v35 }
0x29a5   : > { %8264 = vmatprep.subr.bf16.mxu1 %v8263_v6  ;;  %8296 = vmatprep.subr.bf16.mxu0 %v8295_v18  ;;  %v5224_v6 = vld [vmem:[%s9137_s1 + $0x318] sm:$0xff]  ;;  %v9999_v18 = vrot.slane %v9960_v44, %v5414_v4 }
0x29a6   : > { %v8337_v33 = vpack.c.bf16 %v5224_v6, %v5223_v58  ;;  %v5213_v58 = vld [vmem:[%s9137_s1 + $0x2c0] sm:$0xff] }
0x29a7   : > { %v5197_v6 = vld [vmem:[%s9137_s1 + $0x240] sm:$0xff] }
0x29a8   : > { %8266 = vmatpush3.bf16.msra.mxu1 %v8265_v20  ;;  %8298 = vmatpush3.bf16.msra.mxu0 %v8297_v29  ;;  %v5210_v20 = vld [vmem:[%s9137_s1 + $0x2a8] sm:$0xff]  ;;  %v5193_v29 = vld [vmem:[%s9137_s1 + $0x220] sm:$0xff] }
0x29a9   : > { %8300 = vmatprep.subr.bf16.mxu1 %v8299_v5  ;;  %8332 = vmatprep.subr.bf16.mxu0 %v8331_v3  ;;  %v8305_v3 = vpack.c.bf16 %v5192_v15, %v5191_v12  ;;  %v5196_v12 = vld [vmem:[%s9137_s1 + $0x238] sm:$0xff] }
0x29aa   : > { %v5228_v15 = vld [vmem:[%s9137_s1 + $0x338] sm:$0xff] }
0x2a45   : > { %v5536_v14 = vpop.f32.mrb[36].mxu1  ;;  %v5613_v59 = vpop.f32.mrb[38].mxu0 }
0x2a46   : > { %v5537_v62 = vadd.f32 %v5536_v14, %v5387_v47  ;;  %v5614_v63 = vadd.f32 %v5613_v59, %v5395_v22  ;;  %v5538_v0 = vpop.f32.mrb[37].mxu1  ;;  %v5615_v19 = vpop.f32.mrb[39].mxu0  ;;  %v8307_v14 = vpack.c.bf16 %v5210_v20, %v5209_v10  ;;  %v8339_v59 = vpack.c.bf16 %v5242_v28, %v5241_v27  ;;  %v5198_v10 = vld [vmem:[%s9137_s1 + $0x248] sm:$0xff] }
0x2a47   : > { %v5539_v1 = vadd.f32 %v5538_v0, %v5391_v48  ;;  %v5616_v2 = vadd.f32 %v5615_v19, %v5399_v49  ;;  %v5243_v0 = vld [vmem:[%s9137_s1 + $0x3b0] sm:$0xff]  ;;  %v5244_v19 = vld [vmem:[%s9137_s1 + $0x3b8] sm:$0xff] }
0x2a48   : > { %v6086_v24 = vmax.f32 %v5537_v62, 0.0  ;;  %v6088_v39 = vmax.f32 %v5614_v63, 0.0  ;;  %v5212_v63 = vld [vmem:[%s9137_s1 + $0x2b8] sm:$0xff] }
0x2a49   : > { %v6087_v13 = vmax.f32 %v5539_v1, 0.0  ;;  %v6089_v40 = vmax.f32 %v5616_v2, 0.0  ;;  %v5542_v54 = vpop.f32.mrb[38].mxu1  ;;  %v5619_v7 = vpop.f32.mrb[40].mxu0  ;;  %v8309_v2 = vpack.c.bf16 %v5194_v30, %v5193_v29  ;;  %v5229_v29 = vld [vmem:[%s9137_s1 + $0x340] sm:$0xff]  ;;  %v5230_v30 = vld [vmem:[%s9137_s1 + $0x348] sm:$0xff] }
0x2a4a   : > { %v5543_v35 = vadd.f32 %v5542_v54, %v5387_v47  ;;  %v5620_v53 = vadd.f32 %v5619_v7, %v5395_v22  ;;  %v5544_v36 = vpop.f32.mrb[39].mxu1  ;;  %v5621_v9 = vpop.f32.mrb[41].mxu0  ;;  %v5225_v47 = vld [vmem:[%s9137_s1 + $0x320] sm:$0xff]  ;;  %v5226_v22 = vld [vmem:[%s9137_s1 + $0x328] sm:$0xff]  ;;  %v5427_v54 = vrot.slane %v10013_v26, %v5394_v43  ;;  %v8311_v7 = vpack.c.bf16 %v5212_v63, %v5211_v60  ;;  %v5199_v60 = vld [vmem:[%s9137_s1 + $0x250] sm:$0xff] }
0x2a4b   : > { %v5545_v37 = vadd.f32 %v5544_v36, %v5391_v48  ;;  %v5622_v38 = vadd.f32 %v5621_v9, %v5399_v49  ;;  %6188 = vmatprep.mubr.f32.mxu1 %v6087_v13  ;;  %6263 = vmatprep.mubr.f32.mxu0 %v6089_v40 }
0x2a4c   : > { %6189 = vmatmul.mubr.f32.vlgmr.msra.gmra.mrb[52].mxu1 %v6086_v24  ;;  %6264 = vmatmul.mubr.f32.vlgmr.msra.gmra.mrb[54].mxu0 %v6088_v39  ;;  %v6102_v48 = vmax.f32 %v5543_v35, 0.0  ;;  %v6104_v49 = vmax.f32 %v5620_v53, 0.0  ;;  %v5214_v24 = vld [vmem:[%s9137_s1 + $0x2c8] sm:$0xff]  ;;  %v5245_v39 = vld [vmem:[%s9137_s1 + $0x3c0] sm:$0xff] }
0x2a4d   : > { %v6103_v41 = vmax.f32 %v5545_v37, 0.0  ;;  %v6105_v31 = vmax.f32 %v5622_v38, 0.0  ;;  %8302 = vmatpush3.bf16.msra.mxu1 %v8301_v8  ;;  %8334 = vmatpush3.bf16.msra.mxu0 %v8333_v55  ;;  %v10006_v5 = vpop.f32.mrb[40].mxu1  ;;  %v10008_v32 = vpop.f32.mrb[42].mxu0  ;;  %v8341_v8 = vpack.c.bf16 %v5226_v22, %v5225_v47  ;;  %v5195_v55 = vld [vmem:[%s9137_s1 + $0x230] sm:$0xff]  ;;  %v5246_v35 = vld [vmem:[%s9137_s1 + $0x3c8] sm:$0xff]  ;;  %v8315_v27 = vpack.c.bf16 %v5214_v24, %v5213_v58 }
0x2a4e   : > { %v5692_v50 = vpop.f32.mrb[41].mxu1  ;;  %v5769_v52 = vpop.f32.mrb[43].mxu0  ;;  %8304 = vmatprep.subr.bf16.mxu1 %v8303_v16  ;;  %8336 = vmatprep.subr.bf16.mxu0 %v8335_v21  ;;  %v8343_v16 = vpack.c.bf16 %v5244_v19, %v5243_v0  ;;  %v5227_v21 = vld [vmem:[%s9137_s1 + $0x330] sm:$0xff]  ;;  %v8313_v36 = vpack.c.bf16 %v5196_v12, %v5195_v55  ;;  %v8347_v28 = vpack.c.bf16 %v5246_v35, %v5245_v39  ;;  %v5248_v22 = vld [vmem:[%s9137_s1 + $0x3d8] sm:$0xff]  ;;  %v5218_v55 = vld [vmem:[%s9137_s1 + $0x2e8] sm:$0xff] }
0x2a4f   : > { %v5693_v61 = vadd.f32 %v5692_v50, %v9989_v51  ;;  %v5770_v62 = vadd.f32 %v5769_v52, %v9999_v18  ;;  %6193 = vmatprep.mubr.f32.mxu1 %v6103_v41  ;;  %6268 = vmatprep.mubr.f32.mxu0 %v6105_v31  ;;  %v8345_v9 = vpack.c.bf16 %v5228_v15, %v5227_v21  ;;  %v5215_v41 = vld [vmem:[%s9137_s1 + $0x2d0] sm:$0xff]  ;;  %v5402_v31 = vsub.s32 4, %v9955_v34  ;;  %v5201_v35 = vld [vmem:[%s9137_s1 + $0x260] sm:$0xff] }
0x2a50   : > { %6194 = vmatmul.mubr.f32.gmra.mrb[54].mxu1 %v6102_v48  ;;  %6269 = vmatmul.mubr.f32.gmra.mrb[56].mxu0 %v6104_v49  ;;  %v5247_v47 = vld [vmem:[%s9137_s1 + $0x3d0] sm:$0xff]  ;;  %v8317_v48 = vpack.c.bf16 %v5198_v10, %v5197_v6  ;;  %v8349_v52 = vpack.c.bf16 %v5230_v30, %v5229_v29  ;;  %v5439_v12 = vrot.slane %v10013_v26, %v5406_v56  ;;  %v5202_v56 = vld [vmem:[%s9137_s1 + $0x268] sm:$0xff]  ;;  %v5220_v29 = vld [vmem:[%s9137_s1 + $0x2f8] sm:$0xff] }
0x2a51   : > { %v6091_v11 = vmax.f32 %v5693_v61, 0.0  ;;  %v6093_v17 = vmax.f32 %v5770_v62, 0.0  ;;  %8306 = vmatpush3.bf16.msra.mxu1 %v8305_v3  ;;  %8338 = vmatpush3.bf16.msra.mxu0 %v8337_v33  ;;  %v10021_v57 = vpop.f32.mrb[42].mxu1  ;;  %v10023_v1 = vpop.f32.mrb[44].mxu0  ;;  %v5410_v3 = vsub.s32 6, %v9955_v34  ;;  %v5216_v33 = vld [vmem:[%s9137_s1 + $0x2d8] sm:$0xff] }
0x2a52   : > { %v10027_v13 = vpop.f32.mrb[43].mxu1  ;;  %v10029_v40 = vpop.f32.mrb[45].mxu0  ;;  %8308 = vmatprep.subr.bf16.mxu1 %v8307_v14  ;;  %8340 = vmatprep.subr.bf16.mxu0 %v8339_v59  ;;  %v5435_v14 = vrot.slane %v10013_v26, %v5402_v31  ;;  %v5200_v61 = vld [vmem:[%s9137_s1 + $0x258] sm:$0xff]  ;;  %v5231_v62 = vld [vmem:[%s9137_s1 + $0x350] sm:$0xff] }
0x2a53   : > { %6338 = vmatprep.mubr.f32.mxu1 %v6091_v11  ;;  %6413 = vmatprep.mubr.f32.mxu0 %v6093_v17  ;;  %v5443_v59 = vrot.slane %v10013_v26, %v5410_v3  ;;  %v8319_v11 = vpack.c.bf16 %v5216_v33, %v5215_v41  ;;  %v8351_v17 = vpack.c.bf16 %v5248_v22, %v5247_v47  ;;  %v5251_v33 = vld [vmem:[%s9137_s1 + $0x3f0] sm:$0xff]  ;;  %v5252_v47 = vld [vmem:[%s9137_s1 + $0x3f8] sm:$0xff] }
0x2a54   : > { %v8321_v58 = vpack.c.bf16 %v5200_v61, %v5199_v60  ;;  %v5403_v22 = vrot.slane %v9960_v44, %v5402_v31  ;;  %v8325_v60 = vpack.c.bf16 %v5202_v56, %v5201_v35  ;;  %v5254_v35 = vld [vmem:[%s9137_s1 + $0x408] sm:$0xff] }
0x2a55   : > { %8310 = vmatpush3.bf16.msra.mxu1 %v8309_v2  ;;  %8342 = vmatpush3.bf16.msra.mxu0 %v8341_v8  ;;  %v10040_v53 = vpop.f32.mrb[44].mxu1  ;;  %v5921_v43 = vpop.f32.mrb[46].mxu0  ;;  %v5232_v2 = vld [vmem:[%s9137_s1 + $0x358] sm:$0xff]  ;;  %v5217_v8 = vld [vmem:[%s9137_s1 + $0x2e0] sm:$0xff] }
0x2a56   : > { %v10044_v37 = vadd.f32 %v5921_v43, %v5427_v54  ;;  %v10046_v38 = vpop.f32.mrb[45].mxu1  ;;  %v10048_v20 = vpop.f32.mrb[47].mxu0  ;;  %8312 = vmatprep.subr.bf16.mxu1 %v8311_v7  ;;  %8344 = vmatprep.subr.bf16.mxu0 %v8343_v16  ;;  %v5249_v7 = vld [vmem:[%s9137_s1 + $0x3e0] sm:$0xff]  ;;  %v5250_v16 = vld [vmem:[%s9137_s1 + $0x3e8] sm:$0xff]  ;;  %v8353_v24 = vpack.c.bf16 %v5232_v2, %v5231_v62  ;;  %v8323_v39 = vpack.c.bf16 %v5218_v55, %v5217_v8  ;;  %v5235_v2 = vld [vmem:[%s9137_s1 + $0x370] sm:$0xff] }
0x2a57   : > { %v5233_v43 = vld [vmem:[%s9137_s1 + $0x360] sm:$0xff]  ;;  %v8355_v10 = vpack.c.bf16 %v5250_v16, %v5249_v7  ;;  %v8359_v55 = vpack.c.bf16 %v5252_v47, %v5251_v33  ;;  %v5236_v7 = vld [vmem:[%s9137_s1 + $0x378] sm:$0xff]  ;;  %v5699_v47 = vadd.f32 %v10027_v13, %v9989_v51 }
0x2a58   : > { %v5269_v16 = vld [vmem:[%s9137_s1 + $0x480] sm:$0xff]  ;;  %v8361_v56 = vpack.c.bf16 %v5236_v7, %v5235_v2  ;;  %v5304_v33 = vld [vmem:[%s9137_s1 + $0x598] sm:$0xff] }
0x2a59   : > { %8314 = vmatpush3.bf16.msra.mxu1 %v8313_v36  ;;  %8346 = vmatpush3.bf16.msra.mxu0 %v8345_v9  ;;  %v10058_v49 = vpop.f32.mrb[46].mxu1  ;;  %v5927_v50 = vpop.f32.mrb[48].mxu0 }
0x2a5a   : > { %v10065_v63 = vadd.f32 %v5927_v50, %v5427_v54  ;;  %v10067_v0 = vpop.f32.mrb[47].mxu1  ;;  %v10069_v19 = vpop.f32.mrb[49].mxu0  ;;  %8316 = vmatprep.subr.bf16.mxu1 %v8315_v27  ;;  %8348 = vmatprep.subr.bf16.mxu0 %v8347_v28  ;;  %v5447_v54 = vrot.slane %v10013_v26, %v5414_v4  ;;  %v5234_v27 = vld [vmem:[%s9137_s1 + $0x368] sm:$0xff]  ;;  %v5219_v28 = vld [vmem:[%s9137_s1 + $0x2f0] sm:$0xff] }
0x2a5b   : > { %v8357_v61 = vpack.c.bf16 %v5234_v27, %v5233_v43  ;;  %v8327_v62 = vpack.c.bf16 %v5220_v29, %v5219_v28  ;;  %v5272_v28 = vld [vmem:[%s9137_s1 + $0x498] sm:$0xff]  ;;  %v5303_v29 = vld [vmem:[%s9137_s1 + $0x590] sm:$0xff] }
0x2a5d   : > { %8318 = vmatpush3.bf16.msra.mxu1 %v8317_v48  ;;  %8350 = vmatpush3.bf16.msra.mxu0 %v8349_v52  ;;  %v5998_v21 = vpop.f32.mrb[48].mxu1  ;;  %v6075_v15 = vpop.f32.mrb[50].mxu0  ;;  %v5411_v48 = vrot.slane %v9960_v44, %v5410_v3 }
0x2a5e   : > { %v10085_v36 = vadd.f32 %v5998_v21, %v5435_v14  ;;  %v10087_v4 = vadd.f32 %v6075_v15, %v5443_v59  ;;  %v6000_v9 = vpop.f32.mrb[49].mxu1  ;;  %v6077_v6 = vpop.f32.mrb[51].mxu0  ;;  %8320 = vmatprep.subr.bf16.mxu1 %v8319_v11  ;;  %8352 = vmatprep.subr.bf16.mxu0 %v8351_v17  ;;  %v5203_v11 = vld [vmem:[%s9137_s1 + $0x270] sm:$0xff]  ;;  %v5204_v17 = vld [vmem:[%s9137_s1 + $0x278] sm:$0xff]  ;;  %v5270_v21 = vld [vmem:[%s9137_s1 + $0x488] sm:$0xff] }
0x2a5f   : > { %v10092_v30 = vadd.f32 %v6000_v9, %v5439_v12  ;;  %v10094_v41 = vadd.f32 %v6077_v6, %v5447_v54  ;;  %v8363_v43 = vpack.c.bf16 %v5270_v21, %v5269_v16  ;;  %v5285_v9 = vld [vmem:[%s9137_s1 + $0x500] sm:$0xff]  ;;  %v5286_v6 = vld [vmem:[%s9137_s1 + $0x508] sm:$0xff] }
0x2a60   : > { %v8397_v51 = vpack.c.bf16 %v5286_v6, %v5285_v9  ;;  %v5257_v21 = vld [vmem:[%s9137_s1 + $0x420] sm:$0xff]  ;;  %v5275_v9 = vld [vmem:[%s9137_s1 + $0x4b0] sm:$0xff]  ;;  %v5276_v6 = vld [vmem:[%s9137_s1 + $0x4b8] sm:$0xff] }
0x2a61   : > { %8322 = vmatpush3.bf16.msra.mxu1 %v8321_v58  ;;  %8354 = vmatpush3.bf16.msra.mxu0 %v8353_v24  ;;  %v6004_v50 = vpop.f32.mrb[50].mxu1  ;;  %v6081_v52 = vpop.f32.mrb[52].mxu0  ;;  %v5301_v24 = vld [vmem:[%s9137_s1 + $0x580] sm:$0xff] }
0x2a62   : > { %v10103_v31 = vadd.f32 %v6004_v50, %v5435_v14  ;;  %v10105_v44 = vadd.f32 %v6081_v52, %v5443_v59  ;;  %v6006_v3 = vpop.f32.mrb[51].mxu1  ;;  %v6083_v8 = vpop.f32.mrb[53].mxu0  ;;  %8324 = vmatprep.subr.bf16.mxu1 %v8323_v39  ;;  %8356 = vmatprep.subr.bf16.mxu0 %v8355_v10  ;;  %v5302_v14 = vld [vmem:[%s9137_s1 + $0x588] sm:$0xff]  ;;  %v5253_v59 = vld [vmem:[%s9137_s1 + $0x400] sm:$0xff]  ;;  %v8329_v39 = vpack.c.bf16 %v5204_v17, %v5203_v11  ;;  %v5271_v10 = vld [vmem:[%s9137_s1 + $0x490] sm:$0xff]  ;;  %v6107_v11 = vmax.f32 %v5699_v47, 0.0 }
0x2a63   : > { %v10110_v15 = vadd.f32 %v6006_v3, %v5439_v12  ;;  %v10112_v58 = vadd.f32 %v6083_v8, %v5447_v54  ;;  %v5691_v12 = vadd.f32 %v10006_v5, %v5403_v22  ;;  %v5768_v54 = vadd.f32 %v10008_v32, %v5411_v48  ;;  %v5287_v8 = vld [vmem:[%s9137_s1 + $0x510] sm:$0xff] }
0x2a64   : > { %v8395_v27 = vpack.c.bf16 %v5302_v14, %v5301_v24  ;;  %v5776_v50 = vadd.f32 %v10029_v40, %v9999_v18  ;;  %v10133_v5 = vrot.slane %v10013_v26, %v5390_v45  ;;  %v10138_v32 = vrot.slane %v10013_v26, %v5398_v46  ;;  %v5255_v46 = vld [vmem:[%s9137_s1 + $0x410] sm:$0xff]  ;;  %v5258_v24 = vld [vmem:[%s9137_s1 + $0x428] sm:$0xff] }
0x2a65   : > { %8326 = vmatpush3.bf16.msra.mxu1 %v8325_v60  ;;  %8358 = vmatpush3.bf16.msra.mxu0 %v8357_v61  ;;  %v8365_v52 = vpack.c.bf16 %v5254_v35, %v5253_v59  ;;  %v8367_v13 = vpack.c.bf16 %v5272_v28, %v5271_v10  ;;  %v8399_v18 = vpack.c.bf16 %v5304_v33, %v5303_v29  ;;  %v6090_v40 = vmax.f32 %v5691_v12, 0.0  ;;  %v5307_v10 = vld [vmem:[%s9137_s1 + $0x5b0] sm:$0xff]  ;;  %v5308_v12 = vld [vmem:[%s9137_s1 + $0x5b8] sm:$0xff] }
0x2a66   : > { %8328 = vmatprep.subr.bf16.mxu1 %v8327_v62  ;;  %8360 = vmatprep.subr.bf16.mxu0 %v8359_v55  ;;  %v6092_v60 = vmax.f32 %v5768_v54, 0.0  ;;  %v5697_v45 = vadd.f32 %v10021_v57, %v5403_v22  ;;  %v5774_v61 = vadd.f32 %v10023_v1, %v5411_v48  ;;  %v5256_v62 = vld [vmem:[%s9137_s1 + $0x418] sm:$0xff]  ;;  %v6109_v17 = vmax.f32 %v5776_v50, 0.0  ;;  %v5273_v57 = vld [vmem:[%s9137_s1 + $0x4a0] sm:$0xff]  ;;  %v5274_v1 = vld [vmem:[%s9137_s1 + $0x4a8] sm:$0xff] }
0x2a67   : > { %v5847_v2 = vadd.f32 %v10046_v38, %v10133_v5  ;;  %v5924_v3 = vadd.f32 %v10048_v20, %v10138_v32  ;;  %v5288_v55 = vld [vmem:[%s9137_s1 + $0x518] sm:$0xff]  ;;  %v5305_v22 = vld [vmem:[%s9137_s1 + $0x5a0] sm:$0xff]  ;;  %v5306_v48 = vld [vmem:[%s9137_s1 + $0x5a8] sm:$0xff]  ;;  %v8369_v20 = vpack.c.bf16 %v5256_v62, %v5255_v46  ;;  %v8371_v35 = vpack.c.bf16 %v5274_v1, %v5273_v57 }
0x2a68   : > { %v6106_v7 = vmax.f32 %v5697_v45, 0.0  ;;  %v6108_v38 = vmax.f32 %v5774_v61, 0.0  ;;  %v8401_v16 = vpack.c.bf16 %v5288_v55, %v5287_v8  ;;  %v8373_v54 = vpack.c.bf16 %v5258_v24, %v5257_v21  ;;  %v5259_v28 = vld [vmem:[%s9137_s1 + $0x430] sm:$0xff]  ;;  %v5260_v29 = vld [vmem:[%s9137_s1 + $0x438] sm:$0xff]  ;;  %v5261_v61 = vld [vmem:[%s9137_s1 + $0x440] sm:$0xff] }
0x2a69   : > { %8330 = vmatpush3.bf16.msra.mxu1 %v8329_v39  ;;  %8362 = vmatpush3.bf16.msra.mxu0 %v8361_v56  ;;  %v6095_v14 = vmax.f32 %v5847_v2, 0.0  ;;  %v6097_v59 = vmax.f32 %v5924_v3, 0.0  ;;  %v8403_v39 = vpack.c.bf16 %v5306_v48, %v5305_v22  ;;  %v5289_v56 = vld [vmem:[%s9137_s1 + $0x520] sm:$0xff]  ;;  %v8375_v33 = vpack.c.bf16 %v5276_v6, %v5275_v9  ;;  %v5291_v50 = vld [vmem:[%s9137_s1 + $0x530] sm:$0xff]  ;;  %v5262_v46 = vld [vmem:[%s9137_s1 + $0x448] sm:$0xff] }
0x2a6a   : > { %8364 = vmatprep.subr.bf16.mxu1 %v8363_v43  ;;  %8396 = vmatprep.subr.bf16.mxu0 %v8395_v27  ;;  %v5290_v43 = vld [vmem:[%s9137_s1 + $0x528] sm:$0xff]  ;;  %v8407_v47 = vpack.c.bf16 %v5308_v12, %v5307_v10  ;;  %v5279_v3 = vld [vmem:[%s9137_s1 + $0x4d0] sm:$0xff]  ;;  %v5280_v8 = vld [vmem:[%s9137_s1 + $0x4d8] sm:$0xff]  ;;  %v8381_v1 = vpack.c.bf16 %v5262_v46, %v5261_v61 }
0x2a6b   : > { %v8405_v27 = vpack.c.bf16 %v5290_v43, %v5289_v56  ;;  %v5294_v2 = vld [vmem:[%s9137_s1 + $0x548] sm:$0xff]  ;;  %v5311_v55 = vld [vmem:[%s9137_s1 + $0x5d0] sm:$0xff]  ;;  %v5312_v57 = vld [vmem:[%s9137_s1 + $0x5d8] sm:$0xff] }
0x2a6c   : > { %6339 = vmatmul.mubr.f32.vlgmr.msra.gmra.mrb[56].mxu1 %v6090_v40  ;;  %6414 = vmatmul.mubr.f32.vlgmr.msra.gmra.mrb[58].mxu0 %v6092_v60  ;;  %v5310_v40 = vld [vmem:[%s9137_s1 + $0x5c8] sm:$0xff]  ;;  %v8377_v60 = vpack.c.bf16 %v5260_v29, %v5259_v28  ;;  %v5263_v48 = vld [vmem:[%s9137_s1 + $0x450] sm:$0xff]  ;;  %v5296_v21 = vld [vmem:[%s9137_s1 + $0x558] sm:$0xff] }
0x2a6d   : > { %6343 = vmatprep.mubr.f32.mxu1 %v6107_v11  ;;  %6418 = vmatprep.mubr.f32.mxu0 %v6109_v17  ;;  %v5293_v17 = vld [vmem:[%s9137_s1 + $0x540] sm:$0xff]  ;;  %v5266_v9 = vld [vmem:[%s9137_s1 + $0x468] sm:$0xff]  ;;  %v5284_v28 = vld [vmem:[%s9137_s1 + $0x4f8] sm:$0xff] }
0x2a6e   : > { %8366 = vmatpush3.bf16.msra.mxu1 %v8365_v52  ;;  %8398 = vmatpush3.bf16.msra.mxu0 %v8397_v51  ;;  %v5292_v52 = vld [vmem:[%s9137_s1 + $0x538] sm:$0xff]  ;;  %v5277_v51 = vld [vmem:[%s9137_s1 + $0x4c0] sm:$0xff]  ;;  %v8413_v22 = vpack.c.bf16 %v5294_v2, %v5293_v17  ;;  %v5315_v29 = vld [vmem:[%s9137_s1 + $0x5f0] sm:$0xff] }
0x2a6f   : > { %8368 = vmatprep.subr.bf16.mxu1 %v8367_v13  ;;  %8400 = vmatprep.subr.bf16.mxu0 %v8399_v18  ;;  %v5278_v13 = vld [vmem:[%s9137_s1 + $0x4c8] sm:$0xff]  ;;  %v5309_v18 = vld [vmem:[%s9137_s1 + $0x5c0] sm:$0xff]  ;;  %v8409_v45 = vpack.c.bf16 %v5292_v52, %v5291_v50  ;;  %v5267_v52 = vld [vmem:[%s9137_s1 + $0x470] sm:$0xff] }
0x2a70   : > { %6344 = vmatmul.mubr.f32.gmra.mrb[58].mxu1 %v6106_v7  ;;  %6419 = vmatmul.mubr.f32.gmra.mrb[60].mxu0 %v6108_v38  ;;  %v8379_v62 = vpack.c.bf16 %v5278_v13, %v5277_v51  ;;  %v8411_v11 = vpack.c.bf16 %v5310_v40, %v5309_v18  ;;  %v5264_v7 = vld [vmem:[%s9137_s1 + $0x458] sm:$0xff]  ;;  %v8383_v38 = vpack.c.bf16 %v5280_v8, %v5279_v3  ;;  %v5281_v24 = vld [vmem:[%s9137_s1 + $0x4e0] sm:$0xff]  ;;  %v5334_v46 = vld [vmem:[%s9137_s1 + $0x688] sm:$0xff] }
0x2a71   : > { %6488 = vmatprep.mubr.f32.mxu1 %v6095_v14  ;;  %6563 = vmatprep.mubr.f32.mxu0 %v6097_v59  ;;  %v5282_v14 = vld [vmem:[%s9137_s1 + $0x4e8] sm:$0xff]  ;;  %v5313_v59 = vld [vmem:[%s9137_s1 + $0x5e0] sm:$0xff]  ;;  %v5268_v51 = vld [vmem:[%s9137_s1 + $0x478] sm:$0xff]  ;;  %v5419_v13 = vrot.slane %v10013_v26, %v5386_v42 }
0x2a72   : > { %8370 = vmatpush3.bf16.msra.mxu1 %v8369_v20  ;;  %8402 = vmatpush3.bf16.msra.mxu0 %v8401_v16  ;;  %v8415_v20 = vpack.c.bf16 %v5312_v57, %v5311_v55  ;;  %v5295_v16 = vld [vmem:[%s9137_s1 + $0x550] sm:$0xff]  ;;  %v5265_v43 = vld [vmem:[%s9137_s1 + $0x460] sm:$0xff]  ;;  %v8387_v6 = vpack.c.bf16 %v5282_v14, %v5281_v24  ;;  %v8393_v34 = vpack.c.bf16 %v5268_v51, %v5267_v52  ;;  %v5318_v8 = vld [vmem:[%s9137_s1 + $0x608] sm:$0xff] }
0x2a73   : > { %8372 = vmatprep.subr.bf16.mxu1 %v8371_v35  ;;  %8404 = vmatprep.subr.bf16.mxu0 %v8403_v39  ;;  %v5314_v35 = vld [vmem:[%s9137_s1 + $0x5e8] sm:$0xff]  ;;  %v8385_v39 = vpack.c.bf16 %v5264_v7, %v5263_v48  ;;  %v8417_v56 = vpack.c.bf16 %v5296_v21, %v5295_v16  ;;  %v5297_v12 = vld [vmem:[%s9137_s1 + $0x560] sm:$0xff]  ;;  %v5845_v26 = vadd.f32 %v10040_v53, %v5419_v13  ;;  %v5335_v48 = vld [vmem:[%s9137_s1 + $0x690] sm:$0xff] }
0x2a74   : > { %v8419_v10 = vpack.c.bf16 %v5314_v35, %v5313_v59  ;;  %v5333_v61 = vld [vmem:[%s9137_s1 + $0x680] sm:$0xff]  ;;  %v5853_v55 = vadd.f32 %v10067_v0, %v10133_v5  ;;  %v5930_v57 = vadd.f32 %v10069_v19, %v10138_v32  ;;  %v5336_v7 = vld [vmem:[%s9137_s1 + $0x698] sm:$0xff]  ;;  %v6096_v0 = vmax.f32 %v10044_v37, 0.0  ;;  %v5319_v32 = vld [vmem:[%s9137_s1 + $0x610] sm:$0xff] }
0x2a75   : > { %v8427_v17 = vpack.c.bf16 %v5334_v46, %v5333_v61  ;;  %v5317_v3 = vld [vmem:[%s9137_s1 + $0x600] sm:$0xff]  ;;  %v5368_v53 = vld [vmem:[%s9137_s1 + $0x798] sm:$0xff]  ;;  %v6094_v16 = vmax.f32 %v5845_v26, 0.0  ;;  %v5851_v19 = vadd.f32 %v10058_v49, %v5419_v13  ;;  %v8431_v59 = vpack.c.bf16 %v5336_v7, %v5335_v48  ;;  %v5338_v37 = vld [vmem:[%s9137_s1 + $0x6a8] sm:$0xff] }
0x2a76   : > { %8374 = vmatpush3.bf16.msra.mxu1 %v8373_v54  ;;  %8406 = vmatpush3.bf16.msra.mxu0 %v8405_v27  ;;  %v5298_v54 = vld [vmem:[%s9137_s1 + $0x568] sm:$0xff]  ;;  %v5283_v27 = vld [vmem:[%s9137_s1 + $0x4f0] sm:$0xff]  ;;  %v5320_v21 = vld [vmem:[%s9137_s1 + $0x618] sm:$0xff]  ;;  %v6111_v24 = vmax.f32 %v5853_v55, 0.0  ;;  %v6113_v14 = vmax.f32 %v5930_v57, 0.0 }
0x2a77   : > { %8376 = vmatprep.subr.bf16.mxu1 %v8375_v33  ;;  %8408 = vmatprep.subr.bf16.mxu0 %v8407_v47  ;;  %v5316_v33 = vld [vmem:[%s9137_s1 + $0x5f8] sm:$0xff]  ;;  %v8389_v47 = vpack.c.bf16 %v5266_v9, %v5265_v43  ;;  %v8421_v50 = vpack.c.bf16 %v5298_v54, %v5297_v12  ;;  %v8391_v18 = vpack.c.bf16 %v5284_v28, %v5283_v27  ;;  %v5337_v43 = vld [vmem:[%s9137_s1 + $0x6a0] sm:$0xff]  ;;  %v5370_v9 = vld [vmem:[%s9137_s1 + $0x7a8] sm:$0xff] }
0x2a78   : > { %v8423_v40 = vpack.c.bf16 %v5316_v33, %v5315_v29  ;;  %v5369_v49 = vld [vmem:[%s9137_s1 + $0x7a0] sm:$0xff]  ;;  %v8433_v12 = vpack.c.bf16 %v5320_v21, %v5319_v32  ;;  %v5322_v28 = vld [vmem:[%s9137_s1 + $0x628] sm:$0xff]  ;;  %v6099_v29 = vmax.f32 %v10092_v30, 0.0  ;;  %v6101_v33 = vmax.f32 %v10094_v41, 0.0  ;;  %v5339_v51 = vld [vmem:[%s9137_s1 + $0x6b0] sm:$0xff] }
0x2a79   : > { %v5321_v27 = vld [vmem:[%s9137_s1 + $0x620] sm:$0xff]  ;;  %v5354_v52 = vld [vmem:[%s9137_s1 + $0x728] sm:$0xff]  ;;  %v5340_v13 = vld [vmem:[%s9137_s1 + $0x6b8] sm:$0xff] }
0x2a7a   : > { %8378 = vmatpush3.bf16.msra.mxu1 %v8377_v60  ;;  %8410 = vmatpush3.bf16.msra.mxu0 %v8409_v45  ;;  %v5299_v60 = vld [vmem:[%s9137_s1 + $0x570] sm:$0xff]  ;;  %v5300_v45 = vld [vmem:[%s9137_s1 + $0x578] sm:$0xff]  ;;  %v8437_v30 = vpack.c.bf16 %v5322_v28, %v5321_v27  ;;  %v8439_v61 = vpack.c.bf16 %v5340_v13, %v5339_v51  ;;  %v5373_v26 = vld [vmem:[%s9137_s1 + $0x7c0] sm:$0xff] }
0x2a7b   : > { %8380 = vmatprep.subr.bf16.mxu1 %v8379_v62  ;;  %8412 = vmatprep.subr.bf16.mxu0 %v8411_v11  ;;  %v5365_v62 = vld [vmem:[%s9137_s1 + $0x780] sm:$0xff]  ;;  %v5366_v11 = vld [vmem:[%s9137_s1 + $0x788] sm:$0xff]  ;;  %v8425_v42 = vpack.c.bf16 %v5300_v45, %v5299_v60  ;;  %v5323_v60 = vld [vmem:[%s9137_s1 + $0x630] sm:$0xff] }
0x2a7c   : > { %v8459_v2 = vpack.c.bf16 %v5366_v11, %v5365_v62  ;;  %v5324_v45 = vld [vmem:[%s9137_s1 + $0x638] sm:$0xff]  ;;  %v5355_v62 = vld [vmem:[%s9137_s1 + $0x730] sm:$0xff]  ;;  %v5326_v55 = vld [vmem:[%s9137_s1 + $0x648] sm:$0xff] }
0x2a7d   : > { %v5356_v11 = vld [vmem:[%s9137_s1 + $0x738] sm:$0xff]  ;;  %v5358_v48 = vld [vmem:[%s9137_s1 + $0x748] sm:$0xff]  ;;  %v5343_v7 = vld [vmem:[%s9137_s1 + $0x6d0] sm:$0xff] }
0x2a7e   : > { %8382 = vmatpush3.bf16.msra.mxu1 %v8381_v1  ;;  %8414 = vmatpush3.bf16.msra.mxu0 %v8413_v22  ;;  %v5349_v1 = vld [vmem:[%s9137_s1 + $0x700] sm:$0xff]  ;;  %v5350_v22 = vld [vmem:[%s9137_s1 + $0x708] sm:$0xff]  ;;  %v5347_v27 = vld [vmem:[%s9137_s1 + $0x6f0] sm:$0xff] }
0x2a7f   : > { %8384 = vmatprep.subr.bf16.mxu1 %v8383_v38  ;;  %8416 = vmatprep.subr.bf16.mxu0 %v8415_v20  ;;  %v5367_v38 = vld [vmem:[%s9137_s1 + $0x790] sm:$0xff]  ;;  %v8429_v20 = vpack.c.bf16 %v5318_v8, %v5317_v3  ;;  %v8461_v5 = vpack.c.bf16 %v5350_v22, %v5349_v1  ;;  %v8473_v3 = vpack.c.bf16 %v5356_v11, %v5355_v62  ;;  %v5325_v8 = vld [vmem:[%s9137_s1 + $0x640] sm:$0xff]  ;;  %v5348_v28 = vld [vmem:[%s9137_s1 + $0x6f8] sm:$0xff]  ;;  %v6114_v62 = vmax.f32 %v10103_v31, 0.0 }
0x2a80   : > { %v8463_v35 = vpack.c.bf16 %v5368_v53, %v5367_v38  ;;  %v5357_v22 = vld [vmem:[%s9137_s1 + $0x740] sm:$0xff]  ;;  %v5344_v38 = vld [vmem:[%s9137_s1 + $0x6d8] sm:$0xff]  ;;  %v5375_v53 = vld [vmem:[%s9137_s1 + $0x7d0] sm:$0xff]  ;;  %v6116_v11 = vmax.f32 %v10105_v44, 0.0 }
0x2a81   : > { %v8447_v32 = vpack.c.bf16 %v5344_v38, %v5343_v7  ;;  %v5332_v13 = vld [vmem:[%s9137_s1 + $0x678] sm:$0xff] }
0x2a82   : > { %8386 = vmatpush3.bf16.msra.mxu1 %v8385_v39  ;;  %8418 = vmatpush3.bf16.msra.mxu0 %v8417_v56  ;;  %v5351_v39 = vld [vmem:[%s9137_s1 + $0x710] sm:$0xff]  ;;  %v5352_v56 = vld [vmem:[%s9137_s1 + $0x718] sm:$0xff] }
0x2a83   : > { %8388 = vmatprep.subr.bf16.mxu1 %v8387_v6  ;;  %8420 = vmatprep.subr.bf16.mxu0 %v8419_v10  ;;  %v6110_v6 = vmax.f32 %v5851_v19, 0.0  ;;  %v6112_v10 = vmax.f32 %v10065_v63, 0.0  ;;  %v8465_v54 = vpack.c.bf16 %v5352_v56, %v5351_v39  ;;  %v5353_v63 = vld [vmem:[%s9137_s1 + $0x720] sm:$0xff]  ;;  %v5327_v19 = vld [vmem:[%s9137_s1 + $0x650] sm:$0xff]  ;;  %v5378_v56 = vld [vmem:[%s9137_s1 + $0x7e8] sm:$0xff] }
0x2a84   : > { %v8469_v41 = vpack.c.bf16 %v5354_v52, %v5353_v63  ;;  %v5377_v39 = vld [vmem:[%s9137_s1 + $0x7e0] sm:$0xff]  ;;  %v5331_v63 = vld [vmem:[%s9137_s1 + $0x670] sm:$0xff]  ;;  %v8455_v52 = vpack.c.bf16 %v5348_v28, %v5347_v27 }
0x2a86   : > { %8390 = vmatpush3.bf16.msra.mxu1 %v8389_v47  ;;  %8422 = vmatpush3.bf16.msra.mxu0 %v8421_v50  ;;  %v8435_v47 = vpack.c.bf16 %v5338_v37, %v5337_v43  ;;  %v8467_v50 = vpack.c.bf16 %v5370_v9, %v5369_v49  ;;  %v5329_v49 = vld [vmem:[%s9137_s1 + $0x660] sm:$0xff]  ;;  %v5330_v9 = vld [vmem:[%s9137_s1 + $0x668] sm:$0xff] }
0x2a87   : > { %8392 = vmatprep.subr.bf16.mxu1 %v8391_v18  ;;  %8424 = vmatprep.subr.bf16.mxu0 %v8423_v40  ;;  %v5371_v18 = vld [vmem:[%s9137_s1 + $0x7b0] sm:$0xff]  ;;  %v5372_v40 = vld [vmem:[%s9137_s1 + $0x7b8] sm:$0xff] }
0x2a88   : > { %v8471_v46 = vpack.c.bf16 %v5372_v40, %v5371_v18  ;;  %v5363_v18 = vld [vmem:[%s9137_s1 + $0x770] sm:$0xff]  ;;  %v5364_v40 = vld [vmem:[%s9137_s1 + $0x778] sm:$0xff] }
0x2a8a   : > { %8394 = vmatpush3.bf16.msra.mxu1 %v8393_v34  ;;  %8426 = vmatpush3.bf16.msra.mxu0 %v8425_v42  ;;  %v5341_v34 = vld [vmem:[%s9137_s1 + $0x6c0] sm:$0xff]  ;;  %v5342_v42 = vld [vmem:[%s9137_s1 + $0x6c8] sm:$0xff] }
0x2a8b   : > { %8428 = vmatprep.subr.bf16.mxu1 %v8427_v17  ;;  %8460 = vmatprep.subr.bf16.mxu0 %v8459_v2  ;;  %v5374_v17 = vld [vmem:[%s9137_s1 + $0x7c8] sm:$0xff]  ;;  %v8441_v2 = vpack.c.bf16 %v5324_v45, %v5323_v60  ;;  %v8443_v57 = vpack.c.bf16 %v5342_v42, %v5341_v34  ;;  %v6098_v60 = vmax.f32 %v10085_v36, 0.0  ;;  %v6100_v45 = vmax.f32 %v10087_v4, 0.0 }
0x2a8c   : > { %v8475_v1 = vpack.c.bf16 %v5374_v17, %v5373_v26 }
0x2a8d   : > { %6489 = vmatmul.mubr.f32.vlgmr.msra.gmra.mrb[60].mxu1 %v6094_v16  ;;  %6564 = vmatmul.mubr.f32.vlgmr.msra.gmra.mrb[62].mxu0 %v6096_v0  ;;  %v8445_v16 = vpack.c.bf16 %v5326_v55, %v5325_v8  ;;  %v8477_v0 = vpack.c.bf16 %v5358_v48, %v5357_v22 }
0x2a8e   : > { %6493 = vmatprep.mubr.f32.mxu1 %v6111_v24  ;;  %6568 = vmatprep.mubr.f32.mxu0 %v6113_v14  ;;  %v5359_v24 = vld [vmem:[%s9137_s1 + $0x750] sm:$0xff]  ;;  %v5360_v14 = vld [vmem:[%s9137_s1 + $0x758] sm:$0xff] }
0x2a8f   : > { %8430 = vmatpush3.bf16.msra.mxu1 %v8429_v20  ;;  %8462 = vmatpush3.bf16.msra.mxu0 %v8461_v5  ;;  %v5376_v20 = vld [vmem:[%s9137_s1 + $0x7d8] sm:$0xff]  ;;  %v8481_v37 = vpack.c.bf16 %v5360_v14, %v5359_v24 }
0x2a90   : > { %8432 = vmatprep.subr.bf16.mxu1 %v8431_v59  ;;  %8464 = vmatprep.subr.bf16.mxu0 %v8463_v35  ;;  %v5328_v5 = vld [vmem:[%s9137_s1 + $0x658] sm:$0xff]  ;;  %v8479_v21 = vpack.c.bf16 %v5376_v20, %v5375_v53  ;;  %v5345_v59 = vld [vmem:[%s9137_s1 + $0x6e0] sm:$0xff]  ;;  %v5346_v35 = vld [vmem:[%s9137_s1 + $0x6e8] sm:$0xff] }
0x2a91   : > { %6494 = vmatmul.mubr.f32.gmra.mrb[62].mxu1 %v6110_v6  ;;  %6569 = vmatmul.mubr.f32.gmra.mrb[64].mxu0 %v6112_v10  ;;  %v8449_v43 = vpack.c.bf16 %v5328_v5, %v5327_v19  ;;  %v8451_v6 = vpack.c.bf16 %v5346_v35, %v5345_v59  ;;  %v8483_v10 = vpack.c.bf16 %v5378_v56, %v5377_v39 }
0x2a92   : > { %6638 = vmatprep.mubr.f32.mxu1 %v6099_v29  ;;  %6713 = vmatprep.mubr.f32.mxu0 %v6101_v33  ;;  %v5379_v29 = vld [vmem:[%s9137_s1 + $0x7f0] sm:$0xff]  ;;  %v5380_v33 = vld [vmem:[%s9137_s1 + $0x7f8] sm:$0xff] }
0x2a93   : > { %8434 = vmatpush3.bf16.msra.mxu1 %v8433_v12  ;;  %8466 = vmatpush3.bf16.msra.mxu0 %v8465_v54  ;;  %v5361_v12 = vld [vmem:[%s9137_s1 + $0x760] sm:$0xff]  ;;  %v5362_v54 = vld [vmem:[%s9137_s1 + $0x768] sm:$0xff]  ;;  %v8487_v51 = vpack.c.bf16 %v5380_v33, %v5379_v29  ;;  %s10475_s1 = sld [smem:[#allocation24_spill]] }
0x2a94   : > { %8436 = vmatprep.subr.bf16.mxu1 %v8435_v47  ;;  %8468 = vmatprep.subr.bf16.mxu0 %v8467_v50  ;;  %v8453_v47 = vpack.c.bf16 %v5330_v9, %v5329_v49  ;;  %v8485_v50 = vpack.c.bf16 %v5362_v54, %v5361_v12 }
0x2a97   : > { %8438 = vmatpush3.bf16.msra.mxu1 %v8437_v30  ;;  %8470 = vmatpush3.bf16.msra.mxu0 %v8469_v41  ;;  %v8457_v30 = vpack.c.bf16 %v5332_v13, %v5331_v63  ;;  %v8489_v41 = vpack.c.bf16 %v5364_v40, %v5363_v18 }
0x2a98   : > { %8440 = vmatprep.subr.bf16.mxu1 %v8439_v61  ;;  %8472 = vmatprep.subr.bf16.mxu0 %v8471_v46  ;;  %v6115_v61 = vmax.f32 %v10110_v15, 0.0  ;;  %v6117_v46 = vmax.f32 %v10112_v58, 0.0 }
0x2a99   : > { %s10476_s18 = scalar_lea.vmem %s10475_s1, %s9057_s7 }
0x2a9a   : > { %v7213_v36 = vld [vmem:[%s10476_s18] ss:$0 sm:$0xff] }
0x2a9b   : > { %8442 = vmatpush3.bf16.msra.mxu1 %v8441_v2  ;;  %8474 = vmatpush3.bf16.msra.mxu0 %v8473_v3 }
0x2a9c   : > { %8444 = vmatprep.subr.bf16.mxu1 %v8443_v57  ;;  %8476 = vmatprep.subr.bf16.mxu0 %v8475_v1 }
0x2a9f   : > { %8446 = vmatpush3.bf16.msra.mxu1 %v8445_v16  ;;  %8478 = vmatpush3.bf16.msra.mxu0 %v8477_v0 }
0x2aa0   : > { %8448 = vmatprep.subr.bf16.mxu1 %v8447_v32  ;;  %8480 = vmatprep.subr.bf16.mxu0 %v8479_v21 }
0x2aa3   : > { %8450 = vmatpush3.bf16.msra.mxu1 %v8449_v43  ;;  %8482 = vmatpush3.bf16.msra.mxu0 %v8481_v37 }
0x2aa4   : > { %8452 = vmatprep.subr.bf16.mxu1 %v8451_v6  ;;  %8484 = vmatprep.subr.bf16.mxu0 %v8483_v10 }
0x2aa7   : > { %8454 = vmatpush3.bf16.msra.mxu1 %v8453_v47  ;;  %8486 = vmatpush3.bf16.msra.mxu0 %v8485_v50 }
0x2aa8   : > { %8456 = vmatprep.subr.bf16.mxu1 %v8455_v52  ;;  %8488 = vmatprep.subr.bf16.mxu0 %v8487_v51 }
0x2aab   : > { %8458 = vmatpush3.bf16.msra.mxu1 %v8457_v30  ;;  %8490 = vmatpush3.bf16.msra.mxu0 %v8489_v41 }
0x2aae   : > { %6639 = vmatmul.mubr.f32.vlgmr.msra.gmra.mrb[64].mxu1 %v6098_v60  ;;  %6714 = vmatmul.mubr.f32.vlgmr.msra.gmra.mrb[66].mxu0 %v6100_v45 }
0x2aaf   : > { %6643 = vmatprep.mubr.f32.mxu1 %v6115_v61  ;;  %6718 = vmatprep.mubr.f32.mxu0 %v6117_v46 }
0x2ab2   : > { %6644 = vmatmul.mubr.f32.gmra.mrb[66].mxu1 %v6114_v62  ;;  %6719 = vmatmul.mubr.f32.gmra.mrb[68].mxu0 %v6116_v11 }
0x2b1f   : > { %v7420_v34 = vpop.f32.mrb[52].mxu1  ;;  %v7458_v42 = vpop.f32.mrb[54].mxu0 }
0x2b20   : > { %v7421_v4 = vpop.f32.mrb[53].mxu1  ;;  %v7459_v15 = vpop.f32.mrb[55].mxu0 }
0x2b21   : > { %v7422_v58 = vadd.f32 %v7421_v4, %v7420_v34  ;;  %v7460_v26 = vadd.f32 %v7459_v15, %v7458_v42 }
0x2b23   : > { %v6191_v17 = vadd.f32 %v7422_v58, %v7213_v36  ;;  %v7423_v2 = vpop.f32.mrb[54].mxu1  ;;  %v7461_v3 = vpop.f32.mrb[56].mxu0 }
0x2b24   : > { %v7424_v8 = vpop.f32.mrb[55].mxu1  ;;  %v7462_v31 = vpop.f32.mrb[57].mxu0 }
0x2b25   : > { %v6266_v55 = vadd.f32 %v7460_v26, %v6191_v17  ;;  %v7425_v44 = vadd.f32 %v7424_v8, %v7423_v2  ;;  %v7463_v57 = vadd.f32 %v7462_v31, %v7461_v3 }
0x2b27   : > { %v6196_v1 = vadd.f32 %v7425_v44, %v7213_v36 }
0x2b29   : > { %v6271_v22 = vadd.f32 %v7463_v57, %v6196_v1 }
0x2b3f   : > { %v7496_v48 = vpop.f32.mrb[56].mxu1  ;;  %v7534_v7 = vpop.f32.mrb[58].mxu0 }
0x2b40   : > { %v7497_v38 = vpop.f32.mrb[57].mxu1  ;;  %v7535_v53 = vpop.f32.mrb[59].mxu0 }
0x2b41   : > { %v7498_v20 = vadd.f32 %v7497_v38, %v7496_v48  ;;  %v7536_v16 = vadd.f32 %v7535_v53, %v7534_v7 }
0x2b43   : > { %v6341_v0 = vadd.f32 %v7498_v20, %v6266_v55  ;;  %v7499_v19 = vpop.f32.mrb[58].mxu1  ;;  %v7537_v5 = vpop.f32.mrb[60].mxu0 }
0x2b44   : > { %v7500_v32 = vpop.f32.mrb[59].mxu1  ;;  %v7538_v21 = vpop.f32.mrb[61].mxu0 }
0x2b45   : > { %v6416_v24 = vadd.f32 %v7536_v16, %v6341_v0  ;;  %v7501_v14 = vadd.f32 %v7500_v32, %v7499_v19  ;;  %v7539_v59 = vadd.f32 %v7538_v21, %v7537_v5  ;;  %v7214_v16 = vld [vmem:[%s10478_s12] ss:$0 sm:$0xff] }
0x2b46   : > { %v7215_v19 = vld [vmem:[%s10480_s5] ss:$0 sm:$0xff] }
0x2b47   : > { %v6346_v35 = vadd.f32 %v7501_v14, %v6271_v22 }
0x2b49   : > { %v6421_v39 = vadd.f32 %v7539_v59, %v6346_v35 }
0x2b60   : > { %v7572_v56 = vpop.f32.mrb[60].mxu1  ;;  %v7610_v43 = vpop.f32.mrb[62].mxu0 }
0x2b61   : > { %v7573_v37 = vpop.f32.mrb[61].mxu1  ;;  %v7611_v49 = vpop.f32.mrb[63].mxu0 }
0x2b62   : > { %v7574_v9 = vadd.f32 %v7573_v37, %v7572_v56  ;;  %v7612_v6 = vadd.f32 %v7611_v49, %v7610_v43 }
0x2b64   : > { %v6491_v10 = vadd.f32 %v7574_v9, %v6416_v24  ;;  %v7575_v12 = vpop.f32.mrb[62].mxu1  ;;  %v7613_v54 = vpop.f32.mrb[64].mxu0 }
0x2b65   : > { %v7576_v27 = vpop.f32.mrb[63].mxu1  ;;  %v7614_v28 = vpop.f32.mrb[65].mxu0 }
0x2b66   : > { %v6566_v29 = vadd.f32 %v7612_v6, %v6491_v10  ;;  %v7577_v33 = vadd.f32 %v7576_v27, %v7575_v12  ;;  %v7615_v47 = vadd.f32 %v7614_v28, %v7613_v54 }
0x2b68   : > { %v6496_v50 = vadd.f32 %v7577_v33, %v6421_v39 }
0x2b6a   : > { %v6571_v63 = vadd.f32 %v7615_v47, %v6496_v50 }
0x2b81   : > { %v7648_v52 = vpop.f32.mrb[64].mxu1  ;;  %v7686_v51 = vpop.f32.mrb[66].mxu0 }
0x2b82   : > { %v7649_v13 = vpop.f32.mrb[65].mxu1  ;;  %v7687_v18 = vpop.f32.mrb[67].mxu0 }
0x2b83   : > { %v7650_v40 = vadd.f32 %v7649_v13, %v7648_v52  ;;  %v7688_v30 = vadd.f32 %v7687_v18, %v7686_v51  ;;  %v7217_v51 = vld [vmem:[%s10482_s27] ss:$0 sm:$0xff] (!%p7216_p5) }
0x2b84   : > { %v7218_v18 = vld [vmem:[%s10483_s4] ss:$0 sm:$0xff] (!%p7216_p5) }
0x2b85   : > { %v6641_v41 = vadd.f32 %v7650_v40, %v6566_v29  ;;  %v7651_v60 = vpop.f32.mrb[66].mxu1  ;;  %v7689_v45 = vpop.f32.mrb[68].mxu0 }
0x2b86   : > { %v7652_v61 = vpop.f32.mrb[67].mxu1  ;;  %v7690_v46 = vpop.f32.mrb[69].mxu0 }
0x2b87   : > { %v6716_v62 = vadd.f32 %v7688_v30, %v6641_v41  ;;  %v7653_v11 = vadd.f32 %v7652_v61, %v7651_v60  ;;  %v7691_v34 = vadd.f32 %v7690_v46, %v7689_v45 }
0x2b89   : > { %v6646_v42 = vadd.f32 %v7653_v11, %v6571_v63  ;;  %v6724_v36 = vadd.f32 %v6716_v62, %v9802_v25 }
0x2b8b   : > { %v6721_v4 = vadd.f32 %v7691_v34, %v6646_v42  ;;  %v6728_v15 = vsel %vm1114_vm1, %v6724_v36, 0.0 }
0x2b8c   : > { %6729 = vadd.xlane.f32.xlu0 %v6728_v15 }
0x2b8d   : > { %v6725_v58 = vadd.f32 %v6721_v4, %v9816_v23 }
0x2b8f   : > { %v6731_v26 = vsel %vm1114_vm1, %v6725_v58, 0.0 }
0x2b90   : > { %6732 = vadd.xlane.f32.xlu1 %v6731_v26 }
0x2c19   : > { %v6730_v17 = vpop.xlane.xlu0 %6729 }
0x2c1a   : > { %v6734_v2 = vmul.f32 0.03125, %v6730_v17 }
0x2c1c   : > { %v6736_v3 = vsub.f32 %v6724_v36, %v6734_v2 }
0x2c1d   : > { %v6733_v8 = vpop.xlane.xlu1 %6732 }
0x2c1e   : > { %v6735_v31 = vmul.f32 0.03125, %v6733_v8  ;;  %v6738_v55 = vmul.f32 %v6736_v3, %v6736_v3 }
0x2c20   : > { %v6737_v44 = vsub.f32 %v6725_v58, %v6735_v31  ;;  %v6740_v57 = vsel %vm1114_vm1, %v6738_v55, 0.0 }
0x2c21   : > { %6741 = vadd.xlane.f32.xlu0 %v6740_v57 }
0x2c22   : > { %v6739_v25 = vmul.f32 %v6737_v44, %v6737_v44 }
0x2c24   : > { %v6743_v1 = vsel %vm1114_vm1, %v6739_v25, 0.0 }
0x2c25   : > { %6744 = vadd.xlane.f32.xlu1 %v6743_v1 }
0x2cae   : > { %v6742_v23 = vpop.xlane.xlu0 %6741 }
0x2caf   : > { %v6746_v22 = vmul.f32 0.03125, %v6742_v23 }
0x2cb1   : > { %v6748_v48 = vadd.f32 1e-05, %v6746_v22 }
0x2cb2   : > { %v6745_v7 = vpop.xlane.xlu1 %6744 }
0x2cb3   : > { %8829 = vrsqrt.f32 %v6748_v48  ;;  %v6747_v38 = vmul.f32 0.03125, %v6745_v7 }
0x2cb5   : > { %v6749_v53 = vadd.f32 1e-05, %v6747_v38 }
0x2cb7   : > { %8831 = vrsqrt.f32 %v6749_v53 }
0x2cbd   : > { %v8830_v20 = vpop.eup %8829 }
0x2cbe   : > { %v6752_v0 = vmul.f32 %v8830_v20, %v6736_v3 }
0x2cc0   : > { %v6760_v5 = vmul.f32 %v7214_v16, %v6752_v0 }
0x2cc1   : > { %v8832_v32 = vpop.eup %8831 }
0x2cc2   : > { %v6768_v21 = vadd.f32 %v7215_v19, %v6760_v5  ;;  %v6753_v24 = vmul.f32 %v8832_v32, %v6737_v44  ;;  %6775 = sbr.rel (%p7216_p5) target bundleno = 11778 (0x2e02), region = 132 }
0x2cc4   : > { %6770 = vst.msk [vmem:[#allocation2] sm:$0xff] %vm1114_vm1, %v6768_v21  ;;  %v6761_v14 = vmul.f32 %v7214_v16, %v6753_v24  ;;  %v6778_v35 = vsel (!%p7216_p5), %vm1114_vm1, %v6768_v21, 0.0 }
0x2cc5   : > { %6779 = vadd.xlane.f32.xlu0 (!%p7216_p5), %v6778_v35 }
0x2cc6   : > { %v6769_v59 = vadd.f32 %v7215_v19, %v6761_v14 }
0x2cc8   : > { %6771 = vst.msk [vmem:[#allocation2 + $0x8] sm:$0xff] %vm1114_vm1, %v6769_v59  ;;  %v6781_v39 = vsel (!%p7216_p5), %vm1114_vm1, %v6769_v59, 0.0 }
0x2cc9   : > { %6782 = vadd.xlane.f32.xlu0 %v6781_v39 }
0x2d52   : > { %v6780_v56 = vpop.xlane.xlu0 %6779 }
0x2d53   : > { %v6784_v43 = vmul.f32 0.03125, %v6780_v56 }
0x2d55   : > { %v6786_v37 = vsub.f32 %v6768_v21, %v6784_v43 }
0x2d56   : > { %v6783_v49 = vpop.xlane.xlu0 %6782 }
0x2d57   : > { %v6785_v9 = vmul.f32 0.03125, %v6783_v49  ;;  %v6788_v6 = vmul.f32 %v6786_v37, %v6786_v37 }
0x2d59   : > { %v6787_v10 = vsub.f32 %v6769_v59, %v6785_v9  ;;  %v6790_v12 = vsel %vm1114_vm1, %v6788_v6, 0.0 }
0x2d5a   : > { %6791 = vadd.xlane.f32.xlu1 %v6790_v12 }
0x2d5b   : > { %v6789_v54 = vmul.f32 %v6787_v10, %v6787_v10 }
0x2d5d   : > { %v6793_v27 = vsel %vm1114_vm1, %v6789_v54, 0.0 }
0x2d5e   : > { %6794 = vadd.xlane.f32.xlu1 %v6793_v27 }
0x2de7   : > { %v6792_v28 = vpop.xlane.xlu1 %6791 }
0x2de8   : > { %v6796_v29 = vmul.f32 0.03125, %v6792_v28 }
0x2dea   : > { %v6798_v33 = vadd.f32 1e-05, %v6796_v29 }
0x2deb   : > { %v6795_v47 = vpop.xlane.xlu1 %6794 }
0x2dec   : > { %8835 = vrsqrt.f32 %v6798_v33  ;;  %v6797_v50 = vmul.f32 0.03125, %v6795_v47 }
0x2dee   : > { %v6799_v63 = vadd.f32 1e-05, %v6797_v50 }
0x2df0   : > { %8837 = vrsqrt.f32 %v6799_v63 }
0x2df6   : > { %v8836_v52 = vpop.eup %8835 }
0x2df7   : > { %v6802_v13 = vmul.f32 %v8836_v52, %v6786_v37 }
0x2df9   : > { %v6810_v40 = vmul.f32 %v7217_v51, %v6802_v13 }
0x2dfa   : > { %v8838_v30 = vpop.eup %8837 }
0x2dfb   : > { %v6818_v41 = vadd.f32 %v7218_v18, %v6810_v40  ;;  %v6803_v60 = vmul.f32 %v8838_v30, %v6787_v10 }
0x2dfd   : > { %6820 = vst.msk [vmem:[#allocation2] sm:$0xff] %vm1114_vm1, %v6818_v41  ;;  %v6811_v45 = vmul.f32 %v7217_v51, %v6803_v60 }
0x2dff   : > { %v6819_v61 = vadd.f32 %v7218_v18, %v6811_v45 }
0x2e01   : > { %6821 = vst.msk [vmem:[#allocation2 + $0x8] sm:$0xff] %vm1114_vm1, %v6819_v61 }
0x2e02 PF: > { %s10484_s2 = sld [smem:[#allocation6_spill]]  ;;  %s8908_s14 = smov [#allocation2]  }
0x2e03   : > { %s6828_s17 = sshll.u32 %s8908_s14, 4  ;;  %s6829_s17 = int_to_ptr.vmem [resolvable:$true] %s6828_s17 }
0x2e04   : > { %s8839_s8 = scalar_lea.vmem %s6829_s17, 256  ;;  %p8846_p10 = scmp.lt.s32.totalorder %s6829_s17, %s6829_s17 }
0x2e05   : > { %p8840_p7 = scmp.ne.s32.totalorder %s6829_s17, %s8839_s8  ;;  %p8847_p11 = scmp.lt.s32.totalorder %s8839_s8, %s8839_s8 }
0x2e07   : > { %p8848_p12 = por %p8847_p11, %p8846_p10 }
0x2e08   : > { %p8495_p6 = scmp.eq.s32.totalorder %s10484_s2, 5 }
0x2e0a   : > { %p8841_p8 = pnand %p8840_p7, %p8495_p6 }
0x2e0c   : > { %p8842_p9 = pneg %p8841_p8 }
0x2e0e   : > { %p8849_p13 = pnand %p8848_p12, %p8842_p9 }
0x2e10   : > { %8852 = shalt.err (!%p8849_p13)
}
0x2e11   : > { %s10485_s18 = sld [smem:[#allocation29_spill]] }
0x2e17   : > { %s8853_s19 = scalar_lea.hbm %s10485_s18, 256 }
0x2e18   : > { %p8854_p0 = scmp.ne.s32.totalorder %s10485_s18, %s8853_s19  ;;  %p8859_p3 = scmp.lt.u32.totalorder %s8853_s19, %s10485_s18 }
0x2e1a   : > { %p8855_p1 = pnand %p8854_p0, %p8495_p6 }
0x2e1c   : > { %p8856_p2 = pneg %p8855_p1 }
0x2e1e   : > { %p8861_p4 = pnand %p8859_p3, %p8856_p2 }
0x2e20   : > { %8864 = shalt.err (!%p8861_p4)
}
0x2e21   : > { %s8909_s9 = smov 128   ;;  %s10486_s30 = smov 8  }
0x2e22   : > { %8492 = dma.vmem_to_hbm [thread:$0]  (%p8495_p6), %s6829_s17, 256, %s10485_s18, [#allocation3], %s8909_s9, %s8909_s9, %s10486_s30  }
0x2e23   : > { %8870 = dma.done.wait (%p8495_p6), [#allocation3], 256  }
0x2e24   : > { %8872 = vsyncadd (%p8495_p6), [#allocation3], 4294967040 }
0x2e25 PF: > { %s10487_s7 = sld [smem:[#allocation5_spill]] }
0x2e2b   : > { %s37_s27 = sadd.s32 1, %s10487_s7  }
0x2e2c   : > { %p34_p5 = scmp.ge.s32.totalorder %s37_s27, 8  }
0x2e2e   :  { %36 = sbr.rel (!%p34_p5) target bundleno = 24 (0x18), region = 216 }
0x2e35   :  { %6844 = vsyncpa [#allocation3], 1 }
0x2e36   :  { %6846 = vsyncpa [#allocation3 + $0x1], 1 }

</bundles_post_ra>
